<compile_context>
chip_gen: v6e
topology: v6e:2x2x1
jax: 0.10.0
libtpu: 0.0.40
codegen_flags: <defaults>
</compile_context>

<pallas_src>
import jax
import jax.numpy as jnp
from jax.experimental import pallas as pl
from jax.experimental.pallas import tpu as pltpu


def _round_up(x, m):
    return ((x + m - 1) // m) * m


def ks_mlp_kernel(x_ref,
                  w1_ref, b1_ref,
                  w2_ref, b2_ref,
                  w3_ref, b3_ref,
                  w4_ref, b4_ref,
                  w5_ref, b5_ref,
                  o_ref):
    # bf16 operands into the MXU, f32 accumulation, f32 bias/ReLU on the VPU.
    h = x_ref[...].astype(jnp.bfloat16)

    h = jnp.dot(h, w1_ref[...], preferred_element_type=jnp.float32)
    h = jnp.maximum(h + b1_ref[...], 0.0).astype(jnp.bfloat16)

    h = jnp.dot(h, w2_ref[...], preferred_element_type=jnp.float32)
    h = jnp.maximum(h + b2_ref[...], 0.0).astype(jnp.bfloat16)

    h = jnp.dot(h, w3_ref[...], preferred_element_type=jnp.float32)
    h = jnp.maximum(h + b3_ref[...], 0.0).astype(jnp.bfloat16)

    h = jnp.dot(h, w4_ref[...], preferred_element_type=jnp.float32)
    h = jnp.maximum(h + b4_ref[...], 0.0).astype(jnp.bfloat16)

    out = jnp.dot(h, w5_ref[...], preferred_element_type=jnp.float32) + b5_ref[...]
    o_ref[...] = out.astype(o_ref.dtype)


def ks_network_forward(x, params, *, batch_tile=256):
    """x: (B, H_obs, W_obs). params: bf16 weights w1..w5 (in,out), f32 biases (1,out)."""
    B = x.shape[0]
    x_flat = x.reshape(B, -1).astype(jnp.float32)
    d_in = x_flat.shape[1]

    w1, b1 = params["w1"], params["b1"]
    w2, b2 = params["w2"], params["b2"]
    w3, b3 = params["w3"], params["b3"]
    w4, b4 = params["w4"], params["b4"]
    w5, b5 = params["w5"], params["b5"]
    hidden = w1.shape[1]
    num_outputs = w5.shape[1]

    # Lane-dense output: pad the final layer's output dim up to a multiple of 128.
    out_pad = _round_up(max(num_outputs, 128), 128)
    w5p = jnp.pad(w5, ((0, 0), (0, out_pad - num_outputs)))
    b5p = jnp.pad(b5, ((0, 0), (0, out_pad - num_outputs)))

    # Batch tiling: multiple of 8 sublanes, capped at `batch_tile`.
    tb = min(batch_tile, _round_up(B, 8))
    b_pad = _round_up(B, tb)
    if b_pad != B:
        x_flat = jnp.pad(x_flat, ((0, b_pad - B), (0, 0)))
    grid = (b_pad // tb,)

    def resident(shape):
        # Weight/bias block: full array, same block for every batch tile
        # -> DMA'd from HBM once, stays VMEM-resident across the grid.
        return pl.BlockSpec(shape, lambda i: (0, 0))

    in_specs = [
        pl.BlockSpec((tb, d_in), lambda i: (i, 0)),        # x tile
        resident(w1.shape), resident(b1.shape),
        resident(w2.shape), resident(b2.shape),
        resident(w3.shape), resident(b3.shape),
        resident(w4.shape), resident(b4.shape),
        resident(w5p.shape), resident(b5p.shape),
    ]
    out_specs = pl.BlockSpec((tb, out_pad), lambda i: (i, 0))

    flops = 2 * b_pad * (d_in * hidden + 3 * hidden * hidden + hidden * out_pad)
    weight_bytes = 2 * (d_in * hidden + 3 * hidden * hidden + hidden * out_pad)  # bf16
    bias_bytes = 4 * (4 * hidden + out_pad)
    io_bytes = 4 * b_pad * (d_in + out_pad)
    cost = pl.CostEstimate(
        flops=flops,
        transcendentals=0,
        bytes_accessed=weight_bytes + bias_bytes + io_bytes,
    )

    out = pl.pallas_call(
        ks_mlp_kernel,
        out_shape=jax.ShapeDtypeStruct((b_pad, out_pad), jnp.float32),
        grid=grid,
        in_specs=in_specs,
        out_specs=out_specs,
        compiler_params=pltpu.CompilerParams(
            dimension_semantics=("parallel",),
            vmem_limit_bytes=32 << 20,   # fits v7x (64 MiB physical VMEM/TC)
        ),
        cost_estimate=cost,
    )(x_flat, w1, b1, w2, b2, w3, b3, w4, b4, w5p, b5p)

    return out[:B, :num_outputs]


def init_params(num_inputs, hidden, num_outputs, key):
    """Deterministic synthetic init (shapes match the PyTorch module).

    Weights are stored as bf16 (in, out); biases as f32 (1, out).
    """
    dims = [(num_inputs, hidden), (hidden, hidden), (hidden, hidden),
            (hidden, hidden), (hidden, num_outputs)]
    params = {}
    keys = jax.random.split(key, 2 * len(dims))
    for i, (d_in, d_out) in enumerate(dims):
        scale = 1.0 / jnp.sqrt(jnp.float32(d_in))
        w = jax.random.uniform(keys[2 * i], (d_in, d_out),
                               minval=-scale, maxval=scale, dtype=jnp.float32)
        b = jax.random.uniform(keys[2 * i + 1], (1, d_out),
                               minval=-scale, maxval=scale, dtype=jnp.float32)
        params[f"w{i + 1}"] = w.astype(jnp.bfloat16)
        params[f"b{i + 1}"] = b
    return params


if __name__ == "__main__":
    key = jax.random.PRNGKey(0)
    k_x, k_p = jax.random.split(key)

    # observation_space.shape = (8, 16)  ->  num_inputs = 128
    # action_space.n = 8                 ->  num_outputs = 8
    B, H_obs, W_obs = 2, 8, 16
    HIDDEN = 1024
    NUM_OUTPUTS = 8

    x = jax.random.normal(k_x, (B, H_obs, W_obs), dtype=jnp.float32)
    params = init_params(H_obs * W_obs, HIDDEN, NUM_OUTPUTS, k_p)

    out = ks_network_forward(x, params)
    out = jax.block_until_ready(out)

    # Pure-JAX reference of the same forward pass (same bf16 weights,
    # f32 accumulation) to validate the kernel numerics.
    h = x.reshape(B, -1)
    for i in range(1, 5):
        h = jnp.maximum(
            jnp.dot(h.astype(jnp.bfloat16), params[f"w{i}"],
                    preferred_element_type=jnp.float32) + params[f"b{i}"],
            0.0)
    ref = jnp.dot(h.astype(jnp.bfloat16), params["w5"],
                  preferred_element_type=jnp.float32) + params["b5"]

    assert out.shape == (B, NUM_OUTPUTS)
    assert jnp.allclose(out, ref, atol=1e-2, rtol=1e-2), (
        f"max abs diff {jnp.max(jnp.abs(out - ref))}")

    print("KERNEL_OK")
</pallas_src>

<mosaic_0001>
module attributes {stable_mosaic.version = 11 : i64} {
  func.func @ks_mlp_kernel(%arg0: i32, %arg1: memref<8x128xf32, #tpu.memory_space<vmem>>, %arg2: memref<128x1024xbf16, #tpu.memory_space<vmem>>, %arg3: memref<1x1024xf32, #tpu.memory_space<vmem>>, %arg4: memref<1024x1024xbf16, #tpu.memory_space<vmem>>, %arg5: memref<1x1024xf32, #tpu.memory_space<vmem>>, %arg6: memref<1024x1024xbf16, #tpu.memory_space<vmem>>, %arg7: memref<1x1024xf32, #tpu.memory_space<vmem>>, %arg8: memref<1024x1024xbf16, #tpu.memory_space<vmem>>, %arg9: memref<1x1024xf32, #tpu.memory_space<vmem>>, %arg10: memref<1024x128xbf16, #tpu.memory_space<vmem>>, %arg11: memref<1x128xf32, #tpu.memory_space<vmem>>, %arg12: memref<8x128xf32, #tpu.memory_space<vmem>>) attributes {dimension_semantics = [#tpu.dimension_semantics<parallel>], iteration_bounds = array<i64: 1>, scalar_prefetch = 0 : i64, scratch_operands = 0 : i64, tpu.core_type = #tpu.core_type<tc>, window_params = [{transform_indices = @transform_0, window_bounds = array<i64: 8, 128>}, {pipeline_mode = #tpu.pipeline_mode<synchronous>, transform_indices = @transform_1, window_bounds = array<i64: 128, 1024>}, {pipeline_mode = #tpu.pipeline_mode<synchronous>, transform_indices = @transform_2, window_bounds = array<i64: 1, 1024>}, {pipeline_mode = #tpu.pipeline_mode<synchronous>, transform_indices = @transform_3, window_bounds = array<i64: 1024, 1024>}, {pipeline_mode = #tpu.pipeline_mode<synchronous>, transform_indices = @transform_4, window_bounds = array<i64: 1, 1024>}, {pipeline_mode = #tpu.pipeline_mode<synchronous>, transform_indices = @transform_5, window_bounds = array<i64: 1024, 1024>}, {pipeline_mode = #tpu.pipeline_mode<synchronous>, transform_indices = @transform_6, window_bounds = array<i64: 1, 1024>}, {pipeline_mode = #tpu.pipeline_mode<synchronous>, transform_indices = @transform_7, window_bounds = array<i64: 1024, 1024>}, {pipeline_mode = #tpu.pipeline_mode<synchronous>, transform_indices = @transform_8, window_bounds = array<i64: 1, 1024>}, {pipeline_mode = #tpu.pipeline_mode<synchronous>, transform_indices = @transform_9, window_bounds = array<i64: 1024, 128>}, {pipeline_mode = #tpu.pipeline_mode<synchronous>, transform_indices = @transform_10, window_bounds = array<i64: 1, 128>}, {transform_indices = @transform_11, window_bounds = array<i64: 8, 128>}]} {
    %c0 = arith.constant 0 : index
    %c0_0 = arith.constant 0 : index
    %0 = vector.load %arg1[%c0, %c0_0] : memref<8x128xf32, #tpu.memory_space<vmem>>, vector<8x128xf32>
    %1 = arith.truncf %0 : vector<8x128xf32> to vector<8x128xbf16>
    %c0_1 = arith.constant 0 : index
    %c0_2 = arith.constant 0 : index
    %2 = vector.load %arg2[%c0_1, %c0_2] : memref<128x1024xbf16, #tpu.memory_space<vmem>>, vector<128x1024xbf16>
    %cst = arith.constant dense<0.000000e+00> : vector<8x1024xf32>
    %3 = tpu.matmul %1, %2, %cst {dimension_numbers = #tpu.dot_dimension_numbers<[1], [0], [0], [1], [0, 0, 1, 1], [], []>} : vector<8x128xbf16>, vector<128x1024xbf16>, vector<8x1024xf32> -> vector<8x1024xf32>
    %c0_3 = arith.constant 0 : index
    %c0_4 = arith.constant 0 : index
    %4 = vector.load %arg3[%c0_3, %c0_4] : memref<1x1024xf32, #tpu.memory_space<vmem>>, vector<1x1024xf32>
    %5 = vector.broadcast %4 : vector<1x1024xf32> to vector<8x1024xf32>
    %6 = arith.addf %3, %5 : vector<8x1024xf32>
    %cst_5 = arith.constant 0.000000e+00 : f32
    %7 = vector.broadcast %cst_5 : f32 to vector<8x1024xf32>
    %8 = arith.maximumf %6, %7 : vector<8x1024xf32>
    %9 = arith.truncf %8 : vector<8x1024xf32> to vector<8x1024xbf16>
    %c0_6 = arith.constant 0 : index
    %c0_7 = arith.constant 0 : index
    %10 = vector.load %arg4[%c0_6, %c0_7] : memref<1024x1024xbf16, #tpu.memory_space<vmem>>, vector<1024x1024xbf16>
    %cst_8 = arith.constant dense<0.000000e+00> : vector<8x1024xf32>
    %11 = tpu.matmul %9, %10, %cst_8 {dimension_numbers = #tpu.dot_dimension_numbers<[1], [0], [0], [1], [0, 0, 1, 1], [], []>} : vector<8x1024xbf16>, vector<1024x1024xbf16>, vector<8x1024xf32> -> vector<8x1024xf32>
    %c0_9 = arith.constant 0 : index
    %c0_10 = arith.constant 0 : index
    %12 = vector.load %arg5[%c0_9, %c0_10] : memref<1x1024xf32, #tpu.memory_space<vmem>>, vector<1x1024xf32>
    %13 = vector.broadcast %12 : vector<1x1024xf32> to vector<8x1024xf32>
    %14 = arith.addf %11, %13 : vector<8x1024xf32>
    %cst_11 = arith.constant 0.000000e+00 : f32
    %15 = vector.broadcast %cst_11 : f32 to vector<8x1024xf32>
    %16 = arith.maximumf %14, %15 : vector<8x1024xf32>
    %17 = arith.truncf %16 : vector<8x1024xf32> to vector<8x1024xbf16>
    %c0_12 = arith.constant 0 : index
    %c0_13 = arith.constant 0 : index
    %18 = vector.load %arg6[%c0_12, %c0_13] : memref<1024x1024xbf16, #tpu.memory_space<vmem>>, vector<1024x1024xbf16>
    %cst_14 = arith.constant dense<0.000000e+00> : vector<8x1024xf32>
    %19 = tpu.matmul %17, %18, %cst_14 {dimension_numbers = #tpu.dot_dimension_numbers<[1], [0], [0], [1], [0, 0, 1, 1], [], []>} : vector<8x1024xbf16>, vector<1024x1024xbf16>, vector<8x1024xf32> -> vector<8x1024xf32>
    %c0_15 = arith.constant 0 : index
    %c0_16 = arith.constant 0 : index
    %20 = vector.load %arg7[%c0_15, %c0_16] : memref<1x1024xf32, #tpu.memory_space<vmem>>, vector<1x1024xf32>
    %21 = vector.broadcast %20 : vector<1x1024xf32> to vector<8x1024xf32>
    %22 = arith.addf %19, %21 : vector<8x1024xf32>
    %cst_17 = arith.constant 0.000000e+00 : f32
    %23 = vector.broadcast %cst_17 : f32 to vector<8x1024xf32>
    %24 = arith.maximumf %22, %23 : vector<8x1024xf32>
    %25 = arith.truncf %24 : vector<8x1024xf32> to vector<8x1024xbf16>
    %c0_18 = arith.constant 0 : index
    %c0_19 = arith.constant 0 : index
    %26 = vector.load %arg8[%c0_18, %c0_19] : memref<1024x1024xbf16, #tpu.memory_space<vmem>>, vector<1024x1024xbf16>
    %cst_20 = arith.constant dense<0.000000e+00> : vector<8x1024xf32>
    %27 = tpu.matmul %25, %26, %cst_20 {dimension_numbers = #tpu.dot_dimension_numbers<[1], [0], [0], [1], [0, 0, 1, 1], [], []>} : vector<8x1024xbf16>, vector<1024x1024xbf16>, vector<8x1024xf32> -> vector<8x1024xf32>
    %c0_21 = arith.constant 0 : index
    %c0_22 = arith.constant 0 : index
    %28 = vector.load %arg9[%c0_21, %c0_22] : memref<1x1024xf32, #tpu.memory_space<vmem>>, vector<1x1024xf32>
    %29 = vector.broadcast %28 : vector<1x1024xf32> to vector<8x1024xf32>
    %30 = arith.addf %27, %29 : vector<8x1024xf32>
    %cst_23 = arith.constant 0.000000e+00 : f32
    %31 = vector.broadcast %cst_23 : f32 to vector<8x1024xf32>
    %32 = arith.maximumf %30, %31 : vector<8x1024xf32>
    %33 = arith.truncf %32 : vector<8x1024xf32> to vector<8x1024xbf16>
    %c0_24 = arith.constant 0 : index
    %c0_25 = arith.constant 0 : index
    %34 = vector.load %arg10[%c0_24, %c0_25] : memref<1024x128xbf16, #tpu.memory_space<vmem>>, vector<1024x128xbf16>
    %cst_26 = arith.constant dense<0.000000e+00> : vector<8x128xf32>
    %35 = tpu.matmul %33, %34, %cst_26 {dimension_numbers = #tpu.dot_dimension_numbers<[1], [0], [0], [1], [0, 0, 1, 1], [], []>} : vector<8x1024xbf16>, vector<1024x128xbf16>, vector<8x128xf32> -> vector<8x128xf32>
    %c0_27 = arith.constant 0 : index
    %c0_28 = arith.constant 0 : index
    %36 = vector.load %arg11[%c0_27, %c0_28] : memref<1x128xf32, #tpu.memory_space<vmem>>, vector<1x128xf32>
    %37 = vector.broadcast %36 : vector<1x128xf32> to vector<8x128xf32>
    %38 = arith.addf %35, %37 : vector<8x128xf32>
    %c0_29 = arith.constant 0 : index
    %c0_30 = arith.constant 0 : index
    %39 = vector.load %arg12[%c0_29, %c0_30] : memref<8x128xf32, #tpu.memory_space<vmem>>, vector<8x128xf32>
    tpu.vector_store %arg12[%c0_29, %c0_30], %38 {strides = array<i32>} : memref<8x128xf32, #tpu.memory_space<vmem>>, vector<8x128xf32>,
    return
  }
  func.func @transform_0(%arg0: i32) -> (i32, i32) {
    %c0_i32 = arith.constant 0 : i32
    %c0_i32_0 = arith.constant 0 : i32
    return %arg0, %c0_i32 : i32, i32
  }
  func.func @transform_1(%arg0: i32) -> (i32, i32) {
    %c0_i32 = arith.constant 0 : i32
    %c0_i32_0 = arith.constant 0 : i32
    %c0_i32_1 = arith.constant 0 : i32
    return %c0_i32, %c0_i32_0 : i32, i32
  }
  func.func @transform_2(%arg0: i32) -> (i32, i32) {
    %c0_i32 = arith.constant 0 : i32
    %c0_i32_0 = arith.constant 0 : i32
    %c0_i32_1 = arith.constant 0 : i32
    return %c0_i32, %c0_i32_0 : i32, i32
  }
  func.func @transform_3(%arg0: i32) -> (i32, i32) {
    %c0_i32 = arith.constant 0 : i32
    %c0_i32_0 = arith.constant 0 : i32
    %c0_i32_1 = arith.constant 0 : i32
    return %c0_i32, %c0_i32_0 : i32, i32
  }
  func.func @transform_4(%arg0: i32) -> (i32, i32) {
    %c0_i32 = arith.constant 0 : i32
    %c0_i32_0 = arith.constant 0 : i32
    %c0_i32_1 = arith.constant 0 : i32
    return %c0_i32, %c0_i32_0 : i32, i32
  }
  func.func @transform_5(%arg0: i32) -> (i32, i32) {
    %c0_i32 = arith.constant 0 : i32
    %c0_i32_0 = arith.constant 0 : i32
    %c0_i32_1 = arith.constant 0 : i32
    return %c0_i32, %c0_i32_0 : i32, i32
  }
  func.func @transform_6(%arg0: i32) -> (i32, i32) {
    %c0_i32 = arith.constant 0 : i32
    %c0_i32_0 = arith.constant 0 : i32
    %c0_i32_1 = arith.constant 0 : i32
    return %c0_i32, %c0_i32_0 : i32, i32
  }
  func.func @transform_7(%arg0: i32) -> (i32, i32) {
    %c0_i32 = arith.constant 0 : i32
    %c0_i32_0 = arith.constant 0 : i32
    %c0_i32_1 = arith.constant 0 : i32
    return %c0_i32, %c0_i32_0 : i32, i32
  }
  func.func @transform_8(%arg0: i32) -> (i32, i32) {
    %c0_i32 = arith.constant 0 : i32
    %c0_i32_0 = arith.constant 0 : i32
    %c0_i32_1 = arith.constant 0 : i32
    return %c0_i32, %c0_i32_0 : i32, i32
  }
  func.func @transform_9(%arg0: i32) -> (i32, i32) {
    %c0_i32 = arith.constant 0 : i32
    %c0_i32_0 = arith.constant 0 : i32
    %c0_i32_1 = arith.constant 0 : i32
    return %c0_i32, %c0_i32_0 : i32, i32
  }
  func.func @transform_10(%arg0: i32) -> (i32, i32) {
    %c0_i32 = arith.constant 0 : i32
    %c0_i32_0 = arith.constant 0 : i32
    %c0_i32_1 = arith.constant 0 : i32
    return %c0_i32, %c0_i32_0 : i32, i32
  }
  func.func @transform_11(%arg0: i32) -> (i32, i32) {
    %c0_i32 = arith.constant 0 : i32
    %c0_i32_0 = arith.constant 0 : i32
    return %arg0, %c0_i32 : i32, i32
  }
}

</mosaic_0001>

<bundles_post_ra>
// kernel: tpu_custom_call.1
= control target key start
LH: loop header
LB: loop body
LE: loop exit
PB: predicated region body
PF: predicated region fallthrough
CT: control target
= control target key end

     0   :  { %16 = vsyncpa [#allocation3], 0  ;;  %s15545_s0 = inlined_call_operand.hbm [shape: f32[8,128], index: 0, kind: input, shape index: {}]   ;;  %s15546_s1 = inlined_call_operand.hbm [shape: bf16[128,1024], index: 1, kind: input, shape index: {}]   ;;  %s15547_s2 = inlined_call_operand.hbm [shape: f32[1,1024], index: 2, kind: input, shape index: {}]   ;;  %s15548_s3 = inlined_call_operand.hbm [shape: bf16[1024,1024], index: 3, kind: input, shape index: {}]   ;;  %s15549_s4 = inlined_call_operand.hbm [shape: f32[1,1024], index: 4, kind: input, shape index: {}]   ;;  %s15550_s5 = inlined_call_operand.hbm [shape: bf16[1024,1024], index: 5, kind: input, shape index: {}]   ;;  %s15551_s6 = inlined_call_operand.hbm [shape: f32[1,1024], index: 6, kind: input, shape index: {}]   ;;  %s15552_s7 = inlined_call_operand.hbm [shape: bf16[1024,1024], index: 7, kind: input, shape index: {}]   ;;  %s15553_s8 = inlined_call_operand.hbm [shape: f32[1,1024], index: 8, kind: input, shape index: {}]   ;;  %s15554_s9 = inlined_call_operand.hbm [shape: bf16[1024,128], index: 9, kind: input, shape index: {}]   ;;  %s15555_s10 = inlined_call_operand.hbm [shape: f32[1,128], index: 10, kind: input, shape index: {}]   ;;  %s15556_s11 = inlined_call_operand.hbm [shape: f32[8,128], index: 11, kind: output, shape index: {}]  }
   0x1   :  { %17 = vsyncpa [#allocation6], 0 }
   0x2   :  { %18 = vsyncpa [#allocation9], 0 }
   0x3   :  { %19 = vsyncpa [#allocation12], 0 }
   0x4   :  { %20 = vsyncpa [#allocation15], 0 }
   0x5   :  { %21 = vsyncpa [#allocation18], 0 }
   0x6   :  { %22 = vsyncpa [#allocation4], 0  ;;  %s14936_s17 = smov [#allocation5]  }
   0x7   :  { %s38_s18 = sshll.u32 %s14936_s17, 4  ;;  %s39_s18 = int_to_ptr.vmem [resolvable:$true] %s38_s18 }
   0x8   :  { %s14690_s19 = scalar_lea.vmem %s39_s18, 8192  ;;  %p14695_p1 = scmp.lt.s32.totalorder %s39_s18, %s39_s18 }
   0x9   :  { %p14691_p0 = scmp.ne.s32.totalorder %s39_s18, %s14690_s19  ;;  %p14696_p2 = scmp.lt.s32.totalorder %s14690_s19, %s14690_s19 }
   0xb   :  { %p14697_p3 = por %p14696_p2, %p14695_p1 }
   0xd   :  { %p14698_p4 = pnand %p14697_p3, %p14691_p0 }
   0xf   :  { %14701 = shalt.err (!%p14698_p4)
}
  0x10   :  { %s14937_s20 = smov 512   ;;  %s14938_s21 = smov 32  }
  0x11   :  { %44 = dma.hbm_to_vmem [thread:$0]  %s15546_s1, 8192, %s39_s18, [#allocation6], %s14937_s20, %s14937_s20, %s14938_s21  }
  0x12   :  { %s14939_s24 = smov [#allocation8]   ;;  %s14940_s26 = smov [#allocation11]  }
  0x13   :  { %s60_s25 = sshll.u32 %s14939_s24, 4  ;;  %s82_s27 = sshll.u32 %s14940_s26, 4  ;;  %s61_s25 = int_to_ptr.vmem [resolvable:$true] %s60_s25  ;;  %s83_s27 = int_to_ptr.vmem [resolvable:$true] %s82_s27 }
  0x14   :  { %s14710_s28 = scalar_lea.vmem %s61_s25, 65536  ;;  %p14715_p6 = scmp.lt.s32.totalorder %s61_s25, %s61_s25 }
  0x15   :  { %p14711_p5 = scmp.ne.s32.totalorder %s61_s25, %s14710_s28  ;;  %p14716_p7 = scmp.lt.s32.totalorder %s14710_s28, %s14710_s28 }
  0x17   :  { %p14717_p8 = por %p14716_p7, %p14715_p6 }
  0x19   :  { %p14718_p9 = pnand %p14717_p8, %p14711_p5 }
  0x1b   :  { %14721 = shalt.err (!%p14718_p9)
}
  0x1c   :  { %66 = dma.hbm_to_vmem [thread:$0]  %s15548_s3, 65536, %s61_s25, [#allocation9], %s14937_s20, %s14937_s20, %s14938_s21  }
  0x1d   :  { %s14730_s1 = scalar_lea.vmem %s83_s27, 65536  ;;  %p14735_p11 = scmp.lt.s32.totalorder %s83_s27, %s83_s27 }
  0x1e   :  { %p14731_p10 = scmp.ne.s32.totalorder %s83_s27, %s14730_s1  ;;  %p14736_p12 = scmp.lt.s32.totalorder %s14730_s1, %s14730_s1 }
  0x20   :  { %p14737_p13 = por %p14736_p12, %p14735_p11 }
  0x22   :  { %p14738_p0 = pnand %p14737_p13, %p14731_p10 }
  0x24   :  { %14741 = shalt.err (!%p14738_p0)
}
  0x25   :  { %88 = dma.hbm_to_vmem [thread:$0]  %s15550_s5, 65536, %s83_s27, [#allocation12], %s14937_s20, %s14937_s20, %s14938_s21  }
  0x26   :  { %s14941_s14 = smov [#allocation14]   ;;  %s14942_s16 = smov [#allocation17]  }
  0x27   :  { %s104_s15 = sshll.u32 %s14941_s14, 4  ;;  %s126_s3 = sshll.u32 %s14942_s16, 4  ;;  %s105_s15 = int_to_ptr.vmem [resolvable:$true] %s104_s15  ;;  %s127_s3 = int_to_ptr.vmem [resolvable:$true] %s126_s3 }
  0x28   :  { %s14750_s17 = scalar_lea.vmem %s105_s15, 65536  ;;  %p14755_p2 = scmp.lt.s32.totalorder %s105_s15, %s105_s15 }
  0x29   :  { %p14751_p1 = scmp.ne.s32.totalorder %s105_s15, %s14750_s17  ;;  %p14756_p3 = scmp.lt.s32.totalorder %s14750_s17, %s14750_s17 }
  0x2b   :  { %p14757_p4 = por %p14756_p3, %p14755_p2 }
  0x2d   :  { %p14758_p5 = pnand %p14757_p4, %p14751_p1 }
  0x2f   :  { %14761 = shalt.err (!%p14758_p5)
}
  0x30   :  { %110 = dma.hbm_to_vmem [thread:$0]  %s15552_s7, 65536, %s105_s15, [#allocation15], %s14937_s20, %s14937_s20, %s14938_s21  }
  0x31   :  { %s14770_s5 = scalar_lea.vmem %s127_s3, 8192  ;;  %p14775_p7 = scmp.lt.s32.totalorder %s127_s3, %s127_s3 }
  0x32   :  { %p14771_p6 = scmp.ne.s32.totalorder %s127_s3, %s14770_s5  ;;  %p14776_p8 = scmp.lt.s32.totalorder %s14770_s5, %s14770_s5 }
  0x34   :  { %p14777_p9 = por %p14776_p8, %p14775_p7 }
  0x36   :  { %p14778_p10 = pnand %p14777_p9, %p14771_p6 }
  0x38   :  { %14781 = shalt.err (!%p14778_p10)
}
  0x39   :  { %s14943_s22 = smov 64   ;;  %s14944_s23 = smov 4  }
  0x3a   :  { %132 = dma.hbm_to_vmem [thread:$0]  %s15554_s9, 8192, %s127_s3, [#allocation18], %s14943_s22, %s14943_s22, %s14944_s23  }
  0x3b   :  { %s14945_s26 = smov [#allocation2]   ;;  %s14946_s28 = smov [#allocation7]  }
  0x3c   :  { %s29_s27 = sshll.u32 %s14945_s26, 4  ;;  %s51_s29 = sshll.u32 %s14946_s28, 4  ;;  %s30_s27 = int_to_ptr.vmem [resolvable:$true] %s29_s27  ;;  %s52_s29 = int_to_ptr.vmem [resolvable:$true] %s51_s29 }
  0x3d   :  { %s14790_s7 = scalar_lea.vmem %s30_s27, 128  ;;  %p14795_p12 = scmp.lt.s32.totalorder %s30_s27, %s30_s27 }
  0x3e   :  { %p14791_p11 = scmp.ne.s32.totalorder %s30_s27, %s14790_s7  ;;  %p14796_p13 = scmp.lt.s32.totalorder %s14790_s7, %s14790_s7 }
  0x40   :  { %p14797_p0 = por %p14796_p13, %p14795_p12 }
  0x42   :  { %p14798_p1 = pnand %p14797_p0, %p14791_p11 }
  0x44   :  { %14801 = shalt.err (!%p14798_p1)
}
  0x45   :  { %32 = dma.hbm_to_vmem [thread:$0]  %s15545_s0, 128, %s30_s27, [#allocation3]  }
  0x46   :  { %s14810_s30 = scalar_lea.vmem %s52_s29, 128  ;;  %p14815_p3 = scmp.lt.s32.totalorder %s52_s29, %s52_s29 }
  0x47   :  { %p14811_p2 = scmp.ne.s32.totalorder %s52_s29, %s14810_s30  ;;  %p14816_p4 = scmp.lt.s32.totalorder %s14810_s30, %s14810_s30 }
  0x49   :  { %p14817_p5 = por %p14816_p4, %p14815_p3 }
  0x4b   :  { %p14818_p6 = pnand %p14817_p5, %p14811_p2 }
  0x4d   :  { %14821 = shalt.err (!%p14818_p6)
}
  0x4e   :  { %54 = dma.hbm_to_vmem [thread:$0]  %s15547_s2, 128, %s52_s29, [#allocation6]  }
  0x4f   :  { %s14947_s12 = smov [#allocation10]   ;;  %s14948_s14 = smov [#allocation13]  }
  0x50   :  { %s73_s13 = sshll.u32 %s14947_s12, 4  ;;  %s95_s15 = sshll.u32 %s14948_s14, 4  ;;  %s74_s13 = int_to_ptr.vmem [resolvable:$true] %s73_s13  ;;  %s96_s15 = int_to_ptr.vmem [resolvable:$true] %s95_s15 }
  0x51   :  { %s14830_s16 = scalar_lea.vmem %s74_s13, 128  ;;  %p14835_p8 = scmp.lt.s32.totalorder %s74_s13, %s74_s13 }
  0x52   :  { %p14831_p7 = scmp.ne.s32.totalorder %s74_s13, %s14830_s16  ;;  %p14836_p9 = scmp.lt.s32.totalorder %s14830_s16, %s14830_s16 }
  0x54   :  { %p14837_p10 = por %p14836_p9, %p14835_p8 }
  0x56   :  { %p14838_p11 = pnand %p14837_p10, %p14831_p7 }
  0x58   :  { %14841 = shalt.err (!%p14838_p11)
}
  0x59   :  { %76 = dma.hbm_to_vmem [thread:$0]  %s15549_s4, 128, %s74_s13, [#allocation9]  }
  0x5a   :  { %s14850_s17 = scalar_lea.vmem %s96_s15, 128  ;;  %p14855_p13 = scmp.lt.s32.totalorder %s96_s15, %s96_s15 }
  0x5b   :  { %p14851_p12 = scmp.ne.s32.totalorder %s96_s15, %s14850_s17  ;;  %p14856_p0 = scmp.lt.s32.totalorder %s14850_s17, %s14850_s17 }
  0x5d   :  { %p14857_p1 = por %p14856_p0, %p14855_p13 }
  0x5f   :  { %p14858_p2 = pnand %p14857_p1, %p14851_p12 }
  0x61   :  { %14861 = shalt.err (!%p14858_p2)
}
  0x62   :  { %98 = dma.hbm_to_vmem [thread:$0]  %s15551_s6, 128, %s96_s15, [#allocation12]  }
  0x63   :  { %s14949_s19 = smov [#allocation16]   ;;  %s14950_s22 = smov [#allocation19]  }
  0x64   :  { %s117_s5 = sshll.u32 %s14949_s19, 4  ;;  %s139_s23 = sshll.u32 %s14950_s22, 4  ;;  %s118_s5 = int_to_ptr.vmem [resolvable:$true] %s117_s5  ;;  %s140_s23 = int_to_ptr.vmem [resolvable:$true] %s139_s23 }
  0x65   :  { %s14870_s24 = scalar_lea.vmem %s118_s5, 128  ;;  %p14875_p4 = scmp.lt.s32.totalorder %s118_s5, %s118_s5 }
  0x66   :  { %p14871_p3 = scmp.ne.s32.totalorder %s118_s5, %s14870_s24  ;;  %p14876_p5 = scmp.lt.s32.totalorder %s14870_s24, %s14870_s24 }
  0x68   :  { %p14877_p6 = por %p14876_p5, %p14875_p4 }
  0x6a   :  { %p14878_p7 = pnand %p14877_p6, %p14871_p3 }
  0x6c   :  { %14881 = shalt.err (!%p14878_p7)
}
  0x6d   :  { %120 = dma.hbm_to_vmem [thread:$0]  %s15553_s8, 128, %s118_s5, [#allocation15]  }
  0x6e   :  { %s14890_s26 = scalar_lea.vmem %s140_s23, 16  ;;  %s14894_s6 = scalar_lea.vmem %s140_s23, 32 }
  0x6f   :  { %p14891_p8 = scmp.ne.s32.totalorder %s140_s23, %s14890_s26  ;;  %p14895_p9 = scmp.lt.s32.totalorder %s140_s23, %s140_s23 }
  0x70   :  { %p14896_p10 = scmp.lt.s32.totalorder %s14894_s6, %s14890_s26 }
  0x72   :  { %p14897_p11 = por %p14896_p10, %p14895_p9 }
  0x74   :  { %p14898_p12 = pnand %p14897_p11, %p14891_p8 }
  0x76   :  { %14901 = shalt.err (!%p14898_p12)
}
  0x77   :  { %142 = dma.hbm_to_vmem [thread:$0]  %s15555_s10, 16, %s140_s23, [#allocation18]  }
  0x78   :  { %14922 = dma.done.wait [#allocation3], 128  }
  0x79   :  { %14923 = vsyncadd [#allocation3], 4294967168 }
  0x7a   :  { %14924 = dma.done.wait [#allocation6], 8320  }
  0x7b   :  { %14925 = vsyncadd [#allocation6], 4294958976 }
  0x7c   :  { %14926 = dma.done.wait [#allocation9], 65664  }
  0x7d   :  { %14927 = vsyncadd [#allocation9], 4294901632 }
  0x7e   :  { %14928 = dma.done.wait [#allocation12], 65664  }
  0x7f   :  { %14929 = vsyncadd [#allocation12], 4294901632 }
  0x80   :  { %14930 = dma.done.wait [#allocation15], 65664  }
  0x81   :  { %14931 = vsyncadd [#allocation15], 4294901632 }
  0x82   :  { %14932 = dma.done.wait [#allocation18], 8208  }
  0x83   :  { %14933 = vsyncadd [#allocation18], 4294959088  ;;  %v14951_v0 = vmov 0   ;;  %v235_v1 = vld [vmem:[#allocation5 + $0x1c0] sm:$0xff]  ;;  %v236_v3 = vld [vmem:[#allocation5 + $0x1c8] sm:$0xff]  ;;  %s14952_s8 = smov [#allocation20]  }
  0x84   :  { %637 = vmatprep.mubr.bf16.mxu0 %v14951_v0  ;;  %678 = vmatprep.mubr.bf16.mxu1 %v14951_v0  ;;  %v239_v2 = vld [vmem:[#allocation5 + $0x1e0] sm:$0xff]  ;;  %v240_v5 = vld [vmem:[#allocation5 + $0x1e8] sm:$0xff]  ;;  %v237_v63 = vld [vmem:[#allocation5 + $0x1d0] sm:$0xff]  ;;  %s12829_s10 = sshll.u32 %s14952_s8, 4  ;;  %s12830_s10 = int_to_ptr.vmem [resolvable:$true] %s12829_s10 }
  0x85   :  { %v12900_v4 = vcombine.high %v235_v1, %v239_v2  ;;  %v12899_v6 = vcombine.low %v235_v1, %v239_v2  ;;  %v227_v7 = vld [vmem:[#allocation5 + $0x180] sm:$0xff]  ;;  %v12902_v9 = vcombine.high %v236_v3, %v240_v5  ;;  %v12901_v10 = vcombine.low %v236_v3, %v240_v5  ;;  %v228_v12 = vld [vmem:[#allocation5 + $0x188] sm:$0xff]  ;;  %v241_v1 = vld [vmem:[#allocation5 + $0x1f0] sm:$0xff]  ;;  %s14902_s29 = scalar_lea.vmem %s12830_s10, 128  ;;  %p14907_p0 = scmp.lt.s32.totalorder %s12830_s10, %s12830_s10 }
  0x86   :  { %v231_v8 = vld [vmem:[#allocation5 + $0x1a0] sm:$0xff]  ;;  %v232_v13 = vld [vmem:[#allocation5 + $0x1a8] sm:$0xff]  ;;  %v238_v2 = vld [vmem:[#allocation5 + $0x1d8] sm:$0xff]  ;;  %p14903_p13 = scmp.ne.s32.totalorder %s12830_s10, %s14902_s29  ;;  %p14908_p1 = scmp.lt.s32.totalorder %s14902_s29, %s14902_s29 }
  0x87   :  { %v12892_v11 = vcombine.high %v227_v7, %v231_v8  ;;  %v219_v14 = vld [vmem:[#allocation5 + $0x140] sm:$0xff]  ;;  %605 = vmatprep.subr.bf16.mxu0 %v12900_v4  ;;  %v12894_v15 = vcombine.high %v228_v12, %v232_v13  ;;  %v220_v17 = vld [vmem:[#allocation5 + $0x148] sm:$0xff]  ;;  %646 = vmatprep.subr.bf16.mxu1 %v12902_v9  ;;  %v12891_v19 = vcombine.low %v227_v7, %v231_v8  ;;  %v242_v3 = vld [vmem:[#allocation5 + $0x1f8] sm:$0xff] }
  0x88   :  { %v223_v16 = vld [vmem:[#allocation5 + $0x160] sm:$0xff]  ;;  %v224_v18 = vld [vmem:[#allocation5 + $0x168] sm:$0xff]  ;;  %606 = vmatpush1.bf16.msra.mxu0 %v12899_v6  ;;  %647 = vmatpush1.bf16.msra.mxu1 %v12901_v10  ;;  %v12893_v20 = vcombine.low %v228_v12, %v232_v13  ;;  %v177_v5 = vld [vmem:[#allocation2] sm:$0xff]  ;;  %v12904_v7 = vcombine.high %v237_v63, %v241_v1  ;;  %v12906_v8 = vcombine.high %v238_v2, %v242_v3  ;;  %p14909_p2 = por %p14908_p1, %p14907_p0 }
  0x89   :  { %607 = vmatprep.subr.bf16.mxu0 %v12892_v11  ;;  %v12884_v21 = vcombine.high %v219_v14, %v223_v16  ;;  %648 = vmatprep.subr.bf16.mxu1 %v12894_v15  ;;  %v12886_v22 = vcombine.high %v220_v17, %v224_v18  ;;  %v211_v23 = vld [vmem:[#allocation5 + $0x100] sm:$0xff]  ;;  %v212_v25 = vld [vmem:[#allocation5 + $0x108] sm:$0xff]  ;;  %v12883_v27 = vcombine.low %v219_v14, %v223_v16  ;;  %v229_v9 = vld [vmem:[#allocation5 + $0x190] sm:$0xff] }
  0x8a   :  { %v215_v24 = vld [vmem:[#allocation5 + $0x120] sm:$0xff]  ;;  %v216_v26 = vld [vmem:[#allocation5 + $0x128] sm:$0xff]  ;;  %v12885_v28 = vcombine.low %v220_v17, %v224_v18  ;;  %v233_v10 = vld [vmem:[#allocation5 + $0x1b0] sm:$0xff]  ;;  %v15060_v11 = vpack.c.bf16 %v177_v5, %v177_v5  ;;  %v12903_v14 = vcombine.low %v237_v63, %v241_v1  ;;  %v12905_v15 = vcombine.low %v238_v2, %v242_v3  ;;  %p14910_p3 = pnand %p14909_p2, %p14903_p13 }
  0x8b   :  { %v12876_v29 = vcombine.high %v211_v23, %v215_v24  ;;  %v12878_v30 = vcombine.high %v212_v25, %v216_v26  ;;  %v203_v31 = vld [vmem:[#allocation5 + $0xc0] sm:$0xff]  ;;  %v204_v33 = vld [vmem:[#allocation5 + $0xc8] sm:$0xff]  ;;  %v12875_v35 = vcombine.low %v211_v23, %v215_v24  ;;  %v12877_v36 = vcombine.low %v212_v25, %v216_v26  ;;  %v230_v12 = vld [vmem:[#allocation5 + $0x198] sm:$0xff] }
  0x8c   :  { %608 = vmatpush1.bf16.msra.mxu0 %v12891_v19  ;;  %649 = vmatpush1.bf16.msra.mxu1 %v12893_v20  ;;  %v207_v32 = vld [vmem:[#allocation5 + $0xe0] sm:$0xff]  ;;  %v208_v34 = vld [vmem:[#allocation5 + $0xe8] sm:$0xff]  ;;  %v234_v13 = vld [vmem:[#allocation5 + $0x1b8] sm:$0xff]  ;;  %v12896_v16 = vcombine.high %v229_v9, %v233_v10 }
  0x8d   :  { %609 = vmatprep.subr.bf16.mxu0 %v12884_v21  ;;  %650 = vmatprep.subr.bf16.mxu1 %v12886_v22  ;;  %v12868_v37 = vcombine.high %v203_v31, %v207_v32  ;;  %v12870_v38 = vcombine.high %v204_v33, %v208_v34  ;;  %v195_v39 = vld [vmem:[#allocation5 + $0x80] sm:$0xff]  ;;  %v196_v41 = vld [vmem:[#allocation5 + $0x88] sm:$0xff]  ;;  %v12867_v43 = vcombine.low %v203_v31, %v207_v32  ;;  %v221_v18 = vld [vmem:[#allocation5 + $0x150] sm:$0xff] }
  0x8e   :  { %v199_v40 = vld [vmem:[#allocation5 + $0xa0] sm:$0xff]  ;;  %v200_v42 = vld [vmem:[#allocation5 + $0xa8] sm:$0xff]  ;;  %v12869_v44 = vcombine.low %v204_v33, %v208_v34  ;;  %v12898_v17 = vcombine.high %v230_v12, %v234_v13  ;;  %v225_v19 = vld [vmem:[#allocation5 + $0x170] sm:$0xff]  ;;  %v12895_v22 = vcombine.low %v229_v9, %v233_v10  ;;  %v12897_v23 = vcombine.low %v230_v12, %v234_v13 }
  0x8f   :  { %v12860_v45 = vcombine.high %v195_v39, %v199_v40  ;;  %v12862_v46 = vcombine.high %v196_v41, %v200_v42  ;;  %v187_v47 = vld [vmem:[#allocation5 + $0x40] sm:$0xff]  ;;  %v188_v49 = vld [vmem:[#allocation5 + $0x48] sm:$0xff]  ;;  %v12859_v51 = vcombine.low %v195_v39, %v199_v40  ;;  %v12861_v52 = vcombine.low %v196_v41, %v200_v42  ;;  %v222_v20 = vld [vmem:[#allocation5 + $0x158] sm:$0xff] }
  0x90   :  { %610 = vmatpush1.bf16.msra.mxu0 %v12883_v27  ;;  %651 = vmatpush1.bf16.msra.mxu1 %v12885_v28  ;;  %v191_v48 = vld [vmem:[#allocation5 + $0x60] sm:$0xff]  ;;  %v192_v50 = vld [vmem:[#allocation5 + $0x68] sm:$0xff]  ;;  %v226_v21 = vld [vmem:[#allocation5 + $0x178] sm:$0xff]  ;;  %v12888_v24 = vcombine.high %v221_v18, %v225_v19 }
  0x91   :  { %611 = vmatprep.subr.bf16.mxu0 %v12876_v29  ;;  %652 = vmatprep.subr.bf16.mxu1 %v12878_v30  ;;  %v12852_v53 = vcombine.high %v187_v47, %v191_v48  ;;  %v12854_v54 = vcombine.high %v188_v49, %v192_v50  ;;  %v179_v55 = vld [vmem:[#allocation5] sm:$0xff]  ;;  %v180_v57 = vld [vmem:[#allocation5 + $0x8] sm:$0xff]  ;;  %v12851_v59 = vcombine.low %v187_v47, %v191_v48  ;;  %v213_v26 = vld [vmem:[#allocation5 + $0x110] sm:$0xff] }
  0x92   :  { %v183_v56 = vld [vmem:[#allocation5 + $0x20] sm:$0xff]  ;;  %v184_v58 = vld [vmem:[#allocation5 + $0x28] sm:$0xff]  ;;  %v12853_v60 = vcombine.low %v188_v49, %v192_v50  ;;  %v12890_v25 = vcombine.high %v222_v20, %v226_v21  ;;  %v217_v27 = vld [vmem:[#allocation5 + $0x130] sm:$0xff]  ;;  %v12887_v30 = vcombine.low %v221_v18, %v225_v19  ;;  %v12889_v33 = vcombine.low %v222_v20, %v226_v21 }
  0x93   :  { %v12844_v61 = vcombine.high %v179_v55, %v183_v56  ;;  %v12846_v62 = vcombine.high %v180_v57, %v184_v58  ;;  %v12843_v4 = vcombine.low %v179_v55, %v183_v56  ;;  %v12845_v6 = vcombine.low %v180_v57, %v184_v58  ;;  %v214_v28 = vld [vmem:[#allocation5 + $0x118] sm:$0xff]  ;;  %v205_v31 = vld [vmem:[#allocation5 + $0xd0] sm:$0xff]  ;;  %v845_v63 = vld [vmem:[#allocation8 + $0x1e0] sm:$0xff] }
  0x94   :  { %612 = vmatpush1.bf16.msra.mxu0 %v12875_v35  ;;  %653 = vmatpush1.bf16.msra.mxu1 %v12877_v36  ;;  %v218_v29 = vld [vmem:[#allocation5 + $0x138] sm:$0xff]  ;;  %v209_v32 = vld [vmem:[#allocation5 + $0xf0] sm:$0xff]  ;;  %v12880_v34 = vcombine.high %v213_v26, %v217_v27  ;;  %v969_v3 = vld [vmem:[#allocation8 + $0x5c0] sm:$0xff] }
  0x95   :  { %613 = vmatprep.subr.bf16.mxu0 %v12868_v37  ;;  %654 = vmatprep.subr.bf16.mxu1 %v12870_v38  ;;  %v206_v35 = vld [vmem:[#allocation5 + $0xd8] sm:$0xff]  ;;  %v12882_v37 = vcombine.high %v214_v28, %v218_v29  ;;  %v12879_v38 = vcombine.low %v213_v26, %v217_v27  ;;  %v197_v39 = vld [vmem:[#allocation5 + $0x90] sm:$0xff]  ;;  %v12881_v41 = vcombine.low %v214_v28, %v218_v29  ;;  %v961_v12 = vld [vmem:[#allocation8 + $0x580] sm:$0xff] }
  0x96   :  { %v210_v36 = vld [vmem:[#allocation5 + $0xf8] sm:$0xff]  ;;  %v201_v40 = vld [vmem:[#allocation5 + $0xb0] sm:$0xff]  ;;  %v965_v13 = vld [vmem:[#allocation8 + $0x5a0] sm:$0xff] }
  0x97   :  { %v198_v42 = vld [vmem:[#allocation5 + $0x98] sm:$0xff]  ;;  %v193_v47 = vld [vmem:[#allocation5 + $0x70] sm:$0xff]  ;;  %v12873_v48 = vcombine.low %v206_v35, %v210_v36  ;;  %v12864_v49 = vcombine.high %v197_v39, %v201_v40  ;;  %v953_v20 = vld [vmem:[#allocation8 + $0x540] sm:$0xff]  ;;  %v13083_v26 = vcombine.low %v961_v12, %v965_v13 }
  0x98   :  { %614 = vmatpush1.bf16.msra.mxu0 %v12867_v43  ;;  %655 = vmatpush1.bf16.msra.mxu1 %v12869_v44  ;;  %v202_v43 = vld [vmem:[#allocation5 + $0xb8] sm:$0xff]  ;;  %v12874_v44 = vcombine.high %v206_v35, %v210_v36  ;;  %v185_v55 = vld [vmem:[#allocation5 + $0x30] sm:$0xff]  ;;  %v957_v21 = vld [vmem:[#allocation8 + $0x560] sm:$0xff] }
  0x99   :  { %615 = vmatprep.subr.bf16.mxu0 %v12860_v45  ;;  %656 = vmatprep.subr.bf16.mxu1 %v12862_v46  ;;  %v12871_v45 = vcombine.low %v205_v31, %v209_v32  ;;  %v189_v46 = vld [vmem:[#allocation5 + $0x50] sm:$0xff]  ;;  %v190_v50 = vld [vmem:[#allocation5 + $0x58] sm:$0xff]  ;;  %v12865_v56 = vcombine.low %v198_v42, %v202_v43  ;;  %v945_v28 = vld [vmem:[#allocation8 + $0x500] sm:$0xff] }
  0x9a   :  { %v12856_v57 = vcombine.high %v189_v46, %v193_v47  ;;  %v182_v58 = vld [vmem:[#allocation5 + $0x18] sm:$0xff]  ;;  %v949_v29 = vld [vmem:[#allocation8 + $0x520] sm:$0xff] }
  0x9b   :  { %v937_v35 = vld [vmem:[#allocation8 + $0x4c0] sm:$0xff] }
  0x9c   :  { %616 = vmatpush1.bf16.msra.mxu0 %v12859_v51  ;;  %657 = vmatpush1.bf16.msra.mxu1 %v12861_v52  ;;  %v194_v51 = vld [vmem:[#allocation5 + $0x78] sm:$0xff]  ;;  %v12866_v52 = vcombine.high %v198_v42, %v202_v43  ;;  %v941_v36 = vld [vmem:[#allocation8 + $0x4e0] sm:$0xff] }
  0x9d   :  { %617 = vmatprep.subr.bf16.mxu0 %v12852_v53  ;;  %658 = vmatprep.subr.bf16.mxu1 %v12854_v54  ;;  %v12863_v53 = vcombine.low %v197_v39, %v201_v40  ;;  %v181_v54 = vld [vmem:[#allocation5 + $0x10] sm:$0xff]  ;;  %v12857_v1 = vcombine.low %v190_v50, %v194_v51  ;;  %v801_v39 = vld [vmem:[#allocation8 + $0x80] sm:$0xff] }
  0x9e   :  { %v12848_v2 = vcombine.high %v181_v54, %v185_v55  ;;  %v805_v40 = vld [vmem:[#allocation8 + $0xa0] sm:$0xff] }
  0x9f   :  { %v929_v42 = vld [vmem:[#allocation8 + $0x480] sm:$0xff] }
  0xa0   :  { %618 = vmatpush1.bf16.msra.mxu0 %v12851_v59  ;;  %659 = vmatpush1.bf16.msra.mxu1 %v12853_v60  ;;  %v186_v59 = vld [vmem:[#allocation5 + $0x38] sm:$0xff]  ;;  %v12858_v60 = vcombine.high %v190_v50, %v194_v51  ;;  %v933_v43 = vld [vmem:[#allocation8 + $0x4a0] sm:$0xff] }
  0xa1   :  { %619 = vmatprep.subr.bf16.mxu0 %v12844_v61  ;;  %660 = vmatprep.subr.bf16.mxu1 %v12846_v62  ;;  %v12855_v61 = vcombine.low %v189_v46, %v193_v47  ;;  %v841_v62 = vld [vmem:[#allocation8 + $0x1c0] sm:$0xff]  ;;  %v12850_v5 = vcombine.high %v182_v58, %v186_v59  ;;  %v12849_v9 = vcombine.low %v182_v58, %v186_v59 }
  0xa2   :  { %v12964_v10 = vcombine.high %v841_v62, %v845_v63  ;;  %v793_v46 = vld [vmem:[#allocation8 + $0x40] sm:$0xff]  ;;  %v13052_v50 = vcombine.high %v929_v42, %v933_v43 }
  0xa3   :  { %v797_v47 = vld [vmem:[#allocation8 + $0x60] sm:$0xff] }
  0xa4   :  { %620 = vmatpush1.bf16.msra.mxu0 %v12843_v4  ;;  %661 = vmatpush1.bf16.msra.mxu1 %v12845_v6  ;;  %v973_v4 = vld [vmem:[#allocation8 + $0x5e0] sm:$0xff]  ;;  %v12847_v6 = vcombine.low %v181_v54, %v185_v55  ;;  %v13051_v54 = vcombine.low %v929_v42, %v933_v43  ;;  %v12916_v55 = vcombine.high %v793_v46, %v797_v47 }
  0xa5   :  { %687 = vmatprep.subr.bf16.mxu0 %v12904_v7  ;;  %728 = vmatprep.subr.bf16.mxu1 %v12906_v8  ;;  %v833_v7 = vld [vmem:[#allocation8 + $0x180] sm:$0xff]  ;;  %v13091_v18 = vcombine.low %v969_v3, %v973_v4 }
  0xa6   :  { %v837_v8 = vld [vmem:[#allocation8 + $0x1a0] sm:$0xff] }
  0xa7   :  { %638 = vmatmul.mubr.bf16.vlgmr.msra.gmra.mxu0 %v15060_v11  ;;  %679 = vmatmul.mubr.bf16.vlgmr.msra.gmra.mxu1 %v15060_v11  ;;  %v12956_v19 = vcombine.high %v833_v7, %v837_v8  ;;  %v921_v51 = vld [vmem:[#allocation8 + $0x440] sm:$0xff] }
  0xa8   :  { %688 = vmatpush1.bf16.msra.mxu0 %v12903_v14  ;;  %729 = vmatpush1.bf16.msra.mxu1 %v12905_v15  ;;  %v13092_v14 = vcombine.high %v969_v3, %v973_v4  ;;  %v12963_v15 = vcombine.low %v841_v62, %v845_v63  ;;  %v789_v58 = vld [vmem:[#allocation8 + $0x20] sm:$0xff] }
  0xa9   :  { %689 = vmatprep.subr.bf16.mxu0 %v12896_v16  ;;  %730 = vmatprep.subr.bf16.mxu1 %v12898_v17  ;;  %v825_v16 = vld [vmem:[#allocation8 + $0x140] sm:$0xff] }
  0xaa   :  { %719 = vmatprep.mubr.bf16.mxu0 %v14951_v0  ;;  %760 = vmatprep.mubr.bf16.mxu1 %v14951_v0  ;;  %v12872_v0 = vcombine.high %v205_v31, %v209_v32  ;;  %v829_v17 = vld [vmem:[#allocation8 + $0x160] sm:$0xff] }
  0xab   :  { %v12948_v27 = vcombine.high %v825_v16, %v829_v17  ;;  %v12947_v31 = vcombine.low %v825_v16, %v829_v17  ;;  %v809_v32 = vld [vmem:[#allocation8 + $0xc0] sm:$0xff] }
  0xac   :  { %690 = vmatpush1.bf16.msra.mxu0 %v12895_v22  ;;  %731 = vmatpush1.bf16.msra.mxu1 %v12897_v23  ;;  %v13084_v22 = vcombine.high %v961_v12, %v965_v13  ;;  %v12955_v23 = vcombine.low %v833_v7, %v837_v8  ;;  %v913_v59 = vld [vmem:[#allocation8 + $0x400] sm:$0xff] }
  0xad   :  { %691 = vmatprep.subr.bf16.mxu0 %v12888_v24  ;;  %732 = vmatprep.subr.bf16.mxu1 %v12890_v25  ;;  %v817_v24 = vld [vmem:[#allocation8 + $0x100] sm:$0xff] }
  0xae   :  { %v821_v25 = vld [vmem:[#allocation8 + $0x120] sm:$0xff] }
  0xaf   :  { %v909_v3 = vld [vmem:[#allocation8 + $0x3e0] sm:$0xff] }
  0xb0   :  { %692 = vmatpush1.bf16.msra.mxu0 %v12887_v30  ;;  %733 = vmatpush1.bf16.msra.mxu1 %v12889_v33  ;;  %v13076_v30 = vcombine.high %v953_v20, %v957_v21  ;;  %v813_v33 = vld [vmem:[#allocation8 + $0xe0] sm:$0xff] }
  0xb1   :  { %693 = vmatprep.subr.bf16.mxu0 %v12880_v34  ;;  %734 = vmatprep.subr.bf16.mxu1 %v12882_v37  ;;  %v13075_v34 = vcombine.low %v953_v20, %v957_v21  ;;  %v13068_v37 = vcombine.high %v945_v28, %v949_v29  ;;  %v1033_v4 = vld [vmem:[#allocation8 + $0x7c0] sm:$0xff] }
  0xb2   :  { %v901_v12 = vld [vmem:[#allocation8 + $0x3a0] sm:$0xff] }
  0xb3   :  { %v1025_v13 = vld [vmem:[#allocation8 + $0x780] sm:$0xff] }
  0xb4   :  { %694 = vmatpush1.bf16.msra.mxu0 %v12879_v38  ;;  %735 = vmatpush1.bf16.msra.mxu1 %v12881_v41  ;;  %v12939_v38 = vcombine.low %v817_v24, %v821_v25  ;;  %v13067_v41 = vcombine.low %v945_v28, %v949_v29  ;;  %v893_v20 = vld [vmem:[#allocation8 + $0x360] sm:$0xff] }
  0xb5   :  { %695 = vmatprep.subr.bf16.mxu0 %v12872_v0  ;;  %736 = vmatprep.subr.bf16.mxu1 %v12874_v44  ;;  %v12932_v0 = vcombine.high %v809_v32, %v813_v33  ;;  %v13060_v44 = vcombine.high %v937_v35, %v941_v36  ;;  %v1017_v21 = vld [vmem:[#allocation8 + $0x740] sm:$0xff] }
  0xb6   :  { %v885_v28 = vld [vmem:[#allocation8 + $0x320] sm:$0xff] }
  0xb7   :  { %v1009_v29 = vld [vmem:[#allocation8 + $0x700] sm:$0xff] }
  0xb8   :  { %696 = vmatpush1.bf16.msra.mxu0 %v12871_v45  ;;  %737 = vmatpush1.bf16.msra.mxu1 %v12873_v48  ;;  %v12931_v45 = vcombine.low %v809_v32, %v813_v33  ;;  %v13059_v48 = vcombine.low %v937_v35, %v941_v36  ;;  %v15068_v36 = vld [vmem:[#allocation8 + $0x9c0] sm:$0xff] }
  0xb9   :  { %697 = vmatprep.subr.bf16.mxu0 %v12864_v49  ;;  %738 = vmatprep.subr.bf16.mxu1 %v12866_v52  ;;  %v12924_v49 = vcombine.high %v801_v39, %v805_v40  ;;  %v925_v52 = vld [vmem:[#allocation8 + $0x460] sm:$0xff] }
  0xba   :  { %v13043_v62 = vcombine.low %v921_v51, %v925_v52 }
  0xbc   :  { %698 = vmatpush1.bf16.msra.mxu0 %v12863_v53  ;;  %739 = vmatpush1.bf16.msra.mxu1 %v12865_v56  ;;  %v12923_v53 = vcombine.low %v801_v39, %v805_v40  ;;  %v13044_v56 = vcombine.high %v921_v51, %v925_v52  ;;  %v1001_v39 = vld [vmem:[#allocation8 + $0x6c0] sm:$0xff] }
  0xbd   :  { %699 = vmatprep.subr.bf16.mxu0 %v12856_v57  ;;  %740 = vmatprep.subr.bf16.mxu1 %v12858_v60  ;;  %v785_v57 = vld [vmem:[#allocation8] sm:$0xff] }
  0xbe   :  { %v917_v60 = vld [vmem:[#allocation8 + $0x420] sm:$0xff]  ;;  %v12908_v63 = vcombine.high %v785_v57, %v789_v58 }
  0xbf   :  { %v13035_v7 = vcombine.low %v913_v59, %v917_v60  ;;  %v1005_v40 = vld [vmem:[#allocation8 + $0x6e0] sm:$0xff] }
  0xc0   :  { %700 = vmatpush1.bf16.msra.mxu0 %v12855_v61  ;;  %741 = vmatpush1.bf16.msra.mxu1 %v12857_v1  ;;  %v12915_v61 = vcombine.low %v793_v46, %v797_v47  ;;  %v13036_v1 = vcombine.high %v913_v59, %v917_v60  ;;  %v13124_v46 = vcombine.high %v1001_v39, %v1005_v40  ;;  %v865_v47 = vld [vmem:[#allocation8 + $0x280] sm:$0xff] }
  0xc1   :  { %701 = vmatprep.subr.bf16.mxu0 %v12848_v2  ;;  %742 = vmatprep.subr.bf16.mxu1 %v12850_v5  ;;  %v905_v2 = vld [vmem:[#allocation8 + $0x3c0] sm:$0xff]  ;;  %v13123_v52 = vcombine.low %v1001_v39, %v1005_v40 }
  0xc2   :  { %v1037_v5 = vld [vmem:[#allocation8 + $0x7e0] sm:$0xff]  ;;  %v13028_v8 = vcombine.high %v905_v2, %v909_v3 }
  0xc3   :  { %v13155_v16 = vcombine.low %v1033_v4, %v1037_v5  ;;  %v1089_v39 = vld [vmem:[#allocation8 + $0x980] sm:$0xff] }
  0xc4   :  { %702 = vmatpush1.bf16.msra.mxu0 %v12847_v6  ;;  %743 = vmatpush1.bf16.msra.mxu1 %v12849_v9  ;;  %v12907_v6 = vcombine.low %v785_v57, %v789_v58  ;;  %v13156_v9 = vcombine.high %v1033_v4, %v1037_v5  ;;  %v985_v57 = vld [vmem:[#allocation8 + $0x640] sm:$0xff] }
  0xc5   :  { %3899 = vmatprep.subr.bf16.mxu0 %v12964_v10  ;;  %3940 = vmatprep.subr.bf16.mxu1 %v13092_v14  ;;  %v897_v10 = vld [vmem:[#allocation8 + $0x380] sm:$0xff] }
  0xc6   :  { %v1029_v14 = vld [vmem:[#allocation8 + $0x7a0] sm:$0xff]  ;;  %v13020_v17 = vcombine.high %v897_v10, %v901_v12 }
  0xc7   :  { %720 = vmatmul.mubr.bf16.vlgmr.msra.gmra.mxu0 %v15060_v11  ;;  %761 = vmatmul.mubr.bf16.vlgmr.msra.gmra.mxu1 %v15060_v11  ;;  %v12940_v11 = vcombine.high %v817_v24, %v821_v25  ;;  %v13147_v24 = vcombine.low %v1025_v13, %v1029_v14  ;;  %v989_v58 = vld [vmem:[#allocation8 + $0x660] sm:$0xff] }
  0xc8   :  { %3900 = vmatpush1.bf16.msra.mxu0 %v12963_v15  ;;  %3941 = vmatpush1.bf16.msra.mxu1 %v13091_v18  ;;  %v13027_v15 = vcombine.low %v905_v2, %v909_v3  ;;  %v13148_v18 = vcombine.high %v1025_v13, %v1029_v14  ;;  %v977_v2 = vld [vmem:[#allocation8 + $0x600] sm:$0xff]  ;;  %v13107_v5 = vcombine.low %v985_v57, %v989_v58  ;;  %v245_v13 = vlaneseq }
  0xc9   :  { %3901 = vmatprep.subr.bf16.mxu0 %v12956_v19  ;;  %3942 = vmatprep.subr.bf16.mxu1 %v13084_v22  ;;  %v889_v19 = vld [vmem:[#allocation8 + $0x340] sm:$0xff] }
  0xca   :  { %v1021_v22 = vld [vmem:[#allocation8 + $0x760] sm:$0xff]  ;;  %v13012_v25 = vcombine.high %v889_v19, %v893_v20  ;;  %v15084_v14 = vshrl.u32 %v245_v13, 7 }
  0xcb   :  { %v13139_v32 = vcombine.low %v1017_v21, %v1021_v22  ;;  %v981_v3 = vld [vmem:[#allocation8 + $0x620] sm:$0xff] }
  0xcc   :  { %3902 = vmatpush1.bf16.msra.mxu0 %v12955_v23  ;;  %3943 = vmatpush1.bf16.msra.mxu1 %v13083_v26  ;;  %v13019_v23 = vcombine.low %v897_v10, %v901_v12  ;;  %v13140_v26 = vcombine.high %v1017_v21, %v1021_v22  ;;  %v1093_v40 = vld [vmem:[#allocation8 + $0x9a0] sm:$0xff] }
  0xcd   :  { %3903 = vmatprep.subr.bf16.mxu0 %v12948_v27  ;;  %3944 = vmatprep.subr.bf16.mxu1 %v13076_v30  ;;  %v881_v27 = vld [vmem:[#allocation8 + $0x300] sm:$0xff] }
  0xce   :  { %v1013_v30 = vld [vmem:[#allocation8 + $0x720] sm:$0xff]  ;;  %v13004_v33 = vcombine.high %v881_v27, %v885_v28 }
  0xcf   :  { %v13132_v35 = vcombine.high %v1009_v29, %v1013_v30  ;;  %v1189_v13 = vld [vmem:[#allocation8 + $0xca0] sm:$0xff] }
  0xd0   :  { %3904 = vmatpush1.bf16.msra.mxu0 %v12947_v31  ;;  %3945 = vmatpush1.bf16.msra.mxu1 %v13075_v34  ;;  %v13011_v31 = vcombine.low %v889_v19, %v893_v20  ;;  %v873_v34 = vld [vmem:[#allocation8 + $0x2c0] sm:$0xff]  ;;  %v15098_v19 = vsub.s32 3, %v15084_v14 }
  0xd1   :  { %3905 = vmatprep.subr.bf16.mxu0 %v12940_v11  ;;  %3946 = vmatprep.subr.bf16.mxu1 %v13068_v37  ;;  %v877_v11 = vld [vmem:[#allocation8 + $0x2e0] sm:$0xff] }
  0xd2   :  { %v15070_v37 = vld [vmem:[#allocation8 + $0x9e0] sm:$0xff]  ;;  %v12995_v51 = vcombine.low %v873_v34, %v877_v11 }
  0xd3   :  { %v13219_v42 = vcombine.low %v15068_v36, %v15070_v37  ;;  %v13220_v10 = vcombine.high %v15068_v36, %v15070_v37 }
  0xd4   :  { %3906 = vmatpush1.bf16.msra.mxu0 %v12939_v38  ;;  %3947 = vmatpush1.bf16.msra.mxu1 %v13067_v41  ;;  %v15072_v38 = vld [vmem:[#allocation8 + $0xdc0] sm:$0xff] }
  0xd5   :  { %3907 = vmatprep.subr.bf16.mxu0 %v12932_v0  ;;  %3948 = vmatprep.subr.bf16.mxu1 %v13060_v44  ;;  %v15074_v41 = vld [vmem:[#allocation8 + $0xde0] sm:$0xff]  ;;  %v13003_v0 = vcombine.low %v881_v27, %v885_v28  ;;  %v13131_v44 = vcombine.low %v1009_v29, %v1013_v30 }
  0xd6   :  { %v13347_v43 = vcombine.low %v15072_v38, %v15074_v41  ;;  %v13348_v12 = vcombine.high %v15072_v38, %v15074_v41  ;;  %v1069_v38 = vld [vmem:[#allocation8 + $0x8e0] sm:$0xff] }
  0xd7   :  { %v1193_v41 = vld [vmem:[#allocation8 + $0xcc0] sm:$0xff] }
  0xd8   :  { %3908 = vmatpush1.bf16.msra.mxu0 %v12931_v45  ;;  %3949 = vmatpush1.bf16.msra.mxu1 %v13059_v48  ;;  %v12996_v45 = vcombine.high %v873_v34, %v877_v11  ;;  %v869_v48 = vld [vmem:[#allocation8 + $0x2a0] sm:$0xff] }
  0xd9   :  { %3909 = vmatprep.subr.bf16.mxu0 %v12924_v49  ;;  %3950 = vmatprep.subr.bf16.mxu1 %v13052_v50  ;;  %v993_v49 = vld [vmem:[#allocation8 + $0x680] sm:$0xff]  ;;  %v12987_v59 = vcombine.low %v865_v47, %v869_v48 }
  0xda   :  { %v997_v50 = vld [vmem:[#allocation8 + $0x6a0] sm:$0xff] }
  0xdb   :  { %v13115_v60 = vcombine.low %v993_v49, %v997_v50 }
  0xdc   :  { %3910 = vmatpush1.bf16.msra.mxu0 %v12923_v53  ;;  %3951 = vmatpush1.bf16.msra.mxu1 %v13051_v54  ;;  %v12988_v53 = vcombine.high %v865_v47, %v869_v48  ;;  %v13116_v54 = vcombine.high %v993_v49, %v997_v50 }
  0xdd   :  { %3911 = vmatprep.subr.bf16.mxu0 %v12916_v55  ;;  %3952 = vmatprep.subr.bf16.mxu1 %v13044_v56  ;;  %v857_v55 = vld [vmem:[#allocation8 + $0x240] sm:$0xff] }
  0xde   :  { %v861_v56 = vld [vmem:[#allocation8 + $0x260] sm:$0xff] }
  0xdf   :  { %v12979_v4 = vcombine.low %v857_v55, %v861_v56 }
  0xe0   :  { %3912 = vmatpush1.bf16.msra.mxu0 %v12915_v61  ;;  %3953 = vmatpush1.bf16.msra.mxu1 %v13043_v62  ;;  %v12980_v61 = vcombine.high %v857_v55, %v861_v56  ;;  %v13108_v62 = vcombine.high %v985_v57, %v989_v58  ;;  %v1085_v55 = vld [vmem:[#allocation8 + $0x960] sm:$0xff]  ;;  %v13211_v58 = vcombine.low %v1089_v39, %v1093_v40 }
  0xe1   :  { %3913 = vmatprep.subr.bf16.mxu0 %v12908_v63  ;;  %3954 = vmatprep.subr.bf16.mxu1 %v13036_v1  ;;  %v849_v63 = vld [vmem:[#allocation8 + $0x200] sm:$0xff] }
  0xe2   :  { %v853_v1 = vld [vmem:[#allocation8 + $0x220] sm:$0xff] }
  0xe3   :  { %v1209_v56 = vld [vmem:[#allocation8 + $0xd40] sm:$0xff] }
  0xe4   :  { %3914 = vmatpush1.bf16.msra.mxu0 %v12907_v6  ;;  %3955 = vmatpush1.bf16.msra.mxu1 %v13035_v7  ;;  %v12972_v6 = vcombine.high %v849_v63, %v853_v1  ;;  %v13100_v7 = vcombine.high %v977_v2, %v981_v3  ;;  %v1213_v57 = vld [vmem:[#allocation8 + $0xd60] sm:$0xff] }
  0xe5   :  { %3915 = vmatprep.subr.bf16.mxu0 %v13028_v8  ;;  %3956 = vmatprep.subr.bf16.mxu1 %v13156_v9  ;;  %v12971_v8 = vcombine.low %v849_v63, %v853_v1  ;;  %v13099_v9 = vcombine.low %v977_v2, %v981_v3  ;;  %v1077_v63 = vld [vmem:[#allocation8 + $0x920] sm:$0xff]  ;;  %v13331_v36 = vcombine.low %v1209_v56, %v1213_v57 }
  0xe6   :  { %v1201_v1 = vld [vmem:[#allocation8 + $0xd00] sm:$0xff] }
  0xe7   :  { %v1205_v2 = vld [vmem:[#allocation8 + $0xd20] sm:$0xff] }
  0xe8   :  { %3916 = vmatpush2.bf16.msra.mxu0 %v13027_v15  ;;  %3957 = vmatpush2.bf16.msra.mxu1 %v13155_v16  ;;  %v15087_v15 = vsub.s32 0, %v15084_v14  ;;  %v15089_v16 = vld [vmem:[#allocation7] sm:$0xff] }
  0xe9   :  { %3917 = vmatprep.subr.bf16.mxu0 %v13020_v17  ;;  %3958 = vmatprep.subr.bf16.mxu1 %v13148_v18  ;;  %v15092_v17 = vsub.s32 2, %v15084_v14  ;;  %v15095_v18 = vsub.s32 1, %v15084_v14 }
  0xea   :  { %v248_v20 = vrot.slane %v15089_v16, %v15087_v15 }
  0xeb   :  { %v256_v21 = vrot.slane %v15089_v16, %v15092_v17  ;;  %v252_v22 = vrot.slane %v15089_v16, %v15095_v18 }
  0xec   :  { %3918 = vmatpush2.bf16.msra.mxu0 %v13019_v23  ;;  %3959 = vmatpush2.bf16.msra.mxu1 %v13147_v24  ;;  %v260_v24 = vrot.slane %v15089_v16, %v15098_v19 }
  0xed   :  { %3919 = vmatprep.subr.bf16.mxu0 %v13012_v25  ;;  %3960 = vmatprep.subr.bf16.mxu1 %v13140_v26 }
  0xf0   :  { %3920 = vmatpush2.bf16.msra.mxu0 %v13011_v31  ;;  %3961 = vmatpush2.bf16.msra.mxu1 %v13139_v32 }
  0xf1   :  { %3921 = vmatprep.subr.bf16.mxu0 %v13004_v33  ;;  %3962 = vmatprep.subr.bf16.mxu1 %v13132_v35 }
  0xf4   :  { %3922 = vmatpush2.bf16.msra.mxu0 %v13003_v0  ;;  %3963 = vmatpush2.bf16.msra.mxu1 %v13131_v44 }
  0xf5   :  { %3923 = vmatprep.subr.bf16.mxu0 %v12996_v45  ;;  %3964 = vmatprep.subr.bf16.mxu1 %v13124_v46  ;;  %v1217_v45 = vld [vmem:[#allocation8 + $0xd80] sm:$0xff] }
  0xf6   :  { %v1221_v46 = vld [vmem:[#allocation8 + $0xda0] sm:$0xff] }
  0xf8   :  { %3924 = vmatpush2.bf16.msra.mxu0 %v12995_v51  ;;  %3965 = vmatpush2.bf16.msra.mxu1 %v13123_v52  ;;  %v13212_v52 = vcombine.high %v1089_v39, %v1093_v40  ;;  %v1173_v39 = vld [vmem:[#allocation8 + $0xc20] sm:$0xff] }
  0xf9   :  { %3925 = vmatprep.subr.bf16.mxu0 %v12988_v53  ;;  %3966 = vmatprep.subr.bf16.mxu1 %v13116_v54  ;;  %v13340_v53 = vcombine.high %v1217_v45, %v1221_v46  ;;  %v1081_v54 = vld [vmem:[#allocation8 + $0x940] sm:$0xff] }
  0xfa   :  { %v13203_v3 = vcombine.low %v1081_v54, %v1085_v55 }
  0xfc   :  { %3926 = vmatpush2.bf16.msra.mxu0 %v12987_v59  ;;  %3967 = vmatpush2.bf16.msra.mxu1 %v13115_v60  ;;  %v13339_v59 = vcombine.low %v1217_v45, %v1221_v46  ;;  %v13204_v60 = vcombine.high %v1081_v54, %v1085_v55  ;;  %v1165_v54 = vld [vmem:[#allocation8 + $0xbe0] sm:$0xff] }
  0xfd   :  { %3927 = vmatprep.subr.bf16.mxu0 %v12980_v61  ;;  %3968 = vmatprep.subr.bf16.mxu1 %v13108_v62  ;;  %v13332_v61 = vcombine.high %v1209_v56, %v1213_v57  ;;  %v1073_v62 = vld [vmem:[#allocation8 + $0x900] sm:$0xff] }
  0xfe   :  { %v13196_v37 = vcombine.high %v1073_v62, %v1077_v63  ;;  %v1289_v56 = vld [vmem:[#allocation8 + $0xfc0] sm:$0xff] }
  0xff   :  { %v1293_v57 = vld [vmem:[#allocation8 + $0xfe0] sm:$0xff] }
 0x100   :  { %3928 = vmatpush2.bf16.msra.mxu0 %v12979_v4  ;;  %3969 = vmatpush2.bf16.msra.mxu1 %v13107_v5  ;;  %v1065_v4 = vld [vmem:[#allocation8 + $0x8c0] sm:$0xff]  ;;  %v13195_v5 = vcombine.low %v1073_v62, %v1077_v63 }
 0x101   :  { %3929 = vmatprep.subr.bf16.mxu0 %v12972_v6  ;;  %3970 = vmatprep.subr.bf16.mxu1 %v13100_v7  ;;  %v13323_v6 = vcombine.low %v1201_v1, %v1205_v2  ;;  %v13188_v7 = vcombine.high %v1065_v4, %v1069_v38 }
 0x104   :  { %3930 = vmatpush2.bf16.msra.mxu0 %v12971_v8  ;;  %3971 = vmatpush2.bf16.msra.mxu1 %v13099_v9  ;;  %v1057_v9 = vld [vmem:[#allocation8 + $0x880] sm:$0xff] }
 0x105   :  { %3981 = vmatprep.subr.bf16.mxu0 %v13220_v10  ;;  %4022 = vmatprep.subr.bf16.mxu1 %v13348_v12  ;;  %v1061_v10 = vld [vmem:[#allocation8 + $0x8a0] sm:$0xff] }
 0x106   :  { %v1185_v12 = vld [vmem:[#allocation8 + $0xc80] sm:$0xff] }
 0x167   :  { %v639_v23 = vpop.f32.mrf.mxu0  ;;  %v680_v26 = vpop.f32.mrf.mxu1 }
 0x168   :  { %v640_v25 = vadd.f32 %v639_v23, %v248_v20  ;;  %v681_v27 = vadd.f32 %v680_v26, %v256_v21  ;;  %v13187_v20 = vcombine.low %v1065_v4, %v1069_v38  ;;  %v13308_v23 = vcombine.high %v1185_v12, %v1189_v13  ;;  %v1177_v26 = vld [vmem:[#allocation8 + $0xc40] sm:$0xff] }
 0x169   :  { %v641_v28 = vpop.f32.mrf.mxu0  ;;  %v682_v30 = vpop.f32.mrf.mxu1  ;;  %v1281_v38 = vld [vmem:[#allocation8 + $0xf80] sm:$0xff] }
 0x16a   :  { %v642_v29 = vadd.f32 %v641_v28, %v252_v22  ;;  %v769_v31 = vmax.f32 %v640_v25, 0.0  ;;  %v771_v32 = vmax.f32 %v681_v27, 0.0  ;;  %v683_v33 = vadd.f32 %v682_v30, %v260_v24  ;;  %v1049_v24 = vld [vmem:[#allocation8 + $0x840] sm:$0xff] }
 0x16b   :  { %v643_v34 = vpop.f32.mrf.mxu0  ;;  %v684_v35 = vpop.f32.mrf.mxu1  ;;  %v13180_v22 = vcombine.high %v1057_v9, %v1061_v10  ;;  %v1053_v25 = vld [vmem:[#allocation8 + $0x860] sm:$0xff]  ;;  %v13179_v28 = vcombine.low %v1057_v9, %v1061_v10  ;;  %v13307_v30 = vcombine.low %v1185_v12, %v1189_v13  ;;  %v13411_v9 = vcombine.low %v1289_v56, %v1293_v57 }
 0x16c   :  { %v770_v11 = vmax.f32 %v642_v29, 0.0  ;;  %v772_v0 = vmax.f32 %v683_v33, 0.0  ;;  %v15108_v47 = vpack.c.bf16 %v771_v32, %v771_v32  ;;  %v15112_v50 = vpack.c.bf16 %v769_v31, %v769_v31  ;;  %v1181_v27 = vld [vmem:[#allocation8 + $0xc60] sm:$0xff] }
 0x16d   :  { %v644_v44 = vpop.f32.mrf.mxu0  ;;  %v685_v49 = vpop.f32.mrf.mxu1  ;;  %v15127_v29 = vsub.s32 5, %v15084_v14  ;;  %v13172_v31 = vcombine.high %v1049_v24, %v1053_v25  ;;  %v15130_v32 = vsub.s32 7, %v15084_v14  ;;  %v13300_v33 = vcombine.high %v1177_v26, %v1181_v27  ;;  %v1041_v34 = vld [vmem:[#allocation8 + $0x800] sm:$0xff] }
 0x16e   :  { %v15110_v48 = vpack.c.bf16 %v770_v11, %v770_v11  ;;  %v15114_v51 = vpack.c.bf16 %v772_v0, %v772_v0  ;;  %v1045_v11 = vld [vmem:[#allocation8 + $0x820] sm:$0xff]  ;;  %v13171_v40 = vcombine.low %v1049_v24, %v1053_v25  ;;  %v13299_v44 = vcombine.low %v1177_v26, %v1181_v27 }
 0x16f   :  { %v1169_v35 = vld [vmem:[#allocation8 + $0xc00] sm:$0xff]  ;;  %v268_v0 = vrot.slane %v15089_v16, %v15127_v29  ;;  %v13164_v45 = vcombine.high %v1041_v34, %v1045_v11  ;;  %v276_v49 = vrot.slane %v15089_v16, %v15130_v32 }
 0x170   :  { %3931 = vmatprep.mubr.bf16.mxu0 %v15110_v48  ;;  %3972 = vmatprep.mubr.bf16.mxu1 %v15114_v51  ;;  %v13291_v62 = vcombine.low %v1169_v35, %v1173_v39 }
 0x171   :  { %3932 = vmatmul.mubr.bf16.vlgmr.msra.gmra.mxu0 %v15112_v50  ;;  %3973 = vmatmul.mubr.bf16.vlgmr.msra.gmra.mxu1 %v15108_v47 }
 0x172   :  { %3982 = vmatpush1.bf16.msra.mxu0 %v13219_v42  ;;  %4023 = vmatpush1.bf16.msra.mxu1 %v13347_v43  ;;  %v13324_v42 = vcombine.high %v1201_v1, %v1205_v2  ;;  %v1197_v43 = vld [vmem:[#allocation8 + $0xce0] sm:$0xff] }
 0x173   :  { %3983 = vmatprep.subr.bf16.mxu0 %v13212_v52  ;;  %4024 = vmatprep.subr.bf16.mxu1 %v13340_v53  ;;  %v13316_v8 = vcombine.high %v1193_v41, %v1197_v43  ;;  %v13315_v21 = vcombine.low %v1193_v41, %v1197_v43  ;;  %v13292_v52 = vcombine.high %v1169_v35, %v1173_v39  ;;  %v1161_v53 = vld [vmem:[#allocation8 + $0xbc0] sm:$0xff] }
 0x174   :  { %v13284_v63 = vcombine.high %v1161_v53, %v1165_v54  ;;  %v1285_v41 = vld [vmem:[#allocation8 + $0xfa0] sm:$0xff] }
 0x175   :  { %v13404_v13 = vcombine.high %v1281_v38, %v1285_v41  ;;  %v13403_v25 = vcombine.low %v1281_v38, %v1285_v41 }
 0x176   :  { %3984 = vmatpush1.bf16.msra.mxu0 %v13211_v58  ;;  %4025 = vmatpush1.bf16.msra.mxu1 %v13339_v59  ;;  %v13163_v59 = vcombine.low %v1041_v34, %v1045_v11 }
 0x177   :  { %3985 = vmatprep.subr.bf16.mxu0 %v13204_v60  ;;  %4026 = vmatprep.subr.bf16.mxu1 %v13332_v61 }
 0x17a   :  { %3986 = vmatpush1.bf16.msra.mxu0 %v13203_v3  ;;  %4027 = vmatpush1.bf16.msra.mxu1 %v13331_v36  ;;  %v13412_v3 = vcombine.high %v1289_v56, %v1293_v57  ;;  %v1153_v36 = vld [vmem:[#allocation8 + $0xb80] sm:$0xff] }
 0x17b   :  { %3987 = vmatprep.subr.bf16.mxu0 %v13196_v37  ;;  %4028 = vmatprep.subr.bf16.mxu1 %v13324_v42  ;;  %v1157_v37 = vld [vmem:[#allocation8 + $0xba0] sm:$0xff] }
 0x17c   :  { %v13276_v10 = vcombine.high %v1153_v36, %v1157_v37  ;;  %v13275_v24 = vcombine.low %v1153_v36, %v1157_v37  ;;  %v1121_v56 = vld [vmem:[#allocation8 + $0xa80] sm:$0xff] }
 0x17d   :  { %v1125_v57 = vld [vmem:[#allocation8 + $0xaa0] sm:$0xff] }
 0x17e   :  { %3988 = vmatpush1.bf16.msra.mxu0 %v13195_v5  ;;  %4029 = vmatpush1.bf16.msra.mxu1 %v13323_v6  ;;  %v13283_v6 = vcombine.low %v1161_v53, %v1165_v54  ;;  %v1117_v36 = vld [vmem:[#allocation8 + $0xa60] sm:$0xff]  ;;  %v13243_v38 = vcombine.low %v1121_v56, %v1125_v57 }
 0x17f   :  { %3989 = vmatprep.subr.bf16.mxu0 %v13188_v7  ;;  %4030 = vmatprep.subr.bf16.mxu1 %v13316_v8  ;;  %v1241_v37 = vld [vmem:[#allocation8 + $0xe40] sm:$0xff] }
 0x182   :  { %3990 = vmatpush1.bf16.msra.mxu0 %v13187_v20  ;;  %4031 = vmatpush1.bf16.msra.mxu1 %v13315_v21  ;;  %v1145_v20 = vld [vmem:[#allocation8 + $0xb40] sm:$0xff] }
 0x183   :  { %3991 = vmatprep.subr.bf16.mxu0 %v13180_v22  ;;  %4032 = vmatprep.subr.bf16.mxu1 %v13308_v23  ;;  %v1149_v21 = vld [vmem:[#allocation8 + $0xb60] sm:$0xff] }
 0x184   :  { %v1273_v22 = vld [vmem:[#allocation8 + $0xf40] sm:$0xff]  ;;  %v13268_v26 = vcombine.high %v1145_v20, %v1149_v21  ;;  %v13267_v34 = vcombine.low %v1145_v20, %v1149_v21 }
 0x185   :  { %v1277_v23 = vld [vmem:[#allocation8 + $0xf60] sm:$0xff] }
 0x186   :  { %3992 = vmatpush1.bf16.msra.mxu0 %v13179_v28  ;;  %4033 = vmatpush1.bf16.msra.mxu1 %v13307_v30  ;;  %v13396_v27 = vcombine.high %v1273_v22, %v1277_v23  ;;  %v1137_v28 = vld [vmem:[#allocation8 + $0xb00] sm:$0xff]  ;;  %v13395_v11 = vcombine.low %v1273_v22, %v1277_v23 }
 0x187   :  { %3993 = vmatprep.subr.bf16.mxu0 %v13172_v31  ;;  %v15134_v46 = vpop.f32.mrf.mxu0  ;;  %4034 = vmatprep.subr.bf16.mxu1 %v13300_v33  ;;  %v15138_v55 = vpop.f32.mrf.mxu1  ;;  %v1141_v30 = vld [vmem:[#allocation8 + $0xb20] sm:$0xff] }
 0x188   :  { %v1265_v31 = vld [vmem:[#allocation8 + $0xf00] sm:$0xff]  ;;  %v13260_v35 = vcombine.high %v1137_v28, %v1141_v30 }
 0x189   :  { %v723_v58 = vpop.f32.mrf.mxu0  ;;  %v764_v61 = vpop.f32.mrf.mxu1  ;;  %v1269_v33 = vld [vmem:[#allocation8 + $0xf20] sm:$0xff] }
 0x18a   :  { %3994 = vmatpush1.bf16.msra.mxu0 %v13171_v40  ;;  %v724_v60 = vadd.f32 %v723_v58, %v268_v0  ;;  %4035 = vmatpush1.bf16.msra.mxu1 %v13299_v44  ;;  %v765_v2 = vadd.f32 %v764_v61, %v276_v49  ;;  %v13388_v39 = vcombine.high %v1265_v31, %v1269_v33  ;;  %v1129_v40 = vld [vmem:[#allocation8 + $0xac0] sm:$0xff]  ;;  %v15147_v61 = vsub.s32 6, %v15084_v14 }
 0x18b   :  { %3995 = vmatprep.subr.bf16.mxu0 %v13164_v45  ;;  %v725_v1 = vpop.f32.mrf.mxu0  ;;  %4036 = vmatprep.subr.bf16.mxu1 %v13292_v52  ;;  %v766_v4 = vpop.f32.mrf.mxu1  ;;  %v1133_v0 = vld [vmem:[#allocation8 + $0xae0] sm:$0xff]  ;;  %v13259_v49 = vcombine.low %v1137_v28, %v1141_v30  ;;  %v13387_v52 = vcombine.low %v1265_v31, %v1269_v33 }
 0x18c   :  { %v774_v42 = vmax.f32 %v724_v60, 0.0  ;;  %v776_v43 = vmax.f32 %v765_v2, 0.0  ;;  %v1257_v44 = vld [vmem:[#allocation8 + $0xec0] sm:$0xff]  ;;  %v13252_v53 = vcombine.high %v1129_v40, %v1133_v0  ;;  %v13251_v60 = vcombine.low %v1129_v40, %v1133_v0  ;;  %v962_v40 = vld [vmem:[#allocation8 + $0x588] sm:$0xff] }
 0x18d   :  { %v726_v5 = vpop.f32.mrf.mxu0  ;;  %v767_v8 = vpop.f32.mrf.mxu1  ;;  %v1261_v45 = vld [vmem:[#allocation8 + $0xee0] sm:$0xff]  ;;  %v13244_v1 = vcombine.high %v1121_v56, %v1125_v57  ;;  %v272_v4 = vrot.slane %v15089_v16, %v15147_v61  ;;  %v966_v0 = vld [vmem:[#allocation8 + $0x5a8] sm:$0xff] }
 0x18e   :  { %3996 = vmatpush1.bf16.msra.mxu0 %v13163_v59  ;;  %v15140_v7 = vpack.c.bf16 %v774_v42, %v774_v42  ;;  %4037 = vmatpush1.bf16.msra.mxu1 %v13291_v62  ;;  %v15142_v12 = vpack.c.bf16 %v776_v43, %v776_v43  ;;  %v13380_v54 = vcombine.high %v1257_v44, %v1261_v45  ;;  %v1249_v58 = vld [vmem:[#allocation8 + $0xe80] sm:$0xff]  ;;  %v954_v56 = vld [vmem:[#allocation8 + $0x548] sm:$0xff] }
 0x18f   :  { %3997 = vmatprep.subr.bf16.mxu0 %v13284_v63  ;;  %4038 = vmatprep.subr.bf16.mxu1 %v13412_v3  ;;  %v1253_v59 = vld [vmem:[#allocation8 + $0xea0] sm:$0xff]  ;;  %v13379_v62 = vcombine.low %v1257_v44, %v1261_v45  ;;  %v15150_v63 = vsub.s32 4, %v15084_v14  ;;  %v958_v57 = vld [vmem:[#allocation8 + $0x568] sm:$0xff] }
 0x190   :  { %4013 = vmatprep.mubr.bf16.mxu0 %v15140_v7  ;;  %4054 = vmatprep.mubr.bf16.mxu1 %v15142_v12  ;;  %v13372_v2 = vcombine.high %v1249_v58, %v1253_v59  ;;  %v1113_v3 = vld [vmem:[#allocation8 + $0xa40] sm:$0xff]  ;;  %v13371_v43 = vcombine.low %v1249_v58, %v1253_v59  ;;  %v13085_v59 = vcombine.low %v962_v40, %v966_v0 }
 0x191   :  { %v1245_v42 = vld [vmem:[#allocation8 + $0xe60] sm:$0xff]  ;;  %v264_v41 = vrot.slane %v15089_v16, %v15150_v63  ;;  %v13236_v14 = vcombine.high %v1113_v3, %v1117_v36  ;;  %v13235_v20 = vcombine.low %v1113_v3, %v1117_v36  ;;  %v946_v3 = vld [vmem:[#allocation8 + $0x508] sm:$0xff] }
 0x192   :  { %3998 = vmatpush2.bf16.msra.mxu0 %v13283_v6  ;;  %4039 = vmatpush2.bf16.msra.mxu1 %v13411_v9  ;;  %v13364_v5 = vcombine.high %v1241_v37, %v1245_v42  ;;  %v1105_v6 = vld [vmem:[#allocation8 + $0xa00] sm:$0xff]  ;;  %v13363_v22 = vcombine.low %v1241_v37, %v1245_v42  ;;  %v950_v36 = vld [vmem:[#allocation8 + $0x528] sm:$0xff]  ;;  %v13077_v42 = vcombine.low %v954_v56, %v958_v57 }
 0x193   :  { %3999 = vmatprep.subr.bf16.mxu0 %v13276_v10  ;;  %4040 = vmatprep.subr.bf16.mxu1 %v13404_v13  ;;  %v1109_v8 = vld [vmem:[#allocation8 + $0xa20] sm:$0xff]  ;;  %v763_v13 = vadd.f32 %v15138_v55, %v272_v4  ;;  %v722_v21 = vadd.f32 %v15134_v46, %v264_v41  ;;  %v810_v41 = vld [vmem:[#allocation8 + $0xc8] sm:$0xff] }
 0x194   :  { %v1233_v9 = vld [vmem:[#allocation8 + $0xe00] sm:$0xff]  ;;  %v13228_v16 = vcombine.high %v1105_v6, %v1109_v8  ;;  %v13227_v30 = vcombine.low %v1105_v6, %v1109_v8  ;;  %v13069_v8 = vcombine.low %v946_v3, %v950_v36 }
 0x195   :  { %v1237_v10 = vld [vmem:[#allocation8 + $0xe20] sm:$0xff]  ;;  %v775_v28 = vmax.f32 %v763_v13, 0.0  ;;  %v773_v31 = vmax.f32 %v722_v21, 0.0  ;;  %v802_v13 = vld [vmem:[#allocation8 + $0x88] sm:$0xff] }
 0x196   :  { %4000 = vmatpush2.bf16.msra.mxu0 %v13275_v24  ;;  %4041 = vmatpush2.bf16.msra.mxu1 %v13403_v25  ;;  %v13356_v23 = vcombine.high %v1233_v9, %v1237_v10  ;;  %v842_v24 = vld [vmem:[#allocation8 + $0x1c8] sm:$0xff]  ;;  %v13355_v55 = vcombine.low %v1233_v9, %v1237_v10 }
 0x197   :  { %4001 = vmatprep.subr.bf16.mxu0 %v13268_v26  ;;  %4042 = vmatprep.subr.bf16.mxu1 %v13396_v27  ;;  %v846_v25 = vld [vmem:[#allocation8 + $0x1e8] sm:$0xff]  ;;  %v15160_v44 = vpack.c.bf16 %v773_v31, %v773_v31 }
 0x198   :  { %v970_v26 = vld [vmem:[#allocation8 + $0x5c8] sm:$0xff]  ;;  %v12966_v33 = vcombine.high %v842_v24, %v846_v25 }
 0x199   :  { %v974_v27 = vld [vmem:[#allocation8 + $0x5e8] sm:$0xff] }
 0x19a   :  { %4002 = vmatpush2.bf16.msra.mxu0 %v13267_v34  ;;  %4043 = vmatpush2.bf16.msra.mxu1 %v13395_v11  ;;  %v13094_v46 = vcombine.high %v970_v26, %v974_v27  ;;  %v834_v34 = vld [vmem:[#allocation8 + $0x188] sm:$0xff]  ;;  %v13093_v45 = vcombine.low %v970_v26, %v974_v27 }
 0x19b   :  { %4003 = vmatprep.subr.bf16.mxu0 %v13260_v35  ;;  %4044 = vmatprep.subr.bf16.mxu1 %v13388_v39  ;;  %v838_v11 = vld [vmem:[#allocation8 + $0x1a8] sm:$0xff]  ;;  %v15158_v35 = vpack.c.bf16 %v775_v28, %v775_v28  ;;  %v12965_v39 = vcombine.low %v842_v24, %v846_v25 }
 0x19c   :  { %v12957_v58 = vcombine.low %v834_v34, %v838_v11  ;;  %v930_v21 = vld [vmem:[#allocation8 + $0x488] sm:$0xff] }
 0x19d   :  { %v794_v26 = vld [vmem:[#allocation8 + $0x48] sm:$0xff] }
 0x19e   :  { %4004 = vmatpush2.bf16.msra.mxu0 %v13259_v49  ;;  %4045 = vmatpush2.bf16.msra.mxu1 %v13387_v52  ;;  %v12958_v49 = vcombine.high %v834_v34, %v838_v11  ;;  %v826_v52 = vld [vmem:[#allocation8 + $0x148] sm:$0xff] }
 0x19f   :  { %4005 = vmatprep.subr.bf16.mxu0 %v13252_v53  ;;  %4046 = vmatprep.subr.bf16.mxu1 %v13380_v54  ;;  %v830_v53 = vld [vmem:[#allocation8 + $0x168] sm:$0xff]  ;;  %v13086_v54 = vcombine.high %v962_v40, %v966_v0 }
 0x1a0   :  { %v12949_v37 = vcombine.low %v826_v52, %v830_v53  ;;  %v798_v27 = vld [vmem:[#allocation8 + $0x68] sm:$0xff] }
 0x1a1   :  { %v922_v28 = vld [vmem:[#allocation8 + $0x448] sm:$0xff]  ;;  %v12917_v0 = vcombine.low %v794_v26, %v798_v27 }
 0x1a2   :  { %4006 = vmatpush2.bf16.msra.mxu0 %v13251_v60  ;;  %4047 = vmatpush2.bf16.msra.mxu1 %v13379_v62  ;;  %v12950_v60 = vcombine.high %v826_v52, %v830_v53  ;;  %v13078_v62 = vcombine.high %v954_v56, %v958_v57  ;;  %v786_v34 = vld [vmem:[#allocation8 + $0x8] sm:$0xff] }
 0x1a3   :  { %4007 = vmatprep.subr.bf16.mxu0 %v13244_v1  ;;  %4048 = vmatprep.subr.bf16.mxu1 %v13372_v2  ;;  %v818_v1 = vld [vmem:[#allocation8 + $0x108] sm:$0xff] }
 0x1a4   :  { %v822_v2 = vld [vmem:[#allocation8 + $0x128] sm:$0xff] }
 0x1a5   :  { %v12942_v4 = vcombine.high %v818_v1, %v822_v2  ;;  %v12941_v6 = vcombine.low %v818_v1, %v822_v2  ;;  %v790_v11 = vld [vmem:[#allocation8 + $0x28] sm:$0xff] }
 0x1a6   :  { %4008 = vmatpush2.bf16.msra.mxu0 %v13243_v38  ;;  %4049 = vmatpush2.bf16.msra.mxu1 %v13371_v43  ;;  %v13070_v38 = vcombine.high %v946_v3, %v950_v36  ;;  %v814_v43 = vld [vmem:[#allocation8 + $0xe8] sm:$0xff] }
 0x1a7   :  { %4009 = vmatprep.subr.bf16.mxu0 %v13236_v14  ;;  %4050 = vmatprep.subr.bf16.mxu1 %v13364_v5  ;;  %v938_v14 = vld [vmem:[#allocation8 + $0x4c8] sm:$0xff]  ;;  %v12934_v9 = vcombine.high %v810_v41, %v814_v43 }
 0x1a8   :  { %v942_v5 = vld [vmem:[#allocation8 + $0x4e8] sm:$0xff] }
 0x1a9   :  { %v13062_v10 = vcombine.high %v938_v14, %v942_v5  ;;  %v918_v40 = vld [vmem:[#allocation8 + $0x428] sm:$0xff] }
 0x1aa   :  { %4010 = vmatpush2.bf16.msra.mxu0 %v13235_v20  ;;  %4051 = vmatpush2.bf16.msra.mxu1 %v13363_v22  ;;  %v806_v20 = vld [vmem:[#allocation8 + $0xa8] sm:$0xff] }
 0x1ab   :  { %4011 = vmatprep.subr.bf16.mxu0 %v13228_v16  ;;  %4052 = vmatprep.subr.bf16.mxu1 %v13356_v23  ;;  %v934_v22 = vld [vmem:[#allocation8 + $0x4a8] sm:$0xff]  ;;  %v12933_v16 = vcombine.low %v810_v41, %v814_v43  ;;  %v13061_v23 = vcombine.low %v938_v14, %v942_v5  ;;  %v12926_v24 = vcombine.high %v802_v13, %v806_v20 }
 0x1ac   :  { %v13054_v25 = vcombine.high %v930_v21, %v934_v22  ;;  %v12925_v31 = vcombine.low %v802_v13, %v806_v20  ;;  %v906_v53 = vld [vmem:[#allocation8 + $0x3c8] sm:$0xff] }
 0x1ad   :  { %v1034_v56 = vld [vmem:[#allocation8 + $0x7c8] sm:$0xff] }
 0x1ae   :  { %4012 = vmatpush2.bf16.msra.mxu0 %v13227_v30  ;;  %4053 = vmatpush2.bf16.msra.mxu1 %v13355_v55  ;;  %v926_v30 = vld [vmem:[#allocation8 + $0x468] sm:$0xff]  ;;  %v13053_v55 = vcombine.low %v930_v21, %v934_v22 }
 0x1af   :  { %4063 = vmatprep.subr.bf16.mxu0 %v12966_v33  ;;  %4104 = vmatprep.subr.bf16.mxu1 %v13094_v46  ;;  %v12918_v33 = vcombine.high %v794_v26, %v798_v27  ;;  %v13046_v46 = vcombine.high %v922_v28, %v926_v30  ;;  %v1038_v57 = vld [vmem:[#allocation8 + $0x7e8] sm:$0xff] }
 0x1b0   :  { %v898_v1 = vld [vmem:[#allocation8 + $0x388] sm:$0xff] }
 0x1b1   :  { %4014 = vmatmul.mubr.bf16.vlgmr.msra.gmra.mxu0 %v15160_v44  ;;  %4055 = vmatmul.mubr.bf16.vlgmr.msra.gmra.mxu1 %v15158_v35  ;;  %v902_v2 = vld [vmem:[#allocation8 + $0x3a8] sm:$0xff] }
 0x1b2   :  { %4064 = vmatpush1.bf16.msra.mxu0 %v12965_v39  ;;  %4095 = vmatprep.mubr.bf16.mxu0 %v15110_v48  ;;  %v914_v39 = vld [vmem:[#allocation8 + $0x408] sm:$0xff] }
 0x1b3   :  { %4105 = vmatpush1.bf16.msra.mxu1 %v13093_v45  ;;  %4136 = vmatprep.mubr.bf16.mxu1 %v15114_v51  ;;  %v13045_v45 = vcombine.low %v922_v28, %v926_v30  ;;  %v13038_v52 = vcombine.high %v914_v39, %v918_v40  ;;  %v1026_v3 = vld [vmem:[#allocation8 + $0x788] sm:$0xff] }
 0x1b4   :  { %4065 = vmatprep.subr.bf16.mxu0 %v12958_v49  ;;  %4106 = vmatprep.subr.bf16.mxu1 %v13086_v54  ;;  %v12910_v49 = vcombine.high %v786_v34, %v790_v11  ;;  %v910_v54 = vld [vmem:[#allocation8 + $0x3e8] sm:$0xff] }
 0x1b5   :  { %v1030_v36 = vld [vmem:[#allocation8 + $0x7a8] sm:$0xff] }
 0x1b6   :  { %4066 = vmatpush1.bf16.msra.mxu0 %v12957_v58  ;;  %v12909_v58 = vcombine.low %v786_v34, %v790_v11  ;;  %v890_v41 = vld [vmem:[#allocation8 + $0x348] sm:$0xff] }
 0x1b7   :  { %4107 = vmatpush1.bf16.msra.mxu1 %v13085_v59  ;;  %4067 = vmatprep.subr.bf16.mxu0 %v12950_v60  ;;  %v13037_v59 = vcombine.low %v914_v39, %v918_v40  ;;  %v13030_v60 = vcombine.high %v906_v53, %v910_v54  ;;  %v894_v43 = vld [vmem:[#allocation8 + $0x368] sm:$0xff] }
 0x1b8   :  { %4108 = vmatprep.subr.bf16.mxu1 %v13078_v62  ;;  %v13158_v62 = vcombine.high %v1034_v56, %v1038_v57  ;;  %v1018_v14 = vld [vmem:[#allocation8 + $0x748] sm:$0xff] }
 0x1b9   :  { %v1022_v5 = vld [vmem:[#allocation8 + $0x768] sm:$0xff] }
 0x1ba   :  { %4068 = vmatpush1.bf16.msra.mxu0 %v12949_v37  ;;  %v13029_v37 = vcombine.low %v906_v53, %v910_v54  ;;  %v882_v13 = vld [vmem:[#allocation8 + $0x308] sm:$0xff] }
 0x1bb   :  { %4109 = vmatpush1.bf16.msra.mxu1 %v13077_v42  ;;  %4069 = vmatprep.subr.bf16.mxu0 %v12942_v4  ;;  %v13157_v42 = vcombine.low %v1034_v56, %v1038_v57  ;;  %v13022_v4 = vcombine.high %v898_v1, %v902_v2  ;;  %v886_v20 = vld [vmem:[#allocation8 + $0x328] sm:$0xff] }
 0x1bc   :  { %4110 = vmatprep.subr.bf16.mxu1 %v13070_v38  ;;  %v13150_v38 = vcombine.high %v1026_v3, %v1030_v36  ;;  %v1010_v21 = vld [vmem:[#allocation8 + $0x708] sm:$0xff] }
 0x1bd   :  { %v1014_v22 = vld [vmem:[#allocation8 + $0x728] sm:$0xff] }
 0x1be   :  { %4070 = vmatpush1.bf16.msra.mxu0 %v12941_v6  ;;  %v13021_v6 = vcombine.low %v898_v1, %v902_v2  ;;  %v874_v26 = vld [vmem:[#allocation8 + $0x2c8] sm:$0xff] }
 0x1bf   :  { %4111 = vmatpush1.bf16.msra.mxu1 %v13069_v8  ;;  %4071 = vmatprep.subr.bf16.mxu0 %v12934_v9  ;;  %v13149_v8 = vcombine.low %v1026_v3, %v1030_v36  ;;  %v13014_v9 = vcombine.high %v890_v41, %v894_v43  ;;  %v878_v27 = vld [vmem:[#allocation8 + $0x2e8] sm:$0xff] }
 0x1c0   :  { %4112 = vmatprep.subr.bf16.mxu1 %v13062_v10  ;;  %v13142_v10 = vcombine.high %v1018_v14, %v1022_v5  ;;  %v1002_v28 = vld [vmem:[#allocation8 + $0x6c8] sm:$0xff] }
 0x1c1   :  { %v1006_v30 = vld [vmem:[#allocation8 + $0x6e8] sm:$0xff] }
 0x1c2   :  { %4072 = vmatpush1.bf16.msra.mxu0 %v12933_v16  ;;  %v13013_v16 = vcombine.low %v890_v41, %v894_v43  ;;  %v866_v34 = vld [vmem:[#allocation8 + $0x288] sm:$0xff] }
 0x1c3   :  { %4113 = vmatpush1.bf16.msra.mxu1 %v13061_v23  ;;  %4073 = vmatprep.subr.bf16.mxu0 %v12926_v24  ;;  %v13141_v23 = vcombine.low %v1018_v14, %v1022_v5  ;;  %v13006_v24 = vcombine.high %v882_v13, %v886_v20  ;;  %v870_v11 = vld [vmem:[#allocation8 + $0x2a8] sm:$0xff] }
 0x1c4   :  { %4114 = vmatprep.subr.bf16.mxu1 %v13054_v25  ;;  %v13134_v25 = vcombine.high %v1010_v21, %v1014_v22  ;;  %v994_v39 = vld [vmem:[#allocation8 + $0x688] sm:$0xff] }
 0x1c5   :  { %v998_v40 = vld [vmem:[#allocation8 + $0x6a8] sm:$0xff] }
 0x1c6   :  { %4074 = vmatpush1.bf16.msra.mxu0 %v12925_v31  ;;  %v13005_v31 = vcombine.low %v882_v13, %v886_v20  ;;  %v858_v53 = vld [vmem:[#allocation8 + $0x248] sm:$0xff] }
 0x1c7   :  { %4115 = vmatpush1.bf16.msra.mxu1 %v13053_v55  ;;  %4075 = vmatprep.subr.bf16.mxu0 %v12918_v33  ;;  %v13133_v55 = vcombine.low %v1010_v21, %v1014_v22  ;;  %v12998_v33 = vcombine.high %v874_v26, %v878_v27  ;;  %v862_v54 = vld [vmem:[#allocation8 + $0x268] sm:$0xff] }
 0x1c8   :  { %4116 = vmatprep.subr.bf16.mxu1 %v13046_v46  ;;  %v13126_v46 = vcombine.high %v1002_v28, %v1006_v30  ;;  %v986_v56 = vld [vmem:[#allocation8 + $0x648] sm:$0xff] }
 0x1c9   :  { %v990_v57 = vld [vmem:[#allocation8 + $0x668] sm:$0xff] }
 0x1ca   :  { %4076 = vmatpush1.bf16.msra.mxu0 %v12917_v0  ;;  %v12997_v0 = vcombine.low %v874_v26, %v878_v27  ;;  %v850_v1 = vld [vmem:[#allocation8 + $0x208] sm:$0xff] }
 0x1cb   :  { %4117 = vmatpush1.bf16.msra.mxu1 %v13045_v45  ;;  %4077 = vmatprep.subr.bf16.mxu0 %v12910_v49  ;;  %v13125_v45 = vcombine.low %v1002_v28, %v1006_v30  ;;  %v12990_v49 = vcombine.high %v866_v34, %v870_v11  ;;  %v854_v2 = vld [vmem:[#allocation8 + $0x228] sm:$0xff] }
 0x1cc   :  { %4118 = vmatprep.subr.bf16.mxu1 %v13038_v52  ;;  %v13118_v52 = vcombine.high %v994_v39, %v998_v40  ;;  %v978_v3 = vld [vmem:[#allocation8 + $0x608] sm:$0xff] }
 0x1cd   :  { %v982_v36 = vld [vmem:[#allocation8 + $0x628] sm:$0xff] }
 0x1ce   :  { %4078 = vmatpush1.bf16.msra.mxu0 %v12909_v58  ;;  %v12989_v58 = vcombine.low %v866_v34, %v870_v11  ;;  %v1098_v41 = vld [vmem:[#allocation8 + $0x9c8] sm:$0xff] }
 0x1cf   :  { %4119 = vmatpush1.bf16.msra.mxu1 %v13037_v59  ;;  %4079 = vmatprep.subr.bf16.mxu0 %v13030_v60  ;;  %v13117_v59 = vcombine.low %v994_v39, %v998_v40  ;;  %v12982_v60 = vcombine.high %v858_v53, %v862_v54  ;;  %v1102_v43 = vld [vmem:[#allocation8 + $0x9e8] sm:$0xff] }
 0x1d0   :  { %4120 = vmatprep.subr.bf16.mxu1 %v13158_v62  ;;  %v13110_v62 = vcombine.high %v986_v56, %v990_v57  ;;  %v1226_v14 = vld [vmem:[#allocation8 + $0xdc8] sm:$0xff]  ;;  %v13221_v21 = vcombine.low %v1098_v41, %v1102_v43 }
 0x1d1   :  { %v1230_v5 = vld [vmem:[#allocation8 + $0xde8] sm:$0xff] }
 0x1d2   :  { %4080 = vmatpush2.bf16.msra.mxu0 %v13029_v37  ;;  %v12981_v37 = vcombine.low %v858_v53, %v862_v54  ;;  %v1090_v13 = vld [vmem:[#allocation8 + $0x988] sm:$0xff] }
 0x1d3   :  { %4121 = vmatpush2.bf16.msra.mxu1 %v13157_v42  ;;  %4081 = vmatprep.subr.bf16.mxu0 %v13022_v4  ;;  %v13109_v42 = vcombine.low %v986_v56, %v990_v57  ;;  %v12974_v4 = vcombine.high %v850_v1, %v854_v2  ;;  %v1094_v20 = vld [vmem:[#allocation8 + $0x9a8] sm:$0xff] }
 0x1d4   :  { %4122 = vmatprep.subr.bf16.mxu1 %v13150_v38  ;;  %v13102_v38 = vcombine.high %v978_v3, %v982_v36  ;;  %v1218_v22 = vld [vmem:[#allocation8 + $0xd88] sm:$0xff] }
 0x1d5   :  { %v1086_v26 = vld [vmem:[#allocation8 + $0x968] sm:$0xff] }
 0x1d6   :  { %4082 = vmatpush2.bf16.msra.mxu0 %v13021_v6  ;;  %v12973_v6 = vcombine.low %v850_v1, %v854_v2  ;;  %v1210_v28 = vld [vmem:[#allocation8 + $0xd48] sm:$0xff] }
 0x1d7   :  { %4123 = vmatpush2.bf16.msra.mxu1 %v13149_v8  ;;  %4083 = vmatprep.subr.bf16.mxu0 %v13014_v9  ;;  %v13101_v8 = vcombine.low %v978_v3, %v982_v36  ;;  %v13222_v9 = vcombine.high %v1098_v41, %v1102_v43  ;;  %v1214_v30 = vld [vmem:[#allocation8 + $0xd68] sm:$0xff] }
 0x1d8   :  { %4124 = vmatprep.subr.bf16.mxu1 %v13142_v10  ;;  %v13350_v10 = vcombine.high %v1226_v14, %v1230_v5  ;;  %v1074_v34 = vld [vmem:[#allocation8 + $0x908] sm:$0xff] }
 0x1d9   :  { %v1078_v11 = vld [vmem:[#allocation8 + $0x928] sm:$0xff] }
 0x1da   :  { %4084 = vmatpush2.bf16.msra.mxu0 %v13013_v16  ;;  %v1222_v16 = vld [vmem:[#allocation8 + $0xda8] sm:$0xff] }
 0x1db   :  { %4125 = vmatpush2.bf16.msra.mxu1 %v13141_v23  ;;  %4085 = vmatprep.subr.bf16.mxu0 %v13006_v24  ;;  %v13349_v23 = vcombine.low %v1226_v14, %v1230_v5  ;;  %v13214_v24 = vcombine.high %v1090_v13, %v1094_v20  ;;  %v13342_v27 = vcombine.high %v1218_v22, %v1222_v16  ;;  %v1202_v39 = vld [vmem:[#allocation8 + $0xd08] sm:$0xff] }
 0x1dc   :  { %4126 = vmatprep.subr.bf16.mxu1 %v13134_v25  ;;  %v1082_v25 = vld [vmem:[#allocation8 + $0x948] sm:$0xff] }
 0x1dd   :  { %v1206_v40 = vld [vmem:[#allocation8 + $0xd28] sm:$0xff] }
 0x1de   :  { %4086 = vmatpush2.bf16.msra.mxu0 %v13005_v31  ;;  %v13213_v31 = vcombine.low %v1090_v13, %v1094_v20  ;;  %v1066_v53 = vld [vmem:[#allocation8 + $0x8c8] sm:$0xff] }
 0x1df   :  { %4127 = vmatpush2.bf16.msra.mxu1 %v13133_v55  ;;  %4087 = vmatprep.subr.bf16.mxu0 %v12998_v33  ;;  %v13341_v55 = vcombine.low %v1218_v22, %v1222_v16  ;;  %v13206_v33 = vcombine.high %v1082_v25, %v1086_v26  ;;  %v1070_v54 = vld [vmem:[#allocation8 + $0x8e8] sm:$0xff] }
 0x1e0   :  { %4128 = vmatprep.subr.bf16.mxu1 %v13126_v46  ;;  %v13334_v46 = vcombine.high %v1210_v28, %v1214_v30  ;;  %v1194_v56 = vld [vmem:[#allocation8 + $0xcc8] sm:$0xff] }
 0x1e1   :  { %v1198_v57 = vld [vmem:[#allocation8 + $0xce8] sm:$0xff] }
 0x1e2   :  { %4088 = vmatpush2.bf16.msra.mxu0 %v12997_v0  ;;  %v13205_v0 = vcombine.low %v1082_v25, %v1086_v26  ;;  %v1058_v1 = vld [vmem:[#allocation8 + $0x888] sm:$0xff] }
 0x1e3   :  { %4129 = vmatpush2.bf16.msra.mxu1 %v13125_v45  ;;  %4089 = vmatprep.subr.bf16.mxu0 %v12990_v49  ;;  %v13333_v45 = vcombine.low %v1210_v28, %v1214_v30  ;;  %v13198_v49 = vcombine.high %v1074_v34, %v1078_v11  ;;  %v1062_v2 = vld [vmem:[#allocation8 + $0x8a8] sm:$0xff] }
 0x1e4   :  { %4130 = vmatprep.subr.bf16.mxu1 %v13118_v52  ;;  %v13326_v52 = vcombine.high %v1202_v39, %v1206_v40  ;;  %v1186_v3 = vld [vmem:[#allocation8 + $0xc88] sm:$0xff] }
 0x1e5   :  { %v1190_v36 = vld [vmem:[#allocation8 + $0xca8] sm:$0xff] }
 0x1e6   :  { %4090 = vmatpush2.bf16.msra.mxu0 %v12989_v58  ;;  %v13197_v58 = vcombine.low %v1074_v34, %v1078_v11  ;;  %v1050_v41 = vld [vmem:[#allocation8 + $0x848] sm:$0xff] }
 0x1e7   :  { %4131 = vmatpush2.bf16.msra.mxu1 %v13117_v59  ;;  %4091 = vmatprep.subr.bf16.mxu0 %v12982_v60  ;;  %v13325_v59 = vcombine.low %v1202_v39, %v1206_v40  ;;  %v13190_v60 = vcombine.high %v1066_v53, %v1070_v54  ;;  %v1054_v43 = vld [vmem:[#allocation8 + $0x868] sm:$0xff] }
 0x1e8   :  { %4132 = vmatprep.subr.bf16.mxu1 %v13110_v62  ;;  %v13318_v62 = vcombine.high %v1194_v56, %v1198_v57  ;;  %v1178_v14 = vld [vmem:[#allocation8 + $0xc48] sm:$0xff]  ;;  %v13173_v16 = vcombine.low %v1050_v41, %v1054_v43 }
 0x1e9   :  { %v1182_v5 = vld [vmem:[#allocation8 + $0xc68] sm:$0xff] }
 0x1ea   :  { %4092 = vmatpush2.bf16.msra.mxu0 %v12981_v37  ;;  %v13189_v37 = vcombine.low %v1066_v53, %v1070_v54  ;;  %v1042_v13 = vld [vmem:[#allocation8 + $0x808] sm:$0xff] }
 0x1eb   :  { %4133 = vmatpush2.bf16.msra.mxu1 %v13109_v42  ;;  %4093 = vmatprep.subr.bf16.mxu0 %v12974_v4  ;;  %v13317_v42 = vcombine.low %v1194_v56, %v1198_v57  ;;  %v13182_v4 = vcombine.high %v1058_v1, %v1062_v2  ;;  %v1046_v20 = vld [vmem:[#allocation8 + $0x828] sm:$0xff] }
 0x1ec   :  { %4134 = vmatprep.subr.bf16.mxu1 %v13102_v38  ;;  %v13310_v38 = vcombine.high %v1186_v3, %v1190_v36  ;;  %v1174_v22 = vld [vmem:[#allocation8 + $0xc28] sm:$0xff] }
 0x1ed   :  { %v1162_v26 = vld [vmem:[#allocation8 + $0xbc8] sm:$0xff] }
 0x1ee   :  { %4094 = vmatpush2.bf16.msra.mxu0 %v12973_v6  ;;  %v13181_v6 = vcombine.low %v1058_v1, %v1062_v2  ;;  %v1290_v28 = vld [vmem:[#allocation8 + $0xfc8] sm:$0xff] }
 0x1ef   :  { %4135 = vmatpush2.bf16.msra.mxu1 %v13101_v8  ;;  %4145 = vmatprep.subr.bf16.mxu0 %v13222_v9  ;;  %v13309_v8 = vcombine.low %v1186_v3, %v1190_v36  ;;  %v13174_v9 = vcombine.high %v1050_v41, %v1054_v43  ;;  %v1294_v30 = vld [vmem:[#allocation8 + $0xfe8] sm:$0xff] }
 0x1f0   :  { %4186 = vmatprep.subr.bf16.mxu1 %v13350_v10  ;;  %v13302_v10 = vcombine.high %v1178_v14, %v1182_v5  ;;  %v1154_v34 = vld [vmem:[#allocation8 + $0xb88] sm:$0xff] }
 0x1f1   :  { %4096 = vmatmul.mubr.bf16.vlgmr.msra.gmra.mxu0 %v15112_v50  ;;  %v1158_v11 = vld [vmem:[#allocation8 + $0xba8] sm:$0xff] }
 0x1f2   :  { %4137 = vmatmul.mubr.bf16.vlgmr.msra.gmra.mxu1 %v15108_v47  ;;  %4146 = vmatpush1.bf16.msra.mxu0 %v13221_v21  ;;  %v1170_v21 = vld [vmem:[#allocation8 + $0xc08] sm:$0xff] }
 0x1f3   :  { %4177 = vmatprep.mubr.bf16.mxu0 %v15140_v7  ;;  %4187 = vmatpush1.bf16.msra.mxu1 %v13349_v23  ;;  %v13301_v23 = vcombine.low %v1178_v14, %v1182_v5  ;;  %v13294_v25 = vcombine.high %v1170_v21, %v1174_v22  ;;  %v1282_v39 = vld [vmem:[#allocation8 + $0xf88] sm:$0xff] }
 0x1f4   :  { %4218 = vmatprep.mubr.bf16.mxu1 %v15142_v12  ;;  %4147 = vmatprep.subr.bf16.mxu0 %v13214_v24  ;;  %v13166_v24 = vcombine.high %v1042_v13, %v1046_v20  ;;  %v1286_v40 = vld [vmem:[#allocation8 + $0xfa8] sm:$0xff] }
 0x1f5   :  { %4188 = vmatprep.subr.bf16.mxu1 %v13342_v27  ;;  %v1166_v27 = vld [vmem:[#allocation8 + $0xbe8] sm:$0xff] }
 0x1f6   :  { %4148 = vmatpush1.bf16.msra.mxu0 %v13213_v31  ;;  %v13165_v31 = vcombine.low %v1042_v13, %v1046_v20  ;;  %v1146_v53 = vld [vmem:[#allocation8 + $0xb48] sm:$0xff] }
 0x1f7   :  { %4189 = vmatpush1.bf16.msra.mxu1 %v13341_v55  ;;  %4149 = vmatprep.subr.bf16.mxu0 %v13206_v33  ;;  %v13293_v55 = vcombine.low %v1170_v21, %v1174_v22  ;;  %v13286_v33 = vcombine.high %v1162_v26, %v1166_v27  ;;  %v1150_v54 = vld [vmem:[#allocation8 + $0xb68] sm:$0xff] }
 0x1f8   :  { %4190 = vmatprep.subr.bf16.mxu1 %v13334_v46  ;;  %v13414_v46 = vcombine.high %v1290_v28, %v1294_v30  ;;  %v1274_v56 = vld [vmem:[#allocation8 + $0xf48] sm:$0xff] }
 0x1f9   :  { %v1278_v57 = vld [vmem:[#allocation8 + $0xf68] sm:$0xff] }
 0x1fa   :  { %4150 = vmatpush1.bf16.msra.mxu0 %v13205_v0  ;;  %v13285_v0 = vcombine.low %v1162_v26, %v1166_v27  ;;  %v1138_v1 = vld [vmem:[#allocation8 + $0xb08] sm:$0xff] }
 0x1fb   :  { %4191 = vmatpush1.bf16.msra.mxu1 %v13333_v45  ;;  %4151 = vmatprep.subr.bf16.mxu0 %v13198_v49  ;;  %v13413_v45 = vcombine.low %v1290_v28, %v1294_v30  ;;  %v13278_v49 = vcombine.high %v1154_v34, %v1158_v11  ;;  %v1142_v2 = vld [vmem:[#allocation8 + $0xb28] sm:$0xff] }
 0x1fc   :  { %4192 = vmatprep.subr.bf16.mxu1 %v13326_v52  ;;  %v13406_v52 = vcombine.high %v1282_v39, %v1286_v40  ;;  %v1266_v3 = vld [vmem:[#allocation8 + $0xf08] sm:$0xff] }
 0x1fd   :  { %v1270_v36 = vld [vmem:[#allocation8 + $0xf28] sm:$0xff] }
 0x1fe   :  { %4152 = vmatpush1.bf16.msra.mxu0 %v13197_v58  ;;  %v13277_v58 = vcombine.low %v1154_v34, %v1158_v11  ;;  %v1130_v41 = vld [vmem:[#allocation8 + $0xac8] sm:$0xff] }
 0x1ff   :  { %4193 = vmatpush1.bf16.msra.mxu1 %v13325_v59  ;;  %4153 = vmatprep.subr.bf16.mxu0 %v13190_v60  ;;  %v13405_v59 = vcombine.low %v1282_v39, %v1286_v40  ;;  %v13270_v60 = vcombine.high %v1146_v53, %v1150_v54  ;;  %v1134_v43 = vld [vmem:[#allocation8 + $0xae8] sm:$0xff] }
 0x200   :  { %4194 = vmatprep.subr.bf16.mxu1 %v13318_v62  ;;  %v13398_v62 = vcombine.high %v1274_v56, %v1278_v57  ;;  %v1258_v14 = vld [vmem:[#allocation8 + $0xec8] sm:$0xff] }
 0x201   :  { %v1262_v5 = vld [vmem:[#allocation8 + $0xee8] sm:$0xff] }
 0x202   :  { %4154 = vmatpush1.bf16.msra.mxu0 %v13189_v37  ;;  %v13269_v37 = vcombine.low %v1146_v53, %v1150_v54  ;;  %v1122_v13 = vld [vmem:[#allocation8 + $0xa88] sm:$0xff]  ;;  %v843_v53 = vld [vmem:[#allocation8 + $0x1d0] sm:$0xff] }
 0x203   :  { %4195 = vmatpush1.bf16.msra.mxu1 %v13317_v42  ;;  %4155 = vmatprep.subr.bf16.mxu0 %v13182_v4  ;;  %v13397_v42 = vcombine.low %v1274_v56, %v1278_v57  ;;  %v13262_v4 = vcombine.high %v1138_v1, %v1142_v2  ;;  %v1126_v20 = vld [vmem:[#allocation8 + $0xaa8] sm:$0xff]  ;;  %v847_v54 = vld [vmem:[#allocation8 + $0x1f0] sm:$0xff] }
 0x204   :  { %4196 = vmatprep.subr.bf16.mxu1 %v13310_v38  ;;  %v13390_v38 = vcombine.high %v1266_v3, %v1270_v36  ;;  %v1250_v21 = vld [vmem:[#allocation8 + $0xe88] sm:$0xff]  ;;  %v971_v56 = vld [vmem:[#allocation8 + $0x5d0] sm:$0xff] }
 0x205   :  { %v1254_v22 = vld [vmem:[#allocation8 + $0xea8] sm:$0xff]  ;;  %v975_v57 = vld [vmem:[#allocation8 + $0x5f0] sm:$0xff] }
 0x206   :  { %4156 = vmatpush1.bf16.msra.mxu0 %v13181_v6  ;;  %v13261_v6 = vcombine.low %v1138_v1, %v1142_v2  ;;  %v1114_v26 = vld [vmem:[#allocation8 + $0xa48] sm:$0xff]  ;;  %v13096_v1 = vcombine.high %v971_v56, %v975_v57  ;;  %v835_v2 = vld [vmem:[#allocation8 + $0x190] sm:$0xff] }
 0x207   :  { %4197 = vmatpush1.bf16.msra.mxu1 %v13309_v8  ;;  %4157 = vmatprep.subr.bf16.mxu0 %v13174_v9  ;;  %v13389_v8 = vcombine.low %v1266_v3, %v1270_v36  ;;  %v13254_v9 = vcombine.high %v1130_v41, %v1134_v43  ;;  %v1118_v27 = vld [vmem:[#allocation8 + $0xa68] sm:$0xff]  ;;  %v839_v3 = vld [vmem:[#allocation8 + $0x1b0] sm:$0xff]  ;;  %v12967_v36 = vcombine.low %v843_v53, %v847_v54 }
 0x208   :  { %4198 = vmatprep.subr.bf16.mxu1 %v13302_v10  ;;  %v13382_v10 = vcombine.high %v1258_v14, %v1262_v5  ;;  %v1242_v28 = vld [vmem:[#allocation8 + $0xe48] sm:$0xff] }
 0x209   :  { %v1246_v30 = vld [vmem:[#allocation8 + $0xe68] sm:$0xff] }
 0x20a   :  { %4158 = vmatpush1.bf16.msra.mxu0 %v13173_v16  ;;  %v13253_v16 = vcombine.low %v1130_v41, %v1134_v43  ;;  %v1106_v34 = vld [vmem:[#allocation8 + $0xa08] sm:$0xff]  ;;  %v12960_v43 = vcombine.high %v835_v2, %v839_v3 }
 0x20b   :  { %4199 = vmatpush1.bf16.msra.mxu1 %v13301_v23  ;;  %4159 = vmatprep.subr.bf16.mxu0 %v13166_v24  ;;  %v13381_v23 = vcombine.low %v1258_v14, %v1262_v5  ;;  %v13246_v24 = vcombine.high %v1122_v13, %v1126_v20  ;;  %v1110_v11 = vld [vmem:[#allocation8 + $0xa28] sm:$0xff]  ;;  %v827_v14 = vld [vmem:[#allocation8 + $0x150] sm:$0xff] }
 0x20c   :  { %4200 = vmatprep.subr.bf16.mxu1 %v13294_v25  ;;  %v13374_v25 = vcombine.high %v1250_v21, %v1254_v22  ;;  %v1234_v39 = vld [vmem:[#allocation8 + $0xe08] sm:$0xff]  ;;  %v831_v5 = vld [vmem:[#allocation8 + $0x170] sm:$0xff] }
 0x20d   :  { %v1238_v40 = vld [vmem:[#allocation8 + $0xe28] sm:$0xff] }
 0x20e   :  { %4160 = vmatpush1.bf16.msra.mxu0 %v13165_v31  ;;  %v13245_v31 = vcombine.low %v1122_v13, %v1126_v20 }
 0x20f   :  { %4201 = vmatpush1.bf16.msra.mxu1 %v13293_v55  ;;  %4161 = vmatprep.subr.bf16.mxu0 %v13286_v33  ;;  %v13373_v55 = vcombine.low %v1250_v21, %v1254_v22  ;;  %v13238_v33 = vcombine.high %v1114_v26, %v1118_v27  ;;  %v12959_v21 = vcombine.low %v835_v2, %v839_v3  ;;  %v807_v2 = vld [vmem:[#allocation8 + $0xb0] sm:$0xff] }
 0x210   :  { %4202 = vmatprep.subr.bf16.mxu1 %v13414_v46  ;;  %v13366_v46 = vcombine.high %v1242_v28, %v1246_v30  ;;  %v931_v3 = vld [vmem:[#allocation8 + $0x490] sm:$0xff] }
 0x212   :  { %4162 = vmatpush2.bf16.msra.mxu0 %v13285_v0  ;;  %v13237_v0 = vcombine.low %v1114_v26, %v1118_v27 }
 0x213   :  { %4203 = vmatpush2.bf16.msra.mxu1 %v13413_v45  ;;  %4163 = vmatprep.subr.bf16.mxu0 %v13278_v49  ;;  %v13365_v45 = vcombine.low %v1242_v28, %v1246_v30  ;;  %v13230_v49 = vcombine.high %v1106_v34, %v1110_v11  ;;  %v819_v28 = vld [vmem:[#allocation8 + $0x110] sm:$0xff] }
 0x214   :  { %4204 = vmatprep.subr.bf16.mxu1 %v13406_v52  ;;  %v13358_v52 = vcombine.high %v1234_v39, %v1238_v40  ;;  %v823_v30 = vld [vmem:[#allocation8 + $0x130] sm:$0xff] }
 0x216   :  { %4164 = vmatpush2.bf16.msra.mxu0 %v13277_v58  ;;  %v13229_v58 = vcombine.low %v1106_v34, %v1110_v11  ;;  %v12951_v11 = vcombine.low %v827_v14, %v831_v5 }
 0x217   :  { %4205 = vmatpush2.bf16.msra.mxu1 %v13405_v59  ;;  %4165 = vmatprep.subr.bf16.mxu0 %v13270_v60  ;;  %v13357_v59 = vcombine.low %v1234_v39, %v1238_v40  ;;  %v12968_v60 = vcombine.high %v843_v53, %v847_v54  ;;  %v815_v53 = vld [vmem:[#allocation8 + $0xf0] sm:$0xff] }
 0x218   :  { %4206 = vmatprep.subr.bf16.mxu1 %v13398_v62  ;;  %v15170_v62 = vld [vmem:[#allocation10] sm:$0xff]  ;;  %v939_v54 = vld [vmem:[#allocation8 + $0x4d0] sm:$0xff] }
 0x219   :  { %v1306_v41 = vrot.slane %v15170_v62, %v15095_v18 }
 0x21a   :  { %4166 = vmatpush2.bf16.msra.mxu0 %v13269_v37  ;;  %v1302_v37 = vrot.slane %v15170_v62, %v15087_v15 }
 0x21b   :  { %4207 = vmatpush2.bf16.msra.mxu1 %v13397_v42  ;;  %4167 = vmatprep.subr.bf16.mxu0 %v13262_v4  ;;  %v963_v42 = vld [vmem:[#allocation8 + $0x590] sm:$0xff] }
 0x21c   :  { %4208 = vmatprep.subr.bf16.mxu1 %v13390_v38  ;;  %v967_v4 = vld [vmem:[#allocation8 + $0x5b0] sm:$0xff]  ;;  %v13095_v38 = vcombine.low %v971_v56, %v975_v57  ;;  %v12943_v57 = vcombine.low %v819_v28, %v823_v30 }
 0x21d   :  { %v943_v56 = vld [vmem:[#allocation8 + $0x4f0] sm:$0xff] }
 0x21e   :  { %4168 = vmatpush2.bf16.msra.mxu0 %v13261_v6 }
 0x21f   :  { %4209 = vmatpush2.bf16.msra.mxu1 %v13389_v8  ;;  %4169 = vmatprep.subr.bf16.mxu0 %v13254_v9  ;;  %v13088_v8 = vcombine.high %v963_v42, %v967_v4  ;;  %v955_v9 = vld [vmem:[#allocation8 + $0x550] sm:$0xff] }
 0x220   :  { %4210 = vmatprep.subr.bf16.mxu1 %v13382_v10  ;;  %v959_v10 = vld [vmem:[#allocation8 + $0x570] sm:$0xff] }
 0x221   :  { %v13080_v27 = vcombine.high %v955_v9, %v959_v10  ;;  %v13079_v40 = vcombine.low %v955_v9, %v959_v10 }
 0x222   :  { %4170 = vmatpush2.bf16.msra.mxu0 %v13253_v16  ;;  %v13087_v16 = vcombine.low %v963_v42, %v967_v4  ;;  %v13063_v42 = vcombine.low %v939_v54, %v943_v56 }
 0x223   :  { %4211 = vmatpush2.bf16.msra.mxu1 %v13381_v23  ;;  %4171 = vmatprep.subr.bf16.mxu0 %v13246_v24  ;;  %v12952_v23 = vcombine.high %v827_v14, %v831_v5  ;;  %v923_v14 = vld [vmem:[#allocation8 + $0x450] sm:$0xff] }
 0x224   :  { %4212 = vmatprep.subr.bf16.mxu1 %v13374_v25  ;;  %v927_v5 = vld [vmem:[#allocation8 + $0x470] sm:$0xff] }
 0x225   :  { %v13048_v10 = vcombine.high %v923_v14, %v927_v5 }
 0x226   :  { %4172 = vmatpush2.bf16.msra.mxu0 %v13245_v31 }
 0x227   :  { %4213 = vmatpush2.bf16.msra.mxu1 %v13373_v55  ;;  %4173 = vmatprep.subr.bf16.mxu0 %v13238_v33  ;;  %v947_v55 = vld [vmem:[#allocation8 + $0x510] sm:$0xff] }
 0x228   :  { %4214 = vmatprep.subr.bf16.mxu1 %v13366_v46  ;;  %v951_v33 = vld [vmem:[#allocation8 + $0x530] sm:$0xff] }
 0x22a   :  { %4174 = vmatpush2.bf16.msra.mxu0 %v13237_v0  ;;  %v12944_v0 = vcombine.high %v819_v28, %v823_v30  ;;  %v911_v28 = vld [vmem:[#allocation8 + $0x3f0] sm:$0xff] }
 0x22b   :  { %4215 = vmatpush2.bf16.msra.mxu1 %v13365_v45  ;;  %4175 = vmatprep.subr.bf16.mxu0 %v13230_v49  ;;  %v13072_v49 = vcombine.high %v947_v55, %v951_v33  ;;  %v1035_v30 = vld [vmem:[#allocation8 + $0x7d0] sm:$0xff] }
 0x22c   :  { %4216 = vmatprep.subr.bf16.mxu1 %v13358_v52  ;;  %v811_v52 = vld [vmem:[#allocation8 + $0xd0] sm:$0xff] }
 0x22e   :  { %4176 = vmatpush2.bf16.msra.mxu0 %v13229_v58  ;;  %v13071_v58 = vcombine.low %v947_v55, %v951_v33 }
 0x22f   :  { %4217 = vmatpush2.bf16.msra.mxu1 %v13357_v59  ;;  %4227 = vmatprep.subr.bf16.mxu0 %v12968_v60  ;;  %v12936_v59 = vcombine.high %v811_v52, %v815_v53  ;;  %v13064_v60 = vcombine.high %v939_v54, %v943_v56  ;;  %v891_v56 = vld [vmem:[#allocation8 + $0x350] sm:$0xff] }
 0x230   :  { %4268 = vmatprep.subr.bf16.mxu1 %v13096_v1  ;;  %v803_v1 = vld [vmem:[#allocation8 + $0x90] sm:$0xff] }
 0x231   :  { %4178 = vmatmul.mubr.bf16.vlgmr.msra.gmra.mxu0 %v15160_v44  ;;  %v3933_v6 = vpop.f32.mrf.mxu0  ;;  %v3974_v20 = vpop.f32.mrf.mxu1  ;;  %v12928_v4 = vcombine.high %v803_v1, %v807_v2 }
 0x232   :  { %4219 = vmatmul.mubr.bf16.vlgmr.msra.gmra.mxu1 %v15158_v35  ;;  %v3934_v13 = vadd.f32 %v3933_v6, %v1302_v37  ;;  %4228 = vmatpush1.bf16.msra.mxu0 %v12967_v36  ;;  %v935_v36 = vld [vmem:[#allocation8 + $0x4b0] sm:$0xff]  ;;  %v12935_v37 = vcombine.low %v811_v52, %v815_v53  ;;  %v12927_v6 = vcombine.low %v803_v1, %v807_v2 }
 0x233   :  { %4259 = vmatprep.mubr.bf16.mxu0 %v15110_v48  ;;  %4269 = vmatpush1.bf16.msra.mxu1 %v13095_v38  ;;  %v3935_v22 = vpop.f32.mrf.mxu0  ;;  %v3976_v26 = vpop.f32.mrf.mxu1  ;;  %v13056_v38 = vcombine.high %v931_v3, %v935_v36 }
 0x234   :  { %v15179_v24 = vadd.f32 %v3974_v20, %v3934_v13  ;;  %4300 = vmatprep.mubr.bf16.mxu1 %v15114_v51  ;;  %v3936_v25 = vadd.f32 %v3935_v22, %v1306_v41  ;;  %4229 = vmatprep.subr.bf16.mxu0 %v12960_v43  ;;  %v795_v41 = vld [vmem:[#allocation8 + $0x50] sm:$0xff] }
 0x235   :  { %4270 = vmatprep.subr.bf16.mxu1 %v13088_v8  ;;  %v3937_v31 = vpop.f32.mrf.mxu0  ;;  %v3978_v34 = vpop.f32.mrf.mxu1  ;;  %v799_v43 = vld [vmem:[#allocation8 + $0x70] sm:$0xff]  ;;  %v13055_v8 = vcombine.low %v931_v3, %v935_v36 }
 0x236   :  { %v15182_v46 = vadd.f32 %v3976_v26, %v3936_v25  ;;  %4230 = vmatpush1.bf16.msra.mxu0 %v12959_v21  ;;  %v12920_v9 = vcombine.high %v795_v41, %v799_v43  ;;  %v787_v13 = vld [vmem:[#allocation8 + $0x10] sm:$0xff] }
 0x237   :  { %4271 = vmatpush1.bf16.msra.mxu1 %v13087_v16  ;;  %v3938_v39 = vpop.f32.mrf.mxu0  ;;  %4231 = vmatprep.subr.bf16.mxu0 %v12952_v23  ;;  %v3979_v45 = vpop.f32.mrf.mxu1  ;;  %v791_v20 = vld [vmem:[#allocation8 + $0x30] sm:$0xff]  ;;  %v12919_v16 = vcombine.low %v795_v41, %v799_v43  ;;  %v13047_v23 = vcombine.low %v923_v14, %v927_v5 }
 0x238   :  { %4272 = vmatprep.subr.bf16.mxu1 %v13080_v27  ;;  %v915_v21 = vld [vmem:[#allocation8 + $0x410] sm:$0xff]  ;;  %v12912_v25 = vcombine.high %v787_v13, %v791_v20  ;;  %v12911_v55 = vcombine.low %v787_v13, %v791_v20 }
 0x239   :  { %v919_v22 = vld [vmem:[#allocation8 + $0x430] sm:$0xff] }
 0x23a   :  { %4232 = vmatpush1.bf16.msra.mxu0 %v12951_v11  ;;  %v13040_v26 = vcombine.high %v915_v21, %v919_v22  ;;  %v907_v27 = vld [vmem:[#allocation8 + $0x3d0] sm:$0xff]  ;;  %v13039_v33 = vcombine.low %v915_v21, %v919_v22 }
 0x23b   :  { %4273 = vmatpush1.bf16.msra.mxu1 %v13079_v40  ;;  %4233 = vmatprep.subr.bf16.mxu0 %v12944_v0  ;;  %v1039_v31 = vld [vmem:[#allocation8 + $0x7f0] sm:$0xff]  ;;  %v13032_v34 = vcombine.high %v907_v27, %v911_v28 }
 0x23c   :  { %4274 = vmatprep.subr.bf16.mxu1 %v13072_v49  ;;  %v13160_v11 = vcombine.high %v1035_v30, %v1039_v31  ;;  %v899_v39 = vld [vmem:[#allocation8 + $0x390] sm:$0xff]  ;;  %v13031_v49 = vcombine.low %v907_v27, %v911_v28  ;;  %v13159_v52 = vcombine.low %v1035_v30, %v1039_v31 }
 0x23d   :  { %v903_v40 = vld [vmem:[#allocation8 + $0x3b0] sm:$0xff] }
 0x23e   :  { %4234 = vmatpush1.bf16.msra.mxu0 %v12943_v57  ;;  %v1027_v0 = vld [vmem:[#allocation8 + $0x790] sm:$0xff]  ;;  %v13024_v53 = vcombine.high %v899_v39, %v903_v40 }
 0x23f   :  { %4275 = vmatpush1.bf16.msra.mxu1 %v13071_v58  ;;  %4235 = vmatprep.subr.bf16.mxu0 %v12936_v59  ;;  %v1031_v45 = vld [vmem:[#allocation8 + $0x7b0] sm:$0xff] }
 0x240   :  { %4276 = vmatprep.subr.bf16.mxu1 %v13064_v60  ;;  %v13152_v54 = vcombine.high %v1027_v0, %v1031_v45  ;;  %v895_v57 = vld [vmem:[#allocation8 + $0x370] sm:$0xff]  ;;  %v13023_v60 = vcombine.low %v899_v39, %v903_v40  ;;  %v13151_v1 = vcombine.low %v1027_v0, %v1031_v45 }
 0x241   :  { %v1019_v58 = vld [vmem:[#allocation8 + $0x750] sm:$0xff]  ;;  %v13016_v2 = vcombine.high %v891_v56, %v895_v57 }
 0x242   :  { %4236 = vmatpush1.bf16.msra.mxu0 %v12935_v37  ;;  %v1023_v59 = vld [vmem:[#allocation8 + $0x770] sm:$0xff] }
 0x243   :  { %4277 = vmatpush1.bf16.msra.mxu1 %v13063_v42  ;;  %4237 = vmatprep.subr.bf16.mxu0 %v12928_v4  ;;  %v13144_v3 = vcombine.high %v1019_v58, %v1023_v59  ;;  %v883_v36 = vld [vmem:[#allocation8 + $0x310] sm:$0xff]  ;;  %v13143_v41 = vcombine.low %v1019_v58, %v1023_v59 }
 0x244   :  { %4278 = vmatprep.subr.bf16.mxu1 %v13056_v38  ;;  %v887_v37 = vld [vmem:[#allocation8 + $0x330] sm:$0xff]  ;;  %v13015_v38 = vcombine.low %v891_v56, %v895_v57 }
 0x245   :  { %v1011_v42 = vld [vmem:[#allocation8 + $0x710] sm:$0xff]  ;;  %v13008_v43 = vcombine.high %v883_v36, %v887_v37 }
 0x246   :  { %4238 = vmatpush1.bf16.msra.mxu0 %v12927_v6  ;;  %v1015_v4 = vld [vmem:[#allocation8 + $0x730] sm:$0xff] }
 0x247   :  { %4279 = vmatpush1.bf16.msra.mxu1 %v13055_v8  ;;  %4239 = vmatprep.subr.bf16.mxu0 %v12920_v9  ;;  %v13136_v14 = vcombine.high %v1011_v42, %v1015_v4  ;;  %v875_v5 = vld [vmem:[#allocation8 + $0x2d0] sm:$0xff]  ;;  %v13135_v13 = vcombine.low %v1011_v42, %v1015_v4 }
 0x248   :  { %4280 = vmatprep.subr.bf16.mxu1 %v13048_v10  ;;  %v879_v6 = vld [vmem:[#allocation8 + $0x2f0] sm:$0xff]  ;;  %v13007_v10 = vcombine.low %v883_v36, %v887_v37 }
 0x249   :  { %v1003_v8 = vld [vmem:[#allocation8 + $0x6d0] sm:$0xff]  ;;  %v13000_v20 = vcombine.high %v875_v5, %v879_v6 }
 0x24a   :  { %4240 = vmatpush1.bf16.msra.mxu0 %v12919_v16  ;;  %v1007_v9 = vld [vmem:[#allocation8 + $0x6f0] sm:$0xff] }
 0x24b   :  { %4281 = vmatpush1.bf16.msra.mxu1 %v13047_v23  ;;  %4241 = vmatprep.subr.bf16.mxu0 %v12912_v25  ;;  %v13128_v21 = vcombine.high %v1003_v8, %v1007_v9  ;;  %v867_v22 = vld [vmem:[#allocation8 + $0x290] sm:$0xff]  ;;  %v13127_v27 = vcombine.low %v1003_v8, %v1007_v9 }
 0x24c   :  { %4282 = vmatprep.subr.bf16.mxu1 %v13040_v26  ;;  %v871_v16 = vld [vmem:[#allocation8 + $0x2b0] sm:$0xff]  ;;  %v12999_v26 = vcombine.low %v875_v5, %v879_v6 }
 0x24d   :  { %v995_v23 = vld [vmem:[#allocation8 + $0x690] sm:$0xff]  ;;  %v12992_v28 = vcombine.high %v867_v22, %v871_v16 }
 0x24e   :  { %4242 = vmatpush1.bf16.msra.mxu0 %v12911_v55  ;;  %v999_v25 = vld [vmem:[#allocation8 + $0x6b0] sm:$0xff] }
 0x24f   :  { %4283 = vmatpush1.bf16.msra.mxu1 %v13039_v33  ;;  %4243 = vmatprep.subr.bf16.mxu0 %v13032_v34  ;;  %v13120_v30 = vcombine.high %v995_v23, %v999_v25  ;;  %v859_v31 = vld [vmem:[#allocation8 + $0x250] sm:$0xff]  ;;  %v13119_v39 = vcombine.low %v995_v23, %v999_v25 }
 0x250   :  { %4284 = vmatprep.subr.bf16.mxu1 %v13160_v11  ;;  %v863_v55 = vld [vmem:[#allocation8 + $0x270] sm:$0xff]  ;;  %v12991_v11 = vcombine.low %v867_v22, %v871_v16 }
 0x251   :  { %v987_v33 = vld [vmem:[#allocation8 + $0x650] sm:$0xff]  ;;  %v12984_v40 = vcombine.high %v859_v31, %v863_v55 }
 0x252   :  { %4244 = vmatpush2.bf16.msra.mxu0 %v13031_v49  ;;  %v991_v34 = vld [vmem:[#allocation8 + $0x670] sm:$0xff] }
 0x253   :  { %4285 = vmatpush2.bf16.msra.mxu1 %v13159_v52  ;;  %4245 = vmatprep.subr.bf16.mxu0 %v13024_v53  ;;  %v13112_v0 = vcombine.high %v987_v33, %v991_v34  ;;  %v851_v45 = vld [vmem:[#allocation8 + $0x210] sm:$0xff]  ;;  %v13111_v56 = vcombine.low %v987_v33, %v991_v34 }
 0x254   :  { %4286 = vmatprep.subr.bf16.mxu1 %v13152_v54  ;;  %v855_v49 = vld [vmem:[#allocation8 + $0x230] sm:$0xff]  ;;  %v12983_v54 = vcombine.low %v859_v31, %v863_v55 }
 0x255   :  { %v979_v52 = vld [vmem:[#allocation8 + $0x610] sm:$0xff]  ;;  %v12976_v57 = vcombine.high %v851_v45, %v855_v49 }
 0x256   :  { %4246 = vmatpush2.bf16.msra.mxu0 %v13023_v60  ;;  %v983_v53 = vld [vmem:[#allocation8 + $0x630] sm:$0xff] }
 0x257   :  { %4287 = vmatpush2.bf16.msra.mxu1 %v13151_v1  ;;  %4247 = vmatprep.subr.bf16.mxu0 %v13016_v2  ;;  %v13104_v58 = vcombine.high %v979_v52, %v983_v53  ;;  %v1099_v59 = vld [vmem:[#allocation8 + $0x9d0] sm:$0xff]  ;;  %v13103_v36 = vcombine.low %v979_v52, %v983_v53 }
 0x258   :  { %4288 = vmatprep.subr.bf16.mxu1 %v13144_v3  ;;  %v1103_v60 = vld [vmem:[#allocation8 + $0x9f0] sm:$0xff]  ;;  %v12975_v3 = vcombine.low %v851_v45, %v855_v49 }
 0x259   :  { %v1227_v1 = vld [vmem:[#allocation8 + $0xdd0] sm:$0xff]  ;;  %v13224_v37 = vcombine.high %v1099_v59, %v1103_v60 }
 0x25a   :  { %4248 = vmatpush2.bf16.msra.mxu0 %v13015_v38  ;;  %v1231_v2 = vld [vmem:[#allocation8 + $0xdf0] sm:$0xff] }
 0x25b   :  { %4289 = vmatpush2.bf16.msra.mxu1 %v13143_v41  ;;  %4249 = vmatprep.subr.bf16.mxu0 %v13008_v43  ;;  %v13352_v42 = vcombine.high %v1227_v1, %v1231_v2  ;;  %v1091_v4 = vld [vmem:[#allocation8 + $0x990] sm:$0xff]  ;;  %v13223_v41 = vcombine.low %v1099_v59, %v1103_v60  ;;  %v13351_v5 = vcombine.low %v1227_v1, %v1231_v2 }
 0x25c   :  { %4290 = vmatprep.subr.bf16.mxu1 %v13136_v14  ;;  %v1095_v38 = vld [vmem:[#allocation8 + $0x9b0] sm:$0xff] }
 0x25d   :  { %v1219_v43 = vld [vmem:[#allocation8 + $0xd90] sm:$0xff]  ;;  %v13216_v6 = vcombine.high %v1091_v4, %v1095_v38  ;;  %v13215_v23 = vcombine.low %v1091_v4, %v1095_v38 }
 0x25e   :  { %4250 = vmatpush2.bf16.msra.mxu0 %v13007_v10  ;;  %v1223_v14 = vld [vmem:[#allocation8 + $0xdb0] sm:$0xff] }
 0x25f   :  { %4291 = vmatpush2.bf16.msra.mxu1 %v13135_v13  ;;  %4251 = vmatprep.subr.bf16.mxu0 %v13000_v20  ;;  %v1083_v8 = vld [vmem:[#allocation8 + $0x950] sm:$0xff]  ;;  %v13344_v13 = vcombine.high %v1219_v43, %v1223_v14 }
 0x260   :  { %4292 = vmatprep.subr.bf16.mxu1 %v13128_v21  ;;  %v1087_v9 = vld [vmem:[#allocation8 + $0x970] sm:$0xff] }
 0x261   :  { %v1211_v20 = vld [vmem:[#allocation8 + $0xd50] sm:$0xff]  ;;  %v13207_v45 = vcombine.low %v1083_v8, %v1087_v9 }
 0x262   :  { %4252 = vmatpush2.bf16.msra.mxu0 %v12999_v26  ;;  %v1215_v21 = vld [vmem:[#allocation8 + $0xd70] sm:$0xff]  ;;  %v13343_v26 = vcombine.low %v1219_v43, %v1223_v14 }
 0x263   :  { %4293 = vmatpush2.bf16.msra.mxu1 %v13127_v27  ;;  %4253 = vmatprep.subr.bf16.mxu0 %v12992_v28  ;;  %v13208_v27 = vcombine.high %v1083_v8, %v1087_v9  ;;  %v1075_v55 = vld [vmem:[#allocation8 + $0x910] sm:$0xff]  ;;  %v13335_v52 = vcombine.low %v1211_v20, %v1215_v21 }
 0x264   :  { %4294 = vmatprep.subr.bf16.mxu1 %v13120_v30  ;;  %v1079_v33 = vld [vmem:[#allocation8 + $0x930] sm:$0xff] }
 0x265   :  { %v13200_v53 = vcombine.high %v1075_v55, %v1079_v33  ;;  %v1199_v59 = vld [vmem:[#allocation8 + $0xcf0] sm:$0xff]  ;;  %v13199_v60 = vcombine.low %v1075_v55, %v1079_v33 }
 0x266   :  { %4254 = vmatpush2.bf16.msra.mxu0 %v12991_v11  ;;  %v1203_v11 = vld [vmem:[#allocation8 + $0xd10] sm:$0xff] }
 0x267   :  { %4295 = vmatpush2.bf16.msra.mxu1 %v13119_v39  ;;  %4255 = vmatprep.subr.bf16.mxu0 %v12984_v40  ;;  %v1207_v39 = vld [vmem:[#allocation8 + $0xd30] sm:$0xff] }
 0x268   :  { %4296 = vmatprep.subr.bf16.mxu1 %v13112_v0  ;;  %v13327_v1 = vcombine.low %v1203_v11, %v1207_v39  ;;  %v1191_v4 = vld [vmem:[#allocation8 + $0xcb0] sm:$0xff] }
 0x269   :  { %v1179_v8 = vld [vmem:[#allocation8 + $0xc50] sm:$0xff] }
 0x26a   :  { %4256 = vmatpush2.bf16.msra.mxu0 %v12983_v54  ;;  %v13328_v54 = vcombine.high %v1203_v11, %v1207_v39  ;;  %v1183_v9 = vld [vmem:[#allocation8 + $0xc70] sm:$0xff] }
 0x26b   :  { %4297 = vmatpush2.bf16.msra.mxu1 %v13111_v56  ;;  %4257 = vmatprep.subr.bf16.mxu0 %v12976_v57  ;;  %v1067_v56 = vld [vmem:[#allocation8 + $0x8d0] sm:$0xff] }
 0x26c   :  { %4298 = vmatprep.subr.bf16.mxu1 %v13104_v58  ;;  %v1071_v57 = vld [vmem:[#allocation8 + $0x8f0] sm:$0xff] }
 0x26d   :  { %v1195_v58 = vld [vmem:[#allocation8 + $0xcd0] sm:$0xff]  ;;  %v13192_v2 = vcombine.high %v1067_v56, %v1071_v57  ;;  %v13191_v38 = vcombine.low %v1067_v56, %v1071_v57 }
 0x26e   :  { %4258 = vmatpush2.bf16.msra.mxu0 %v12975_v3  ;;  %v13320_v3 = vcombine.high %v1195_v58, %v1199_v59  ;;  %v1167_v55 = vld [vmem:[#allocation8 + $0xbf0] sm:$0xff] }
 0x26f   :  { %4299 = vmatpush2.bf16.msra.mxu1 %v13103_v36  ;;  %4309 = vmatprep.subr.bf16.mxu0 %v13224_v37  ;;  %v1059_v36 = vld [vmem:[#allocation8 + $0x890] sm:$0xff] }
 0x270   :  { %4350 = vmatprep.subr.bf16.mxu1 %v13352_v42  ;;  %v1063_v37 = vld [vmem:[#allocation8 + $0x8b0] sm:$0xff] }
 0x271   :  { %v4015_v10 = vpop.f32.mrf.mxu0  ;;  %4260 = vmatmul.mubr.bf16.vlgmr.msra.gmra.mxu0 %v15112_v50  ;;  %v4056_v16 = vpop.f32.mrf.mxu1  ;;  %v1187_v42 = vld [vmem:[#allocation8 + $0xc90] sm:$0xff]  ;;  %v13184_v43 = vcombine.high %v1059_v36, %v1063_v37 }
 0x272   :  { %v4016_v22 = vadd.f32 %v4015_v10, %v15179_v24  ;;  %4301 = vmatmul.mubr.bf16.vlgmr.msra.gmra.mxu1 %v15108_v47  ;;  %4310 = vmatpush1.bf16.msra.mxu0 %v13223_v41  ;;  %v13336_v24 = vcombine.high %v1211_v20, %v1215_v21  ;;  %v13319_v41 = vcombine.low %v1195_v58, %v1199_v59  ;;  %v1291_v33 = vld [vmem:[#allocation8 + $0xfd0] sm:$0xff] }
 0x273   :  { %4341 = vmatprep.mubr.bf16.mxu0 %v15140_v7  ;;  %4351 = vmatpush1.bf16.msra.mxu1 %v13351_v5  ;;  %v4017_v25 = vpop.f32.mrf.mxu0  ;;  %v4058_v31 = vpop.f32.mrf.mxu1  ;;  %v13312_v14 = vcombine.high %v1187_v42, %v1191_v4  ;;  %v1051_v5 = vld [vmem:[#allocation8 + $0x850] sm:$0xff]  ;;  %v13183_v10 = vcombine.low %v1059_v36, %v1063_v37  ;;  %v13304_v21 = vcombine.high %v1179_v8, %v1183_v9 }
 0x274   :  { %v15188_v28 = vadd.f32 %v4056_v16, %v4016_v22  ;;  %4382 = vmatprep.mubr.bf16.mxu1 %v15142_v12  ;;  %v4018_v30 = vadd.f32 %v4017_v25, %v15182_v46  ;;  %4311 = vmatprep.subr.bf16.mxu0 %v13216_v6  ;;  %v1055_v6 = vld [vmem:[#allocation8 + $0x870] sm:$0xff] }
 0x275   :  { %v4019_v34 = vpop.f32.mrf.mxu0  ;;  %4352 = vmatprep.subr.bf16.mxu1 %v13344_v13  ;;  %v4060_v0 = vpop.f32.mrf.mxu1  ;;  %v13311_v13 = vcombine.low %v1187_v42, %v1191_v4  ;;  %v13176_v20 = vcombine.high %v1051_v5, %v1055_v6  ;;  %v1043_v22 = vld [vmem:[#allocation8 + $0x810] sm:$0xff] }
 0x276   :  { %v15192_v40 = vadd.f32 %v4058_v31, %v4018_v30  ;;  %4312 = vmatpush1.bf16.msra.mxu0 %v13215_v23  ;;  %v1047_v16 = vld [vmem:[#allocation8 + $0x830] sm:$0xff] }
 0x277   :  { %4353 = vmatpush1.bf16.msra.mxu1 %v13343_v26  ;;  %v4020_v49 = vpop.f32.mrf.mxu0  ;;  %4313 = vmatprep.subr.bf16.mxu0 %v13208_v27  ;;  %v4061_v46 = vpop.f32.mrf.mxu1  ;;  %v1171_v23 = vld [vmem:[#allocation8 + $0xc10] sm:$0xff]  ;;  %v13175_v26 = vcombine.low %v1051_v5, %v1055_v6  ;;  %v13303_v27 = vcombine.low %v1179_v8, %v1183_v9  ;;  %v13168_v30 = vcombine.high %v1043_v22, %v1047_v16 }
 0x278   :  { %4354 = vmatprep.subr.bf16.mxu1 %v13336_v24  ;;  %v1175_v25 = vld [vmem:[#allocation8 + $0xc30] sm:$0xff]  ;;  %v13167_v11 = vcombine.low %v1043_v22, %v1047_v16 }
 0x279   :  { %v13296_v31 = vcombine.high %v1171_v23, %v1175_v25  ;;  %v1163_v24 = vld [vmem:[#allocation8 + $0xbd0] sm:$0xff]  ;;  %v13295_v39 = vcombine.low %v1171_v23, %v1175_v25 }
 0x27a   :  { %4314 = vmatpush1.bf16.msra.mxu0 %v13207_v45  ;;  %v1295_v34 = vld [vmem:[#allocation8 + $0xff0] sm:$0xff]  ;;  %v13288_v0 = vcombine.high %v1163_v24, %v1167_v55 }
 0x27b   :  { %4355 = vmatpush1.bf16.msra.mxu1 %v13335_v52  ;;  %4315 = vmatprep.subr.bf16.mxu0 %v13200_v53  ;;  %v13416_v45 = vcombine.high %v1291_v33, %v1295_v34  ;;  %v1155_v49 = vld [vmem:[#allocation8 + $0xb90] sm:$0xff]  ;;  %v13415_v56 = vcombine.low %v1291_v33, %v1295_v34 }
 0x27c   :  { %4356 = vmatprep.subr.bf16.mxu1 %v13328_v54  ;;  %v1159_v52 = vld [vmem:[#allocation8 + $0xbb0] sm:$0xff]  ;;  %v13287_v54 = vcombine.low %v1163_v24, %v1167_v55 }
 0x27d   :  { %v1283_v53 = vld [vmem:[#allocation8 + $0xf90] sm:$0xff]  ;;  %v13280_v57 = vcombine.high %v1155_v49, %v1159_v52 }
 0x27e   :  { %4316 = vmatpush1.bf16.msra.mxu0 %v13199_v60  ;;  %v1287_v46 = vld [vmem:[#allocation8 + $0xfb0] sm:$0xff] }
 0x27f   :  { %4357 = vmatpush1.bf16.msra.mxu1 %v13327_v1  ;;  %4317 = vmatprep.subr.bf16.mxu0 %v13192_v2  ;;  %v13408_v58 = vcombine.high %v1283_v53, %v1287_v46  ;;  %v1147_v59 = vld [vmem:[#allocation8 + $0xb50] sm:$0xff]  ;;  %v13407_v36 = vcombine.low %v1283_v53, %v1287_v46 }
 0x280   :  { %4358 = vmatprep.subr.bf16.mxu1 %v13320_v3  ;;  %v1151_v60 = vld [vmem:[#allocation8 + $0xb70] sm:$0xff]  ;;  %v13279_v3 = vcombine.low %v1155_v49, %v1159_v52 }
 0x281   :  { %v1275_v1 = vld [vmem:[#allocation8 + $0xf50] sm:$0xff]  ;;  %v13272_v37 = vcombine.high %v1147_v59, %v1151_v60 }
 0x282   :  { %4318 = vmatpush1.bf16.msra.mxu0 %v13191_v38  ;;  %v1279_v2 = vld [vmem:[#allocation8 + $0xf70] sm:$0xff] }
 0x283   :  { %4359 = vmatpush1.bf16.msra.mxu1 %v13319_v41  ;;  %4319 = vmatprep.subr.bf16.mxu0 %v13184_v43  ;;  %v13400_v42 = vcombine.high %v1275_v1, %v1279_v2  ;;  %v1139_v4 = vld [vmem:[#allocation8 + $0xb10] sm:$0xff]  ;;  %v13399_v5 = vcombine.low %v1275_v1, %v1279_v2  ;;  %v844_v2 = vld [vmem:[#allocation8 + $0x1d8] sm:$0xff] }
 0x284   :  { %4360 = vmatprep.subr.bf16.mxu1 %v13312_v14  ;;  %v1143_v38 = vld [vmem:[#allocation8 + $0xb30] sm:$0xff]  ;;  %v13271_v14 = vcombine.low %v1147_v59, %v1151_v60 }
 0x285   :  { %v1267_v41 = vld [vmem:[#allocation8 + $0xf10] sm:$0xff]  ;;  %v13264_v6 = vcombine.high %v1139_v4, %v1143_v38 }
 0x286   :  { %4320 = vmatpush1.bf16.msra.mxu0 %v13183_v10  ;;  %v1271_v43 = vld [vmem:[#allocation8 + $0xf30] sm:$0xff] }
 0x287   :  { %4361 = vmatpush1.bf16.msra.mxu1 %v13311_v13  ;;  %4321 = vmatprep.subr.bf16.mxu0 %v13176_v20  ;;  %v13392_v8 = vcombine.high %v1267_v41, %v1271_v43  ;;  %v1131_v9 = vld [vmem:[#allocation8 + $0xad0] sm:$0xff]  ;;  %v13391_v22 = vcombine.low %v1267_v41, %v1271_v43  ;;  %v836_v43 = vld [vmem:[#allocation8 + $0x198] sm:$0xff] }
 0x288   :  { %4362 = vmatprep.subr.bf16.mxu1 %v13304_v21  ;;  %v1135_v10 = vld [vmem:[#allocation8 + $0xaf0] sm:$0xff]  ;;  %v13263_v21 = vcombine.low %v1139_v4, %v1143_v38 }
 0x289   :  { %v1259_v13 = vld [vmem:[#allocation8 + $0xed0] sm:$0xff]  ;;  %v13256_v16 = vcombine.high %v1131_v9, %v1135_v10 }
 0x28a   :  { %4322 = vmatpush1.bf16.msra.mxu0 %v13175_v26  ;;  %v1263_v20 = vld [vmem:[#allocation8 + $0xef0] sm:$0xff] }
 0x28b   :  { %4363 = vmatpush1.bf16.msra.mxu1 %v13303_v27  ;;  %4323 = vmatprep.subr.bf16.mxu0 %v13168_v30  ;;  %v13384_v23 = vcombine.high %v1259_v13, %v1263_v20  ;;  %v1123_v25 = vld [vmem:[#allocation8 + $0xa90] sm:$0xff]  ;;  %v13383_v24 = vcombine.low %v1259_v13, %v1263_v20  ;;  %v1314_v13 = vrot.slane %v15170_v62, %v15098_v19 }
 0x28c   :  { %4364 = vmatprep.subr.bf16.mxu1 %v13296_v31  ;;  %v1127_v26 = vld [vmem:[#allocation8 + $0xab0] sm:$0xff]  ;;  %v13255_v31 = vcombine.low %v1131_v9, %v1135_v10  ;;  %v968_v9 = vld [vmem:[#allocation8 + $0x5b8] sm:$0xff] }
 0x28d   :  { %v1251_v27 = vld [vmem:[#allocation8 + $0xe90] sm:$0xff]  ;;  %v13248_v55 = vcombine.high %v1123_v25, %v1127_v26 }
 0x28e   :  { %4324 = vmatpush1.bf16.msra.mxu0 %v13167_v11  ;;  %v1255_v30 = vld [vmem:[#allocation8 + $0xeb0] sm:$0xff] }
 0x28f   :  { %4365 = vmatpush1.bf16.msra.mxu1 %v13295_v39  ;;  %4325 = vmatprep.subr.bf16.mxu0 %v13288_v0  ;;  %v13376_v33 = vcombine.high %v1251_v27, %v1255_v30  ;;  %v1115_v34 = vld [vmem:[#allocation8 + $0xa50] sm:$0xff]  ;;  %v13375_v49 = vcombine.low %v1251_v27, %v1255_v30 }
 0x290   :  { %4366 = vmatprep.subr.bf16.mxu1 %v13416_v45  ;;  %v1119_v11 = vld [vmem:[#allocation8 + $0xa70] sm:$0xff]  ;;  %v13247_v45 = vcombine.low %v1123_v25, %v1127_v26  ;;  %v956_v25 = vld [vmem:[#allocation8 + $0x558] sm:$0xff] }
 0x291   :  { %v1243_v39 = vld [vmem:[#allocation8 + $0xe50] sm:$0xff]  ;;  %v13240_v52 = vcombine.high %v1115_v34, %v1119_v11  ;;  %v960_v26 = vld [vmem:[#allocation8 + $0x578] sm:$0xff] }
 0x292   :  { %4326 = vmatpush2.bf16.msra.mxu0 %v13287_v54  ;;  %v1247_v0 = vld [vmem:[#allocation8 + $0xe70] sm:$0xff] }
 0x293   :  { %4367 = vmatpush2.bf16.msra.mxu1 %v13415_v56  ;;  %4327 = vmatprep.subr.bf16.mxu0 %v13280_v57  ;;  %v13368_v53 = vcombine.high %v1243_v39, %v1247_v0  ;;  %v1107_v46 = vld [vmem:[#allocation8 + $0xa10] sm:$0xff]  ;;  %v13367_v59 = vcombine.low %v1243_v39, %v1247_v0  ;;  %v13082_v39 = vcombine.high %v956_v25, %v960_v26  ;;  %v820_v0 = vld [vmem:[#allocation8 + $0x118] sm:$0xff] }
 0x294   :  { %4368 = vmatprep.subr.bf16.mxu1 %v13408_v58  ;;  %v1111_v54 = vld [vmem:[#allocation8 + $0xa30] sm:$0xff]  ;;  %v13239_v58 = vcombine.low %v1115_v34, %v1119_v11 }
 0x295   :  { %v1235_v56 = vld [vmem:[#allocation8 + $0xe10] sm:$0xff]  ;;  %v13232_v60 = vcombine.high %v1107_v46, %v1111_v54 }
 0x296   :  { %4328 = vmatpush2.bf16.msra.mxu0 %v13279_v3  ;;  %v1239_v57 = vld [vmem:[#allocation8 + $0xe30] sm:$0xff]  ;;  %v848_v3 = vld [vmem:[#allocation8 + $0x1f8] sm:$0xff] }
 0x297   :  { %4369 = vmatpush2.bf16.msra.mxu1 %v13407_v36  ;;  %4329 = vmatprep.subr.bf16.mxu0 %v13272_v37  ;;  %v13360_v1 = vcombine.high %v1235_v56, %v1239_v57  ;;  %v972_v36 = vld [vmem:[#allocation8 + $0x5d8] sm:$0xff]  ;;  %v13359_v4 = vcombine.low %v1235_v56, %v1239_v57  ;;  %v12970_v38 = vcombine.high %v844_v2, %v848_v3 }
 0x298   :  { %4370 = vmatprep.subr.bf16.mxu1 %v13400_v42  ;;  %v976_v37 = vld [vmem:[#allocation8 + $0x5f8] sm:$0xff]  ;;  %v13231_v42 = vcombine.low %v1107_v46, %v1111_v54  ;;  %v13081_v57 = vcombine.low %v956_v25, %v960_v26 }
 0x299   :  { %v13098_v41 = vcombine.high %v972_v36, %v976_v37  ;;  %v13097_v10 = vcombine.low %v972_v36, %v976_v37  ;;  %v788_v26 = vld [vmem:[#allocation8 + $0x18] sm:$0xff] }
 0x29a   :  { %4330 = vmatpush2.bf16.msra.mxu0 %v13271_v14  ;;  %v840_v14 = vld [vmem:[#allocation8 + $0x1b8] sm:$0xff] }
 0x29b   :  { %4371 = vmatpush2.bf16.msra.mxu1 %v13399_v5  ;;  %4331 = vmatprep.subr.bf16.mxu0 %v13264_v6  ;;  %v1310_v5 = vrot.slane %v15170_v62, %v15092_v17  ;;  %v12969_v6 = vcombine.low %v844_v2, %v848_v3  ;;  %v12962_v20 = vcombine.high %v836_v43, %v840_v14  ;;  %v940_v2 = vld [vmem:[#allocation8 + $0x4d8] sm:$0xff] }
 0x29c   :  { %4372 = vmatprep.subr.bf16.mxu1 %v13392_v8  ;;  %v964_v8 = vld [vmem:[#allocation8 + $0x598] sm:$0xff] }
 0x29d   :  { %v13089_v62 = vcombine.low %v964_v8, %v968_v9  ;;  %v944_v3 = vld [vmem:[#allocation8 + $0x4f8] sm:$0xff] }
 0x29e   :  { %4332 = vmatpush2.bf16.msra.mxu0 %v13263_v21  ;;  %v828_v21 = vld [vmem:[#allocation8 + $0x158] sm:$0xff] }
 0x29f   :  { %4373 = vmatpush2.bf16.msra.mxu1 %v13391_v22  ;;  %4333 = vmatprep.subr.bf16.mxu0 %v13256_v16  ;;  %v832_v22 = vld [vmem:[#allocation8 + $0x178] sm:$0xff] }
 0x2a0   :  { %4374 = vmatprep.subr.bf16.mxu1 %v13384_v23  ;;  %v13090_v23 = vcombine.high %v964_v8, %v968_v9  ;;  %v12953_v54 = vcombine.low %v828_v21, %v832_v22 }
 0x2a2   :  { %4334 = vmatpush2.bf16.msra.mxu0 %v13255_v31  ;;  %v12961_v31 = vcombine.low %v836_v43, %v840_v14  ;;  %v932_v43 = vld [vmem:[#allocation8 + $0x498] sm:$0xff] }
 0x2a3   :  { %4375 = vmatpush2.bf16.msra.mxu1 %v13383_v24  ;;  %4335 = vmatprep.subr.bf16.mxu0 %v13248_v55  ;;  %v12954_v55 = vcombine.high %v828_v21, %v832_v22  ;;  %v936_v14 = vld [vmem:[#allocation8 + $0x4b8] sm:$0xff] }
 0x2a4   :  { %4376 = vmatprep.subr.bf16.mxu1 %v13376_v33  ;;  %v13058_v9 = vcombine.high %v932_v43, %v936_v14  ;;  %v928_v21 = vld [vmem:[#allocation8 + $0x478] sm:$0xff] }
 0x2a6   :  { %4336 = vmatpush2.bf16.msra.mxu0 %v13247_v45  ;;  %v824_v45 = vld [vmem:[#allocation8 + $0x138] sm:$0xff] }
 0x2a7   :  { %4377 = vmatpush2.bf16.msra.mxu1 %v13375_v49  ;;  %4337 = vmatprep.subr.bf16.mxu0 %v13240_v52  ;;  %v948_v52 = vld [vmem:[#allocation8 + $0x518] sm:$0xff]  ;;  %v12945_v36 = vcombine.low %v820_v0, %v824_v45 }
 0x2a8   :  { %4378 = vmatprep.subr.bf16.mxu1 %v13368_v53  ;;  %v952_v53 = vld [vmem:[#allocation8 + $0x538] sm:$0xff] }
 0x2a9   :  { %v13073_v37 = vcombine.low %v948_v52, %v952_v53 }
 0x2aa   :  { %4338 = vmatpush2.bf16.msra.mxu0 %v13239_v58 }
 0x2ab   :  { %4379 = vmatpush2.bf16.msra.mxu1 %v13367_v59  ;;  %4339 = vmatprep.subr.bf16.mxu0 %v13232_v60  ;;  %v13074_v59 = vcombine.high %v948_v52, %v952_v53  ;;  %v812_v60 = vld [vmem:[#allocation8 + $0xd8] sm:$0xff] }
 0x2ac   :  { %4380 = vmatprep.subr.bf16.mxu1 %v13360_v1  ;;  %v816_v1 = vld [vmem:[#allocation8 + $0xf8] sm:$0xff] }
 0x2ae   :  { %4340 = vmatpush2.bf16.msra.mxu0 %v13231_v42  ;;  %v12938_v42 = vcombine.high %v812_v60, %v816_v1 }
 0x2af   :  { %4381 = vmatpush2.bf16.msra.mxu1 %v13359_v4  ;;  %4391 = vmatprep.subr.bf16.mxu0 %v12970_v38  ;;  %v13066_v4 = vcombine.high %v940_v2, %v944_v3  ;;  %v804_v38 = vld [vmem:[#allocation8 + $0x98] sm:$0xff] }
 0x2b0   :  { %4432 = vmatprep.subr.bf16.mxu1 %v13098_v41  ;;  %v808_v41 = vld [vmem:[#allocation8 + $0xb8] sm:$0xff] }
 0x2b1   :  { %v4097_v16 = vpop.f32.mrf.mxu0  ;;  %4342 = vmatmul.mubr.bf16.vlgmr.msra.gmra.mxu0 %v15160_v44  ;;  %v12930_v8 = vcombine.high %v804_v38, %v808_v41  ;;  %v12929_v22 = vcombine.low %v804_v38, %v808_v41 }
 0x2b2   :  { %v4098_v27 = vadd.f32 %v4097_v16, %v1310_v5  ;;  %v4138_v30 = vpop.f32.mrf.mxu1  ;;  %4383 = vmatmul.mubr.bf16.vlgmr.msra.gmra.mxu1 %v15158_v35  ;;  %4392 = vmatpush1.bf16.msra.mxu0 %v12969_v6  ;;  %v12937_v5 = vcombine.low %v812_v60, %v816_v1  ;;  %v13065_v6 = vcombine.low %v940_v2, %v944_v3  ;;  %v892_v2 = vld [vmem:[#allocation8 + $0x358] sm:$0xff] }
 0x2b3   :  { %4423 = vmatprep.mubr.bf16.mxu0 %v15110_v48  ;;  %4433 = vmatpush1.bf16.msra.mxu1 %v13097_v10  ;;  %v4099_v24 = vpop.f32.mrf.mxu0  ;;  %v796_v10 = vld [vmem:[#allocation8 + $0x58] sm:$0xff]  ;;  %v13057_v16 = vcombine.low %v932_v43, %v936_v14 }
 0x2b4   :  { %v15201_v33 = vadd.f32 %v4138_v30, %v4098_v27  ;;  %4464 = vmatprep.mubr.bf16.mxu1 %v15114_v51  ;;  %v4100_v34 = vadd.f32 %v4099_v24, %v1314_v13  ;;  %v4140_v11 = vpop.f32.mrf.mxu1  ;;  %4393 = vmatprep.subr.bf16.mxu0 %v12962_v20  ;;  %v12946_v51 = vcombine.high %v820_v0, %v824_v45  ;;  %v800_v13 = vld [vmem:[#allocation8 + $0x78] sm:$0xff] }
 0x2b5   :  { %v4101_v49 = vpop.f32.mrf.mxu0  ;;  %4434 = vmatprep.subr.bf16.mxu1 %v13090_v23  ;;  %v924_v20 = vld [vmem:[#allocation8 + $0x458] sm:$0xff]  ;;  %v12922_v23 = vcombine.high %v796_v10, %v800_v13  ;;  %v12921_v24 = vcombine.low %v796_v10, %v800_v13 }
 0x2b6   :  { %v15204_v46 = vadd.f32 %v4140_v11, %v4100_v34  ;;  %v4142_v48 = vpop.f32.mrf.mxu1  ;;  %4394 = vmatpush1.bf16.msra.mxu0 %v12961_v31  ;;  %v13050_v25 = vcombine.high %v924_v20, %v928_v21  ;;  %v792_v27 = vld [vmem:[#allocation8 + $0x38] sm:$0xff] }
 0x2b7   :  { %4435 = vmatpush1.bf16.msra.mxu1 %v13089_v62  ;;  %v4102_v56 = vpop.f32.mrf.mxu0  ;;  %4395 = vmatprep.subr.bf16.mxu0 %v12954_v55  ;;  %v916_v30 = vld [vmem:[#allocation8 + $0x418] sm:$0xff]  ;;  %v13049_v62 = vcombine.low %v924_v20, %v928_v21  ;;  %v12914_v55 = vcombine.high %v788_v26, %v792_v27  ;;  %v12913_v49 = vcombine.low %v788_v26, %v792_v27 }
 0x2b8   :  { %v4143_v58 = vpop.f32.mrf.mxu1  ;;  %4436 = vmatprep.subr.bf16.mxu1 %v13082_v39  ;;  %v920_v31 = vld [vmem:[#allocation8 + $0x438] sm:$0xff] }
 0x2b9   :  { %v13042_v34 = vcombine.high %v916_v30, %v920_v31  ;;  %v908_v11 = vld [vmem:[#allocation8 + $0x3d8] sm:$0xff]  ;;  %v13041_v52 = vcombine.low %v916_v30, %v920_v31 }
 0x2ba   :  { %4396 = vmatpush1.bf16.msra.mxu0 %v12953_v54  ;;  %v912_v39 = vld [vmem:[#allocation8 + $0x3f8] sm:$0xff] }
 0x2bb   :  { %4437 = vmatpush1.bf16.msra.mxu1 %v13081_v57  ;;  %4397 = vmatprep.subr.bf16.mxu0 %v12946_v51  ;;  %v1036_v0 = vld [vmem:[#allocation8 + $0x7d8] sm:$0xff]  ;;  %v13034_v53 = vcombine.high %v908_v11, %v912_v39  ;;  %v13033_v58 = vcombine.low %v908_v11, %v912_v39 }
 0x2bc   :  { %4438 = vmatprep.subr.bf16.mxu1 %v13074_v59  ;;  %v1040_v45 = vld [vmem:[#allocation8 + $0x7f8] sm:$0xff] }
 0x2bd   :  { %v13162_v48 = vcombine.high %v1036_v0, %v1040_v45  ;;  %v900_v54 = vld [vmem:[#allocation8 + $0x398] sm:$0xff]  ;;  %v13161_v59 = vcombine.low %v1036_v0, %v1040_v45 }
 0x2be   :  { %4398 = vmatpush1.bf16.msra.mxu0 %v12945_v36  ;;  %v904_v56 = vld [vmem:[#allocation8 + $0x3b8] sm:$0xff] }
 0x2bf   :  { %4439 = vmatpush1.bf16.msra.mxu1 %v13073_v37  ;;  %4399 = vmatprep.subr.bf16.mxu0 %v12938_v42  ;;  %v1028_v57 = vld [vmem:[#allocation8 + $0x798] sm:$0xff]  ;;  %v13026_v60 = vcombine.high %v900_v54, %v904_v56  ;;  %v13025_v42 = vcombine.low %v900_v54, %v904_v56 }
 0x2c0   :  { %4440 = vmatprep.subr.bf16.mxu1 %v13066_v4  ;;  %v1032_v51 = vld [vmem:[#allocation8 + $0x7b8] sm:$0xff] }
 0x2c1   :  { %v13154_v1 = vcombine.high %v1028_v57, %v1032_v51  ;;  %v896_v3 = vld [vmem:[#allocation8 + $0x378] sm:$0xff]  ;;  %v13153_v4 = vcombine.low %v1028_v57, %v1032_v51 }
 0x2c2   :  { %4400 = vmatpush1.bf16.msra.mxu0 %v12937_v5  ;;  %v1020_v36 = vld [vmem:[#allocation8 + $0x758] sm:$0xff]  ;;  %v13018_v38 = vcombine.high %v892_v2, %v896_v3 }
 0x2c3   :  { %4441 = vmatpush1.bf16.msra.mxu1 %v13065_v6  ;;  %4401 = vmatprep.subr.bf16.mxu0 %v12930_v8  ;;  %v1024_v37 = vld [vmem:[#allocation8 + $0x778] sm:$0xff]  ;;  %v13017_v8 = vcombine.low %v892_v2, %v896_v3 }
 0x2c4   :  { %4442 = vmatprep.subr.bf16.mxu1 %v13058_v9  ;;  %v13146_v41 = vcombine.high %v1020_v36, %v1024_v37  ;;  %v884_v43 = vld [vmem:[#allocation8 + $0x318] sm:$0xff]  ;;  %v13145_v9 = vcombine.low %v1020_v36, %v1024_v37 }
 0x2c5   :  { %v888_v14 = vld [vmem:[#allocation8 + $0x338] sm:$0xff] }
 0x2c6   :  { %4402 = vmatpush1.bf16.msra.mxu0 %v12929_v22  ;;  %v1012_v5 = vld [vmem:[#allocation8 + $0x718] sm:$0xff]  ;;  %v13010_v10 = vcombine.high %v884_v43, %v888_v14 }
 0x2c7   :  { %4443 = vmatpush1.bf16.msra.mxu1 %v13057_v16  ;;  %4403 = vmatprep.subr.bf16.mxu0 %v12922_v23  ;;  %v1016_v6 = vld [vmem:[#allocation8 + $0x738] sm:$0xff]  ;;  %v13009_v23 = vcombine.low %v884_v43, %v888_v14 }
 0x2c8   :  { %4444 = vmatprep.subr.bf16.mxu1 %v13050_v25  ;;  %v13138_v13 = vcombine.high %v1012_v5, %v1016_v6  ;;  %v876_v20 = vld [vmem:[#allocation8 + $0x2d8] sm:$0xff]  ;;  %v13137_v25 = vcombine.low %v1012_v5, %v1016_v6 }
 0x2c9   :  { %v880_v21 = vld [vmem:[#allocation8 + $0x2f8] sm:$0xff] }
 0x2ca   :  { %4404 = vmatpush1.bf16.msra.mxu0 %v12921_v24  ;;  %v1004_v22 = vld [vmem:[#allocation8 + $0x6d8] sm:$0xff]  ;;  %v13002_v26 = vcombine.high %v876_v20, %v880_v21 }
 0x2cb   :  { %4445 = vmatpush1.bf16.msra.mxu1 %v13049_v62  ;;  %4405 = vmatprep.subr.bf16.mxu0 %v12914_v55  ;;  %v1008_v16 = vld [vmem:[#allocation8 + $0x6f8] sm:$0xff]  ;;  %v13001_v55 = vcombine.low %v876_v20, %v880_v21 }
 0x2cc   :  { %4446 = vmatprep.subr.bf16.mxu1 %v13042_v34  ;;  %v13130_v27 = vcombine.high %v1004_v22, %v1008_v16  ;;  %v868_v30 = vld [vmem:[#allocation8 + $0x298] sm:$0xff]  ;;  %v13129_v34 = vcombine.low %v1004_v22, %v1008_v16 }
 0x2cd   :  { %v872_v31 = vld [vmem:[#allocation8 + $0x2b8] sm:$0xff] }
 0x2ce   :  { %4406 = vmatpush1.bf16.msra.mxu0 %v12913_v49  ;;  %v996_v24 = vld [vmem:[#allocation8 + $0x698] sm:$0xff]  ;;  %v12994_v11 = vcombine.high %v868_v30, %v872_v31 }
 0x2cf   :  { %4447 = vmatpush1.bf16.msra.mxu1 %v13041_v52  ;;  %4407 = vmatprep.subr.bf16.mxu0 %v13034_v53  ;;  %v1000_v62 = vld [vmem:[#allocation8 + $0x6b8] sm:$0xff]  ;;  %v12993_v53 = vcombine.low %v868_v30, %v872_v31 }
 0x2d0   :  { %4448 = vmatprep.subr.bf16.mxu1 %v13162_v48  ;;  %v13122_v39 = vcombine.high %v996_v24, %v1000_v62  ;;  %v860_v0 = vld [vmem:[#allocation8 + $0x258] sm:$0xff]  ;;  %v13121_v48 = vcombine.low %v996_v24, %v1000_v62 }
 0x2d1   :  { %v864_v45 = vld [vmem:[#allocation8 + $0x278] sm:$0xff] }
 0x2d2   :  { %4408 = vmatpush2.bf16.msra.mxu0 %v13033_v58  ;;  %v988_v49 = vld [vmem:[#allocation8 + $0x658] sm:$0xff]  ;;  %v12986_v54 = vcombine.high %v860_v0, %v864_v45 }
 0x2d3   :  { %4449 = vmatpush2.bf16.msra.mxu1 %v13161_v59  ;;  %4409 = vmatprep.subr.bf16.mxu0 %v13026_v60  ;;  %v992_v52 = vld [vmem:[#allocation8 + $0x678] sm:$0xff]  ;;  %v12985_v60 = vcombine.low %v860_v0, %v864_v45 }
 0x2d4   :  { %4450 = vmatprep.subr.bf16.mxu1 %v13154_v1  ;;  %v13114_v56 = vcombine.high %v988_v49, %v992_v52  ;;  %v852_v57 = vld [vmem:[#allocation8 + $0x218] sm:$0xff]  ;;  %v13113_v1 = vcombine.low %v988_v49, %v992_v52 }
 0x2d5   :  { %v856_v51 = vld [vmem:[#allocation8 + $0x238] sm:$0xff] }
 0x2d6   :  { %4410 = vmatpush2.bf16.msra.mxu0 %v13025_v42  ;;  %v980_v58 = vld [vmem:[#allocation8 + $0x618] sm:$0xff]  ;;  %v12978_v2 = vcombine.high %v852_v57, %v856_v51 }
 0x2d7   :  { %4451 = vmatpush2.bf16.msra.mxu1 %v13153_v4  ;;  %4411 = vmatprep.subr.bf16.mxu0 %v13018_v38  ;;  %v984_v59 = vld [vmem:[#allocation8 + $0x638] sm:$0xff]  ;;  %v12977_v38 = vcombine.low %v852_v57, %v856_v51 }
 0x2d8   :  { %4452 = vmatprep.subr.bf16.mxu1 %v13146_v41  ;;  %v13106_v3 = vcombine.high %v980_v58, %v984_v59  ;;  %v1100_v36 = vld [vmem:[#allocation8 + $0x9d8] sm:$0xff]  ;;  %v13105_v41 = vcombine.low %v980_v58, %v984_v59 }
 0x2d9   :  { %v1104_v37 = vld [vmem:[#allocation8 + $0x9f8] sm:$0xff] }
 0x2da   :  { %4412 = vmatpush2.bf16.msra.mxu0 %v13017_v8  ;;  %v1228_v42 = vld [vmem:[#allocation8 + $0xdd8] sm:$0xff]  ;;  %v13226_v43 = vcombine.high %v1100_v36, %v1104_v37  ;;  %v13225_v8 = vcombine.low %v1100_v36, %v1104_v37 }
 0x2db   :  { %4453 = vmatpush2.bf16.msra.mxu1 %v13145_v9  ;;  %4413 = vmatprep.subr.bf16.mxu0 %v13010_v10  ;;  %v1232_v4 = vld [vmem:[#allocation8 + $0xdf8] sm:$0xff] }
 0x2dc   :  { %4454 = vmatprep.subr.bf16.mxu1 %v13138_v13  ;;  %v13354_v14 = vcombine.high %v1228_v42, %v1232_v4  ;;  %v1092_v5 = vld [vmem:[#allocation8 + $0x998] sm:$0xff]  ;;  %v13353_v13 = vcombine.low %v1228_v42, %v1232_v4 }
 0x2dd   :  { %v1096_v6 = vld [vmem:[#allocation8 + $0x9b8] sm:$0xff] }
 0x2de   :  { %4414 = vmatpush2.bf16.msra.mxu0 %v13009_v23  ;;  %v1220_v9 = vld [vmem:[#allocation8 + $0xd98] sm:$0xff]  ;;  %v13218_v20 = vcombine.high %v1092_v5, %v1096_v6  ;;  %v13217_v31 = vcombine.low %v1092_v5, %v1096_v6 }
 0x2df   :  { %4455 = vmatpush2.bf16.msra.mxu1 %v13137_v25  ;;  %4415 = vmatprep.subr.bf16.mxu0 %v13002_v26  ;;  %v1224_v10 = vld [vmem:[#allocation8 + $0xdb8] sm:$0xff] }
 0x2e0   :  { %4456 = vmatprep.subr.bf16.mxu1 %v13130_v27  ;;  %v1084_v21 = vld [vmem:[#allocation8 + $0x958] sm:$0xff]  ;;  %v13346_v23 = vcombine.high %v1220_v9, %v1224_v10  ;;  %v13345_v62 = vcombine.low %v1220_v9, %v1224_v10 }
 0x2e1   :  { %v1088_v22 = vld [vmem:[#allocation8 + $0x978] sm:$0xff] }
 0x2e2   :  { %4416 = vmatpush2.bf16.msra.mxu0 %v13001_v55  ;;  %v1212_v25 = vld [vmem:[#allocation8 + $0xd58] sm:$0xff]  ;;  %v13210_v55 = vcombine.high %v1084_v21, %v1088_v22  ;;  %v13209_v49 = vcombine.low %v1084_v21, %v1088_v22 }
 0x2e3   :  { %4457 = vmatpush2.bf16.msra.mxu1 %v13129_v34  ;;  %4417 = vmatprep.subr.bf16.mxu0 %v12994_v11  ;;  %v1216_v26 = vld [vmem:[#allocation8 + $0xd78] sm:$0xff] }
 0x2e4   :  { %4458 = vmatprep.subr.bf16.mxu1 %v13122_v39  ;;  %v1076_v11 = vld [vmem:[#allocation8 + $0x918] sm:$0xff] }
 0x2e5   :  { %v1080_v39 = vld [vmem:[#allocation8 + $0x938] sm:$0xff] }
 0x2e6   :  { %4418 = vmatpush2.bf16.msra.mxu0 %v12993_v53  ;;  %v1204_v0 = vld [vmem:[#allocation8 + $0xd18] sm:$0xff]  ;;  %v13337_v53 = vcombine.low %v1212_v25, %v1216_v26  ;;  %v13201_v59 = vcombine.low %v1076_v11, %v1080_v39 }
 0x2e7   :  { %4459 = vmatpush2.bf16.msra.mxu1 %v13121_v48  ;;  %4419 = vmatprep.subr.bf16.mxu0 %v12986_v54  ;;  %v1208_v45 = vld [vmem:[#allocation8 + $0xd38] sm:$0xff]  ;;  %v13202_v48 = vcombine.high %v1076_v11, %v1080_v39 }
 0x2e8   :  { %4460 = vmatprep.subr.bf16.mxu1 %v13114_v56  ;;  %v1068_v56 = vld [vmem:[#allocation8 + $0x8d8] sm:$0xff] }
 0x2e9   :  { %v1072_v57 = vld [vmem:[#allocation8 + $0x8f8] sm:$0xff] }
 0x2ea   :  { %4420 = vmatpush2.bf16.msra.mxu0 %v12985_v60  ;;  %v1196_v51 = vld [vmem:[#allocation8 + $0xcd8] sm:$0xff]  ;;  %v13329_v60 = vcombine.low %v1204_v0, %v1208_v45  ;;  %v13193_v4 = vcombine.low %v1068_v56, %v1072_v57 }
 0x2eb   :  { %4461 = vmatpush2.bf16.msra.mxu1 %v13113_v1  ;;  %4421 = vmatprep.subr.bf16.mxu0 %v12978_v2  ;;  %v1200_v58 = vld [vmem:[#allocation8 + $0xcf8] sm:$0xff]  ;;  %v13194_v1 = vcombine.high %v1068_v56, %v1072_v57 }
 0x2ec   :  { %4462 = vmatprep.subr.bf16.mxu1 %v13106_v3  ;;  %v13322_v2 = vcombine.high %v1196_v51, %v1200_v58  ;;  %v1060_v3 = vld [vmem:[#allocation8 + $0x898] sm:$0xff] }
 0x2ed   :  { %v1064_v36 = vld [vmem:[#allocation8 + $0x8b8] sm:$0xff] }
 0x2ee   :  { %4422 = vmatpush2.bf16.msra.mxu0 %v12977_v38  ;;  %v1188_v37 = vld [vmem:[#allocation8 + $0xc98] sm:$0xff]  ;;  %v13321_v38 = vcombine.low %v1196_v51, %v1200_v58  ;;  %v13185_v9 = vcombine.low %v1060_v3, %v1064_v36 }
 0x2ef   :  { %4463 = vmatpush2.bf16.msra.mxu1 %v13105_v41  ;;  %4473 = vmatprep.subr.bf16.mxu0 %v13226_v43  ;;  %v1192_v42 = vld [vmem:[#allocation8 + $0xcb8] sm:$0xff]  ;;  %v13186_v41 = vcombine.high %v1060_v3, %v1064_v36 }
 0x2f0   :  { %4514 = vmatprep.subr.bf16.mxu1 %v13354_v14  ;;  %v13314_v43 = vcombine.high %v1188_v37, %v1192_v42  ;;  %v1052_v14 = vld [vmem:[#allocation8 + $0x858] sm:$0xff]  ;;  %v13313_v10 = vcombine.low %v1188_v37, %v1192_v42 }
 0x2f1   :  { %v4179_v16 = vpop.f32.mrf.mxu0  ;;  %4424 = vmatmul.mubr.bf16.vlgmr.msra.gmra.mxu0 %v15112_v50  ;;  %v1056_v5 = vld [vmem:[#allocation8 + $0x878] sm:$0xff] }
 0x2f2   :  { %v4180_v27 = vadd.f32 %v4179_v16, %v15201_v33  ;;  %v4220_v30 = vpop.f32.mrf.mxu1  ;;  %4465 = vmatmul.mubr.bf16.vlgmr.msra.gmra.mxu1 %v15108_v47  ;;  %4474 = vmatpush1.bf16.msra.mxu0 %v13225_v8  ;;  %v13338_v33 = vcombine.high %v1212_v25, %v1216_v26  ;;  %v1180_v6 = vld [vmem:[#allocation8 + $0xc58] sm:$0xff]  ;;  %v13177_v25 = vcombine.low %v1052_v14, %v1056_v5 }
 0x2f3   :  { %4505 = vmatprep.mubr.bf16.mxu0 %v15140_v7  ;;  %4515 = vmatpush1.bf16.msra.mxu1 %v13353_v13  ;;  %v15210_v24 = vpop.f32.mrf.mxu0  ;;  %v1184_v8 = vld [vmem:[#allocation8 + $0xc78] sm:$0xff]  ;;  %v13178_v13 = vcombine.high %v1052_v14, %v1056_v5 }
 0x2f4   :  { %v15212_v34 = vadd.f32 %v4220_v30, %v4180_v27  ;;  %4546 = vmatprep.mubr.bf16.mxu1 %v15142_v12  ;;  %v15215_v50 = vpop.f32.mrf.mxu1  ;;  %4475 = vmatprep.subr.bf16.mxu0 %v13218_v20  ;;  %v13330_v12 = vcombine.high %v1204_v0, %v1208_v45  ;;  %v13306_v20 = vcombine.high %v1180_v6, %v1184_v8  ;;  %v1044_v21 = vld [vmem:[#allocation8 + $0x818] sm:$0xff] }
 0x2f5   :  { %v4183_v47 = vpop.f32.mrf.mxu0  ;;  %4516 = vmatprep.subr.bf16.mxu1 %v13346_v23  ;;  %v1048_v22 = vld [vmem:[#allocation8 + $0x838] sm:$0xff]  ;;  %v13305_v26 = vcombine.low %v1180_v6, %v1184_v8 }
 0x2f6   :  { %v4224_v7 = vpop.f32.mrf.mxu1  ;;  %4476 = vmatpush1.bf16.msra.mxu0 %v13217_v31  ;;  %v1172_v16 = vld [vmem:[#allocation8 + $0xc18] sm:$0xff]  ;;  %v13170_v27 = vcombine.high %v1044_v21, %v1048_v22  ;;  %v13169_v11 = vcombine.low %v1044_v21, %v1048_v22 }
 0x2f7   :  { %4517 = vmatpush1.bf16.msra.mxu1 %v13345_v62  ;;  %v4184_v52 = vpop.f32.mrf.mxu0  ;;  %4477 = vmatprep.subr.bf16.mxu0 %v13210_v55  ;;  %v1176_v23 = vld [vmem:[#allocation8 + $0xc38] sm:$0xff] }
 0x2f8   :  { %v4225_v54 = vpop.f32.mrf.mxu1  ;;  %4518 = vmatprep.subr.bf16.mxu1 %v13338_v33  ;;  %v13298_v30 = vcombine.high %v1172_v16, %v1176_v23  ;;  %v1164_v31 = vld [vmem:[#allocation8 + $0xbd8] sm:$0xff]  ;;  %v13297_v39 = vcombine.low %v1172_v16, %v1176_v23 }
 0x2f9   :  { %v1168_v62 = vld [vmem:[#allocation8 + $0xbf8] sm:$0xff] }
 0x2fa   :  { %4478 = vmatpush1.bf16.msra.mxu0 %v13209_v49  ;;  %v1292_v55 = vld [vmem:[#allocation8 + $0xfd8] sm:$0xff]  ;;  %v13290_v47 = vcombine.high %v1164_v31, %v1168_v62 }
 0x2fb   :  { %4519 = vmatpush1.bf16.msra.mxu1 %v13337_v53  ;;  %4479 = vmatprep.subr.bf16.mxu0 %v13202_v48  ;;  %v1296_v33 = vld [vmem:[#allocation8 + $0xff8] sm:$0xff]  ;;  %v13289_v53 = vcombine.low %v1164_v31, %v1168_v62 }
 0x2fc   :  { %4520 = vmatprep.subr.bf16.mxu1 %v13330_v12  ;;  %v13418_v0 = vcombine.high %v1292_v55, %v1296_v33  ;;  %v1156_v45 = vld [vmem:[#allocation8 + $0xb98] sm:$0xff]  ;;  %v13417_v48 = vcombine.low %v1292_v55, %v1296_v33 }
 0x2fd   :  { %v1160_v7 = vld [vmem:[#allocation8 + $0xbb8] sm:$0xff] }
 0x2fe   :  { %4480 = vmatpush1.bf16.msra.mxu0 %v13201_v59  ;;  %v1284_v49 = vld [vmem:[#allocation8 + $0xf98] sm:$0xff]  ;;  %v13282_v54 = vcombine.high %v1156_v45, %v1160_v7  ;;  %v13281_v59 = vcombine.low %v1156_v45, %v1160_v7 }
 0x2ff   :  { %4521 = vmatpush1.bf16.msra.mxu1 %v13329_v60  ;;  %4481 = vmatprep.subr.bf16.mxu0 %v13194_v1  ;;  %v1288_v52 = vld [vmem:[#allocation8 + $0xfb8] sm:$0xff] }
 0x300   :  { %4522 = vmatprep.subr.bf16.mxu1 %v13322_v2  ;;  %v13410_v12 = vcombine.high %v1284_v49, %v1288_v52  ;;  %v1148_v56 = vld [vmem:[#allocation8 + $0xb58] sm:$0xff]  ;;  %v13409_v60 = vcombine.low %v1284_v49, %v1288_v52 }
 0x301   :  { %v1152_v57 = vld [vmem:[#allocation8 + $0xb78] sm:$0xff] }
 0x302   :  { %4482 = vmatpush1.bf16.msra.mxu0 %v13193_v4  ;;  %v1276_v51 = vld [vmem:[#allocation8 + $0xf58] sm:$0xff]  ;;  %v13274_v1 = vcombine.high %v1148_v56, %v1152_v57  ;;  %v13273_v4 = vcombine.low %v1148_v56, %v1152_v57  ;;  %v4627_v57 = vld [vmem:[#allocation11 + $0x1c0] sm:$0xff] }
 0x303   :  { %4523 = vmatpush1.bf16.msra.mxu1 %v13321_v38  ;;  %4483 = vmatprep.subr.bf16.mxu0 %v13186_v41  ;;  %v1280_v58 = vld [vmem:[#allocation8 + $0xf78] sm:$0xff] }
 0x304   :  { %4524 = vmatprep.subr.bf16.mxu1 %v13314_v43  ;;  %v13402_v2 = vcombine.high %v1276_v51, %v1280_v58  ;;  %v1140_v3 = vld [vmem:[#allocation8 + $0xb18] sm:$0xff]  ;;  %v13401_v38 = vcombine.low %v1276_v51, %v1280_v58  ;;  %v4631_v51 = vld [vmem:[#allocation11 + $0x1e0] sm:$0xff] }
 0x305   :  { %v1144_v36 = vld [vmem:[#allocation8 + $0xb38] sm:$0xff]  ;;  %v4755_v58 = vld [vmem:[#allocation11 + $0x5c0] sm:$0xff] }
 0x306   :  { %4484 = vmatpush1.bf16.msra.mxu0 %v13185_v9  ;;  %v1268_v37 = vld [vmem:[#allocation8 + $0xf18] sm:$0xff]  ;;  %v13266_v41 = vcombine.high %v1140_v3, %v1144_v36  ;;  %v13265_v9 = vcombine.low %v1140_v3, %v1144_v36  ;;  %v4556_v3 = vmax.f32 %v15192_v40, 0.0  ;;  %v4619_v36 = vld [vmem:[#allocation11 + $0x180] sm:$0xff] }
 0x307   :  { %4525 = vmatpush1.bf16.msra.mxu1 %v13313_v10  ;;  %4485 = vmatprep.subr.bf16.mxu0 %v13178_v13  ;;  %v1272_v42 = vld [vmem:[#allocation8 + $0xf38] sm:$0xff] }
 0x308   :  { %4526 = vmatprep.subr.bf16.mxu1 %v13306_v20  ;;  %v13394_v43 = vcombine.high %v1268_v37, %v1272_v42  ;;  %v1132_v14 = vld [vmem:[#allocation8 + $0xad8] sm:$0xff]  ;;  %v13393_v10 = vcombine.low %v1268_v37, %v1272_v42  ;;  %v4623_v37 = vld [vmem:[#allocation11 + $0x1a0] sm:$0xff]  ;;  %v15225_v40 = vpack.c.bf16 %v4556_v3, %v4556_v3 }
 0x309   :  { %v1136_v5 = vld [vmem:[#allocation8 + $0xaf8] sm:$0xff] }
 0x30a   :  { %4486 = vmatpush1.bf16.msra.mxu0 %v13177_v25  ;;  %v1260_v6 = vld [vmem:[#allocation8 + $0xed8] sm:$0xff]  ;;  %v13258_v13 = vcombine.high %v1132_v14, %v1136_v5  ;;  %v13257_v25 = vcombine.low %v1132_v14, %v1136_v5  ;;  %v13468_v5 = vcombine.high %v4619_v36, %v4623_v37 }
 0x30b   :  { %4527 = vmatpush1.bf16.msra.mxu1 %v13305_v26  ;;  %4487 = vmatprep.subr.bf16.mxu0 %v13170_v27  ;;  %v1264_v8 = vld [vmem:[#allocation8 + $0xef8] sm:$0xff] }
 0x30c   :  { %4528 = vmatprep.subr.bf16.mxu1 %v13298_v30  ;;  %v13386_v20 = vcombine.high %v1260_v6, %v1264_v8  ;;  %v1124_v21 = vld [vmem:[#allocation8 + $0xa98] sm:$0xff]  ;;  %v13385_v26 = vcombine.low %v1260_v6, %v1264_v8  ;;  %v4611_v6 = vld [vmem:[#allocation11 + $0x140] sm:$0xff] }
 0x30d   :  { %v1128_v22 = vld [vmem:[#allocation8 + $0xab8] sm:$0xff]  ;;  %v4615_v8 = vld [vmem:[#allocation11 + $0x160] sm:$0xff] }
 0x30e   :  { %4488 = vmatpush1.bf16.msra.mxu0 %v13169_v11  ;;  %v1252_v16 = vld [vmem:[#allocation8 + $0xe98] sm:$0xff]  ;;  %v13250_v27 = vcombine.high %v1124_v21, %v1128_v22  ;;  %v13249_v11 = vcombine.low %v1124_v21, %v1128_v22 }
 0x30f   :  { %4529 = vmatpush1.bf16.msra.mxu1 %v13297_v39  ;;  %4489 = vmatprep.subr.bf16.mxu0 %v13290_v47  ;;  %v1256_v23 = vld [vmem:[#allocation8 + $0xeb8] sm:$0xff] }
 0x310   :  { %4530 = vmatprep.subr.bf16.mxu1 %v13418_v0  ;;  %v13378_v30 = vcombine.high %v1252_v16, %v1256_v23  ;;  %v1116_v31 = vld [vmem:[#allocation8 + $0xa58] sm:$0xff]  ;;  %v13377_v39 = vcombine.low %v1252_v16, %v1256_v23  ;;  %v13467_v23 = vcombine.low %v4619_v36, %v4623_v37  ;;  %v4579_v37 = vld [vmem:[#allocation11 + $0x40] sm:$0xff] }
 0x311   :  { %v1120_v62 = vld [vmem:[#allocation8 + $0xa78] sm:$0xff] }
 0x312   :  { %4490 = vmatpush2.bf16.msra.mxu0 %v13289_v53  ;;  %v1244_v55 = vld [vmem:[#allocation8 + $0xe58] sm:$0xff]  ;;  %v13242_v47 = vcombine.high %v1116_v31, %v1120_v62  ;;  %v4182_v53 = vadd.f32 %v15210_v24, %v15204_v46  ;;  %v13476_v46 = vcombine.high %v4627_v57, %v4631_v51 }
 0x313   :  { %4531 = vmatpush2.bf16.msra.mxu1 %v13417_v48  ;;  %4491 = vmatprep.subr.bf16.mxu0 %v13282_v54  ;;  %v1248_v33 = vld [vmem:[#allocation8 + $0xe78] sm:$0xff]  ;;  %v13241_v48 = vcombine.low %v1116_v31, %v1120_v62  ;;  %v4603_v62 = vld [vmem:[#allocation11 + $0x100] sm:$0xff] }
 0x314   :  { %4532 = vmatprep.subr.bf16.mxu1 %v13410_v12  ;;  %v13370_v0 = vcombine.high %v1244_v55, %v1248_v33  ;;  %v1108_v45 = vld [vmem:[#allocation8 + $0xa18] sm:$0xff]  ;;  %v13369_v54 = vcombine.low %v1244_v55, %v1248_v33  ;;  %v4607_v55 = vld [vmem:[#allocation11 + $0x120] sm:$0xff] }
 0x315   :  { %v1112_v7 = vld [vmem:[#allocation8 + $0xa38] sm:$0xff]  ;;  %v4731_v33 = vld [vmem:[#allocation11 + $0x500] sm:$0xff] }
 0x316   :  { %4492 = vmatpush2.bf16.msra.mxu0 %v13281_v59  ;;  %v1236_v49 = vld [vmem:[#allocation8 + $0xe18] sm:$0xff]  ;;  %v13234_v12 = vcombine.high %v1108_v45, %v1112_v7  ;;  %v4759_v59 = vld [vmem:[#allocation11 + $0x5e0] sm:$0xff] }
 0x317   :  { %4533 = vmatpush2.bf16.msra.mxu1 %v13409_v60  ;;  %4493 = vmatprep.subr.bf16.mxu0 %v13274_v1  ;;  %v1240_v52 = vld [vmem:[#allocation8 + $0xe38] sm:$0xff]  ;;  %v4223_v60 = vadd.f32 %v15215_v50, %v4182_v53  ;;  %v13233_v1 = vcombine.low %v1108_v45, %v1112_v7  ;;  %v13604_v24 = vcombine.high %v4755_v58, %v4759_v59  ;;  %v4595_v53 = vld [vmem:[#allocation11 + $0xc0] sm:$0xff] }
 0x318   :  { %4534 = vmatprep.subr.bf16.mxu1 %v13402_v2  ;;  %v13362_v56 = vcombine.high %v1236_v49, %v1240_v52  ;;  %v13361_v2 = vcombine.low %v1236_v49, %v1240_v52  ;;  %v13475_v50 = vcombine.low %v4627_v57, %v4631_v51  ;;  %v13603_v14 = vcombine.low %v4755_v58, %v4759_v59  ;;  %v4587_v59 = vld [vmem:[#allocation11 + $0x80] sm:$0xff] }
 0x319   :  { %v4558_v42 = vmax.f32 %v4223_v60, 0.0  ;;  %v13452_v7 = vcombine.high %v4603_v62, %v4607_v55  ;;  %v4591_v60 = vld [vmem:[#allocation11 + $0xa0] sm:$0xff] }
 0x31a   :  { %4494 = vmatpush2.bf16.msra.mxu0 %v13273_v4  ;;  %v15221_v4 = vld [vmem:[#allocation10] sm:$0xff]  ;;  %v13436_v3 = vcombine.high %v4587_v59, %v4591_v60 }
 0x31b   :  { %4535 = vmatpush2.bf16.msra.mxu1 %v13401_v38  ;;  %4495 = vmatprep.subr.bf16.mxu0 %v13266_v41  ;;  %v1318_v38 = vrot.slane %v15221_v4, %v15150_v63  ;;  %v4747_v41 = vld [vmem:[#allocation11 + $0x580] sm:$0xff]  ;;  %v15228_v21 = vpack.c.bf16 %v4558_v42, %v4558_v42 }
 0x31c   :  { %4536 = vmatprep.subr.bf16.mxu1 %v13394_v43  ;;  %v4751_v43 = vld [vmem:[#allocation11 + $0x5a0] sm:$0xff] }
 0x31d   :  { %v4583_v42 = vld [vmem:[#allocation11 + $0x60] sm:$0xff] }
 0x31e   :  { %4496 = vmatpush2.bf16.msra.mxu0 %v13265_v9 }
 0x31f   :  { %4537 = vmatpush2.bf16.msra.mxu1 %v13393_v10  ;;  %4497 = vmatprep.subr.bf16.mxu0 %v13258_v13  ;;  %v13596_v10 = vcombine.high %v4747_v41, %v4751_v43  ;;  %v4739_v13 = vld [vmem:[#allocation11 + $0x540] sm:$0xff] }
 0x320   :  { %4538 = vmatprep.subr.bf16.mxu1 %v13386_v20  ;;  %v4743_v20 = vld [vmem:[#allocation11 + $0x560] sm:$0xff] }
 0x321   :  { %v13588_v31 = vcombine.high %v4739_v13, %v4743_v20  ;;  %v13587_v45 = vcombine.low %v4739_v13, %v4743_v20  ;;  %v13427_v13 = vcombine.low %v4579_v37, %v4583_v42 }
 0x322   :  { %4498 = vmatpush2.bf16.msra.mxu0 %v13257_v25 }
 0x323   :  { %4539 = vmatpush2.bf16.msra.mxu1 %v13385_v26  ;;  %4499 = vmatprep.subr.bf16.mxu0 %v13250_v27  ;;  %v13595_v26 = vcombine.low %v4747_v41, %v4751_v43  ;;  %v13460_v27 = vcombine.high %v4611_v6, %v4615_v8  ;;  %v13435_v41 = vcombine.low %v4587_v59, %v4591_v60  ;;  %v4667_v59 = vld [vmem:[#allocation11 + $0x300] sm:$0xff] }
 0x324   :  { %4540 = vmatprep.subr.bf16.mxu1 %v13378_v30  ;;  %v4671_v60 = vld [vmem:[#allocation11 + $0x320] sm:$0xff] }
 0x326   :  { %4500 = vmatpush2.bf16.msra.mxu0 %v13249_v11  ;;  %v4735_v11 = vld [vmem:[#allocation11 + $0x520] sm:$0xff] }
 0x327   :  { %4541 = vmatpush2.bf16.msra.mxu1 %v13377_v39  ;;  %4501 = vmatprep.subr.bf16.mxu0 %v13242_v47  ;;  %v13459_v47 = vcombine.low %v4611_v6, %v4615_v8  ;;  %v13580_v52 = vcombine.high %v4731_v33, %v4735_v11  ;;  %v13579_v57 = vcombine.low %v4731_v33, %v4735_v11  ;;  %v4571_v6 = vld [vmem:[#allocation11] sm:$0xff] }
 0x328   :  { %4542 = vmatprep.subr.bf16.mxu1 %v13370_v0  ;;  %v4575_v8 = vld [vmem:[#allocation11 + $0x20] sm:$0xff] }
 0x329   :  { %v4683_v11 = vld [vmem:[#allocation11 + $0x380] sm:$0xff] }
 0x32a   :  { %4502 = vmatpush2.bf16.msra.mxu0 %v13241_v48  ;;  %v4599_v48 = vld [vmem:[#allocation11 + $0xe0] sm:$0xff] }
 0x32b   :  { %4543 = vmatpush2.bf16.msra.mxu1 %v13369_v54  ;;  %4503 = vmatprep.subr.bf16.mxu0 %v13234_v12  ;;  %v4723_v54 = vld [vmem:[#allocation11 + $0x4c0] sm:$0xff]  ;;  %v13444_v51 = vcombine.high %v4595_v53, %v4599_v48 }
 0x32c   :  { %4544 = vmatprep.subr.bf16.mxu1 %v13362_v56  ;;  %v4727_v12 = vld [vmem:[#allocation11 + $0x4e0] sm:$0xff]  ;;  %v13451_v56 = vcombine.low %v4603_v62, %v4607_v55  ;;  %v13419_v62 = vcombine.low %v4571_v6, %v4575_v8 }
 0x32d   :  { %v13572_v58 = vcombine.high %v4723_v54, %v4727_v12 }
 0x32e   :  { %4504 = vmatpush2.bf16.msra.mxu0 %v13233_v1  ;;  %v4715_v1 = vld [vmem:[#allocation11 + $0x480] sm:$0xff] }
 0x32f   :  { %4545 = vmatpush2.bf16.msra.mxu1 %v13361_v2  ;;  %7685 = vmatprep.subr.bf16.mxu0 %v13476_v46  ;;  %v4719_v2 = vld [vmem:[#allocation11 + $0x4a0] sm:$0xff]  ;;  %v13443_v46 = vcombine.low %v4595_v53, %v4599_v48 }
 0x330   :  { %7726 = vmatprep.subr.bf16.mxu1 %v13604_v24  ;;  %v13571_v24 = vcombine.low %v4723_v54, %v4727_v12  ;;  %v13564_v36 = vcombine.high %v4715_v1, %v4719_v2  ;;  %v13563_v43 = vcombine.low %v4715_v1, %v4719_v2  ;;  %v4675_v53 = vld [vmem:[#allocation11 + $0x340] sm:$0xff] }
 0x331   :  { %v4261_v9 = vpop.f32.mrf.mxu0  ;;  %4506 = vmatmul.mubr.bf16.vlgmr.msra.gmra.mxu0 %v15160_v44  ;;  %v4679_v48 = vld [vmem:[#allocation11 + $0x360] sm:$0xff] }
 0x332   :  { %v4262_v22 = vadd.f32 %v4261_v9, %v1318_v38  ;;  %v4302_v16 = vpop.f32.mrf.mxu1  ;;  %4547 = vmatmul.mubr.bf16.vlgmr.msra.gmra.mxu1 %v15158_v35  ;;  %7686 = vmatpush1.bf16.msra.mxu0 %v13475_v50  ;;  %v4707_v38 = vld [vmem:[#allocation11 + $0x440] sm:$0xff] }
 0x333   :  { %7717 = vmatprep.mubr.bf16.mxu0 %v15225_v40  ;;  %7727 = vmatpush1.bf16.msra.mxu1 %v13603_v14  ;;  %v15232_v25 = vpop.f32.mrf.mxu0  ;;  %v4711_v50 = vld [vmem:[#allocation11 + $0x460] sm:$0xff]  ;;  %v13428_v14 = vcombine.high %v4579_v37, %v4583_v42 }
 0x334   :  { %v15234_v30 = vadd.f32 %v4302_v16, %v4262_v22  ;;  %7758 = vmatprep.mubr.bf16.mxu1 %v15228_v21  ;;  %v15237_v44 = vpop.f32.mrf.mxu1  ;;  %7687 = vmatprep.subr.bf16.mxu0 %v13468_v5  ;;  %v13556_v5 = vcombine.high %v4707_v38, %v4711_v50  ;;  %v4699_v9 = vld [vmem:[#allocation11 + $0x400] sm:$0xff]  ;;  %v13555_v20 = vcombine.low %v4707_v38, %v4711_v50 }
 0x335   :  { %v4265_v35 = vpop.f32.mrf.mxu0  ;;  %7728 = vmatprep.subr.bf16.mxu1 %v13596_v10  ;;  %v4703_v10 = vld [vmem:[#allocation11 + $0x420] sm:$0xff]  ;;  %v13420_v22 = vcombine.high %v4571_v6, %v4575_v8 }
 0x336   :  { %v4306_v39 = vpop.f32.mrf.mxu1  ;;  %7688 = vmatpush1.bf16.msra.mxu0 %v13467_v23  ;;  %v13548_v16 = vcombine.high %v4699_v9, %v4703_v10  ;;  %v4691_v23 = vld [vmem:[#allocation11 + $0x3c0] sm:$0xff]  ;;  %v13547_v55 = vcombine.low %v4699_v9, %v4703_v10 }
 0x337   :  { %7729 = vmatpush1.bf16.msra.mxu1 %v13595_v26  ;;  %v4266_v0 = vpop.f32.mrf.mxu0  ;;  %7689 = vmatprep.subr.bf16.mxu0 %v13460_v27  ;;  %v4695_v26 = vld [vmem:[#allocation11 + $0x3e0] sm:$0xff] }
 0x338   :  { %v4307_v49 = vpop.f32.mrf.mxu1  ;;  %7730 = vmatprep.subr.bf16.mxu1 %v13588_v31  ;;  %v4819_v27 = vld [vmem:[#allocation11 + $0x7c0] sm:$0xff]  ;;  %v13540_v35 = vcombine.high %v4691_v23, %v4695_v26 }
 0x339   :  { %v4823_v31 = vld [vmem:[#allocation11 + $0x7e0] sm:$0xff] }
 0x33a   :  { %7690 = vmatpush1.bf16.msra.mxu0 %v13459_v47  ;;  %v13668_v33 = vcombine.high %v4819_v27, %v4823_v31  ;;  %v4687_v39 = vld [vmem:[#allocation11 + $0x3a0] sm:$0xff] }
 0x33b   :  { %7731 = vmatpush1.bf16.msra.mxu1 %v13587_v45  ;;  %7691 = vmatprep.subr.bf16.mxu0 %v13452_v7  ;;  %v4811_v47 = vld [vmem:[#allocation11 + $0x780] sm:$0xff]  ;;  %v13539_v45 = vcombine.low %v4691_v23, %v4695_v26  ;;  %v13667_v7 = vcombine.low %v4819_v27, %v4823_v31  ;;  %v13532_v49 = vcombine.high %v4683_v11, %v4687_v39 }
 0x33c   :  { %7732 = vmatprep.subr.bf16.mxu1 %v13580_v52  ;;  %v4815_v0 = vld [vmem:[#allocation11 + $0x7a0] sm:$0xff] }
 0x33d   :  { %v13660_v52 = vcombine.high %v4811_v47, %v4815_v0  ;;  %v4803_v54 = vld [vmem:[#allocation11 + $0x740] sm:$0xff] }
 0x33e   :  { %7692 = vmatpush1.bf16.msra.mxu0 %v13451_v56  ;;  %v4807_v12 = vld [vmem:[#allocation11 + $0x760] sm:$0xff]  ;;  %v13531_v56 = vcombine.low %v4683_v11, %v4687_v39 }
 0x33f   :  { %7733 = vmatpush1.bf16.msra.mxu1 %v13579_v57  ;;  %7693 = vmatprep.subr.bf16.mxu0 %v13444_v51  ;;  %v13659_v57 = vcombine.low %v4811_v47, %v4815_v0  ;;  %v13524_v51 = vcombine.high %v4675_v53, %v4679_v48  ;;  %v4795_v1 = vld [vmem:[#allocation11 + $0x700] sm:$0xff] }
 0x340   :  { %7734 = vmatprep.subr.bf16.mxu1 %v13572_v58  ;;  %v13652_v58 = vcombine.high %v4803_v54, %v4807_v12  ;;  %v4799_v2 = vld [vmem:[#allocation11 + $0x720] sm:$0xff] }
 0x341   :  { %v4659_v37 = vld [vmem:[#allocation11 + $0x2c0] sm:$0xff] }
 0x342   :  { %7694 = vmatpush1.bf16.msra.mxu0 %v13443_v46  ;;  %v13523_v46 = vcombine.low %v4675_v53, %v4679_v48  ;;  %v4663_v42 = vld [vmem:[#allocation11 + $0x2e0] sm:$0xff] }
 0x343   :  { %7735 = vmatpush1.bf16.msra.mxu1 %v13571_v24  ;;  %7695 = vmatprep.subr.bf16.mxu0 %v13436_v3  ;;  %v13651_v24 = vcombine.low %v4803_v54, %v4807_v12  ;;  %v13516_v3 = vcombine.high %v4667_v59, %v4671_v60  ;;  %v4787_v38 = vld [vmem:[#allocation11 + $0x6c0] sm:$0xff] }
 0x344   :  { %7736 = vmatprep.subr.bf16.mxu1 %v13564_v36  ;;  %v13644_v36 = vcombine.high %v4795_v1, %v4799_v2  ;;  %v4791_v50 = vld [vmem:[#allocation11 + $0x6e0] sm:$0xff] }
 0x345   :  { %v4651_v6 = vld [vmem:[#allocation11 + $0x280] sm:$0xff] }
 0x346   :  { %7696 = vmatpush1.bf16.msra.mxu0 %v13435_v41  ;;  %v13515_v41 = vcombine.low %v4667_v59, %v4671_v60  ;;  %v4655_v8 = vld [vmem:[#allocation11 + $0x2a0] sm:$0xff]  ;;  %v4557_v60 = vmax.f32 %v15212_v34, 0.0 }
 0x347   :  { %7737 = vmatpush1.bf16.msra.mxu1 %v13563_v43  ;;  %7697 = vmatprep.subr.bf16.mxu0 %v13428_v14  ;;  %v13643_v43 = vcombine.low %v4795_v1, %v4799_v2  ;;  %v13508_v14 = vcombine.high %v4659_v37, %v4663_v42  ;;  %v4779_v9 = vld [vmem:[#allocation11 + $0x680] sm:$0xff] }
 0x348   :  { %7738 = vmatprep.subr.bf16.mxu1 %v13556_v5  ;;  %v13636_v5 = vcombine.high %v4787_v38, %v4791_v50  ;;  %v4783_v10 = vld [vmem:[#allocation11 + $0x6a0] sm:$0xff] }
 0x349   :  { %v4643_v23 = vld [vmem:[#allocation11 + $0x240] sm:$0xff] }
 0x34a   :  { %7698 = vmatpush1.bf16.msra.mxu0 %v13427_v13  ;;  %v13507_v13 = vcombine.low %v4659_v37, %v4663_v42  ;;  %v4647_v26 = vld [vmem:[#allocation11 + $0x260] sm:$0xff] }
 0x34b   :  { %7739 = vmatpush1.bf16.msra.mxu1 %v13555_v20  ;;  %7699 = vmatprep.subr.bf16.mxu0 %v13420_v22  ;;  %v13635_v20 = vcombine.low %v4787_v38, %v4791_v50  ;;  %v13500_v22 = vcombine.high %v4651_v6, %v4655_v8  ;;  %v4771_v27 = vld [vmem:[#allocation11 + $0x640] sm:$0xff]  ;;  %v15246_v38 = vpack.c.bf16 %v4557_v60, %v4557_v60 }
 0x34c   :  { %7740 = vmatprep.subr.bf16.mxu1 %v13548_v16  ;;  %v13628_v16 = vcombine.high %v4779_v9, %v4783_v10  ;;  %v4775_v31 = vld [vmem:[#allocation11 + $0x660] sm:$0xff] }
 0x34d   :  { %v4635_v11 = vld [vmem:[#allocation11 + $0x200] sm:$0xff] }
 0x34e   :  { %7700 = vmatpush1.bf16.msra.mxu0 %v13419_v62  ;;  %v13499_v62 = vcombine.low %v4651_v6, %v4655_v8  ;;  %v4639_v39 = vld [vmem:[#allocation11 + $0x220] sm:$0xff] }
 0x34f   :  { %7741 = vmatpush1.bf16.msra.mxu1 %v13547_v55  ;;  %7701 = vmatprep.subr.bf16.mxu0 %v13540_v35  ;;  %v13627_v55 = vcombine.low %v4779_v9, %v4783_v10  ;;  %v13492_v35 = vcombine.high %v4643_v23, %v4647_v26  ;;  %v4763_v47 = vld [vmem:[#allocation11 + $0x600] sm:$0xff] }
 0x350   :  { %7742 = vmatprep.subr.bf16.mxu1 %v13668_v33  ;;  %v13620_v33 = vcombine.high %v4771_v27, %v4775_v31  ;;  %v4767_v0 = vld [vmem:[#allocation11 + $0x620] sm:$0xff] }
 0x351   :  { %v4883_v53 = vld [vmem:[#allocation11 + $0x9c0] sm:$0xff] }
 0x352   :  { %7702 = vmatpush2.bf16.msra.mxu0 %v13539_v45  ;;  %v13491_v45 = vcombine.low %v4643_v23, %v4647_v26  ;;  %v4887_v48 = vld [vmem:[#allocation11 + $0x9e0] sm:$0xff] }
 0x353   :  { %7743 = vmatpush2.bf16.msra.mxu1 %v13667_v7  ;;  %7703 = vmatprep.subr.bf16.mxu0 %v13532_v49  ;;  %v13619_v7 = vcombine.low %v4771_v27, %v4775_v31  ;;  %v13484_v49 = vcombine.high %v4635_v11, %v4639_v39  ;;  %v5011_v54 = vld [vmem:[#allocation11 + $0xdc0] sm:$0xff]  ;;  %v13732_v59 = vcombine.high %v4883_v53, %v4887_v48 }
 0x354   :  { %7744 = vmatprep.subr.bf16.mxu1 %v13660_v52  ;;  %v13612_v52 = vcombine.high %v4763_v47, %v4767_v0  ;;  %v5015_v12 = vld [vmem:[#allocation11 + $0xde0] sm:$0xff] }
 0x355   :  { %v4875_v1 = vld [vmem:[#allocation11 + $0x980] sm:$0xff]  ;;  %v13859_v42 = vcombine.low %v5011_v54, %v5015_v12 }
 0x356   :  { %7704 = vmatpush2.bf16.msra.mxu0 %v13531_v56  ;;  %v1322_v56 = vrot.slane %v15221_v4, %v15127_v29  ;;  %v4879_v2 = vld [vmem:[#allocation11 + $0x9a0] sm:$0xff]  ;;  %v13731_v4 = vcombine.low %v4883_v53, %v4887_v48 }
 0x357   :  { %7745 = vmatpush2.bf16.msra.mxu1 %v13659_v57  ;;  %7705 = vmatprep.subr.bf16.mxu0 %v13524_v51  ;;  %v13483_v57 = vcombine.low %v4635_v11, %v4639_v39  ;;  %v4555_v51 = vmax.f32 %v15188_v28, 0.0  ;;  %v13724_v28 = vcombine.high %v4875_v1, %v4879_v2  ;;  %v4867_v50 = vld [vmem:[#allocation11 + $0x940] sm:$0xff]  ;;  %v13723_v8 = vcombine.low %v4875_v1, %v4879_v2 }
 0x358   :  { %7746 = vmatprep.subr.bf16.mxu1 %v13652_v58  ;;  %v13611_v58 = vcombine.low %v4763_v47, %v4767_v0  ;;  %v4871_v34 = vld [vmem:[#allocation11 + $0x960] sm:$0xff] }
 0x359   :  { %v15244_v37 = vpack.c.bf16 %v4555_v51, %v4555_v51  ;;  %v13716_v10 = vcombine.high %v4867_v50, %v4871_v34  ;;  %v4863_v23 = vld [vmem:[#allocation11 + $0x920] sm:$0xff]  ;;  %v15259_v51 = vld [vmem:[#allocation11 + $0x5e8] sm:$0xff] }
 0x35a   :  { %7706 = vmatpush2.bf16.msra.mxu0 %v13523_v46  ;;  %v13860_v46 = vcombine.high %v5011_v54, %v5015_v12  ;;  %v4987_v31 = vld [vmem:[#allocation11 + $0xd00] sm:$0xff] }
 0x35b   :  { %7747 = vmatpush2.bf16.msra.mxu1 %v13651_v24  ;;  %7707 = vmatprep.subr.bf16.mxu0 %v13516_v3  ;;  %v5003_v24 = vld [vmem:[#allocation11 + $0xd80] sm:$0xff] }
 0x35c   :  { %7748 = vmatprep.subr.bf16.mxu1 %v13644_v36  ;;  %v5007_v3 = vld [vmem:[#allocation11 + $0xda0] sm:$0xff]  ;;  %v4264_v36 = vadd.f32 %v15232_v25, %v1322_v56 }
 0x35d   :  { %v4999_v25 = vld [vmem:[#allocation11 + $0xd60] sm:$0xff] }
 0x35e   :  { %7708 = vmatpush2.bf16.msra.mxu0 %v13515_v41  ;;  %v13852_v41 = vcombine.high %v5003_v24, %v5007_v3  ;;  %v4983_v53 = vld [vmem:[#allocation11 + $0xce0] sm:$0xff] }
 0x35f   :  { %7749 = vmatpush2.bf16.msra.mxu1 %v13643_v43  ;;  %7709 = vmatprep.subr.bf16.mxu0 %v13508_v14  ;;  %v4995_v14 = vld [vmem:[#allocation11 + $0xd40] sm:$0xff] }
 0x360   :  { %7750 = vmatprep.subr.bf16.mxu1 %v13636_v5  ;;  %v4305_v5 = vadd.f32 %v15237_v44, %v4264_v36  ;;  %v13844_v26 = vcombine.high %v4995_v14, %v4999_v25  ;;  %v4991_v44 = vld [vmem:[#allocation11 + $0xd20] sm:$0xff]  ;;  %v13843_v39 = vcombine.low %v4995_v14, %v4999_v25 }
 0x361   :  { %v13835_v56 = vcombine.low %v4987_v31, %v4991_v44  ;;  %v4971_v2 = vld [vmem:[#allocation11 + $0xc80] sm:$0xff] }
 0x362   :  { %7710 = vmatpush2.bf16.msra.mxu0 %v13507_v13  ;;  %v13851_v13 = vcombine.low %v5003_v24, %v5007_v3 }
 0x363   :  { %7751 = vmatpush2.bf16.msra.mxu1 %v13635_v20  ;;  %7711 = vmatprep.subr.bf16.mxu0 %v13500_v22 }
 0x364   :  { %7752 = vmatprep.subr.bf16.mxu1 %v13628_v16  ;;  %v4859_v16 = vld [vmem:[#allocation11 + $0x900] sm:$0xff] }
 0x365   :  { %v13708_v11 = vcombine.high %v4859_v16, %v4863_v23  ;;  %v13707_v54 = vcombine.low %v4859_v16, %v4863_v23  ;;  %v4947_v23 = vld [vmem:[#allocation11 + $0xbc0] sm:$0xff] }
 0x366   :  { %7712 = vmatpush2.bf16.msra.mxu0 %v13499_v62 }
 0x367   :  { %7753 = vmatpush2.bf16.msra.mxu1 %v13627_v55  ;;  %7713 = vmatprep.subr.bf16.mxu0 %v13492_v35  ;;  %v13715_v35 = vcombine.low %v4867_v50, %v4871_v34  ;;  %v4963_v50 = vld [vmem:[#allocation11 + $0xc40] sm:$0xff] }
 0x368   :  { %7754 = vmatprep.subr.bf16.mxu1 %v13620_v33  ;;  %v4967_v34 = vld [vmem:[#allocation11 + $0xc60] sm:$0xff] }
 0x369   :  { %v13811_v16 = vcombine.low %v4963_v50, %v4967_v34 }
 0x36a   :  { %7714 = vmatpush2.bf16.msra.mxu0 %v13491_v45  ;;  %v4851_v45 = vld [vmem:[#allocation11 + $0x8c0] sm:$0xff] }
 0x36b   :  { %7755 = vmatpush2.bf16.msra.mxu1 %v13619_v7  ;;  %7715 = vmatprep.subr.bf16.mxu0 %v13484_v49  ;;  %v4855_v7 = vld [vmem:[#allocation11 + $0x8e0] sm:$0xff]  ;;  %v13836_v49 = vcombine.high %v4987_v31, %v4991_v44 }
 0x36c   :  { %7756 = vmatprep.subr.bf16.mxu1 %v13612_v52  ;;  %v4979_v52 = vld [vmem:[#allocation11 + $0xcc0] sm:$0xff]  ;;  %v13700_v12 = vcombine.high %v4851_v45, %v4855_v7  ;;  %v13699_v24 = vcombine.low %v4851_v45, %v4855_v7 }
 0x36d   :  { %v13828_v60 = vcombine.high %v4979_v52, %v4983_v53  ;;  %v13827_v36 = vcombine.low %v4979_v52, %v4983_v53  ;;  %v5075_v31 = vld [vmem:[#allocation11 + $0xfc0] sm:$0xff] }
 0x36e   :  { %7716 = vmatpush2.bf16.msra.mxu0 %v13483_v57  ;;  %v15257_v57 = vld [vmem:[#allocation11 + $0x5c8] sm:$0xff]  ;;  %v5079_v44 = vld [vmem:[#allocation11 + $0xfe0] sm:$0xff] }
 0x36f   :  { %7757 = vmatpush2.bf16.msra.mxu1 %v13611_v58  ;;  %7767 = vmatprep.subr.bf16.mxu0 %v13732_v59  ;;  %v4843_v58 = vld [vmem:[#allocation11 + $0x880] sm:$0xff]  ;;  %v13605_v1 = vcombine.low %v15257_v57, %v15259_v51 }
 0x370   :  { %7808 = vmatprep.subr.bf16.mxu1 %v13860_v46  ;;  %v4847_v59 = vld [vmem:[#allocation11 + $0x8a0] sm:$0xff] }
 0x371   :  { %v15248_v43 = vpop.f32.mrf.mxu0  ;;  %7718 = vmatmul.mubr.bf16.vlgmr.msra.gmra.mxu0 %v15244_v37  ;;  %v4975_v46 = vld [vmem:[#allocation11 + $0xca0] sm:$0xff]  ;;  %v13692_v3 = vcombine.high %v4843_v58, %v4847_v59 }
 0x372   :  { %v15252_v6 = vpop.f32.mrf.mxu1  ;;  %7759 = vmatmul.mubr.bf16.vlgmr.msra.gmra.mxu1 %v15246_v38  ;;  %7768 = vmatpush1.bf16.msra.mxu0 %v13731_v4  ;;  %v4835_v4 = vld [vmem:[#allocation11 + $0x840] sm:$0xff]  ;;  %v13819_v25 = vcombine.low %v4971_v2, %v4975_v46 }
 0x373   :  { %v4345_v9 = vpop.f32.mrf.mxu0  ;;  %7769 = vmatprep.subr.bf16.mxu0 %v13724_v28  ;;  %7809 = vmatpush1.bf16.msra.mxu1 %v13859_v42  ;;  %v4839_v28 = vld [vmem:[#allocation11 + $0x860] sm:$0xff]  ;;  %v13820_v42 = vcombine.high %v4971_v2, %v4975_v46 }
 0x374   :  { %v4346_v20 = vadd.f32 %v4345_v9, %v4305_v5  ;;  %v4386_v22 = vpop.f32.mrf.mxu1  ;;  %7810 = vmatprep.subr.bf16.mxu1 %v13852_v41  ;;  %v13691_v41 = vcombine.low %v4843_v58, %v4847_v59  ;;  %v13684_v14 = vcombine.high %v4835_v4, %v4839_v28  ;;  %v4827_v5 = vld [vmem:[#allocation11 + $0x800] sm:$0xff]  ;;  %v13812_v9 = vcombine.high %v4963_v50, %v4967_v34 }
 0x375   :  { %v4347_v27 = vpop.f32.mrf.mxu0  ;;  %v4931_v52 = vld [vmem:[#allocation11 + $0xb40] sm:$0xff] }
 0x376   :  { %v4387_v62 = vadd.f32 %v4386_v22, %v4346_v20  ;;  %v4388_v55 = vpop.f32.mrf.mxu1  ;;  %7770 = vmatpush1.bf16.msra.mxu0 %v13723_v8  ;;  %v4831_v8 = vld [vmem:[#allocation11 + $0x820] sm:$0xff]  ;;  %v13683_v20 = vcombine.low %v4835_v4, %v4839_v28 }
 0x377   :  { %v4348_v33 = vpop.f32.mrf.mxu0  ;;  %7771 = vmatprep.subr.bf16.mxu0 %v13716_v10  ;;  %7811 = vmatpush1.bf16.msra.mxu1 %v13851_v13  ;;  %v4955_v10 = vld [vmem:[#allocation11 + $0xc00] sm:$0xff]  ;;  %v13676_v22 = vcombine.high %v4827_v5, %v4831_v8 }
 0x378   :  { %v4560_v47 = vmax.f32 %v4387_v62, 0.0  ;;  %v4389_v0 = vpop.f32.mrf.mxu1  ;;  %7812 = vmatprep.subr.bf16.mxu1 %v13844_v26  ;;  %v4959_v13 = vld [vmem:[#allocation11 + $0xc20] sm:$0xff]  ;;  %v13675_v62 = vcombine.low %v4827_v5, %v4831_v8 }
 0x379   :  { %v4951_v26 = vld [vmem:[#allocation11 + $0xbe0] sm:$0xff]  ;;  %v13804_v27 = vcombine.high %v4955_v10, %v4959_v13 }
 0x37a   :  { %v15255_v48 = vpack.c.bf16 %v4560_v47, %v4560_v47  ;;  %7772 = vmatpush1.bf16.msra.mxu0 %v13715_v35  ;;  %v13796_v55 = vcombine.high %v4947_v23, %v4951_v26  ;;  %v13803_v35 = vcombine.low %v4955_v10, %v4959_v13  ;;  %v4939_v33 = vld [vmem:[#allocation11 + $0xb80] sm:$0xff]  ;;  %v13795_v45 = vcombine.low %v4947_v23, %v4951_v26 }
 0x37b   :  { %7773 = vmatprep.subr.bf16.mxu0 %v13708_v11  ;;  %7813 = vmatpush1.bf16.msra.mxu1 %v13843_v39  ;;  %v4943_v11 = vld [vmem:[#allocation11 + $0xba0] sm:$0xff]  ;;  %v13924_v39 = vcombine.high %v5075_v31, %v5079_v44 }
 0x37c   :  { %7799 = vmatprep.mubr.bf16.mxu0 %v15255_v48  ;;  %7814 = vmatprep.subr.bf16.mxu1 %v13836_v49  ;;  %v5067_v47 = vld [vmem:[#allocation11 + $0xf80] sm:$0xff]  ;;  %v13788_v7 = vcombine.high %v4939_v33, %v4943_v11  ;;  %v13923_v49 = vcombine.low %v5075_v31, %v5079_v44  ;;  %v13787_v58 = vcombine.low %v4939_v33, %v4943_v11 }
 0x37d   :  { %v5071_v0 = vld [vmem:[#allocation11 + $0xfa0] sm:$0xff]  ;;  %v4344_v11 = vadd.f32 %v15248_v43, %v15234_v30  ;;  %v4632_v30 = vld [vmem:[#allocation11 + $0x1e8] sm:$0xff] }
 0x37e   :  { %7774 = vmatpush1.bf16.msra.mxu0 %v13707_v54  ;;  %v4935_v53 = vld [vmem:[#allocation11 + $0xb60] sm:$0xff]  ;;  %v13916_v54 = vcombine.high %v5067_v47, %v5071_v0 }
 0x37f   :  { %7775 = vmatprep.subr.bf16.mxu0 %v13700_v12  ;;  %7815 = vmatpush1.bf16.msra.mxu1 %v13835_v56  ;;  %v5059_v12 = vld [vmem:[#allocation11 + $0xf40] sm:$0xff]  ;;  %v13780_v59 = vcombine.high %v4931_v52, %v4935_v53  ;;  %v13779_v4 = vcombine.low %v4931_v52, %v4935_v53 }
 0x380   :  { %7816 = vmatprep.subr.bf16.mxu1 %v13828_v60  ;;  %v5063_v56 = vld [vmem:[#allocation11 + $0xf60] sm:$0xff]  ;;  %v13915_v60 = vcombine.low %v5067_v47, %v5071_v0 }
 0x381   :  { %v4923_v2 = vld [vmem:[#allocation11 + $0xb00] sm:$0xff] }
 0x382   :  { %7776 = vmatpush1.bf16.msra.mxu0 %v13699_v24  ;;  %v4927_v46 = vld [vmem:[#allocation11 + $0xb20] sm:$0xff]  ;;  %v13908_v24 = vcombine.high %v5059_v12, %v5063_v56 }
 0x383   :  { %7777 = vmatprep.subr.bf16.mxu0 %v13692_v3  ;;  %7817 = vmatpush1.bf16.msra.mxu1 %v13827_v36  ;;  %v5051_v3 = vld [vmem:[#allocation11 + $0xf00] sm:$0xff]  ;;  %v13772_v28 = vcombine.high %v4923_v2, %v4927_v46  ;;  %v13771_v5 = vcombine.low %v4923_v2, %v4927_v46 }
 0x384   :  { %7818 = vmatprep.subr.bf16.mxu1 %v13820_v42  ;;  %v5055_v36 = vld [vmem:[#allocation11 + $0xf20] sm:$0xff]  ;;  %v13907_v42 = vcombine.low %v5059_v12, %v5063_v56 }
 0x385   :  { %v4915_v50 = vld [vmem:[#allocation11 + $0xac0] sm:$0xff] }
 0x386   :  { %7778 = vmatpush1.bf16.msra.mxu0 %v13691_v41  ;;  %v4919_v34 = vld [vmem:[#allocation11 + $0xae0] sm:$0xff]  ;;  %v13900_v41 = vcombine.high %v5051_v3, %v5055_v36 }
 0x387   :  { %7779 = vmatprep.subr.bf16.mxu0 %v13684_v14  ;;  %7819 = vmatpush1.bf16.msra.mxu1 %v13819_v25  ;;  %v5043_v14 = vld [vmem:[#allocation11 + $0xec0] sm:$0xff]  ;;  %v13764_v8 = vcombine.high %v4915_v50, %v4919_v34  ;;  %v13763_v23 = vcombine.low %v4915_v50, %v4919_v34  ;;  %v4616_v50 = vld [vmem:[#allocation11 + $0x168] sm:$0xff] }
 0x388   :  { %7820 = vmatprep.subr.bf16.mxu1 %v13812_v9  ;;  %v5047_v25 = vld [vmem:[#allocation11 + $0xee0] sm:$0xff]  ;;  %v13899_v9 = vcombine.low %v5051_v3, %v5055_v36  ;;  %v4624_v3 = vld [vmem:[#allocation11 + $0x1a8] sm:$0xff] }
 0x389   :  { %v4907_v10 = vld [vmem:[#allocation11 + $0xa80] sm:$0xff] }
 0x38a   :  { %7780 = vmatpush1.bf16.msra.mxu0 %v13683_v20  ;;  %v4911_v13 = vld [vmem:[#allocation11 + $0xaa0] sm:$0xff]  ;;  %v13892_v20 = vcombine.high %v5043_v14, %v5047_v25 }
 0x38b   :  { %7781 = vmatprep.subr.bf16.mxu0 %v13676_v22  ;;  %7821 = vmatpush1.bf16.msra.mxu1 %v13811_v16  ;;  %v5035_v22 = vld [vmem:[#allocation11 + $0xe80] sm:$0xff]  ;;  %v13756_v26 = vcombine.high %v4907_v10, %v4911_v13  ;;  %v13755_v33 = vcombine.low %v4907_v10, %v4911_v13  ;;  %v4608_v10 = vld [vmem:[#allocation11 + $0x128] sm:$0xff] }
 0x38c   :  { %7822 = vmatprep.subr.bf16.mxu1 %v13804_v27  ;;  %v5039_v16 = vld [vmem:[#allocation11 + $0xea0] sm:$0xff]  ;;  %v13891_v27 = vcombine.low %v5043_v14, %v5047_v25 }
 0x38d   :  { %v4899_v31 = vld [vmem:[#allocation11 + $0xa40] sm:$0xff]  ;;  %v13883_v47 = vcombine.low %v5035_v22, %v5039_v16 }
 0x38e   :  { %7782 = vmatpush1.bf16.msra.mxu0 %v13675_v62  ;;  %v4903_v44 = vld [vmem:[#allocation11 + $0xa60] sm:$0xff]  ;;  %v13884_v62 = vcombine.high %v5035_v22, %v5039_v16 }
 0x38f   :  { %7783 = vmatprep.subr.bf16.mxu0 %v13796_v55  ;;  %7823 = vmatpush1.bf16.msra.mxu1 %v13803_v35  ;;  %v5027_v55 = vld [vmem:[#allocation11 + $0xe40] sm:$0xff]  ;;  %v13747_v53 = vcombine.low %v4899_v31, %v4903_v44 }
 0x390   :  { %7824 = vmatprep.subr.bf16.mxu1 %v13924_v39  ;;  %v5031_v35 = vld [vmem:[#allocation11 + $0xe60] sm:$0xff]  ;;  %v13748_v39 = vcombine.high %v4899_v31, %v4903_v44  ;;  %v4600_v31 = vld [vmem:[#allocation11 + $0xe8] sm:$0xff] }
 0x391   :  { %v4891_v0 = vld [vmem:[#allocation11 + $0xa00] sm:$0xff]  ;;  %v13875_v56 = vcombine.low %v5027_v55, %v5031_v35 }
 0x392   :  { %7784 = vmatpush2.bf16.msra.mxu0 %v13795_v45  ;;  %v4895_v45 = vld [vmem:[#allocation11 + $0xa20] sm:$0xff] }
 0x393   :  { %7785 = vmatprep.subr.bf16.mxu0 %v13788_v7  ;;  %7825 = vmatpush2.bf16.msra.mxu1 %v13923_v49  ;;  %v13876_v7 = vcombine.high %v5027_v55, %v5031_v35  ;;  %v5019_v49 = vld [vmem:[#allocation11 + $0xe00] sm:$0xff]  ;;  %v13740_v12 = vcombine.high %v4891_v0, %v4895_v45  ;;  %v4588_v55 = vld [vmem:[#allocation11 + $0x88] sm:$0xff] }
 0x394   :  { %7826 = vmatprep.subr.bf16.mxu1 %v13916_v54  ;;  %v5023_v52 = vld [vmem:[#allocation11 + $0xe20] sm:$0xff]  ;;  %v4385_v54 = vadd.f32 %v15252_v6, %v4344_v11  ;;  %v13606_v6 = vcombine.high %v15257_v57, %v15259_v51  ;;  %v4592_v35 = vld [vmem:[#allocation11 + $0xa8] sm:$0xff] }
 0x395   :  { %v13868_v43 = vcombine.high %v5019_v49, %v5023_v52  ;;  %v13867_v46 = vcombine.low %v5019_v49, %v5023_v52  ;;  %v13438_v11 = vcombine.high %v4588_v55, %v4592_v35  ;;  %v4576_v49 = vld [vmem:[#allocation11 + $0x28] sm:$0xff] }
 0x396   :  { %7786 = vmatpush2.bf16.msra.mxu0 %v13787_v58  ;;  %v4628_v58 = vld [vmem:[#allocation11 + $0x1c8] sm:$0xff] }
 0x397   :  { %7787 = vmatprep.subr.bf16.mxu0 %v13780_v59  ;;  %7827 = vmatpush2.bf16.msra.mxu1 %v13915_v60  ;;  %v13739_v59 = vcombine.low %v4891_v0, %v4895_v45  ;;  %v4559_v60 = vmax.f32 %v4385_v54, 0.0  ;;  %v13478_v2 = vcombine.high %v4628_v58, %v4632_v30  ;;  %v13477_v36 = vcombine.low %v4628_v58, %v4632_v30  ;;  %v4692_v54 = vld [vmem:[#allocation11 + $0x3c8] sm:$0xff] }
 0x398   :  { %7828 = vmatprep.subr.bf16.mxu1 %v13908_v24  ;;  %v4620_v24 = vld [vmem:[#allocation11 + $0x188] sm:$0xff]  ;;  %v13437_v0 = vcombine.low %v4588_v55, %v4592_v35  ;;  %v14678_v35 = vld [vmem:[#allocation10] sm:$0xff] }
 0x399   :  { %v13469_v14 = vcombine.low %v4620_v24, %v4624_v3  ;;  %v4684_v30 = vld [vmem:[#allocation11 + $0x388] sm:$0xff] }
 0x39a   :  { %7788 = vmatpush2.bf16.msra.mxu0 %v13779_v4  ;;  %v15269_v4 = vpack.c.bf16 %v4559_v60, %v4559_v60 }
 0x39b   :  { %7789 = vmatprep.subr.bf16.mxu0 %v13772_v28  ;;  %7829 = vmatpush2.bf16.msra.mxu1 %v13907_v42  ;;  %v13470_v28 = vcombine.high %v4620_v24, %v4624_v3  ;;  %v4612_v42 = vld [vmem:[#allocation11 + $0x148] sm:$0xff] }
 0x39c   :  { %7830 = vmatprep.subr.bf16.mxu1 %v13900_v41  ;;  %v13461_v22 = vcombine.low %v4612_v42, %v4616_v50 }
 0x39e   :  { %7790 = vmatpush2.bf16.msra.mxu0 %v13771_v5  ;;  %v13462_v5 = vcombine.high %v4612_v42, %v4616_v50  ;;  %v4660_v50 = vld [vmem:[#allocation11 + $0x2c8] sm:$0xff] }
 0x39f   :  { %7791 = vmatprep.subr.bf16.mxu0 %v13764_v8  ;;  %7831 = vmatpush2.bf16.msra.mxu1 %v13899_v9  ;;  %v4604_v9 = vld [vmem:[#allocation11 + $0x108] sm:$0xff] }
 0x3a0   :  { %7832 = vmatprep.subr.bf16.mxu1 %v13892_v20  ;;  %v13453_v44 = vcombine.low %v4604_v9, %v4608_v10 }
 0x3a2   :  { %7792 = vmatpush2.bf16.msra.mxu0 %v13763_v23  ;;  %v13454_v23 = vcombine.high %v4604_v9, %v4608_v10  ;;  %v4652_v10 = vld [vmem:[#allocation11 + $0x288] sm:$0xff] }
 0x3a3   :  { %7793 = vmatprep.subr.bf16.mxu0 %v13756_v26  ;;  %7833 = vmatpush2.bf16.msra.mxu1 %v13891_v27  ;;  %v4596_v27 = vld [vmem:[#allocation11 + $0xc8] sm:$0xff] }
 0x3a4   :  { %7834 = vmatprep.subr.bf16.mxu1 %v13884_v62  ;;  %v13446_v62 = vcombine.high %v4596_v27, %v4600_v31 }
 0x3a6   :  { %7794 = vmatpush2.bf16.msra.mxu0 %v13755_v33  ;;  %v13445_v33 = vcombine.low %v4596_v27, %v4600_v31  ;;  %v4636_v31 = vld [vmem:[#allocation11 + $0x208] sm:$0xff] }
 0x3a7   :  { %7795 = vmatprep.subr.bf16.mxu0 %v13748_v39  ;;  %7835 = vmatpush2.bf16.msra.mxu1 %v13883_v47  ;;  %v4580_v39 = vld [vmem:[#allocation11 + $0x48] sm:$0xff] }
 0x3a8   :  { %7836 = vmatprep.subr.bf16.mxu1 %v13876_v7  ;;  %v4584_v47 = vld [vmem:[#allocation11 + $0x68] sm:$0xff] }
 0x3a9   :  { %v13430_v45 = vcombine.high %v4580_v39, %v4584_v47  ;;  %v4572_v7 = vld [vmem:[#allocation11 + $0x8] sm:$0xff]  ;;  %v13429_v52 = vcombine.low %v4580_v39, %v4584_v47  ;;  %v1330_v47 = vrot.slane %v14678_v35, %v15130_v32 }
 0x3aa   :  { %7796 = vmatpush2.bf16.msra.mxu0 %v13747_v53  ;;  %v13422_v53 = vcombine.high %v4572_v7, %v4576_v49  ;;  %v4888_v39 = vld [vmem:[#allocation11 + $0x9e8] sm:$0xff] }
 0x3ab   :  { %7797 = vmatprep.subr.bf16.mxu0 %v13740_v12  ;;  %7837 = vmatpush2.bf16.msra.mxu1 %v13875_v56  ;;  %v4696_v12 = vld [vmem:[#allocation11 + $0x3e8] sm:$0xff]  ;;  %v13421_v56 = vcombine.low %v4572_v7, %v4576_v49 }
 0x3ac   :  { %7838 = vmatprep.subr.bf16.mxu1 %v13868_v43  ;;  %v13542_v58 = vcombine.high %v4692_v54, %v4696_v12  ;;  %v4688_v43 = vld [vmem:[#allocation11 + $0x3a8] sm:$0xff] }
 0x3ad   :  { %v13534_v60 = vcombine.high %v4684_v30, %v4688_v43  ;;  %v13533_v24 = vcombine.low %v4684_v30, %v4688_v43  ;;  %v4876_v49 = vld [vmem:[#allocation11 + $0x988] sm:$0xff] }
 0x3ae   :  { %7798 = vmatpush2.bf16.msra.mxu0 %v13739_v59  ;;  %v13541_v59 = vcombine.low %v4692_v54, %v4696_v12  ;;  %v4872_v30 = vld [vmem:[#allocation11 + $0x968] sm:$0xff] }
 0x3af   :  { %7849 = vmatprep.subr.bf16.mxu0 %v13478_v2  ;;  %7839 = vmatpush2.bf16.msra.mxu1 %v13867_v46  ;;  %v4676_v2 = vld [vmem:[#allocation11 + $0x348] sm:$0xff] }
 0x3b0   :  { %7890 = vmatprep.subr.bf16.mxu1 %v13606_v6  ;;  %v4680_v46 = vld [vmem:[#allocation11 + $0x368] sm:$0xff] }
 0x3b1   :  { %v15271_v34 = vpop.f32.mrf.mxu0  ;;  %7800 = vmatmul.mubr.bf16.vlgmr.msra.gmra.mxu0 %v15269_v4  ;;  %v13526_v3 = vcombine.high %v4676_v2, %v4680_v46  ;;  %v4668_v6 = vld [vmem:[#allocation11 + $0x308] sm:$0xff] }
 0x3b2   :  { %v15274_v41 = vpop.f32.mrf.mxu1  ;;  %7850 = vmatpush1.bf16.msra.mxu0 %v13477_v36  ;;  %7881 = vmatprep.mubr.bf16.mxu0 %v15225_v40  ;;  %v4672_v36 = vld [vmem:[#allocation11 + $0x328] sm:$0xff] }
 0x3b3   :  { %v15277_v25 = vpop.f32.mrf.mxu0  ;;  %7851 = vmatprep.subr.bf16.mxu0 %v13470_v28  ;;  %v13525_v28 = vcombine.low %v4676_v2, %v4680_v46  ;;  %v13518_v42 = vcombine.high %v4668_v6, %v4672_v36 }
 0x3b4   :  { %v15279_v8 = vpop.f32.mrf.mxu1 }
 0x3b5   :  { %v4429_v13 = vpop.f32.mrf.mxu0 }
 0x3b6   :  { %v4470_v20 = vpop.f32.mrf.mxu1  ;;  %7852 = vmatpush1.bf16.msra.mxu0 %v13469_v14  ;;  %v4664_v14 = vld [vmem:[#allocation11 + $0x2e8] sm:$0xff] }
 0x3b7   :  { %v4430_v16 = vpop.f32.mrf.mxu0  ;;  %7853 = vmatprep.subr.bf16.mxu0 %v13462_v5  ;;  %v13517_v5 = vcombine.low %v4668_v6, %v4672_v36  ;;  %v13510_v9 = vcombine.high %v4660_v50, %v4664_v14  ;;  %v4656_v13 = vld [vmem:[#allocation11 + $0x2a8] sm:$0xff]  ;;  %v13509_v20 = vcombine.low %v4660_v50, %v4664_v14 }
 0x3b8   :  { %v4471_v26 = vpop.f32.mrf.mxu1  ;;  %v4644_v16 = vld [vmem:[#allocation11 + $0x248] sm:$0xff] }
 0x3b9   :  { %v13501_v26 = vcombine.low %v4652_v10, %v4656_v13  ;;  %v4864_v36 = vld [vmem:[#allocation11 + $0x928] sm:$0xff] }
 0x3ba   :  { %7854 = vmatpush1.bf16.msra.mxu0 %v13461_v22  ;;  %v13502_v22 = vcombine.high %v4652_v10, %v4656_v13 }
 0x3bb   :  { %7855 = vmatprep.subr.bf16.mxu0 %v13454_v23  ;;  %v4648_v23 = vld [vmem:[#allocation11 + $0x268] sm:$0xff] }
 0x3bc   :  { %v13494_v27 = vcombine.high %v4644_v16, %v4648_v23 }
 0x3be   :  { %7856 = vmatpush1.bf16.msra.mxu0 %v13453_v44  ;;  %v4640_v44 = vld [vmem:[#allocation11 + $0x228] sm:$0xff] }
 0x3bf   :  { %7857 = vmatprep.subr.bf16.mxu0 %v13446_v62  ;;  %v13493_v62 = vcombine.low %v4644_v16, %v4648_v23  ;;  %v13486_v55 = vcombine.high %v4636_v31, %v4640_v44  ;;  %v4852_v16 = vld [vmem:[#allocation11 + $0x8c8] sm:$0xff] }
 0x3c0   :  { %v4856_v23 = vld [vmem:[#allocation11 + $0x8e8] sm:$0xff] }
 0x3c2   :  { %7858 = vmatpush1.bf16.msra.mxu0 %v13445_v33  ;;  %v1326_v33 = vrot.slane %v14678_v35, %v15147_v61  ;;  %v4744_v35 = vld [vmem:[#allocation11 + $0x568] sm:$0xff] }
 0x3c3   :  { %7859 = vmatprep.subr.bf16.mxu0 %v13438_v11  ;;  %v4884_v11 = vld [vmem:[#allocation11 + $0x9c8] sm:$0xff] }
 0x3c4   :  { %v4426_v7 = vadd.f32 %v15271_v34, %v1326_v33  ;;  %v13733_v54 = vcombine.low %v4884_v11, %v4888_v39  ;;  %v4844_v33 = vld [vmem:[#allocation11 + $0x888] sm:$0xff] }
 0x3c6   :  { %7860 = vmatpush1.bf16.msra.mxu0 %v13437_v0  ;;  %v13485_v0 = vcombine.low %v4636_v31, %v4640_v44 }
 0x3c7   :  { %7861 = vmatprep.subr.bf16.mxu0 %v13430_v45  ;;  %v13734_v45 = vcombine.high %v4884_v11, %v4888_v39  ;;  %v4848_v11 = vld [vmem:[#allocation11 + $0x8a8] sm:$0xff] }
 0x3ca   :  { %7862 = vmatpush1.bf16.msra.mxu0 %v13429_v52  ;;  %v4880_v52 = vld [vmem:[#allocation11 + $0x9a8] sm:$0xff] }
 0x3cb   :  { %7863 = vmatprep.subr.bf16.mxu0 %v13422_v53  ;;  %v4428_v53 = vadd.f32 %v15277_v25, %v1330_v47  ;;  %v13726_v12 = vcombine.high %v4876_v49, %v4880_v52  ;;  %v13725_v34 = vcombine.low %v4876_v49, %v4880_v52  ;;  %v13701_v47 = vcombine.low %v4852_v16, %v4856_v23  ;;  %v4736_v49 = vld [vmem:[#allocation11 + $0x528] sm:$0xff] }
 0x3cc   :  { %v4836_v52 = vld [vmem:[#allocation11 + $0x848] sm:$0xff] }
 0x3ce   :  { %7864 = vmatpush1.bf16.msra.mxu0 %v13421_v56  ;;  %v4467_v56 = vadd.f32 %v15274_v41, %v4426_v7  ;;  %v4860_v41 = vld [vmem:[#allocation11 + $0x908] sm:$0xff] }
 0x3cf   :  { %7865 = vmatprep.subr.bf16.mxu0 %v13542_v58  ;;  %v4868_v58 = vld [vmem:[#allocation11 + $0x948] sm:$0xff]  ;;  %v13709_v31 = vcombine.low %v4860_v41, %v4864_v36 }
 0x3d0   :  { %v13718_v46 = vcombine.high %v4868_v58, %v4872_v30  ;;  %v13717_v14 = vcombine.low %v4868_v58, %v4872_v30  ;;  %v4732_v7 = vld [vmem:[#allocation11 + $0x508] sm:$0xff] }
 0x3d1   :  { %v13582_v57 = vcombine.high %v4732_v7, %v4736_v49  ;;  %v4828_v58 = vld [vmem:[#allocation11 + $0x808] sm:$0xff] }
 0x3d2   :  { %7866 = vmatpush2.bf16.msra.mxu0 %v13541_v59  ;;  %v4469_v59 = vadd.f32 %v15279_v8, %v4428_v53  ;;  %v4840_v53 = vld [vmem:[#allocation11 + $0x868] sm:$0xff] }
 0x3d3   :  { %7867 = vmatprep.subr.bf16.mxu0 %v13534_v60  ;;  %v13686_v51 = vcombine.high %v4836_v52, %v4840_v53  ;;  %v4832_v30 = vld [vmem:[#allocation11 + $0x828] sm:$0xff] }
 0x3d6   :  { %7868 = vmatpush2.bf16.msra.mxu0 %v13533_v24 }
 0x3d7   :  { %7869 = vmatprep.subr.bf16.mxu0 %v13526_v3 }
 0x3da   :  { %7870 = vmatpush2.bf16.msra.mxu0 %v13525_v28 }
 0x3db   :  { %7871 = vmatprep.subr.bf16.mxu0 %v13518_v42 }
 0x3de   :  { %7872 = vmatpush2.bf16.msra.mxu0 %v13517_v5 }
 0x3df   :  { %7873 = vmatprep.subr.bf16.mxu0 %v13510_v9  ;;  %v13710_v9 = vcombine.high %v4860_v41, %v4864_v36 }
 0x3e2   :  { %7874 = vmatpush2.bf16.msra.mxu0 %v13509_v20  ;;  %v4748_v20 = vld [vmem:[#allocation11 + $0x588] sm:$0xff] }
 0x3e3   :  { %7875 = vmatprep.subr.bf16.mxu0 %v13502_v22  ;;  %v4752_v22 = vld [vmem:[#allocation11 + $0x5a8] sm:$0xff] }
 0x3e4   :  { %v13598_v44 = vcombine.high %v4748_v20, %v4752_v22  ;;  %v13597_v39 = vcombine.low %v4748_v20, %v4752_v22  ;;  %v4704_v20 = vld [vmem:[#allocation11 + $0x428] sm:$0xff] }
 0x3e5   :  { %v4932_v22 = vld [vmem:[#allocation11 + $0xb48] sm:$0xff] }
 0x3e6   :  { %7876 = vmatpush2.bf16.msra.mxu0 %v13501_v26 }
 0x3e7   :  { %7877 = vmatprep.subr.bf16.mxu0 %v13494_v27 }
 0x3ea   :  { %7878 = vmatpush2.bf16.msra.mxu0 %v13493_v62  ;;  %v13702_v62 = vcombine.high %v4852_v16, %v4856_v23  ;;  %v4936_v16 = vld [vmem:[#allocation11 + $0xb68] sm:$0xff] }
 0x3eb   :  { %7879 = vmatprep.subr.bf16.mxu0 %v13486_v55  ;;  %v4740_v55 = vld [vmem:[#allocation11 + $0x548] sm:$0xff] }
 0x3ee   :  { %7880 = vmatpush2.bf16.msra.mxu0 %v13485_v0  ;;  %v13590_v0 = vcombine.high %v4740_v55, %v4744_v35 }
 0x3ef   :  { %7931 = vmatprep.subr.bf16.mxu0 %v13734_v45  ;;  %v13694_v45 = vcombine.high %v4844_v33, %v4848_v11 }
 0x3f1   :  { %v4507_v43 = vpop.f32.mrf.mxu0  ;;  %7882 = vmatmul.mubr.bf16.vlgmr.msra.gmra.mxu0 %v15244_v37 }
 0x3f2   :  { %v4508_v60 = vadd.f32 %v4507_v43, %v4467_v56  ;;  %v4548_v2 = vpop.f32.mrf.mxu1  ;;  %7932 = vmatpush1.bf16.msra.mxu0 %v13733_v54  ;;  %7963 = vmatprep.mubr.bf16.mxu0 %v15255_v48  ;;  %v13589_v54 = vcombine.low %v4740_v55, %v4744_v35  ;;  %v4728_v56 = vld [vmem:[#allocation11 + $0x4e8] sm:$0xff]  ;;  %v13581_v43 = vcombine.low %v4732_v7, %v4736_v49 }
 0x3f3   :  { %v4509_v25 = vpop.f32.mrf.mxu0  ;;  %7933 = vmatprep.subr.bf16.mxu0 %v13726_v12  ;;  %v13693_v12 = vcombine.low %v4844_v33, %v4848_v11  ;;  %v4820_v55 = vld [vmem:[#allocation11 + $0x7c8] sm:$0xff] }
 0x3f4   :  { %v4549_v24 = vadd.f32 %v4548_v2, %v4508_v60  ;;  %v4510_v3 = vadd.f32 %v4509_v25, %v4469_v59  ;;  %v4550_v6 = vpop.f32.mrf.mxu1  ;;  %v13685_v59 = vcombine.low %v4836_v52, %v4840_v53  ;;  %v13678_v2 = vcombine.high %v4828_v58, %v4832_v30  ;;  %v4720_v25 = vld [vmem:[#allocation11 + $0x4a8] sm:$0xff] }
 0x3f5   :  { %v4511_v28 = vpop.f32.mrf.mxu0  ;;  %v4824_v35 = vld [vmem:[#allocation11 + $0x7e8] sm:$0xff] }
 0x3f6   :  { %v4551_v42 = vadd.f32 %v4550_v6, %v4510_v3  ;;  %v4552_v50 = vpop.f32.mrf.mxu1  ;;  %7934 = vmatpush1.bf16.msra.mxu0 %v13725_v34  ;;  %v4561_v8 = vmax.f32 %v4549_v24, 0.0  ;;  %v4716_v34 = vld [vmem:[#allocation11 + $0x488] sm:$0xff]  ;;  %v13677_v6 = vcombine.low %v4828_v58, %v4832_v30 }
 0x3f7   :  { %v4512_v5 = vpop.f32.mrf.mxu0  ;;  %7935 = vmatprep.subr.bf16.mxu0 %v13718_v46  ;;  %v4948_v46 = vld [vmem:[#allocation11 + $0xbc8] sm:$0xff]  ;;  %v13566_v41 = vcombine.high %v4716_v34, %v4720_v25 }
 0x3f8   :  { %v4562_v10 = vmax.f32 %v4551_v42, 0.0  ;;  %v4553_v13 = vpop.f32.mrf.mxu1  ;;  %v15291_v27 = vpack.c.bf16 %v4561_v8, %v4561_v8  ;;  %v4952_v24 = vld [vmem:[#allocation11 + $0xbe8] sm:$0xff]  ;;  %v13565_v8 = vcombine.low %v4716_v34, %v4720_v25 }
 0x3f9   :  { %v13798_v36 = vcombine.high %v4948_v46, %v4952_v24  ;;  %v4708_v28 = vld [vmem:[#allocation11 + $0x448] sm:$0xff]  ;;  %v13797_v5 = vcombine.low %v4948_v46, %v4952_v24 }
 0x3fa   :  { %v15289_v26 = vpack.c.bf16 %v4562_v10, %v4562_v10  ;;  %7936 = vmatpush1.bf16.msra.mxu0 %v13717_v14  ;;  %v4712_v42 = vld [vmem:[#allocation11 + $0x468] sm:$0xff] }
 0x3fb   :  { %7937 = vmatprep.subr.bf16.mxu0 %v13710_v9  ;;  %v4940_v50 = vld [vmem:[#allocation11 + $0xb88] sm:$0xff]  ;;  %v13558_v9 = vcombine.high %v4708_v28, %v4712_v42  ;;  %v13557_v23 = vcombine.low %v4708_v28, %v4712_v42 }
 0x3fc   :  { %7840 = vmatprep.mubr.bf16.mxu1 %v15289_v26  ;;  %v4944_v14 = vld [vmem:[#allocation11 + $0xba8] sm:$0xff] }
 0x3fd   :  { %7841 = vmatmul.mubr.bf16.vlgmr.msra.gmra.mxu1 %v15291_v27  ;;  %v13790_v10 = vcombine.high %v4940_v50, %v4944_v14  ;;  %v4700_v13 = vld [vmem:[#allocation11 + $0x408] sm:$0xff] }
 0x3fe   :  { %7891 = vmatpush1.bf16.msra.mxu1 %v13605_v1  ;;  %7922 = vmatprep.mubr.bf16.mxu1 %v15228_v21  ;;  %v4724_v1 = vld [vmem:[#allocation11 + $0x4c8] sm:$0xff] }
 0x3ff   :  { %7938 = vmatpush1.bf16.msra.mxu0 %v13709_v31  ;;  %7892 = vmatprep.subr.bf16.mxu1 %v13598_v44  ;;  %v13574_v60 = vcombine.high %v4724_v1, %v4728_v56  ;;  %v13573_v3 = vcombine.low %v4724_v1, %v4728_v56  ;;  %v13789_v31 = vcombine.low %v4940_v50, %v4944_v14  ;;  %v4924_v33 = vld [vmem:[#allocation11 + $0xb08] sm:$0xff] }
 0x400   :  { %7939 = vmatprep.subr.bf16.mxu0 %v13702_v62  ;;  %v13550_v44 = vcombine.high %v4700_v13, %v4704_v20  ;;  %v13782_v62 = vcombine.high %v4932_v22, %v4936_v16  ;;  %v4928_v11 = vld [vmem:[#allocation11 + $0xb28] sm:$0xff] }
 0x401   :  { %v4812_v7 = vld [vmem:[#allocation11 + $0x788] sm:$0xff] }
 0x402   :  { %7893 = vmatpush1.bf16.msra.mxu1 %v13597_v39  ;;  %v13549_v39 = vcombine.low %v4700_v13, %v4704_v20  ;;  %v4816_v49 = vld [vmem:[#allocation11 + $0x7a8] sm:$0xff] }
 0x403   :  { %7940 = vmatpush1.bf16.msra.mxu0 %v13701_v47  ;;  %7894 = vmatprep.subr.bf16.mxu1 %v13590_v0  ;;  %v13781_v47 = vcombine.low %v4932_v22, %v4936_v16  ;;  %v13670_v0 = vcombine.high %v4820_v55, %v4824_v35  ;;  %v4916_v52 = vld [vmem:[#allocation11 + $0xac8] sm:$0xff]  ;;  %v4629_v22 = vld [vmem:[#allocation11 + $0x1d0] sm:$0xff] }
 0x404   :  { %7941 = vmatprep.subr.bf16.mxu0 %v13694_v45  ;;  %v13774_v45 = vcombine.high %v4924_v33, %v4928_v11  ;;  %v4920_v53 = vld [vmem:[#allocation11 + $0xae8] sm:$0xff]  ;;  %v4633_v16 = vld [vmem:[#allocation11 + $0x1f0] sm:$0xff] }
 0x405   :  { %v4804_v1 = vld [vmem:[#allocation11 + $0x748] sm:$0xff] }
 0x406   :  { %7895 = vmatpush1.bf16.msra.mxu1 %v13589_v54  ;;  %v13669_v54 = vcombine.low %v4820_v55, %v4824_v35  ;;  %v4808_v56 = vld [vmem:[#allocation11 + $0x768] sm:$0xff]  ;;  %v13480_v55 = vcombine.high %v4629_v22, %v4633_v16 }
 0x407   :  { %7942 = vmatpush1.bf16.msra.mxu0 %v13693_v12  ;;  %7896 = vmatprep.subr.bf16.mxu1 %v13582_v57  ;;  %v13773_v12 = vcombine.low %v4924_v33, %v4928_v11  ;;  %v13662_v57 = vcombine.high %v4812_v7, %v4816_v49  ;;  %v4908_v58 = vld [vmem:[#allocation11 + $0xa88] sm:$0xff]  ;;  %v4621_v11 = vld [vmem:[#allocation11 + $0x190] sm:$0xff] }
 0x408   :  { %7943 = vmatprep.subr.bf16.mxu0 %v13686_v51  ;;  %v13766_v51 = vcombine.high %v4916_v52, %v4920_v53  ;;  %v4912_v30 = vld [vmem:[#allocation11 + $0xaa8] sm:$0xff] }
 0x409   :  { %v4796_v34 = vld [vmem:[#allocation11 + $0x708] sm:$0xff] }
 0x40a   :  { %7897 = vmatpush1.bf16.msra.mxu1 %v13581_v43  ;;  %v13661_v43 = vcombine.low %v4812_v7, %v4816_v49  ;;  %v4800_v25 = vld [vmem:[#allocation11 + $0x728] sm:$0xff] }
 0x40b   :  { %7944 = vmatpush1.bf16.msra.mxu0 %v13685_v59  ;;  %7898 = vmatprep.subr.bf16.mxu1 %v13574_v60  ;;  %v13765_v59 = vcombine.low %v4916_v52, %v4920_v53  ;;  %v13654_v60 = vcombine.high %v4804_v1, %v4808_v56  ;;  %v4900_v46 = vld [vmem:[#allocation11 + $0xa48] sm:$0xff] }
 0x40c   :  { %7945 = vmatprep.subr.bf16.mxu0 %v13678_v2  ;;  %v13758_v2 = vcombine.high %v4908_v58, %v4912_v30  ;;  %v4904_v24 = vld [vmem:[#allocation11 + $0xa68] sm:$0xff] }
 0x40d   :  { %v4788_v28 = vld [vmem:[#allocation11 + $0x6c8] sm:$0xff] }
 0x40e   :  { %7899 = vmatpush1.bf16.msra.mxu1 %v13573_v3  ;;  %v13653_v3 = vcombine.low %v4804_v1, %v4808_v56  ;;  %v4792_v42 = vld [vmem:[#allocation11 + $0x6e8] sm:$0xff] }
 0x40f   :  { %7946 = vmatpush1.bf16.msra.mxu0 %v13677_v6  ;;  %7900 = vmatprep.subr.bf16.mxu1 %v13566_v41  ;;  %v13757_v6 = vcombine.low %v4908_v58, %v4912_v30  ;;  %v13646_v41 = vcombine.high %v4796_v34, %v4800_v25  ;;  %v4892_v50 = vld [vmem:[#allocation11 + $0xa08] sm:$0xff] }
 0x410   :  { %7947 = vmatprep.subr.bf16.mxu0 %v13798_v36  ;;  %v13750_v36 = vcombine.high %v4900_v46, %v4904_v24  ;;  %v4896_v14 = vld [vmem:[#allocation11 + $0xa28] sm:$0xff] }
 0x411   :  { %v4780_v13 = vld [vmem:[#allocation11 + $0x688] sm:$0xff] }
 0x412   :  { %7901 = vmatpush1.bf16.msra.mxu1 %v13565_v8  ;;  %v13645_v8 = vcombine.low %v4796_v34, %v4800_v25  ;;  %v4784_v20 = vld [vmem:[#allocation11 + $0x6a8] sm:$0xff] }
 0x413   :  { %7948 = vmatpush2.bf16.msra.mxu0 %v13797_v5  ;;  %7902 = vmatprep.subr.bf16.mxu1 %v13558_v9  ;;  %v13749_v5 = vcombine.low %v4900_v46, %v4904_v24  ;;  %v13638_v9 = vcombine.high %v4788_v28, %v4792_v42  ;;  %v4772_v35 = vld [vmem:[#allocation11 + $0x648] sm:$0xff] }
 0x414   :  { %7949 = vmatprep.subr.bf16.mxu0 %v13790_v10  ;;  %v13742_v10 = vcombine.high %v4892_v50, %v4896_v14  ;;  %v4776_v33 = vld [vmem:[#allocation11 + $0x668] sm:$0xff] }
 0x415   :  { %v13622_v49 = vcombine.high %v4772_v35, %v4776_v33  ;;  %v4764_v53 = vld [vmem:[#allocation11 + $0x608] sm:$0xff]  ;;  %v13621_v58 = vcombine.low %v4772_v35, %v4776_v33  ;;  %v4589_v35 = vld [vmem:[#allocation11 + $0x90] sm:$0xff] }
 0x416   :  { %7903 = vmatpush1.bf16.msra.mxu1 %v13557_v23  ;;  %v13637_v23 = vcombine.low %v4788_v28, %v4792_v42  ;;  %v5012_v46 = vld [vmem:[#allocation11 + $0xdc8] sm:$0xff]  ;;  %v4593_v33 = vld [vmem:[#allocation11 + $0xb0] sm:$0xff] }
 0x417   :  { %7950 = vmatpush2.bf16.msra.mxu0 %v13789_v31  ;;  %7904 = vmatprep.subr.bf16.mxu1 %v13550_v44  ;;  %v13741_v31 = vcombine.low %v4892_v50, %v4896_v14  ;;  %v13630_v44 = vcombine.high %v4780_v13, %v4784_v20  ;;  %v5016_v24 = vld [vmem:[#allocation11 + $0xde8] sm:$0xff] }
 0x418   :  { %7951 = vmatprep.subr.bf16.mxu0 %v13782_v62  ;;  %v5083_v62 = vld [vmem:[#allocation13] sm:$0xff] }
 0x419   :  { %v5092_v7 = vrot.slane %v5083_v62, %v15095_v18 }
 0x41a   :  { %7905 = vmatpush1.bf16.msra.mxu1 %v13549_v39  ;;  %v4625_v39 = vld [vmem:[#allocation11 + $0x1b0] sm:$0xff] }
 0x41b   :  { %7952 = vmatpush2.bf16.msra.mxu0 %v13781_v47  ;;  %7906 = vmatprep.subr.bf16.mxu1 %v13670_v0  ;;  %v13629_v47 = vcombine.low %v4780_v13, %v4784_v20  ;;  %v5088_v0 = vrot.slane %v5083_v62, %v15087_v15  ;;  %v13472_v52 = vcombine.high %v4621_v11, %v4625_v39  ;;  %v5008_v13 = vld [vmem:[#allocation11 + $0xda8] sm:$0xff]  ;;  %v4597_v20 = vld [vmem:[#allocation11 + $0xd0] sm:$0xff] }
 0x41c   :  { %7953 = vmatprep.subr.bf16.mxu0 %v13774_v45  ;;  %v13479_v45 = vcombine.low %v4629_v22, %v4633_v16  ;;  %v4601_v22 = vld [vmem:[#allocation11 + $0xf0] sm:$0xff]  ;;  %v13861_v16 = vcombine.low %v5012_v46, %v5016_v24  ;;  %v4996_v62 = vld [vmem:[#allocation11 + $0xd48] sm:$0xff] }
 0x41e   :  { %7907 = vmatpush2.bf16.msra.mxu1 %v13669_v54  ;;  %v4768_v54 = vld [vmem:[#allocation11 + $0x628] sm:$0xff] }
 0x41f   :  { %7954 = vmatpush2.bf16.msra.mxu0 %v13773_v12  ;;  %7908 = vmatprep.subr.bf16.mxu1 %v13662_v57  ;;  %v4613_v57 = vld [vmem:[#allocation11 + $0x150] sm:$0xff]  ;;  %v13613_v42 = vcombine.low %v4764_v53, %v4768_v54 }
 0x420   :  { %7955 = vmatprep.subr.bf16.mxu0 %v13766_v51  ;;  %v4617_v51 = vld [vmem:[#allocation11 + $0x170] sm:$0xff] }
 0x421   :  { %v13464_v25 = vcombine.high %v4613_v57, %v4617_v51  ;;  %v13463_v14 = vcombine.low %v4613_v57, %v4617_v51  ;;  %v4980_v51 = vld [vmem:[#allocation11 + $0xcc8] sm:$0xff] }
 0x422   :  { %7909 = vmatpush2.bf16.msra.mxu1 %v13661_v43  ;;  %v13471_v43 = vcombine.low %v4621_v11, %v4625_v39  ;;  %v13447_v39 = vcombine.low %v4597_v20, %v4601_v22 }
 0x423   :  { %7956 = vmatpush2.bf16.msra.mxu0 %v13765_v59  ;;  %7910 = vmatprep.subr.bf16.mxu1 %v13654_v60  ;;  %v13614_v59 = vcombine.high %v4764_v53, %v4768_v54  ;;  %v13439_v54 = vcombine.low %v4589_v35, %v4593_v33 }
 0x424   :  { %7957 = vmatprep.subr.bf16.mxu0 %v13758_v2 }
 0x426   :  { %7911 = vmatpush2.bf16.msra.mxu1 %v13653_v3 }
 0x427   :  { %7958 = vmatpush2.bf16.msra.mxu0 %v13757_v6  ;;  %7912 = vmatprep.subr.bf16.mxu1 %v13646_v41  ;;  %v4605_v6 = vld [vmem:[#allocation11 + $0x110] sm:$0xff] }
 0x428   :  { %7959 = vmatprep.subr.bf16.mxu0 %v13750_v36  ;;  %v4609_v41 = vld [vmem:[#allocation11 + $0x130] sm:$0xff] }
 0x42a   :  { %7913 = vmatpush2.bf16.msra.mxu1 %v13645_v8  ;;  %v13862_v8 = vcombine.high %v5012_v46, %v5016_v24  ;;  %v4693_v46 = vld [vmem:[#allocation11 + $0x3d0] sm:$0xff] }
 0x42b   :  { %7960 = vmatpush2.bf16.msra.mxu0 %v13749_v5  ;;  %7914 = vmatprep.subr.bf16.mxu1 %v13638_v9  ;;  %v13456_v9 = vcombine.high %v4605_v6, %v4609_v41  ;;  %v4697_v24 = vld [vmem:[#allocation11 + $0x3f0] sm:$0xff] }
 0x42c   :  { %7961 = vmatprep.subr.bf16.mxu0 %v13742_v10  ;;  %v5004_v10 = vld [vmem:[#allocation11 + $0xd88] sm:$0xff] }
 0x42d   :  { %v13853_v11 = vcombine.low %v5004_v10, %v5008_v13 }
 0x42e   :  { %7915 = vmatpush2.bf16.msra.mxu1 %v13637_v23  ;;  %v13455_v23 = vcombine.low %v4605_v6, %v4609_v41 }
 0x42f   :  { %7962 = vmatpush2.bf16.msra.mxu0 %v13741_v31  ;;  %7916 = vmatprep.subr.bf16.mxu1 %v13630_v44  ;;  %v13854_v31 = vcombine.high %v5004_v10, %v5008_v13  ;;  %v13448_v44 = vcombine.high %v4597_v20, %v4601_v22  ;;  %v4956_v20 = vld [vmem:[#allocation11 + $0xc08] sm:$0xff] }
 0x430   :  { %8013 = vmatprep.subr.bf16.mxu0 %v13480_v55  ;;  %v5000_v55 = vld [vmem:[#allocation11 + $0xd68] sm:$0xff] }
 0x431   :  { %v7719_v12 = vpop.f32.mrf.mxu0  ;;  %v13845_v53 = vcombine.low %v4996_v62, %v5000_v55  ;;  %v4960_v22 = vld [vmem:[#allocation11 + $0xc28] sm:$0xff] }
 0x432   :  { %v7720_v1 = vadd.f32 %v7719_v12, %v5088_v0  ;;  %v7760_v56 = vpop.f32.mrf.mxu1  ;;  %7917 = vmatpush2.bf16.msra.mxu1 %v13629_v47  ;;  %7964 = vmatmul.mubr.bf16.vlgmr.msra.gmra.mxu0 %v15269_v4  ;;  %v13846_v47 = vcombine.high %v4996_v62, %v5000_v55  ;;  %v13440_v0 = vcombine.high %v4589_v35, %v4593_v33  ;;  %v5076_v35 = vld [vmem:[#allocation11 + $0xfc8] sm:$0xff] }
 0x433   :  { %8014 = vmatpush1.bf16.msra.mxu0 %v13479_v45  ;;  %8045 = vmatprep.mubr.bf16.mxu0 %v15225_v40  ;;  %v7721_v30 = vpop.f32.mrf.mxu0  ;;  %v4988_v45 = vld [vmem:[#allocation11 + $0xd08] sm:$0xff]  ;;  %v13806_v62 = vcombine.high %v4956_v20, %v4960_v22 }
 0x434   :  { %v15303_v60 = vadd.f32 %v7760_v56, %v7720_v1  ;;  %v7722_v2 = vadd.f32 %v7721_v30, %v5092_v7  ;;  %v7762_v34 = vpop.f32.mrf.mxu1  ;;  %7918 = vmatprep.subr.bf16.mxu1 %v13622_v49  ;;  %8015 = vmatprep.subr.bf16.mxu0 %v13472_v52  ;;  %v4992_v7 = vld [vmem:[#allocation11 + $0xd28] sm:$0xff]  ;;  %v4581_v49 = vld [vmem:[#allocation11 + $0x50] sm:$0xff] }
 0x435   :  { %v7723_v3 = vpop.f32.mrf.mxu0  ;;  %v4585_v52 = vld [vmem:[#allocation11 + $0x70] sm:$0xff]  ;;  %v13838_v12 = vcombine.high %v4988_v45, %v4992_v7  ;;  %v4984_v1 = vld [vmem:[#allocation11 + $0xce8] sm:$0xff]  ;;  %v13837_v30 = vcombine.low %v4988_v45, %v4992_v7 }
 0x436   :  { %v15305_v36 = vadd.f32 %v7762_v34, %v7722_v2  ;;  %v7764_v28 = vpop.f32.mrf.mxu1  ;;  %7919 = vmatpush2.bf16.msra.mxu1 %v13621_v58  ;;  %v13432_v57 = vcombine.high %v4581_v49, %v4585_v52  ;;  %v4573_v56 = vld [vmem:[#allocation11 + $0x10] sm:$0xff]  ;;  %v4972_v34 = vld [vmem:[#allocation11 + $0xc88] sm:$0xff]  ;;  %v13829_v3 = vcombine.low %v4980_v51, %v4984_v1 }
 0x437   :  { %8016 = vmatpush1.bf16.msra.mxu0 %v13471_v43  ;;  %v7724_v50 = vpop.f32.mrf.mxu0  ;;  %7920 = vmatprep.subr.bf16.mxu1 %v13614_v59  ;;  %v4577_v58 = vld [vmem:[#allocation11 + $0x30] sm:$0xff]  ;;  %v13431_v43 = vcombine.low %v4581_v49, %v4585_v52  ;;  %v13830_v59 = vcombine.high %v4980_v51, %v4984_v1  ;;  %v13544_v28 = vcombine.high %v4693_v46, %v4697_v24  ;;  %v5080_v33 = vld [vmem:[#allocation11 + $0xfe8] sm:$0xff] }
 0x438   :  { %v7765_v5 = vpop.f32.mrf.mxu1  ;;  %8017 = vmatprep.subr.bf16.mxu0 %v13464_v25  ;;  %v13424_v2 = vcombine.high %v4573_v56, %v4577_v58  ;;  %v4976_v25 = vld [vmem:[#allocation11 + $0xca8] sm:$0xff]  ;;  %v13423_v6 = vcombine.low %v4573_v56, %v4577_v58  ;;  %v13926_v45 = vcombine.high %v5076_v35, %v5080_v33 }
 0x439   :  { %v13822_v41 = vcombine.high %v4972_v34, %v4976_v25  ;;  %v4968_v50 = vld [vmem:[#allocation11 + $0xc68] sm:$0xff]  ;;  %v13821_v5 = vcombine.low %v4972_v34, %v4976_v25 }
 0x43a   :  { %7921 = vmatpush2.bf16.msra.mxu1 %v13613_v42  ;;  %v4964_v42 = vld [vmem:[#allocation11 + $0xc48] sm:$0xff] }
 0x43b   :  { %8018 = vmatpush1.bf16.msra.mxu0 %v13463_v14  ;;  %7972 = vmatprep.subr.bf16.mxu1 %v13862_v8  ;;  %v4685_v14 = vld [vmem:[#allocation11 + $0x390] sm:$0xff]  ;;  %v13814_v10 = vcombine.high %v4964_v42, %v4968_v50  ;;  %v5068_v49 = vld [vmem:[#allocation11 + $0xf88] sm:$0xff] }
 0x43c   :  { %8019 = vmatprep.subr.bf16.mxu0 %v13456_v9  ;;  %v4689_v8 = vld [vmem:[#allocation11 + $0x3b0] sm:$0xff]  ;;  %v13543_v9 = vcombine.low %v4693_v46, %v4697_v24  ;;  %v5072_v52 = vld [vmem:[#allocation11 + $0xfa8] sm:$0xff] }
 0x43d   :  { %7923 = vmatmul.mubr.bf16.vlgmr.msra.gmra.mxu1 %v15246_v38  ;;  %v13536_v13 = vcombine.high %v4685_v14, %v4689_v8  ;;  %v13918_v51 = vcombine.high %v5068_v49, %v5072_v52  ;;  %v5060_v56 = vld [vmem:[#allocation11 + $0xf48] sm:$0xff] }
 0x43e   :  { %7973 = vmatpush1.bf16.msra.mxu1 %v13861_v16  ;;  %8004 = vmatprep.mubr.bf16.mxu1 %v15289_v26  ;;  %v4677_v16 = vld [vmem:[#allocation11 + $0x350] sm:$0xff]  ;;  %v5064_v58 = vld [vmem:[#allocation11 + $0xf68] sm:$0xff] }
 0x43f   :  { %8020 = vmatpush1.bf16.msra.mxu0 %v13455_v23  ;;  %7974 = vmatprep.subr.bf16.mxu1 %v13854_v31  ;;  %v4681_v23 = vld [vmem:[#allocation11 + $0x370] sm:$0xff]  ;;  %v13813_v31 = vcombine.low %v4964_v42, %v4968_v50  ;;  %v13910_v34 = vcombine.high %v5060_v56, %v5064_v58  ;;  %v5052_v46 = vld [vmem:[#allocation11 + $0xf08] sm:$0xff] }
 0x440   :  { %8021 = vmatprep.subr.bf16.mxu0 %v13448_v44  ;;  %v13535_v44 = vcombine.low %v4685_v14, %v4689_v8  ;;  %v13528_v55 = vcombine.high %v4677_v16, %v4681_v23  ;;  %v5056_v24 = vld [vmem:[#allocation11 + $0xf28] sm:$0xff] }
 0x441   :  { %v13902_v42 = vcombine.high %v5052_v46, %v5056_v24  ;;  %v5044_v14 = vld [vmem:[#allocation11 + $0xec8] sm:$0xff] }
 0x442   :  { %7975 = vmatpush1.bf16.msra.mxu1 %v13853_v11  ;;  %v4669_v11 = vld [vmem:[#allocation11 + $0x310] sm:$0xff]  ;;  %v5048_v8 = vld [vmem:[#allocation11 + $0xee8] sm:$0xff] }
 0x443   :  { %8022 = vmatpush1.bf16.msra.mxu0 %v13447_v39  ;;  %7976 = vmatprep.subr.bf16.mxu1 %v13846_v47  ;;  %v4673_v39 = vld [vmem:[#allocation11 + $0x330] sm:$0xff]  ;;  %v13805_v47 = vcombine.low %v4956_v20, %v4960_v22  ;;  %v13894_v20 = vcombine.high %v5044_v14, %v5048_v8 }
 0x444   :  { %8023 = vmatprep.subr.bf16.mxu0 %v13440_v0  ;;  %v13527_v0 = vcombine.low %v4677_v16, %v4681_v23  ;;  %v13520_v7 = vcombine.high %v4669_v11, %v4673_v39  ;;  %v5036_v16 = vld [vmem:[#allocation11 + $0xe88] sm:$0xff] }
 0x445   :  { %v5040_v23 = vld [vmem:[#allocation11 + $0xea8] sm:$0xff] }
 0x446   :  { %7977 = vmatpush1.bf16.msra.mxu1 %v13845_v53  ;;  %v4661_v53 = vld [vmem:[#allocation11 + $0x2d0] sm:$0xff] }
 0x447   :  { %8024 = vmatpush1.bf16.msra.mxu0 %v13439_v54  ;;  %7978 = vmatprep.subr.bf16.mxu1 %v13838_v12  ;;  %v4665_v54 = vld [vmem:[#allocation11 + $0x2f0] sm:$0xff]  ;;  %v13925_v12 = vcombine.low %v5076_v35, %v5080_v33  ;;  %v13886_v35 = vcombine.high %v5036_v16, %v5040_v23 }
 0x448   :  { %8025 = vmatprep.subr.bf16.mxu0 %v13432_v57  ;;  %v13519_v57 = vcombine.low %v4669_v11, %v4673_v39  ;;  %v13512_v1 = vcombine.high %v4661_v53, %v4665_v54  ;;  %v5028_v11 = vld [vmem:[#allocation11 + $0xe48] sm:$0xff] }
 0x449   :  { %v5032_v39 = vld [vmem:[#allocation11 + $0xe68] sm:$0xff] }
 0x44a   :  { %7979 = vmatpush1.bf16.msra.mxu1 %v13837_v30  ;;  %v4653_v30 = vld [vmem:[#allocation11 + $0x290] sm:$0xff] }
 0x44b   :  { %8026 = vmatpush1.bf16.msra.mxu0 %v13431_v43  ;;  %7980 = vmatprep.subr.bf16.mxu1 %v13830_v59  ;;  %v4657_v43 = vld [vmem:[#allocation11 + $0x2b0] sm:$0xff]  ;;  %v13917_v59 = vcombine.low %v5068_v49, %v5072_v52  ;;  %v13878_v49 = vcombine.high %v5028_v11, %v5032_v39 }
 0x44c   :  { %8027 = vmatprep.subr.bf16.mxu0 %v13424_v2  ;;  %v13511_v2 = vcombine.low %v4661_v53, %v4665_v54  ;;  %v13504_v25 = vcombine.high %v4653_v30, %v4657_v43  ;;  %v5020_v53 = vld [vmem:[#allocation11 + $0xe08] sm:$0xff] }
 0x44d   :  { %v5024_v54 = vld [vmem:[#allocation11 + $0xe28] sm:$0xff] }
 0x44e   :  { %7981 = vmatpush1.bf16.msra.mxu1 %v13829_v3  ;;  %v4645_v3 = vld [vmem:[#allocation11 + $0x250] sm:$0xff] }
 0x44f   :  { %8028 = vmatpush1.bf16.msra.mxu0 %v13423_v6  ;;  %7982 = vmatprep.subr.bf16.mxu1 %v13822_v41  ;;  %v4649_v6 = vld [vmem:[#allocation11 + $0x270] sm:$0xff]  ;;  %v13909_v41 = vcombine.low %v5060_v56, %v5064_v58  ;;  %v13877_v56 = vcombine.low %v5028_v11, %v5032_v39 }
 0x450   :  { %8029 = vmatprep.subr.bf16.mxu0 %v13544_v28  ;;  %v13503_v28 = vcombine.low %v4653_v30, %v4657_v43  ;;  %v13496_v50 = vcombine.high %v4645_v3, %v4649_v6  ;;  %v13870_v43 = vcombine.high %v5020_v53, %v5024_v54  ;;  %v4837_v11 = vld [vmem:[#allocation11 + $0x850] sm:$0xff] }
 0x451   :  { %v4841_v39 = vld [vmem:[#allocation11 + $0x870] sm:$0xff] }
 0x452   :  { %7983 = vmatpush1.bf16.msra.mxu1 %v13821_v5  ;;  %v4637_v5 = vld [vmem:[#allocation11 + $0x210] sm:$0xff] }
 0x453   :  { %8030 = vmatpush2.bf16.msra.mxu0 %v13543_v9  ;;  %7984 = vmatprep.subr.bf16.mxu1 %v13814_v10  ;;  %v4641_v9 = vld [vmem:[#allocation11 + $0x230] sm:$0xff]  ;;  %v13901_v10 = vcombine.low %v5052_v46, %v5056_v24 }
 0x454   :  { %8031 = vmatprep.subr.bf16.mxu0 %v13536_v13  ;;  %v13495_v13 = vcombine.low %v4645_v3, %v4649_v6  ;;  %v13488_v22 = vcombine.high %v4637_v5, %v4641_v9  ;;  %v4861_v46 = vld [vmem:[#allocation11 + $0x910] sm:$0xff]  ;;  %v13869_v3 = vcombine.low %v5020_v53, %v5024_v54 }
 0x455   :  { %v4865_v24 = vld [vmem:[#allocation11 + $0x930] sm:$0xff] }
 0x456   :  { %7985 = vmatpush1.bf16.msra.mxu1 %v13813_v31  ;;  %v4885_v31 = vld [vmem:[#allocation11 + $0x9d0] sm:$0xff] }
 0x457   :  { %8032 = vmatpush2.bf16.msra.mxu0 %v13535_v44  ;;  %7986 = vmatprep.subr.bf16.mxu1 %v13806_v62  ;;  %v4889_v44 = vld [vmem:[#allocation11 + $0x9f0] sm:$0xff]  ;;  %v13893_v62 = vcombine.low %v5044_v14, %v5048_v8 }
 0x458   :  { %8033 = vmatprep.subr.bf16.mxu0 %v13528_v55  ;;  %v13487_v55 = vcombine.low %v4637_v5, %v4641_v9  ;;  %v13736_v33 = vcombine.high %v4885_v31, %v4889_v44  ;;  %v4853_v14 = vld [vmem:[#allocation11 + $0x8d0] sm:$0xff]  ;;  %v13711_v9 = vcombine.low %v4861_v46, %v4865_v24 }
 0x459   :  { %v4857_v8 = vld [vmem:[#allocation11 + $0x8f0] sm:$0xff] }
 0x45a   :  { %7987 = vmatpush1.bf16.msra.mxu1 %v13805_v47  ;;  %v4877_v47 = vld [vmem:[#allocation11 + $0x990] sm:$0xff] }
 0x45b   :  { %8034 = vmatpush2.bf16.msra.mxu0 %v13527_v0  ;;  %7988 = vmatprep.subr.bf16.mxu1 %v13926_v45  ;;  %v4881_v0 = vld [vmem:[#allocation11 + $0x9b0] sm:$0xff]  ;;  %v13885_v45 = vcombine.low %v5036_v16, %v5040_v23 }
 0x45c   :  { %8035 = vmatprep.subr.bf16.mxu0 %v13520_v7  ;;  %v13735_v7 = vcombine.low %v4885_v31, %v4889_v44  ;;  %v13728_v52 = vcombine.high %v4877_v47, %v4881_v0  ;;  %v13727_v30 = vcombine.low %v4877_v47, %v4881_v0  ;;  %v4845_v16 = vld [vmem:[#allocation11 + $0x890] sm:$0xff]  ;;  %v13703_v44 = vcombine.low %v4853_v14, %v4857_v8 }
 0x45d   :  { %v4849_v23 = vld [vmem:[#allocation11 + $0x8b0] sm:$0xff] }
 0x45e   :  { %7989 = vmatpush2.bf16.msra.mxu1 %v13925_v12  ;;  %v13695_v0 = vcombine.low %v4845_v16, %v4849_v23  ;;  %v4829_v53 = vld [vmem:[#allocation11 + $0x810] sm:$0xff] }
 0x45f   :  { %8036 = vmatpush2.bf16.msra.mxu0 %v13519_v57  ;;  %7990 = vmatprep.subr.bf16.mxu1 %v13918_v51  ;;  %v4869_v57 = vld [vmem:[#allocation11 + $0x950] sm:$0xff] }
 0x460   :  { %8037 = vmatprep.subr.bf16.mxu0 %v13512_v1  ;;  %v4873_v51 = vld [vmem:[#allocation11 + $0x970] sm:$0xff] }
 0x461   :  { %v4833_v54 = vld [vmem:[#allocation11 + $0x830] sm:$0xff] }
 0x462   :  { %7991 = vmatpush2.bf16.msra.mxu1 %v13917_v59 }
 0x463   :  { %8038 = vmatpush2.bf16.msra.mxu0 %v13511_v2  ;;  %7992 = vmatprep.subr.bf16.mxu1 %v13910_v34  ;;  %v13720_v2 = vcombine.high %v4869_v57, %v4873_v51  ;;  %v4757_v34 = vld [vmem:[#allocation11 + $0x5d0] sm:$0xff] }
 0x464   :  { %8039 = vmatprep.subr.bf16.mxu0 %v13504_v25  ;;  %v4761_v25 = vld [vmem:[#allocation11 + $0x5f0] sm:$0xff] }
 0x465   :  { %v13607_v5 = vcombine.low %v4757_v34, %v4761_v25 }
 0x466   :  { %7993 = vmatpush2.bf16.msra.mxu1 %v13909_v41  ;;  %v13719_v41 = vcombine.low %v4869_v57, %v4873_v51  ;;  %v13687_v57 = vcombine.low %v4837_v11, %v4841_v39 }
 0x467   :  { %8040 = vmatpush2.bf16.msra.mxu0 %v13503_v28  ;;  %7994 = vmatprep.subr.bf16.mxu1 %v13902_v42  ;;  %v13608_v28 = vcombine.high %v4757_v34, %v4761_v25  ;;  %v13712_v42 = vcombine.high %v4861_v46, %v4865_v24  ;;  %v13679_v25 = vcombine.low %v4829_v53, %v4833_v54  ;;  %v4709_v24 = vld [vmem:[#allocation11 + $0x450] sm:$0xff] }
 0x468   :  { %8041 = vmatprep.subr.bf16.mxu0 %v13496_v50  ;;  %v4749_v50 = vld [vmem:[#allocation11 + $0x590] sm:$0xff] }
 0x46a   :  { %7995 = vmatpush2.bf16.msra.mxu1 %v13901_v10 }
 0x46b   :  { %8042 = vmatpush2.bf16.msra.mxu0 %v13495_v13  ;;  %7996 = vmatprep.subr.bf16.mxu1 %v13894_v20  ;;  %v13704_v13 = vcombine.high %v4853_v14, %v4857_v8  ;;  %v4741_v20 = vld [vmem:[#allocation11 + $0x550] sm:$0xff] }
 0x46c   :  { %8043 = vmatprep.subr.bf16.mxu0 %v13488_v22  ;;  %v4745_v22 = vld [vmem:[#allocation11 + $0x570] sm:$0xff] }
 0x46d   :  { %v13591_v47 = vcombine.low %v4741_v20, %v4745_v22  ;;  %v4701_v14 = vld [vmem:[#allocation11 + $0x410] sm:$0xff] }
 0x46e   :  { %7997 = vmatpush2.bf16.msra.mxu1 %v13893_v62  ;;  %v13592_v62 = vcombine.high %v4741_v20, %v4745_v22  ;;  %v4705_v8 = vld [vmem:[#allocation11 + $0x430] sm:$0xff] }
 0x46f   :  { %8044 = vmatpush2.bf16.msra.mxu0 %v13487_v55  ;;  %7998 = vmatprep.subr.bf16.mxu1 %v13886_v35  ;;  %v13696_v55 = vcombine.high %v4845_v16, %v4849_v23  ;;  %v4733_v35 = vld [vmem:[#allocation11 + $0x510] sm:$0xff]  ;;  %v13552_v20 = vcombine.high %v4701_v14, %v4705_v8 }
 0x470   :  { %8095 = vmatprep.subr.bf16.mxu0 %v13736_v33  ;;  %v4737_v33 = vld [vmem:[#allocation11 + $0x530] sm:$0xff] }
 0x471   :  { %v7801_v12 = vpop.f32.mrf.mxu0  ;;  %v4821_v16 = vld [vmem:[#allocation11 + $0x7d0] sm:$0xff] }
 0x472   :  { %v15310_v1 = vadd.f32 %v7801_v12, %v15303_v60  ;;  %7999 = vmatpush2.bf16.msra.mxu1 %v13885_v45  ;;  %8046 = vmatmul.mubr.bf16.vlgmr.msra.gmra.mxu0 %v15244_v37  ;;  %v13584_v45 = vcombine.high %v4733_v35, %v4737_v33  ;;  %v13583_v12 = vcombine.low %v4733_v35, %v4737_v33  ;;  %v4825_v23 = vld [vmem:[#allocation11 + $0x7f0] sm:$0xff] }
 0x473   :  { %8096 = vmatpush1.bf16.msra.mxu0 %v13735_v7  ;;  %8127 = vmatprep.mubr.bf16.mxu0 %v15255_v48  ;;  %v7803_v58 = vpop.f32.mrf.mxu0  ;;  %v13688_v7 = vcombine.high %v4837_v11, %v4841_v39  ;;  %v13672_v35 = vcombine.high %v4821_v16, %v4825_v23  ;;  %v4813_v11 = vld [vmem:[#allocation11 + $0x790] sm:$0xff] }
 0x474   :  { %v15315_v59 = vadd.f32 %v7803_v58, %v15305_v36  ;;  %8000 = vmatprep.subr.bf16.mxu1 %v13878_v49  ;;  %8097 = vmatprep.subr.bf16.mxu0 %v13728_v52  ;;  %v4753_v36 = vld [vmem:[#allocation11 + $0x5b0] sm:$0xff] }
 0x475   :  { %v7805_v60 = vpop.f32.mrf.mxu0  ;;  %v13600_v10 = vcombine.high %v4749_v50, %v4753_v36  ;;  %v13599_v31 = vcombine.low %v4749_v50, %v4753_v36  ;;  %v4725_v49 = vld [vmem:[#allocation11 + $0x4d0] sm:$0xff] }
 0x476   :  { %8001 = vmatpush2.bf16.msra.mxu1 %v13877_v56  ;;  %v4729_v52 = vld [vmem:[#allocation11 + $0x4f0] sm:$0xff]  ;;  %v13680_v56 = vcombine.high %v4829_v53, %v4833_v54 }
 0x477   :  { %8098 = vmatpush1.bf16.msra.mxu0 %v13727_v30  ;;  %v7806_v6 = vpop.f32.mrf.mxu0  ;;  %8002 = vmatprep.subr.bf16.mxu1 %v13870_v43  ;;  %v13576_v51 = vcombine.high %v4725_v49, %v4729_v52  ;;  %v4717_v58 = vld [vmem:[#allocation11 + $0x490] sm:$0xff]  ;;  %v13575_v34 = vcombine.low %v4725_v49, %v4729_v52 }
 0x478   :  { %8099 = vmatprep.subr.bf16.mxu0 %v13720_v2  ;;  %v4721_v30 = vld [vmem:[#allocation11 + $0x4b0] sm:$0xff] }
 0x479   :  { %v4949_v43 = vld [vmem:[#allocation11 + $0xbd0] sm:$0xff]  ;;  %v13568_v60 = vcombine.high %v4717_v58, %v4721_v30 }
 0x47a   :  { %8003 = vmatpush2.bf16.msra.mxu1 %v13869_v3  ;;  %v4953_v2 = vld [vmem:[#allocation11 + $0xbf0] sm:$0xff] }
 0x47b   :  { %8100 = vmatpush1.bf16.msra.mxu0 %v13719_v41  ;;  %8054 = vmatprep.subr.bf16.mxu1 %v13608_v28  ;;  %v13800_v46 = vcombine.high %v4949_v43, %v4953_v2  ;;  %v4713_v3 = vld [vmem:[#allocation11 + $0x470] sm:$0xff]  ;;  %v13567_v28 = vcombine.low %v4717_v58, %v4721_v30 }
 0x47c   :  { %8101 = vmatprep.subr.bf16.mxu0 %v13712_v42  ;;  %v4941_v6 = vld [vmem:[#allocation11 + $0xb90] sm:$0xff]  ;;  %v13799_v42 = vcombine.low %v4949_v43, %v4953_v2  ;;  %v13560_v50 = vcombine.high %v4709_v24, %v4713_v3 }
 0x47d   :  { %8005 = vmatmul.mubr.bf16.vlgmr.msra.gmra.mxu1 %v15291_v27  ;;  %v4945_v41 = vld [vmem:[#allocation11 + $0xbb0] sm:$0xff] }
 0x47e   :  { %8055 = vmatpush1.bf16.msra.mxu1 %v13607_v5  ;;  %8086 = vmatprep.mubr.bf16.mxu1 %v15228_v21  ;;  %v13792_v36 = vcombine.high %v4941_v6, %v4945_v41  ;;  %v4933_v5 = vld [vmem:[#allocation11 + $0xb50] sm:$0xff] }
 0x47f   :  { %8102 = vmatpush1.bf16.msra.mxu0 %v13711_v9  ;;  %8056 = vmatprep.subr.bf16.mxu1 %v13600_v10  ;;  %v4937_v9 = vld [vmem:[#allocation11 + $0xb70] sm:$0xff]  ;;  %v13559_v10 = vcombine.low %v4709_v24, %v4713_v3 }
 0x480   :  { %8103 = vmatprep.subr.bf16.mxu0 %v13704_v13  ;;  %v13791_v13 = vcombine.low %v4941_v6, %v4945_v41  ;;  %v13784_v22 = vcombine.high %v4933_v5, %v4937_v9  ;;  %v4817_v39 = vld [vmem:[#allocation11 + $0x7b0] sm:$0xff] }
 0x481   :  { %v13664_v49 = vcombine.high %v4813_v11, %v4817_v39  ;;  %v4805_v53 = vld [vmem:[#allocation11 + $0x750] sm:$0xff] }
 0x482   :  { %8057 = vmatpush1.bf16.msra.mxu1 %v13599_v31  ;;  %v4925_v31 = vld [vmem:[#allocation11 + $0xb10] sm:$0xff] }
 0x483   :  { %8104 = vmatpush1.bf16.msra.mxu0 %v13703_v44  ;;  %8058 = vmatprep.subr.bf16.mxu1 %v13592_v62  ;;  %v4929_v44 = vld [vmem:[#allocation11 + $0xb30] sm:$0xff]  ;;  %v13551_v62 = vcombine.low %v4701_v14, %v4705_v8 }
 0x484   :  { %8105 = vmatprep.subr.bf16.mxu0 %v13696_v55  ;;  %v13783_v55 = vcombine.low %v4933_v5, %v4937_v9  ;;  %v13776_v33 = vcombine.high %v4925_v31, %v4929_v44  ;;  %v4809_v54 = vld [vmem:[#allocation11 + $0x770] sm:$0xff] }
 0x485   :  { %v13656_v58 = vcombine.high %v4805_v53, %v4809_v54  ;;  %v4797_v43 = vld [vmem:[#allocation11 + $0x710] sm:$0xff] }
 0x486   :  { %8059 = vmatpush1.bf16.msra.mxu1 %v13591_v47  ;;  %v4917_v47 = vld [vmem:[#allocation11 + $0xad0] sm:$0xff] }
 0x487   :  { %8106 = vmatpush1.bf16.msra.mxu0 %v13695_v0  ;;  %8060 = vmatprep.subr.bf16.mxu1 %v13584_v45  ;;  %v4921_v0 = vld [vmem:[#allocation11 + $0xaf0] sm:$0xff]  ;;  %v13671_v45 = vcombine.low %v4821_v16, %v4825_v23 }
 0x488   :  { %8107 = vmatprep.subr.bf16.mxu0 %v13688_v7  ;;  %v13775_v7 = vcombine.low %v4925_v31, %v4929_v44  ;;  %v13768_v52 = vcombine.high %v4917_v47, %v4921_v0  ;;  %v4801_v2 = vld [vmem:[#allocation11 + $0x730] sm:$0xff] }
 0x489   :  { %v13648_v24 = vcombine.high %v4797_v43, %v4801_v2  ;;  %v4789_v6 = vld [vmem:[#allocation11 + $0x6d0] sm:$0xff] }
 0x48a   :  { %8061 = vmatpush1.bf16.msra.mxu1 %v13583_v12  ;;  %v4909_v12 = vld [vmem:[#allocation11 + $0xa90] sm:$0xff] }
 0x48b   :  { %8108 = vmatpush1.bf16.msra.mxu0 %v13687_v57  ;;  %8062 = vmatprep.subr.bf16.mxu1 %v13576_v51  ;;  %v4913_v57 = vld [vmem:[#allocation11 + $0xab0] sm:$0xff]  ;;  %v13663_v51 = vcombine.low %v4813_v11, %v4817_v39 }
 0x48c   :  { %8109 = vmatprep.subr.bf16.mxu0 %v13680_v56  ;;  %v13767_v56 = vcombine.low %v4917_v47, %v4921_v0  ;;  %v13760_v30 = vcombine.high %v4909_v12, %v4913_v57  ;;  %v4793_v41 = vld [vmem:[#allocation11 + $0x6f0] sm:$0xff] }
 0x48d   :  { %v13640_v14 = vcombine.high %v4789_v6, %v4793_v41  ;;  %v4781_v5 = vld [vmem:[#allocation11 + $0x690] sm:$0xff] }
 0x48e   :  { %8063 = vmatpush1.bf16.msra.mxu1 %v13575_v34  ;;  %v4901_v34 = vld [vmem:[#allocation11 + $0xa50] sm:$0xff] }
 0x48f   :  { %8110 = vmatpush1.bf16.msra.mxu0 %v13679_v25  ;;  %8064 = vmatprep.subr.bf16.mxu1 %v13568_v60  ;;  %v4905_v25 = vld [vmem:[#allocation11 + $0xa70] sm:$0xff]  ;;  %v13655_v60 = vcombine.low %v4805_v53, %v4809_v54 }
 0x490   :  { %8111 = vmatprep.subr.bf16.mxu0 %v13800_v46  ;;  %v13759_v46 = vcombine.low %v4909_v12, %v4913_v57  ;;  %v13752_v3 = vcombine.high %v4901_v34, %v4905_v25  ;;  %v4785_v9 = vld [vmem:[#allocation11 + $0x6b0] sm:$0xff] }
 0x491   :  { %v13632_v16 = vcombine.high %v4781_v5, %v4785_v9  ;;  %v4773_v31 = vld [vmem:[#allocation11 + $0x650] sm:$0xff] }
 0x492   :  { %8065 = vmatpush1.bf16.msra.mxu1 %v13567_v28  ;;  %v4893_v28 = vld [vmem:[#allocation11 + $0xa10] sm:$0xff] }
 0x493   :  { %8112 = vmatpush2.bf16.msra.mxu0 %v13799_v42  ;;  %8066 = vmatprep.subr.bf16.mxu1 %v13560_v50  ;;  %v4897_v42 = vld [vmem:[#allocation11 + $0xa30] sm:$0xff]  ;;  %v13647_v50 = vcombine.low %v4797_v43, %v4801_v2  ;;  %v4610_v43 = vld [vmem:[#allocation11 + $0x138] sm:$0xff] }
 0x494   :  { %8113 = vmatprep.subr.bf16.mxu0 %v13792_v36  ;;  %v13751_v36 = vcombine.low %v4901_v34, %v4905_v25  ;;  %v13744_v8 = vcombine.high %v4893_v28, %v4897_v42  ;;  %v4777_v44 = vld [vmem:[#allocation11 + $0x670] sm:$0xff] }
 0x495   :  { %v13624_v11 = vcombine.high %v4773_v31, %v4777_v44  ;;  %v4765_v47 = vld [vmem:[#allocation11 + $0x610] sm:$0xff] }
 0x496   :  { %8067 = vmatpush1.bf16.msra.mxu1 %v13559_v10  ;;  %v4630_v10 = vld [vmem:[#allocation11 + $0x1d8] sm:$0xff]  ;;  %v4769_v0 = vld [vmem:[#allocation11 + $0x630] sm:$0xff] }
 0x497   :  { %8114 = vmatpush2.bf16.msra.mxu0 %v13791_v13  ;;  %8068 = vmatprep.subr.bf16.mxu1 %v13552_v20  ;;  %v4634_v13 = vld [vmem:[#allocation11 + $0x1f8] sm:$0xff]  ;;  %v13639_v20 = vcombine.low %v4789_v6, %v4793_v41  ;;  %v13616_v12 = vcombine.high %v4765_v47, %v4769_v0  ;;  %v13615_v2 = vcombine.low %v4765_v47, %v4769_v0 }
 0x498   :  { %8115 = vmatprep.subr.bf16.mxu0 %v13784_v22  ;;  %v13743_v22 = vcombine.low %v4893_v28, %v4897_v42  ;;  %v13482_v23 = vcombine.high %v4630_v10, %v4634_v13  ;;  %v4602_v6 = vld [vmem:[#allocation11 + $0xf8] sm:$0xff] }
 0x49a   :  { %8069 = vmatpush1.bf16.msra.mxu1 %v13551_v62  ;;  %v4622_v62 = vld [vmem:[#allocation11 + $0x198] sm:$0xff] }
 0x49b   :  { %8116 = vmatpush2.bf16.msra.mxu0 %v13783_v55  ;;  %8070 = vmatprep.subr.bf16.mxu1 %v13672_v35  ;;  %v4626_v55 = vld [vmem:[#allocation11 + $0x1b8] sm:$0xff]  ;;  %v13631_v35 = vcombine.low %v4781_v5, %v4785_v9 }
 0x49c   :  { %8117 = vmatprep.subr.bf16.mxu0 %v13776_v33  ;;  %v13481_v33 = vcombine.low %v4630_v10, %v4634_v13  ;;  %v13474_v39 = vcombine.high %v4622_v62, %v4626_v55  ;;  %v13473_v54 = vcombine.low %v4622_v62, %v4626_v55  ;;  %v4590_v5 = vld [vmem:[#allocation11 + $0x98] sm:$0xff]  ;;  %v4993_v62 = vld [vmem:[#allocation11 + $0xd30] sm:$0xff] }
 0x49d   :  { %v4594_v9 = vld [vmem:[#allocation11 + $0xb8] sm:$0xff] }
 0x49e   :  { %8071 = vmatpush2.bf16.msra.mxu1 %v13671_v45 }
 0x49f   :  { %8118 = vmatpush2.bf16.msra.mxu0 %v13775_v7  ;;  %8072 = vmatprep.subr.bf16.mxu1 %v13664_v49  ;;  %v4614_v7 = vld [vmem:[#allocation11 + $0x158] sm:$0xff] }
 0x4a0   :  { %8119 = vmatprep.subr.bf16.mxu0 %v13768_v52  ;;  %v4618_v49 = vld [vmem:[#allocation11 + $0x178] sm:$0xff]  ;;  %v13623_v52 = vcombine.low %v4773_v31, %v4777_v44  ;;  %v13442_v31 = vcombine.high %v4590_v5, %v4594_v9  ;;  %v4989_v44 = vld [vmem:[#allocation11 + $0xd10] sm:$0xff] }
 0x4a1   :  { %v13466_v57 = vcombine.high %v4614_v7, %v4618_v49  ;;  %v13465_v25 = vcombine.low %v4614_v7, %v4618_v49  ;;  %v13840_v47 = vcombine.high %v4989_v44, %v4993_v62  ;;  %v4981_v7 = vld [vmem:[#allocation11 + $0xcd0] sm:$0xff] }
 0x4a2   :  { %8073 = vmatpush2.bf16.msra.mxu1 %v13663_v51  ;;  %v5013_v51 = vld [vmem:[#allocation11 + $0xdd0] sm:$0xff] }
 0x4a3   :  { %8120 = vmatpush2.bf16.msra.mxu0 %v13767_v56  ;;  %8074 = vmatprep.subr.bf16.mxu1 %v13656_v58  ;;  %v5017_v56 = vld [vmem:[#allocation11 + $0xdf0] sm:$0xff] }
 0x4a4   :  { %8121 = vmatprep.subr.bf16.mxu0 %v13760_v30  ;;  %v4606_v30 = vld [vmem:[#allocation11 + $0x118] sm:$0xff]  ;;  %v13863_v41 = vcombine.low %v5013_v51, %v5017_v56  ;;  %v4985_v49 = vld [vmem:[#allocation11 + $0xcf0] sm:$0xff] }
 0x4a5   :  { %v13457_v28 = vcombine.low %v4606_v30, %v4610_v43 }
 0x4a6   :  { %8075 = vmatpush2.bf16.msra.mxu1 %v13655_v60  ;;  %v13864_v60 = vcombine.high %v5013_v51, %v5017_v56  ;;  %v4973_v56 = vld [vmem:[#allocation11 + $0xc90] sm:$0xff] }
 0x4a7   :  { %8122 = vmatpush2.bf16.msra.mxu0 %v13759_v46  ;;  %8076 = vmatprep.subr.bf16.mxu1 %v13648_v24  ;;  %v5005_v46 = vld [vmem:[#allocation11 + $0xd90] sm:$0xff] }
 0x4a8   :  { %8123 = vmatprep.subr.bf16.mxu0 %v13752_v3  ;;  %v5009_v24 = vld [vmem:[#allocation11 + $0xdb0] sm:$0xff]  ;;  %v4598_v3 = vld [vmem:[#allocation11 + $0xd8] sm:$0xff] }
 0x4a9   :  { %v13856_v42 = vcombine.high %v5005_v46, %v5009_v24  ;;  %v13855_v13 = vcombine.low %v5005_v46, %v5009_v24  ;;  %v4969_v46 = vld [vmem:[#allocation11 + $0xc70] sm:$0xff]  ;;  %v4686_v24 = vld [vmem:[#allocation11 + $0x398] sm:$0xff] }
 0x4aa   :  { %8077 = vmatpush2.bf16.msra.mxu1 %v13647_v50  ;;  %v13450_v50 = vcombine.high %v4598_v3, %v4602_v6 }
 0x4ab   :  { %8124 = vmatpush2.bf16.msra.mxu0 %v13751_v36  ;;  %8078 = vmatprep.subr.bf16.mxu1 %v13640_v14  ;;  %v4997_v36 = vld [vmem:[#allocation11 + $0xd50] sm:$0xff] }
 0x4ac   :  { %8125 = vmatprep.subr.bf16.mxu0 %v13744_v8  ;;  %v5001_v14 = vld [vmem:[#allocation11 + $0xd70] sm:$0xff] }
 0x4ae   :  { %8079 = vmatpush2.bf16.msra.mxu1 %v13639_v20 }
 0x4af   :  { %8126 = vmatpush2.bf16.msra.mxu0 %v13743_v22  ;;  %8080 = vmatprep.subr.bf16.mxu1 %v13632_v16  ;;  %v13449_v22 = vcombine.low %v4598_v3, %v4602_v6  ;;  %v13848_v16 = vcombine.high %v4997_v36, %v5001_v14  ;;  %v4690_v3 = vld [vmem:[#allocation11 + $0x3b8] sm:$0xff] }
 0x4b0   :  { %8177 = vmatprep.subr.bf16.mxu0 %v13482_v23 }
 0x4b1   :  { %v15319_v45 = vpop.f32.mrf.mxu0 }
 0x4b2   :  { %8081 = vmatpush2.bf16.msra.mxu1 %v13631_v35  ;;  %8128 = vmatmul.mubr.bf16.vlgmr.msra.gmra.mxu0 %v15269_v4  ;;  %v4582_v35 = vld [vmem:[#allocation11 + $0x58] sm:$0xff] }
 0x4b3   :  { %8178 = vmatpush1.bf16.msra.mxu0 %v13481_v33  ;;  %8209 = vmatprep.mubr.bf16.mxu0 %v15225_v40  ;;  %v15323_v53 = vpop.f32.mrf.mxu0  ;;  %v13458_v40 = vcombine.high %v4606_v30, %v4610_v43  ;;  %v13847_v33 = vcombine.low %v4997_v36, %v5001_v14  ;;  %v4694_v30 = vld [vmem:[#allocation11 + $0x3d8] sm:$0xff]  ;;  %v4961_v36 = vld [vmem:[#allocation11 + $0xc30] sm:$0xff] }
 0x4b4   :  { %8082 = vmatprep.subr.bf16.mxu1 %v13624_v11  ;;  %8179 = vmatprep.subr.bf16.mxu0 %v13474_v39  ;;  %v13441_v39 = vcombine.low %v4590_v5, %v4594_v9  ;;  %v4698_v43 = vld [vmem:[#allocation11 + $0x3f8] sm:$0xff]  ;;  %v13537_v9 = vcombine.low %v4686_v24, %v4690_v3 }
 0x4b5   :  { %v7887_v58 = vpop.f32.mrf.mxu0  ;;  %v4678_v14 = vld [vmem:[#allocation11 + $0x358] sm:$0xff] }
 0x4b6   :  { %8083 = vmatpush2.bf16.msra.mxu1 %v13623_v52  ;;  %v4578_v52 = vld [vmem:[#allocation11 + $0x38] sm:$0xff]  ;;  %v4977_v58 = vld [vmem:[#allocation11 + $0xcb0] sm:$0xff] }
 0x4b7   :  { %8180 = vmatpush1.bf16.msra.mxu0 %v13473_v54  ;;  %v7888_v34 = vpop.f32.mrf.mxu0  ;;  %8084 = vmatprep.subr.bf16.mxu1 %v13616_v12  ;;  %v13839_v54 = vcombine.low %v4989_v44, %v4993_v62  ;;  %v13823_v6 = vcombine.low %v4973_v56, %v4977_v58  ;;  %v4674_v44 = vld [vmem:[#allocation11 + $0x338] sm:$0xff] }
 0x4b8   :  { %8181 = vmatprep.subr.bf16.mxu0 %v13466_v57  ;;  %v13832_v57 = vcombine.high %v4981_v7, %v4985_v49 }
 0x4ba   :  { %8085 = vmatpush2.bf16.msra.mxu1 %v13615_v2  ;;  %v13831_v2 = vcombine.low %v4981_v7, %v4985_v49 }
 0x4bb   :  { %8182 = vmatpush1.bf16.msra.mxu0 %v13465_v25  ;;  %8136 = vmatprep.subr.bf16.mxu1 %v13864_v60  ;;  %v13824_v25 = vcombine.high %v4973_v56, %v4977_v58  ;;  %v13546_v60 = vcombine.high %v4694_v30, %v4698_v43 }
 0x4bc   :  { %8183 = vmatprep.subr.bf16.mxu0 %v13458_v40  ;;  %v4965_v40 = vld [vmem:[#allocation11 + $0xc50] sm:$0xff] }
 0x4bd   :  { %8087 = vmatmul.mubr.bf16.vlgmr.msra.gmra.mxu1 %v15246_v38  ;;  %v7842_v8 = vpop.f32.mrf.mxu1  ;;  %v13815_v5 = vcombine.low %v4965_v40, %v4969_v46 }
 0x4be   :  { %v15327_v10 = vadd.f32 %v7842_v8, %v15310_v1  ;;  %8137 = vmatpush1.bf16.msra.mxu1 %v13863_v41  ;;  %8168 = vmatprep.mubr.bf16.mxu1 %v15289_v26  ;;  %v4586_v1 = vld [vmem:[#allocation11 + $0x78] sm:$0xff]  ;;  %v13545_v41 = vcombine.low %v4694_v30, %v4698_v43  ;;  %v5053_v43 = vld [vmem:[#allocation11 + $0xf10] sm:$0xff] }
 0x4bf   :  { %8184 = vmatpush1.bf16.msra.mxu0 %v13457_v28  ;;  %v7844_v20 = vpop.f32.mrf.mxu1  ;;  %8138 = vmatprep.subr.bf16.mxu1 %v13856_v42  ;;  %v13434_v0 = vcombine.high %v4582_v35, %v4586_v1  ;;  %v13433_v12 = vcombine.low %v4582_v35, %v4586_v1  ;;  %v13816_v28 = vcombine.high %v4965_v40, %v4969_v46  ;;  %v4682_v8 = vld [vmem:[#allocation11 + $0x378] sm:$0xff] }
 0x4c0   :  { %v15331_v23 = vadd.f32 %v7844_v20, %v15315_v59  ;;  %8185 = vmatprep.subr.bf16.mxu0 %v13450_v50  ;;  %v4574_v59 = vld [vmem:[#allocation11 + $0x18] sm:$0xff]  ;;  %v13538_v42 = vcombine.high %v4686_v24, %v4690_v3  ;;  %v4957_v50 = vld [vmem:[#allocation11 + $0xc10] sm:$0xff]  ;;  %v13530_v20 = vcombine.high %v4678_v14, %v4682_v8 }
 0x4c1   :  { %v7846_v55 = vpop.f32.mrf.mxu1  ;;  %v13426_v51 = vcombine.high %v4574_v59, %v4578_v52  ;;  %v13425_v34 = vcombine.low %v4574_v59, %v4578_v52  ;;  %v13807_v62 = vcombine.low %v4957_v50, %v4961_v36  ;;  %v5061_v52 = vld [vmem:[#allocation11 + $0xf50] sm:$0xff] }
 0x4c2   :  { %8139 = vmatpush1.bf16.msra.mxu1 %v13855_v13  ;;  %v13808_v13 = vcombine.high %v4957_v50, %v4961_v36  ;;  %v13529_v55 = vcombine.low %v4678_v14, %v4682_v8  ;;  %v5045_v3 = vld [vmem:[#allocation11 + $0xed0] sm:$0xff] }
 0x4c3   :  { %8186 = vmatpush1.bf16.msra.mxu0 %v13449_v22  ;;  %v7847_v11 = vpop.f32.mrf.mxu1  ;;  %8140 = vmatprep.subr.bf16.mxu1 %v13848_v16  ;;  %v5077_v22 = vld [vmem:[#allocation11 + $0xfd0] sm:$0xff] }
 0x4c4   :  { %8187 = vmatprep.subr.bf16.mxu0 %v13442_v31  ;;  %v5081_v16 = vld [vmem:[#allocation11 + $0xff0] sm:$0xff]  ;;  %v4670_v31 = vld [vmem:[#allocation11 + $0x318] sm:$0xff] }
 0x4c5   :  { %v13928_v35 = vcombine.high %v5077_v22, %v5081_v16  ;;  %v13522_v1 = vcombine.high %v4670_v31, %v4674_v44  ;;  %v5073_v11 = vld [vmem:[#allocation11 + $0xfb0] sm:$0xff]  ;;  %v13521_v7 = vcombine.low %v4670_v31, %v4674_v44 }
 0x4c6   :  { %8141 = vmatpush1.bf16.msra.mxu1 %v13847_v33  ;;  %v5069_v33 = vld [vmem:[#allocation11 + $0xf90] sm:$0xff] }
 0x4c7   :  { %8188 = vmatpush1.bf16.msra.mxu0 %v13441_v39  ;;  %8142 = vmatprep.subr.bf16.mxu1 %v13840_v47  ;;  %v4662_v39 = vld [vmem:[#allocation11 + $0x2d8] sm:$0xff]  ;;  %v13920_v49 = vcombine.high %v5069_v33, %v5073_v11  ;;  %v5037_v8 = vld [vmem:[#allocation11 + $0xe90] sm:$0xff] }
 0x4c8   :  { %8189 = vmatprep.subr.bf16.mxu0 %v13434_v0  ;;  %v4666_v47 = vld [vmem:[#allocation11 + $0x2f8] sm:$0xff]  ;;  %v13927_v0 = vcombine.low %v5077_v22, %v5081_v16  ;;  %v5029_v44 = vld [vmem:[#allocation11 + $0xe50] sm:$0xff] }
 0x4c9   :  { %v13514_v59 = vcombine.high %v4662_v39, %v4666_v47  ;;  %v13513_v56 = vcombine.low %v4662_v39, %v4666_v47  ;;  %v5021_v47 = vld [vmem:[#allocation11 + $0xe10] sm:$0xff] }
 0x4ca   :  { %8143 = vmatpush1.bf16.msra.mxu1 %v13839_v54  ;;  %v5065_v54 = vld [vmem:[#allocation11 + $0xf70] sm:$0xff] }
 0x4cb   :  { %8190 = vmatpush1.bf16.msra.mxu0 %v13433_v12  ;;  %8144 = vmatprep.subr.bf16.mxu1 %v13832_v57  ;;  %v4654_v12 = vld [vmem:[#allocation11 + $0x298] sm:$0xff]  ;;  %v13912_v58 = vcombine.high %v5061_v52, %v5065_v54 }
 0x4cc   :  { %8191 = vmatprep.subr.bf16.mxu0 %v13426_v51  ;;  %v4658_v57 = vld [vmem:[#allocation11 + $0x2b8] sm:$0xff]  ;;  %v13919_v51 = vcombine.low %v5069_v33, %v5073_v11 }
 0x4cd   :  { %v13506_v30 = vcombine.high %v4654_v12, %v4658_v57  ;;  %v13505_v40 = vcombine.low %v4654_v12, %v4658_v57 }
 0x4ce   :  { %8145 = vmatpush1.bf16.msra.mxu1 %v13831_v2  ;;  %v5057_v2 = vld [vmem:[#allocation11 + $0xf30] sm:$0xff] }
 0x4cf   :  { %8192 = vmatpush1.bf16.msra.mxu0 %v13425_v34  ;;  %8146 = vmatprep.subr.bf16.mxu1 %v13824_v25  ;;  %v4646_v34 = vld [vmem:[#allocation11 + $0x258] sm:$0xff]  ;;  %v13904_v46 = vcombine.high %v5053_v43, %v5057_v2 }
 0x4d0   :  { %8193 = vmatprep.subr.bf16.mxu0 %v13546_v60  ;;  %v4650_v25 = vld [vmem:[#allocation11 + $0x278] sm:$0xff]  ;;  %v13911_v60 = vcombine.low %v5061_v52, %v5065_v54 }
 0x4d1   :  { %v13498_v24 = vcombine.high %v4646_v34, %v4650_v25  ;;  %v13497_v50 = vcombine.low %v4646_v34, %v4650_v25 }
 0x4d2   :  { %8147 = vmatpush1.bf16.msra.mxu1 %v13823_v6  ;;  %v5049_v6 = vld [vmem:[#allocation11 + $0xef0] sm:$0xff] }
 0x4d3   :  { %8194 = vmatpush2.bf16.msra.mxu0 %v13545_v41  ;;  %8148 = vmatprep.subr.bf16.mxu1 %v13816_v28  ;;  %v4638_v41 = vld [vmem:[#allocation11 + $0x218] sm:$0xff]  ;;  %v13896_v36 = vcombine.high %v5045_v3, %v5049_v6 }
 0x4d4   :  { %8195 = vmatprep.subr.bf16.mxu0 %v13538_v42  ;;  %v4642_v28 = vld [vmem:[#allocation11 + $0x238] sm:$0xff]  ;;  %v13903_v42 = vcombine.low %v5053_v43, %v5057_v2 }
 0x4d5   :  { %v13490_v14 = vcombine.high %v4638_v41, %v4642_v28  ;;  %v13489_v22 = vcombine.low %v4638_v41, %v4642_v28  ;;  %v4866_v43 = vld [vmem:[#allocation11 + $0x938] sm:$0xff] }
 0x4d6   :  { %8149 = vmatpush1.bf16.msra.mxu1 %v13815_v5  ;;  %v5041_v5 = vld [vmem:[#allocation11 + $0xeb0] sm:$0xff]  ;;  %v4858_v41 = vld [vmem:[#allocation11 + $0x8f8] sm:$0xff] }
 0x4d7   :  { %8196 = vmatpush2.bf16.msra.mxu0 %v13537_v9  ;;  %8150 = vmatprep.subr.bf16.mxu1 %v13808_v13  ;;  %v4886_v9 = vld [vmem:[#allocation11 + $0x9d8] sm:$0xff]  ;;  %v13888_v16 = vcombine.high %v5037_v8, %v5041_v5 }
 0x4d8   :  { %8197 = vmatprep.subr.bf16.mxu0 %v13530_v20  ;;  %v4890_v13 = vld [vmem:[#allocation11 + $0x9f8] sm:$0xff]  ;;  %v13895_v20 = vcombine.low %v5045_v3, %v5049_v6 }
 0x4d9   :  { %v13738_v31 = vcombine.high %v4886_v9, %v4890_v13  ;;  %v13737_v33 = vcombine.low %v4886_v9, %v4890_v13  ;;  %v4754_v3 = vld [vmem:[#allocation11 + $0x5b8] sm:$0xff] }
 0x4da   :  { %8151 = vmatpush1.bf16.msra.mxu1 %v13807_v62  ;;  %v5033_v62 = vld [vmem:[#allocation11 + $0xe70] sm:$0xff]  ;;  %v4854_v6 = vld [vmem:[#allocation11 + $0x8d8] sm:$0xff] }
 0x4db   :  { %8198 = vmatpush2.bf16.msra.mxu0 %v13529_v55  ;;  %8152 = vmatprep.subr.bf16.mxu1 %v13928_v35  ;;  %v4878_v55 = vld [vmem:[#allocation11 + $0x998] sm:$0xff]  ;;  %v13880_v11 = vcombine.high %v5029_v44, %v5033_v62  ;;  %v13879_v52 = vcombine.low %v5029_v44, %v5033_v62 }
 0x4dc   :  { %8199 = vmatprep.subr.bf16.mxu0 %v13522_v1  ;;  %v4882_v35 = vld [vmem:[#allocation11 + $0x9b8] sm:$0xff]  ;;  %v13887_v1 = vcombine.low %v5037_v8, %v5041_v5  ;;  %v13706_v8 = vcombine.high %v4854_v6, %v4858_v41 }
 0x4dd   :  { %v13730_v39 = vcombine.high %v4878_v55, %v4882_v35  ;;  %v13729_v54 = vcombine.low %v4878_v55, %v4882_v35  ;;  %v4742_v5 = vld [vmem:[#allocation11 + $0x558] sm:$0xff] }
 0x4de   :  { %8153 = vmatpush2.bf16.msra.mxu1 %v13927_v0  ;;  %v5025_v0 = vld [vmem:[#allocation11 + $0xe30] sm:$0xff]  ;;  %v4746_v9 = vld [vmem:[#allocation11 + $0x578] sm:$0xff] }
 0x4df   :  { %8200 = vmatpush2.bf16.msra.mxu0 %v13521_v7  ;;  %8154 = vmatprep.subr.bf16.mxu1 %v13920_v49  ;;  %v4870_v7 = vld [vmem:[#allocation11 + $0x958] sm:$0xff]  ;;  %v13872_v12 = vcombine.high %v5021_v47, %v5025_v0  ;;  %v13871_v34 = vcombine.low %v5021_v47, %v5025_v0  ;;  %v13594_v55 = vcombine.high %v4742_v5, %v4746_v9 }
 0x4e0   :  { %8201 = vmatprep.subr.bf16.mxu0 %v13514_v59  ;;  %v4874_v49 = vld [vmem:[#allocation11 + $0x978] sm:$0xff] }
 0x4e1   :  { %v4842_v0 = vld [vmem:[#allocation11 + $0x878] sm:$0xff] }
 0x4e2   :  { %8155 = vmatpush2.bf16.msra.mxu1 %v13919_v51  ;;  %v13722_v51 = vcombine.high %v4870_v7, %v4874_v49 }
 0x4e3   :  { %8202 = vmatpush2.bf16.msra.mxu0 %v13513_v56  ;;  %8156 = vmatprep.subr.bf16.mxu1 %v13912_v58  ;;  %v4758_v56 = vld [vmem:[#allocation11 + $0x5d8] sm:$0xff] }
 0x4e4   :  { %8203 = vmatprep.subr.bf16.mxu0 %v13506_v30  ;;  %v4762_v58 = vld [vmem:[#allocation11 + $0x5f8] sm:$0xff] }
 0x4e5   :  { %v4862_v30 = vld [vmem:[#allocation11 + $0x918] sm:$0xff]  ;;  %v13610_v25 = vcombine.high %v4758_v56, %v4762_v58 }
 0x4e6   :  { %8157 = vmatpush2.bf16.msra.mxu1 %v13911_v60  ;;  %v15337_v60 = vld [vmem:[#allocation13] sm:$0xff] }
 0x4e7   :  { %8204 = vmatpush2.bf16.msra.mxu0 %v13505_v40  ;;  %8158 = vmatprep.subr.bf16.mxu1 %v13904_v46  ;;  %v13714_v46 = vcombine.high %v4862_v30, %v4866_v43  ;;  %v5100_v28 = vrot.slane %v15337_v60, %v15098_v19 }
 0x4e8   :  { %8205 = vmatprep.subr.bf16.mxu0 %v13498_v24  ;;  %v4750_v24 = vld [vmem:[#allocation11 + $0x598] sm:$0xff] }
 0x4e9   :  { %v13601_v44 = vcombine.low %v4750_v24, %v4754_v3 }
 0x4ea   :  { %8159 = vmatpush2.bf16.msra.mxu1 %v13903_v42  ;;  %v13609_v42 = vcombine.low %v4758_v56, %v4762_v58  ;;  %v4730_v56 = vld [vmem:[#allocation11 + $0x4f8] sm:$0xff] }
 0x4eb   :  { %8206 = vmatpush2.bf16.msra.mxu0 %v13497_v50  ;;  %8160 = vmatprep.subr.bf16.mxu1 %v13896_v36  ;;  %v13713_v50 = vcombine.low %v4862_v30, %v4866_v43  ;;  %v13602_v36 = vcombine.high %v4750_v24, %v4754_v3  ;;  %v4830_v58 = vld [vmem:[#allocation11 + $0x818] sm:$0xff] }
 0x4ec   :  { %8207 = vmatprep.subr.bf16.mxu0 %v13490_v14  ;;  %v4834_v30 = vld [vmem:[#allocation11 + $0x838] sm:$0xff] }
 0x4ee   :  { %8161 = vmatpush2.bf16.msra.mxu1 %v13895_v20  ;;  %v4846_v20 = vld [vmem:[#allocation11 + $0x898] sm:$0xff] }
 0x4ef   :  { %8208 = vmatpush2.bf16.msra.mxu0 %v13489_v22  ;;  %8162 = vmatprep.subr.bf16.mxu1 %v13888_v16  ;;  %v4850_v22 = vld [vmem:[#allocation11 + $0x8b8] sm:$0xff]  ;;  %v7886_v16 = vadd.f32 %v15323_v53, %v5100_v28 }
 0x4f0   :  { %8259 = vmatprep.subr.bf16.mxu0 %v13738_v31  ;;  %v4838_v53 = vld [vmem:[#allocation11 + $0x858] sm:$0xff] }
 0x4f1   :  { %v13689_v43 = vcombine.low %v4838_v53, %v4842_v0  ;;  %v4942_v28 = vld [vmem:[#allocation11 + $0xb98] sm:$0xff] }
 0x4f2   :  { %v15333_v59 = vpop.f32.mrf.mxu0  ;;  %8163 = vmatpush2.bf16.msra.mxu1 %v13887_v1  ;;  %8210 = vmatmul.mubr.bf16.vlgmr.msra.gmra.mxu0 %v15244_v37  ;;  %v13721_v37 = vcombine.low %v4870_v7, %v4874_v49  ;;  %v13698_v1 = vcombine.high %v4846_v20, %v4850_v22  ;;  %v13593_v7 = vcombine.low %v4742_v5, %v4746_v9  ;;  %v4702_v5 = vld [vmem:[#allocation11 + $0x418] sm:$0xff] }
 0x4f3   :  { %8260 = vmatpush1.bf16.msra.mxu0 %v13737_v33  ;;  %8291 = vmatprep.mubr.bf16.mxu0 %v15255_v48  ;;  %v5096_v48 = vrot.slane %v15337_v60, %v15092_v17  ;;  %v4734_v33 = vld [vmem:[#allocation11 + $0x518] sm:$0xff] }
 0x4f4   :  { %v7967_v57 = vpop.f32.mrf.mxu0  ;;  %8164 = vmatprep.subr.bf16.mxu1 %v13880_v11  ;;  %8261 = vmatprep.subr.bf16.mxu0 %v13730_v39  ;;  %v4738_v11 = vld [vmem:[#allocation11 + $0x538] sm:$0xff] }
 0x4f5   :  { %v7884_v14 = vadd.f32 %v15319_v45, %v5096_v48  ;;  %v13705_v45 = vcombine.low %v4854_v6, %v4858_v41  ;;  %v4954_v48 = vld [vmem:[#allocation11 + $0xbf8] sm:$0xff] }
 0x4f6   :  { %v7969_v2 = vpop.f32.mrf.mxu0  ;;  %8165 = vmatpush2.bf16.msra.mxu1 %v13879_v52  ;;  %v13697_v52 = vcombine.low %v4846_v20, %v4850_v22  ;;  %v4710_v6 = vld [vmem:[#allocation11 + $0x458] sm:$0xff] }
 0x4f7   :  { %8262 = vmatpush1.bf16.msra.mxu0 %v13729_v54  ;;  %8166 = vmatprep.subr.bf16.mxu1 %v13872_v12  ;;  %v13586_v54 = vcombine.high %v4734_v33, %v4738_v11  ;;  %v13690_v12 = vcombine.high %v4838_v53, %v4842_v0  ;;  %v4714_v41 = vld [vmem:[#allocation11 + $0x478] sm:$0xff] }
 0x4f8   :  { %v7970_v40 = vpop.f32.mrf.mxu0  ;;  %8263 = vmatprep.subr.bf16.mxu0 %v13722_v51  ;;  %v4726_v51 = vld [vmem:[#allocation11 + $0x4d8] sm:$0xff]  ;;  %v13561_v22 = vcombine.low %v4710_v6, %v4714_v41 }
 0x4f9   :  { %v13578_v2 = vcombine.high %v4726_v51, %v4730_v56  ;;  %v13577_v40 = vcombine.low %v4726_v51, %v4730_v56  ;;  %v4706_v9 = vld [vmem:[#allocation11 + $0x438] sm:$0xff] }
 0x4fa   :  { %8167 = vmatpush2.bf16.msra.mxu1 %v13871_v34  ;;  %v4718_v34 = vld [vmem:[#allocation11 + $0x498] sm:$0xff] }
 0x4fb   :  { %8264 = vmatpush1.bf16.msra.mxu0 %v13721_v37  ;;  %8218 = vmatprep.subr.bf16.mxu1 %v13610_v25  ;;  %v4722_v37 = vld [vmem:[#allocation11 + $0x4b8] sm:$0xff] }
 0x4fc   :  { %8265 = vmatprep.subr.bf16.mxu0 %v13714_v46  ;;  %v4950_v25 = vld [vmem:[#allocation11 + $0xbd8] sm:$0xff]  ;;  %v13681_v46 = vcombine.low %v4830_v58, %v4834_v30  ;;  %v13570_v24 = vcombine.high %v4718_v34, %v4722_v37 }
 0x4fd   :  { %v7924_v13 = vpop.f32.mrf.mxu1  ;;  %8169 = vmatmul.mubr.bf16.vlgmr.msra.gmra.mxu1 %v15291_v27  ;;  %v13802_v3 = vcombine.high %v4950_v25, %v4954_v48  ;;  %v4938_v20 = vld [vmem:[#allocation11 + $0xb78] sm:$0xff] }
 0x4fe   :  { %v7925_v31 = vadd.f32 %v7924_v13, %v7884_v14  ;;  %8219 = vmatpush1.bf16.msra.mxu1 %v13609_v42  ;;  %8250 = vmatprep.mubr.bf16.mxu1 %v15228_v21  ;;  %v4946_v42 = vld [vmem:[#allocation11 + $0xbb8] sm:$0xff]  ;;  %v13562_v14 = vcombine.high %v4710_v6, %v4714_v41 }
 0x4ff   :  { %v7926_v62 = vpop.f32.mrf.mxu1  ;;  %8266 = vmatpush1.bf16.msra.mxu0 %v13713_v50  ;;  %8220 = vmatprep.subr.bf16.mxu1 %v13602_v36  ;;  %v13569_v50 = vcombine.low %v4718_v34, %v4722_v37  ;;  %v13801_v36 = vcombine.low %v4950_v25, %v4954_v48  ;;  %v4934_v13 = vld [vmem:[#allocation11 + $0xb58] sm:$0xff] }
 0x500   :  { %v7927_v35 = vadd.f32 %v7926_v62, %v7886_v16  ;;  %8267 = vmatprep.subr.bf16.mxu0 %v13706_v8  ;;  %v15348_v39 = vadd.f32 %v15333_v59, %v7925_v31  ;;  %v13585_v59 = vcombine.low %v4734_v33, %v4738_v11  ;;  %v13794_v8 = vcombine.high %v4942_v28, %v4946_v42  ;;  %v4822_v62 = vld [vmem:[#allocation11 + $0x7d8] sm:$0xff] }
 0x501   :  { %v7928_v47 = vpop.f32.mrf.mxu1  ;;  %v13793_v16 = vcombine.low %v4942_v28, %v4946_v42  ;;  %v13554_v31 = vcombine.high %v4702_v5, %v4706_v9  ;;  %v13785_v33 = vcombine.low %v4934_v13, %v4938_v20  ;;  %v4814_v53 = vld [vmem:[#allocation11 + $0x798] sm:$0xff] }
 0x502   :  { %8221 = vmatpush1.bf16.msra.mxu1 %v13601_v44  ;;  %v15350_v21 = vadd.f32 %v7967_v57, %v7927_v35  ;;  %v13682_v57 = vcombine.high %v4830_v58, %v4834_v30  ;;  %v13786_v44 = vcombine.high %v4934_v13, %v4938_v20  ;;  %v4930_v35 = vld [vmem:[#allocation11 + $0xb38] sm:$0xff]  ;;  %v8413_v20 = vld [vmem:[#allocation14 + $0x1c0] sm:$0xff] }
 0x503   :  { %v7929_v49 = vpop.f32.mrf.mxu1  ;;  %8268 = vmatpush1.bf16.msra.mxu0 %v13705_v45  ;;  %8222 = vmatprep.subr.bf16.mxu1 %v13594_v55  ;;  %v4826_v45 = vld [vmem:[#allocation11 + $0x7f8] sm:$0xff] }
 0x504   :  { %8269 = vmatprep.subr.bf16.mxu0 %v13698_v1  ;;  %v4926_v55 = vld [vmem:[#allocation11 + $0xb18] sm:$0xff]  ;;  %v13553_v1 = vcombine.low %v4702_v5, %v4706_v9  ;;  %v13674_v11 = vcombine.high %v4822_v62, %v4826_v45 }
 0x505   :  { %v13778_v47 = vcombine.high %v4926_v55, %v4930_v35  ;;  %v4818_v0 = vld [vmem:[#allocation11 + $0x7b8] sm:$0xff] }
 0x506   :  { %8223 = vmatpush1.bf16.msra.mxu1 %v13593_v7  ;;  %v4918_v7 = vld [vmem:[#allocation11 + $0xad8] sm:$0xff] }
 0x507   :  { %8270 = vmatpush1.bf16.msra.mxu0 %v13697_v52  ;;  %8224 = vmatprep.subr.bf16.mxu1 %v13586_v54  ;;  %v4922_v49 = vld [vmem:[#allocation11 + $0xaf8] sm:$0xff]  ;;  %v13673_v52 = vcombine.low %v4822_v62, %v4826_v45  ;;  %v13777_v54 = vcombine.low %v4926_v55, %v4930_v35  ;;  %v8342_v55 = vmax.f32 %v15331_v23, 0.0 }
 0x508   :  { %8271 = vmatprep.subr.bf16.mxu0 %v13690_v12  ;;  %v13666_v12 = vcombine.high %v4814_v53, %v4818_v0  ;;  %v13770_v51 = vcombine.high %v4918_v7, %v4922_v49  ;;  %v4806_v56 = vld [vmem:[#allocation11 + $0x758] sm:$0xff] }
 0x509   :  { %v4810_v58 = vld [vmem:[#allocation11 + $0x778] sm:$0xff] }
 0x50a   :  { %8225 = vmatpush1.bf16.msra.mxu1 %v13585_v59  ;;  %v4910_v30 = vld [vmem:[#allocation11 + $0xa98] sm:$0xff] }
 0x50b   :  { %8272 = vmatpush1.bf16.msra.mxu0 %v13689_v43  ;;  %8226 = vmatprep.subr.bf16.mxu1 %v13578_v2  ;;  %v4914_v59 = vld [vmem:[#allocation11 + $0xab8] sm:$0xff]  ;;  %v13665_v43 = vcombine.low %v4814_v53, %v4818_v0  ;;  %v13769_v2 = vcombine.low %v4918_v7, %v4922_v49 }
 0x50c   :  { %8273 = vmatprep.subr.bf16.mxu0 %v13682_v57  ;;  %v13658_v57 = vcombine.high %v4806_v56, %v4810_v58  ;;  %v13762_v34 = vcombine.high %v4910_v30, %v4914_v59  ;;  %v4798_v37 = vld [vmem:[#allocation11 + $0x718] sm:$0xff] }
 0x50d   :  { %v4802_v25 = vld [vmem:[#allocation11 + $0x738] sm:$0xff] }
 0x50e   :  { %8227 = vmatpush1.bf16.msra.mxu1 %v13577_v40  ;;  %v4902_v48 = vld [vmem:[#allocation11 + $0xa58] sm:$0xff] }
 0x50f   :  { %8274 = vmatpush1.bf16.msra.mxu0 %v13681_v46  ;;  %8228 = vmatprep.subr.bf16.mxu1 %v13570_v24  ;;  %v4906_v40 = vld [vmem:[#allocation11 + $0xa78] sm:$0xff]  ;;  %v13657_v46 = vcombine.low %v4806_v56, %v4810_v58  ;;  %v13761_v24 = vcombine.low %v4910_v30, %v4914_v59 }
 0x510   :  { %8275 = vmatprep.subr.bf16.mxu0 %v13802_v3  ;;  %v13650_v3 = vcombine.high %v4798_v37, %v4802_v25  ;;  %v13754_v6 = vcombine.high %v4902_v48, %v4906_v40  ;;  %v4790_v41 = vld [vmem:[#allocation11 + $0x6d8] sm:$0xff] }
 0x511   :  { %v4794_v28 = vld [vmem:[#allocation11 + $0x6f8] sm:$0xff] }
 0x512   :  { %8229 = vmatpush1.bf16.msra.mxu1 %v13569_v50  ;;  %v4894_v42 = vld [vmem:[#allocation11 + $0xa18] sm:$0xff] }
 0x513   :  { %8276 = vmatpush2.bf16.msra.mxu0 %v13801_v36  ;;  %8230 = vmatprep.subr.bf16.mxu1 %v13562_v14  ;;  %v4898_v50 = vld [vmem:[#allocation11 + $0xa38] sm:$0xff]  ;;  %v13649_v36 = vcombine.low %v4798_v37, %v4802_v25  ;;  %v13753_v14 = vcombine.low %v4902_v48, %v4906_v40 }
 0x514   :  { %8277 = vmatprep.subr.bf16.mxu0 %v13794_v8  ;;  %v13642_v8 = vcombine.high %v4790_v41, %v4794_v28  ;;  %v13746_v5 = vcombine.high %v4894_v42, %v4898_v50  ;;  %v4782_v9 = vld [vmem:[#allocation11 + $0x698] sm:$0xff] }
 0x515   :  { %v4786_v13 = vld [vmem:[#allocation11 + $0x6b8] sm:$0xff] }
 0x516   :  { %8231 = vmatpush1.bf16.msra.mxu1 %v13561_v22  ;;  %v8417_v22 = vld [vmem:[#allocation14 + $0x1e0] sm:$0xff]  ;;  %v4774_v45 = vld [vmem:[#allocation11 + $0x658] sm:$0xff] }
 0x517   :  { %8278 = vmatpush2.bf16.msra.mxu0 %v13793_v16  ;;  %8232 = vmatprep.subr.bf16.mxu1 %v13554_v31  ;;  %v13641_v16 = vcombine.low %v4790_v41, %v4794_v28  ;;  %v13745_v31 = vcombine.low %v4894_v42, %v4898_v50  ;;  %v13988_v62 = vcombine.high %v8413_v20, %v8417_v22  ;;  %v4778_v35 = vld [vmem:[#allocation11 + $0x678] sm:$0xff]  ;;  %v8385_v41 = vld [vmem:[#allocation14 + $0xe0] sm:$0xff] }
 0x518   :  { %8279 = vmatprep.subr.bf16.mxu0 %v13786_v44  ;;  %v13634_v44 = vcombine.high %v4782_v9, %v4786_v13  ;;  %v13626_v53 = vcombine.high %v4774_v45, %v4778_v35  ;;  %v4766_v7 = vld [vmem:[#allocation11 + $0x618] sm:$0xff]  ;;  %v13625_v23 = vcombine.low %v4774_v45, %v4778_v35  ;;  %v8365_v35 = vld [vmem:[#allocation14 + $0x40] sm:$0xff] }
 0x519   :  { %v4770_v49 = vld [vmem:[#allocation11 + $0x638] sm:$0xff] }
 0x51a   :  { %8233 = vmatpush1.bf16.msra.mxu1 %v13553_v1  ;;  %v8405_v1 = vld [vmem:[#allocation14 + $0x180] sm:$0xff]  ;;  %v13618_v58 = vcombine.high %v4766_v7, %v4770_v49  ;;  %v13617_v25 = vcombine.low %v4766_v7, %v4770_v49  ;;  %v4990_v45 = vld [vmem:[#allocation11 + $0xd18] sm:$0xff] }
 0x51b   :  { %8280 = vmatpush2.bf16.msra.mxu0 %v13785_v33  ;;  %8234 = vmatprep.subr.bf16.mxu1 %v13674_v11  ;;  %v8409_v33 = vld [vmem:[#allocation14 + $0x1a0] sm:$0xff]  ;;  %v13633_v11 = vcombine.low %v4782_v9, %v4786_v13 }
 0x51c   :  { %8281 = vmatprep.subr.bf16.mxu0 %v13778_v47  ;;  %v13987_v47 = vcombine.low %v8413_v20, %v8417_v22  ;;  %v13980_v0 = vcombine.high %v8405_v1, %v8409_v33  ;;  %v13979_v56 = vcombine.low %v8405_v1, %v8409_v33  ;;  %v8373_v9 = vld [vmem:[#allocation14 + $0x80] sm:$0xff] }
 0x51d   :  { %v8377_v13 = vld [vmem:[#allocation14 + $0xa0] sm:$0xff] }
 0x51e   :  { %8235 = vmatpush2.bf16.msra.mxu1 %v13673_v52  ;;  %v15353_v52 = vpack.c.bf16 %v8342_v55, %v8342_v55  ;;  %v4994_v55 = vld [vmem:[#allocation11 + $0xd38] sm:$0xff]  ;;  %v8369_v1 = vld [vmem:[#allocation14 + $0x60] sm:$0xff] }
 0x51f   :  { %8282 = vmatpush2.bf16.msra.mxu0 %v13777_v54  ;;  %8236 = vmatprep.subr.bf16.mxu1 %v13666_v12  ;;  %v8397_v54 = vld [vmem:[#allocation14 + $0x140] sm:$0xff] }
 0x520   :  { %8283 = vmatprep.subr.bf16.mxu0 %v13770_v51  ;;  %v8401_v12 = vld [vmem:[#allocation14 + $0x160] sm:$0xff] }
 0x521   :  { %v13972_v59 = vcombine.high %v8397_v54, %v8401_v12  ;;  %v8357_v7 = vld [vmem:[#allocation14] sm:$0xff] }
 0x522   :  { %8237 = vmatpush2.bf16.msra.mxu1 %v13665_v43  ;;  %v5014_v43 = vld [vmem:[#allocation11 + $0xdd8] sm:$0xff]  ;;  %v8361_v49 = vld [vmem:[#allocation14 + $0x20] sm:$0xff] }
 0x523   :  { %8284 = vmatpush2.bf16.msra.mxu0 %v13769_v2  ;;  %8238 = vmatprep.subr.bf16.mxu1 %v13658_v57  ;;  %v5018_v2 = vld [vmem:[#allocation11 + $0xdf8] sm:$0xff]  ;;  %v8389_v57 = vld [vmem:[#allocation14 + $0x100] sm:$0xff] }
 0x524   :  { %8285 = vmatprep.subr.bf16.mxu0 %v13762_v34  ;;  %v8393_v34 = vld [vmem:[#allocation14 + $0x120] sm:$0xff]  ;;  %v13866_v48 = vcombine.high %v5014_v43, %v5018_v2  ;;  %v13865_v28 = vcombine.low %v5014_v43, %v5018_v2 }
 0x525   :  { %v13963_v42 = vcombine.low %v8389_v57, %v8393_v34  ;;  %v8477_v43 = vld [vmem:[#allocation14 + $0x3c0] sm:$0xff] }
 0x526   :  { %8239 = vmatpush2.bf16.msra.mxu1 %v13657_v46  ;;  %v13964_v46 = vcombine.high %v8389_v57, %v8393_v34  ;;  %v8481_v2 = vld [vmem:[#allocation14 + $0x3e0] sm:$0xff]  ;;  %v13931_v34 = vcombine.low %v8357_v7, %v8361_v49 }
 0x527   :  { %8286 = vmatpush2.bf16.msra.mxu0 %v13761_v24  ;;  %8240 = vmatprep.subr.bf16.mxu1 %v13650_v3  ;;  %v5006_v24 = vld [vmem:[#allocation11 + $0xd98] sm:$0xff] }
 0x528   :  { %8287 = vmatprep.subr.bf16.mxu0 %v13754_v6  ;;  %v5010_v3 = vld [vmem:[#allocation11 + $0xdb8] sm:$0xff]  ;;  %v8381_v6 = vld [vmem:[#allocation14 + $0xc0] sm:$0xff] }
 0x529   :  { %v13858_v50 = vcombine.high %v5006_v24, %v5010_v3  ;;  %v13857_v22 = vcombine.low %v5006_v24, %v5010_v3  ;;  %v14051_v3 = vcombine.low %v8477_v43, %v8481_v2 }
 0x52a   :  { %8241 = vmatpush2.bf16.msra.mxu1 %v13649_v36  ;;  %v13956_v36 = vcombine.high %v8381_v6, %v8385_v41 }
 0x52b   :  { %8288 = vmatpush2.bf16.msra.mxu0 %v13753_v14  ;;  %8242 = vmatprep.subr.bf16.mxu1 %v13642_v8  ;;  %v4998_v14 = vld [vmem:[#allocation11 + $0xd58] sm:$0xff] }
 0x52c   :  { %8289 = vmatprep.subr.bf16.mxu0 %v13746_v5  ;;  %v5002_v8 = vld [vmem:[#allocation11 + $0xd78] sm:$0xff] }
 0x52e   :  { %8243 = vmatpush2.bf16.msra.mxu1 %v13641_v16 }
 0x52f   :  { %8290 = vmatpush2.bf16.msra.mxu0 %v13745_v31  ;;  %8244 = vmatprep.subr.bf16.mxu1 %v13634_v44  ;;  %v13955_v31 = vcombine.low %v8381_v6, %v8385_v41  ;;  %v13850_v44 = vcombine.high %v4998_v14, %v5002_v8 }
 0x530   :  { %11471 = vmatprep.subr.bf16.mxu0 %v13988_v62  ;;  %v13948_v62 = vcombine.high %v8373_v9, %v8377_v13 }
 0x532   :  { %v15355_v51 = vpop.f32.mrf.mxu0  ;;  %8245 = vmatpush2.bf16.msra.mxu1 %v13633_v11  ;;  %8292 = vmatmul.mubr.bf16.vlgmr.msra.gmra.mxu0 %v15269_v4  ;;  %v13971_v4 = vcombine.low %v8397_v54, %v8401_v12  ;;  %v13842_v11 = vcombine.high %v4990_v45, %v4994_v55  ;;  %v13841_v54 = vcombine.low %v4990_v45, %v4994_v55 }
 0x533   :  { %11472 = vmatpush1.bf16.msra.mxu0 %v13987_v47  ;;  %11503 = vmatprep.mubr.bf16.mxu0 %v15353_v52  ;;  %v13940_v47 = vcombine.high %v8365_v35, %v8369_v1  ;;  %v13939_v12 = vcombine.low %v8365_v35, %v8369_v1  ;;  %v5070_v35 = vld [vmem:[#allocation11 + $0xf98] sm:$0xff] }
 0x534   :  { %v15359_v30 = vpop.f32.mrf.mxu0  ;;  %8246 = vmatprep.subr.bf16.mxu1 %v13626_v53  ;;  %11473 = vmatprep.subr.bf16.mxu0 %v13980_v0  ;;  %v4982_v53 = vld [vmem:[#allocation11 + $0xcd8] sm:$0xff] }
 0x535   :  { %v4986_v0 = vld [vmem:[#allocation11 + $0xcf8] sm:$0xff] }
 0x536   :  { %v8051_v37 = vpop.f32.mrf.mxu0  ;;  %8247 = vmatpush2.bf16.msra.mxu1 %v13625_v23  ;;  %v13834_v23 = vcombine.high %v4982_v53, %v4986_v0  ;;  %v13833_v57 = vcombine.low %v4982_v53, %v4986_v0  ;;  %v5074_v1 = vld [vmem:[#allocation11 + $0xfb8] sm:$0xff] }
 0x537   :  { %11474 = vmatpush1.bf16.msra.mxu0 %v13979_v56  ;;  %8248 = vmatprep.subr.bf16.mxu1 %v13618_v58  ;;  %v13932_v56 = vcombine.high %v8357_v7, %v8361_v49  ;;  %v4974_v58 = vld [vmem:[#allocation11 + $0xc98] sm:$0xff]  ;;  %v8437_v49 = vld [vmem:[#allocation14 + $0x280] sm:$0xff] }
 0x538   :  { %v8052_v40 = vpop.f32.mrf.mxu0  ;;  %11475 = vmatprep.subr.bf16.mxu0 %v13972_v59  ;;  %v4978_v59 = vld [vmem:[#allocation11 + $0xcb8] sm:$0xff] }
 0x539   :  { %v13826_v37 = vcombine.high %v4974_v58, %v4978_v59  ;;  %v8469_v40 = vld [vmem:[#allocation14 + $0x380] sm:$0xff]  ;;  %v13825_v24 = vcombine.low %v4974_v58, %v4978_v59  ;;  %v5062_v0 = vld [vmem:[#allocation11 + $0xf58] sm:$0xff] }
 0x53a   :  { %8249 = vmatpush2.bf16.msra.mxu1 %v13617_v25  ;;  %v14052_v25 = vcombine.high %v8477_v43, %v8481_v2  ;;  %v5066_v7 = vld [vmem:[#allocation11 + $0xf78] sm:$0xff]  ;;  %v8429_v2 = vld [vmem:[#allocation14 + $0x240] sm:$0xff] }
 0x53b   :  { %11476 = vmatpush1.bf16.msra.mxu0 %v13971_v4  ;;  %8300 = vmatprep.subr.bf16.mxu1 %v13866_v48  ;;  %v4966_v4 = vld [vmem:[#allocation11 + $0xc58] sm:$0xff] }
 0x53c   :  { %11477 = vmatprep.subr.bf16.mxu0 %v13964_v46  ;;  %v4970_v48 = vld [vmem:[#allocation11 + $0xc78] sm:$0xff]  ;;  %v8473_v46 = vld [vmem:[#allocation14 + $0x3a0] sm:$0xff] }
 0x53d   :  { %v8006_v5 = vpop.f32.mrf.mxu1  ;;  %8251 = vmatmul.mubr.bf16.vlgmr.msra.gmra.mxu1 %v15246_v38  ;;  %v13818_v6 = vcombine.high %v4966_v4, %v4970_v48  ;;  %v14044_v41 = vcombine.high %v8469_v40, %v8473_v46  ;;  %v5054_v59 = vld [vmem:[#allocation11 + $0xf18] sm:$0xff] }
 0x53e   :  { %v15363_v20 = vadd.f32 %v8006_v5, %v15348_v39  ;;  %8301 = vmatpush1.bf16.msra.mxu1 %v13865_v28  ;;  %8332 = vmatprep.mubr.bf16.mxu1 %v15289_v26  ;;  %v13849_v39 = vcombine.low %v4998_v14, %v5002_v8  ;;  %v13947_v26 = vcombine.low %v8373_v9, %v8377_v13  ;;  %v4958_v28 = vld [vmem:[#allocation11 + $0xc18] sm:$0xff] }
 0x53f   :  { %v15366_v16 = vpop.f32.mrf.mxu1  ;;  %11478 = vmatpush1.bf16.msra.mxu0 %v13963_v42  ;;  %8302 = vmatprep.subr.bf16.mxu1 %v13858_v50  ;;  %v4962_v42 = vld [vmem:[#allocation11 + $0xc38] sm:$0xff]  ;;  %v8461_v50 = vld [vmem:[#allocation14 + $0x340] sm:$0xff]  ;;  %v13817_v14 = vcombine.low %v4966_v4, %v4970_v48  ;;  %v14043_v8 = vcombine.low %v8469_v40, %v8473_v46 }
 0x540   :  { %11479 = vmatprep.subr.bf16.mxu0 %v13956_v36  ;;  %v8465_v36 = vld [vmem:[#allocation14 + $0x360] sm:$0xff]  ;;  %v13810_v5 = vcombine.high %v4958_v28, %v4962_v42  ;;  %v5078_v13 = vld [vmem:[#allocation11 + $0xfd8] sm:$0xff] }
 0x541   :  { %v8010_v38 = vpop.f32.mrf.mxu1  ;;  %v14036_v9 = vcombine.high %v8461_v50, %v8465_v36  ;;  %v14035_v45 = vcombine.low %v8461_v50, %v8465_v36  ;;  %v5058_v43 = vld [vmem:[#allocation11 + $0xf38] sm:$0xff]  ;;  %v8421_v46 = vld [vmem:[#allocation14 + $0x200] sm:$0xff] }
 0x542   :  { %8303 = vmatpush1.bf16.msra.mxu1 %v13857_v22  ;;  %v5082_v22 = vld [vmem:[#allocation11 + $0xff8] sm:$0xff]  ;;  %v8669_v36 = vld [vmem:[#allocation14 + $0x9c0] sm:$0xff] }
 0x543   :  { %v8011_v33 = vpop.f32.mrf.mxu1  ;;  %11480 = vmatpush1.bf16.msra.mxu0 %v13955_v31  ;;  %8304 = vmatprep.subr.bf16.mxu1 %v13850_v44  ;;  %v8453_v31 = vld [vmem:[#allocation14 + $0x300] sm:$0xff]  ;;  %v13930_v55 = vcombine.high %v5078_v13, %v5082_v22  ;;  %v5046_v48 = vld [vmem:[#allocation11 + $0xed8] sm:$0xff] }
 0x544   :  { %11481 = vmatprep.subr.bf16.mxu0 %v13948_v62  ;;  %v8457_v44 = vld [vmem:[#allocation14 + $0x320] sm:$0xff]  ;;  %v13809_v62 = vcombine.low %v4958_v28, %v4962_v42  ;;  %v5050_v40 = vld [vmem:[#allocation11 + $0xef8] sm:$0xff] }
 0x545   :  { %v14028_v38 = vcombine.high %v8453_v31, %v8457_v44  ;;  %v8449_v33 = vld [vmem:[#allocation14 + $0x2e0] sm:$0xff]  ;;  %v5038_v42 = vld [vmem:[#allocation11 + $0xe98] sm:$0xff] }
 0x546   :  { %8305 = vmatpush1.bf16.msra.mxu1 %v13849_v39  ;;  %v8445_v39 = vld [vmem:[#allocation14 + $0x2c0] sm:$0xff]  ;;  %v5042_v50 = vld [vmem:[#allocation11 + $0xeb8] sm:$0xff] }
 0x547   :  { %11482 = vmatpush1.bf16.msra.mxu0 %v13947_v26  ;;  %8306 = vmatprep.subr.bf16.mxu1 %v13842_v11  ;;  %v13929_v26 = vcombine.low %v5078_v13, %v5082_v22  ;;  %v14027_v11 = vcombine.low %v8453_v31, %v8457_v44  ;;  %v14020_v53 = vcombine.high %v8445_v39, %v8449_v33  ;;  %v8341_v13 = vmax.f32 %v15327_v10, 0.0  ;;  %v5030_v22 = vld [vmem:[#allocation11 + $0xe58] sm:$0xff]  ;;  %v8657_v10 = vld [vmem:[#allocation14 + $0x960] sm:$0xff] }
 0x548   :  { %11483 = vmatprep.subr.bf16.mxu0 %v13940_v47  ;;  %v13922_v47 = vcombine.high %v5070_v35, %v5074_v1  ;;  %v5034_v31 = vld [vmem:[#allocation11 + $0xe78] sm:$0xff] }
 0x54a   :  { %8307 = vmatpush1.bf16.msra.mxu1 %v13841_v54  ;;  %v8441_v54 = vld [vmem:[#allocation14 + $0x2a0] sm:$0xff] }
 0x54b   :  { %11484 = vmatpush1.bf16.msra.mxu0 %v13939_v12  ;;  %8308 = vmatprep.subr.bf16.mxu1 %v13834_v23  ;;  %v13921_v12 = vcombine.low %v5070_v35, %v5074_v1  ;;  %v14019_v23 = vcombine.low %v8445_v39, %v8449_v33  ;;  %v14012_v58 = vcombine.high %v8437_v49, %v8441_v54  ;;  %v5022_v39 = vld [vmem:[#allocation11 + $0xe18] sm:$0xff] }
 0x54c   :  { %11485 = vmatprep.subr.bf16.mxu0 %v13932_v56  ;;  %v13914_v56 = vcombine.high %v5062_v0, %v5066_v7  ;;  %v15369_v1 = vpack.c.bf16 %v8341_v13, %v8341_v13  ;;  %v5026_v33 = vld [vmem:[#allocation11 + $0xe38] sm:$0xff] }
 0x54e   :  { %8309 = vmatpush1.bf16.msra.mxu1 %v13833_v57  ;;  %v8433_v57 = vld [vmem:[#allocation14 + $0x260] sm:$0xff] }
 0x54f   :  { %11486 = vmatpush1.bf16.msra.mxu0 %v13931_v34  ;;  %8310 = vmatprep.subr.bf16.mxu1 %v13826_v37  ;;  %v13913_v34 = vcombine.low %v5062_v0, %v5066_v7  ;;  %v14011_v37 = vcombine.low %v8437_v49, %v8441_v54  ;;  %v14004_v4 = vcombine.high %v8429_v2, %v8433_v57 }
 0x550   :  { %11487 = vmatprep.subr.bf16.mxu0 %v14052_v25  ;;  %v13906_v25 = vcombine.high %v5054_v59, %v5058_v43  ;;  %v13874_v0 = vcombine.high %v5022_v39, %v5026_v33  ;;  %v8009_v49 = vadd.f32 %v15366_v16, %v15350_v21  ;;  %v8533_v21 = vld [vmem:[#allocation14 + $0x580] sm:$0xff] }
 0x551   :  { %v8537_v16 = vld [vmem:[#allocation14 + $0x5a0] sm:$0xff] }
 0x552   :  { %8311 = vmatpush1.bf16.msra.mxu1 %v13825_v24  ;;  %v8425_v24 = vld [vmem:[#allocation14 + $0x220] sm:$0xff] }
 0x553   :  { %11488 = vmatpush2.bf16.msra.mxu0 %v14051_v3  ;;  %8312 = vmatprep.subr.bf16.mxu1 %v13818_v6  ;;  %v13905_v3 = vcombine.low %v5054_v59, %v5058_v43  ;;  %v14003_v6 = vcombine.low %v8429_v2, %v8433_v57  ;;  %v13996_v28 = vcombine.high %v8421_v46, %v8425_v24  ;;  %v8649_v59 = vld [vmem:[#allocation14 + $0x920] sm:$0xff] }
 0x554   :  { %11489 = vmatprep.subr.bf16.mxu0 %v14044_v41  ;;  %v13898_v41 = vcombine.high %v5046_v48, %v5050_v40  ;;  %v13873_v2 = vcombine.low %v5022_v39, %v5026_v33  ;;  %v8625_v39 = vld [vmem:[#allocation14 + $0x860] sm:$0xff] }
 0x556   :  { %8313 = vmatpush1.bf16.msra.mxu1 %v13817_v14  ;;  %v8673_v14 = vld [vmem:[#allocation14 + $0x9e0] sm:$0xff] }
 0x557   :  { %11490 = vmatpush2.bf16.msra.mxu0 %v14043_v8  ;;  %8314 = vmatprep.subr.bf16.mxu1 %v13810_v5  ;;  %v13897_v8 = vcombine.low %v5046_v48, %v5050_v40  ;;  %v13995_v5 = vcombine.low %v8421_v46, %v8425_v24  ;;  %v14244_v44 = vcombine.high %v8669_v36, %v8673_v14  ;;  %v8637_v40 = vld [vmem:[#allocation14 + $0x8c0] sm:$0xff] }
 0x558   :  { %11491 = vmatprep.subr.bf16.mxu0 %v14036_v9  ;;  %v13890_v9 = vcombine.high %v5038_v42, %v5042_v50  ;;  %v14243_v35 = vcombine.low %v8669_v36, %v8673_v14  ;;  %v8641_v46 = vld [vmem:[#allocation14 + $0x8e0] sm:$0xff]  ;;  %v5108_v24 = vrot.slane %v15337_v60, %v15127_v29 }
 0x559   :  { %v8529_v36 = vld [vmem:[#allocation14 + $0x560] sm:$0xff]  ;;  %v14212_v14 = vcombine.high %v8637_v40, %v8641_v46 }
 0x55a   :  { %8315 = vmatpush1.bf16.msra.mxu1 %v13809_v62  ;;  %v8661_v62 = vld [vmem:[#allocation14 + $0x980] sm:$0xff] }
 0x55b   :  { %11492 = vmatpush2.bf16.msra.mxu0 %v14035_v45  ;;  %8316 = vmatprep.subr.bf16.mxu1 %v13930_v55  ;;  %v8665_v45 = vld [vmem:[#allocation14 + $0x9a0] sm:$0xff]  ;;  %v13889_v55 = vcombine.low %v5038_v42, %v5042_v50 }
 0x55c   :  { %11493 = vmatprep.subr.bf16.mxu0 %v14028_v38  ;;  %v13882_v38 = vcombine.high %v5030_v22, %v5034_v31  ;;  %v14235_v7 = vcombine.low %v8661_v62, %v8665_v45  ;;  %v8525_v50 = vld [vmem:[#allocation14 + $0x540] sm:$0xff] }
 0x55d   :  { %v14099_v33 = vcombine.low %v8525_v50, %v8529_v36 }
 0x55e   :  { %8317 = vmatpush2.bf16.msra.mxu1 %v13929_v26  ;;  %v14236_v26 = vcombine.high %v8661_v62, %v8665_v45  ;;  %v8517_v45 = vld [vmem:[#allocation14 + $0x500] sm:$0xff] }
 0x55f   :  { %11494 = vmatpush2.bf16.msra.mxu0 %v14027_v11  ;;  %8318 = vmatprep.subr.bf16.mxu1 %v13922_v47  ;;  %v8653_v11 = vld [vmem:[#allocation14 + $0x940] sm:$0xff] }
 0x560   :  { %11495 = vmatprep.subr.bf16.mxu0 %v14020_v53  ;;  %v13881_v53 = vcombine.low %v5030_v22, %v5034_v31  ;;  %v14107_v22 = vcombine.low %v8533_v21, %v8537_v16 }
 0x562   :  { %8319 = vmatpush2.bf16.msra.mxu1 %v13921_v12  ;;  %v8541_v12 = vld [vmem:[#allocation14 + $0x5c0] sm:$0xff] }
 0x563   :  { %11496 = vmatpush2.bf16.msra.mxu0 %v14019_v23  ;;  %8320 = vmatprep.subr.bf16.mxu1 %v13914_v56  ;;  %v8545_v23 = vld [vmem:[#allocation14 + $0x5e0] sm:$0xff]  ;;  %v14228_v56 = vcombine.high %v8653_v11, %v8657_v10 }
 0x564   :  { %11497 = vmatprep.subr.bf16.mxu0 %v14012_v58  ;;  %v8645_v58 = vld [vmem:[#allocation14 + $0x900] sm:$0xff]  ;;  %v14116_v57 = vcombine.high %v8541_v12, %v8545_v23 }
 0x565   :  { %v14220_v48 = vcombine.high %v8645_v58, %v8649_v59 }
 0x566   :  { %8321 = vmatpush2.bf16.msra.mxu1 %v13913_v34  ;;  %v14227_v34 = vcombine.low %v8653_v11, %v8657_v10 }
 0x567   :  { %11498 = vmatpush2.bf16.msra.mxu0 %v14011_v37  ;;  %8322 = vmatprep.subr.bf16.mxu1 %v13906_v25  ;;  %v5104_v37 = vrot.slane %v15337_v60, %v15150_v63  ;;  %v8344_v25 = vmax.f32 %v8009_v49, 0.0  ;;  %v8050_v60 = vadd.f32 %v15359_v30, %v5108_v24  ;;  %v8621_v30 = vld [vmem:[#allocation14 + $0x840] sm:$0xff] }
 0x568   :  { %11499 = vmatprep.subr.bf16.mxu0 %v14004_v4  ;;  %v14196_v49 = vcombine.high %v8621_v30, %v8625_v39 }
 0x569   :  { %v15381_v42 = vpack.c.bf16 %v8344_v25, %v8344_v25 }
 0x56a   :  { %8323 = vmatpush2.bf16.msra.mxu1 %v13905_v3  ;;  %v14115_v3 = vcombine.low %v8541_v12, %v8545_v23  ;;  %v8613_v12 = vld [vmem:[#allocation14 + $0x800] sm:$0xff] }
 0x56b   :  { %11500 = vmatpush2.bf16.msra.mxu0 %v14003_v6  ;;  %8324 = vmatprep.subr.bf16.mxu1 %v13898_v41  ;;  %v14108_v6 = vcombine.high %v8533_v21, %v8537_v16  ;;  %v14219_v41 = vcombine.low %v8645_v58, %v8649_v59  ;;  %v8617_v23 = vld [vmem:[#allocation14 + $0x820] sm:$0xff]  ;;  %v14195_v58 = vcombine.low %v8621_v30, %v8625_v39 }
 0x56c   :  { %11501 = vmatprep.subr.bf16.mxu0 %v13996_v28  ;;  %v8048_v28 = vadd.f32 %v15355_v51, %v5104_v37  ;;  %v14100_v51 = vcombine.high %v8525_v50, %v8529_v36  ;;  %v8501_v59 = vld [vmem:[#allocation14 + $0x480] sm:$0xff]  ;;  %v14187_v25 = vcombine.low %v8613_v12, %v8617_v23 }
 0x56d   :  { %v8497_v21 = vld [vmem:[#allocation14 + $0x460] sm:$0xff] }
 0x56e   :  { %8325 = vmatpush2.bf16.msra.mxu1 %v13897_v8  ;;  %v8717_v50 = vld [vmem:[#allocation14 + $0xb40] sm:$0xff] }
 0x56f   :  { %11502 = vmatpush2.bf16.msra.mxu0 %v13995_v5  ;;  %8326 = vmatprep.subr.bf16.mxu1 %v13890_v9  ;;  %v8629_v5 = vld [vmem:[#allocation14 + $0x880] sm:$0xff] }
 0x570   :  { %11553 = vmatprep.subr.bf16.mxu0 %v14244_v44  ;;  %v8633_v9 = vld [vmem:[#allocation14 + $0x8a0] sm:$0xff]  ;;  %v14211_v44 = vcombine.low %v8637_v40, %v8641_v46 }
 0x571   :  { %v8729_v40 = vld [vmem:[#allocation14 + $0xba0] sm:$0xff] }
 0x572   :  { %v15371_v47 = vpop.f32.mrf.mxu0  ;;  %8327 = vmatpush2.bf16.msra.mxu1 %v13889_v55  ;;  %11504 = vmatmul.mubr.bf16.vlgmr.msra.gmra.mxu0 %v15369_v1  ;;  %v8521_v55 = vld [vmem:[#allocation14 + $0x520] sm:$0xff] }
 0x573   :  { %8328 = vmatprep.subr.bf16.mxu1 %v13882_v38  ;;  %11554 = vmatpush1.bf16.msra.mxu0 %v14243_v35  ;;  %v14204_v38 = vcombine.high %v8629_v5, %v8633_v9  ;;  %v14092_v10 = vcombine.high %v8517_v45, %v8521_v55  ;;  %v8721_v36 = vld [vmem:[#allocation14 + $0xb60] sm:$0xff] }
 0x574   :  { %v8131_v54 = vpop.f32.mrf.mxu0  ;;  %11555 = vmatprep.subr.bf16.mxu0 %v14236_v26  ;;  %v8705_v30 = vld [vmem:[#allocation14 + $0xae0] sm:$0xff] }
 0x576   :  { %v8133_v43 = vpop.f32.mrf.mxu0  ;;  %8329 = vmatpush2.bf16.msra.mxu1 %v13881_v53  ;;  %v14203_v53 = vcombine.low %v8629_v5, %v8633_v9  ;;  %v8605_v9 = vld [vmem:[#allocation14 + $0x7c0] sm:$0xff] }
 0x577   :  { %8330 = vmatprep.subr.bf16.mxu1 %v13874_v0  ;;  %11556 = vmatpush1.bf16.msra.mxu0 %v14235_v7  ;;  %v8509_v0 = vld [vmem:[#allocation14 + $0x4c0] sm:$0xff]  ;;  %v14188_v43 = vcombine.high %v8613_v12, %v8617_v23 }
 0x578   :  { %v8134_v4 = vpop.f32.mrf.mxu0  ;;  %11557 = vmatprep.subr.bf16.mxu0 %v14228_v56  ;;  %v8513_v7 = vld [vmem:[#allocation14 + $0x4e0] sm:$0xff] }
 0x579   :  { %v14084_v56 = vcombine.high %v8509_v0, %v8513_v7  ;;  %v8493_v4 = vld [vmem:[#allocation14 + $0x440] sm:$0xff] }
 0x57a   :  { %8331 = vmatpush2.bf16.msra.mxu1 %v13873_v2  ;;  %v8733_v2 = vld [vmem:[#allocation14 + $0xbc0] sm:$0xff]  ;;  %v14068_v24 = vcombine.high %v8493_v4, %v8497_v21 }
 0x57b   :  { %11512 = vmatprep.subr.bf16.mxu1 %v14116_v57  ;;  %11558 = vmatpush1.bf16.msra.mxu0 %v14227_v34  ;;  %v8737_v57 = vld [vmem:[#allocation14 + $0xbe0] sm:$0xff]  ;;  %v14083_v34 = vcombine.low %v8509_v0, %v8513_v7 }
 0x57c   :  { %11559 = vmatprep.subr.bf16.mxu0 %v14220_v48  ;;  %v14308_v16 = vcombine.high %v8733_v2, %v8737_v57  ;;  %v8725_v48 = vld [vmem:[#allocation14 + $0xb80] sm:$0xff] }
 0x57d   :  { %v8088_v8 = vpop.f32.mrf.mxu1  ;;  %8333 = vmatmul.mubr.bf16.vlgmr.msra.gmra.mxu1 %v15291_v27  ;;  %v14299_v5 = vcombine.low %v8725_v48, %v8729_v40  ;;  %v8693_v7 = vld [vmem:[#allocation14 + $0xa80] sm:$0xff] }
 0x57e   :  { %v8089_v13 = vadd.f32 %v8088_v8, %v8048_v28  ;;  %11513 = vmatpush1.bf16.msra.mxu1 %v14115_v3  ;;  %11544 = vmatprep.mubr.bf16.mxu1 %v15381_v42  ;;  %v14307_v3 = vcombine.low %v8733_v2, %v8737_v57  ;;  %v14300_v28 = vcombine.high %v8725_v48, %v8729_v40 }
 0x57f   :  { %v8090_v31 = vpop.f32.mrf.mxu1  ;;  %11514 = vmatprep.subr.bf16.mxu1 %v14108_v6  ;;  %11560 = vmatpush1.bf16.msra.mxu0 %v14219_v41  ;;  %v8485_v6 = vld [vmem:[#allocation14 + $0x400] sm:$0xff] }
 0x580   :  { %v8091_v62 = vadd.f32 %v8090_v31, %v8050_v60  ;;  %11561 = vmatprep.subr.bf16.mxu0 %v14212_v14  ;;  %v15387_v27 = vadd.f32 %v15371_v47, %v8089_v13  ;;  %v14091_v47 = vcombine.low %v8517_v45, %v8521_v55  ;;  %v8489_v41 = vld [vmem:[#allocation14 + $0x420] sm:$0xff]  ;;  %v14067_v14 = vcombine.low %v8493_v4, %v8497_v21 }
 0x581   :  { %v8092_v35 = vpop.f32.mrf.mxu1  ;;  %v14060_v8 = vcombine.high %v8485_v6, %v8489_v41  ;;  %v8609_v60 = vld [vmem:[#allocation14 + $0x7e0] sm:$0xff]  ;;  %v14292_v13 = vcombine.high %v8717_v50, %v8721_v36 }
 0x582   :  { %11515 = vmatpush1.bf16.msra.mxu1 %v14107_v22  ;;  %v15389_v26 = vadd.f32 %v8131_v54, %v8091_v62  ;;  %v8505_v54 = vld [vmem:[#allocation14 + $0x4a0] sm:$0xff]  ;;  %v14291_v62 = vcombine.low %v8717_v50, %v8721_v36  ;;  %v14179_v39 = vcombine.low %v8605_v9, %v8609_v60 }
 0x583   :  { %v8093_v11 = vpop.f32.mrf.mxu1  ;;  %11516 = vmatprep.subr.bf16.mxu1 %v14100_v51  ;;  %11562 = vmatpush1.bf16.msra.mxu0 %v14211_v44  ;;  %v14076_v37 = vcombine.high %v8501_v59, %v8505_v54  ;;  %v14075_v46 = vcombine.low %v8501_v59, %v8505_v54  ;;  %v8709_v22 = vld [vmem:[#allocation14 + $0xb00] sm:$0xff]  ;;  %v14059_v51 = vcombine.low %v8485_v6, %v8489_v41  ;;  %v15391_v41 = vld [vmem:[#allocation14 + $0x1c8] sm:$0xff] }
 0x584   :  { %11563 = vmatprep.subr.bf16.mxu0 %v14204_v38  ;;  %v8713_v31 = vld [vmem:[#allocation14 + $0xb20] sm:$0xff]  ;;  %v14180_v44 = vcombine.high %v8605_v9, %v8609_v60 }
 0x585   :  { %v8597_v45 = vld [vmem:[#allocation14 + $0x780] sm:$0xff]  ;;  %v14284_v38 = vcombine.high %v8709_v22, %v8713_v31  ;;  %v14283_v11 = vcombine.low %v8709_v22, %v8713_v31 }
 0x586   :  { %11517 = vmatpush1.bf16.msra.mxu1 %v14099_v33  ;;  %v8601_v55 = vld [vmem:[#allocation14 + $0x7a0] sm:$0xff] }
 0x587   :  { %11518 = vmatprep.subr.bf16.mxu1 %v14092_v10  ;;  %11564 = vmatpush1.bf16.msra.mxu0 %v14203_v53  ;;  %v8701_v35 = vld [vmem:[#allocation14 + $0xac0] sm:$0xff]  ;;  %v14172_v33 = vcombine.high %v8597_v45, %v8601_v55  ;;  %v14171_v12 = vcombine.low %v8597_v45, %v8601_v55 }
 0x588   :  { %11565 = vmatprep.subr.bf16.mxu0 %v14196_v49  ;;  %v8589_v10 = vld [vmem:[#allocation14 + $0x740] sm:$0xff]  ;;  %v14276_v0 = vcombine.high %v8701_v35, %v8705_v30 }
 0x589   :  { %v8593_v53 = vld [vmem:[#allocation14 + $0x760] sm:$0xff] }
 0x58a   :  { %11519 = vmatpush1.bf16.msra.mxu1 %v14091_v47  ;;  %v8697_v49 = vld [vmem:[#allocation14 + $0xaa0] sm:$0xff]  ;;  %v14164_v23 = vcombine.high %v8589_v10, %v8593_v53  ;;  %v14275_v47 = vcombine.low %v8701_v35, %v8705_v30  ;;  %v14163_v2 = vcombine.low %v8589_v10, %v8593_v53 }
 0x58b   :  { %11520 = vmatprep.subr.bf16.mxu1 %v14084_v56  ;;  %11566 = vmatpush1.bf16.msra.mxu0 %v14195_v58  ;;  %v8581_v56 = vld [vmem:[#allocation14 + $0x700] sm:$0xff]  ;;  %v14268_v59 = vcombine.high %v8693_v7, %v8697_v49 }
 0x58c   :  { %11567 = vmatprep.subr.bf16.mxu0 %v14188_v43  ;;  %v8585_v58 = vld [vmem:[#allocation14 + $0x720] sm:$0xff] }
 0x58d   :  { %v8685_v54 = vld [vmem:[#allocation14 + $0xa40] sm:$0xff]  ;;  %v14156_v57 = vcombine.high %v8581_v56, %v8585_v58  ;;  %v14155_v48 = vcombine.low %v8581_v56, %v8585_v58 }
 0x58e   :  { %11521 = vmatpush1.bf16.msra.mxu1 %v14083_v34  ;;  %v8689_v43 = vld [vmem:[#allocation14 + $0xa60] sm:$0xff]  ;;  %v14267_v34 = vcombine.low %v8693_v7, %v8697_v49 }
 0x58f   :  { %11522 = vmatprep.subr.bf16.mxu1 %v14076_v37  ;;  %11568 = vmatpush1.bf16.msra.mxu0 %v14187_v25  ;;  %v8573_v37 = vld [vmem:[#allocation14 + $0x6c0] sm:$0xff]  ;;  %v14260_v4 = vcombine.high %v8685_v54, %v8689_v43 }
 0x590   :  { %11569 = vmatprep.subr.bf16.mxu0 %v14308_v16  ;;  %v8577_v25 = vld [vmem:[#allocation14 + $0x6e0] sm:$0xff] }
 0x591   :  { %v8677_v21 = vld [vmem:[#allocation14 + $0xa00] sm:$0xff]  ;;  %v14148_v40 = vcombine.high %v8573_v37, %v8577_v25  ;;  %v14147_v50 = vcombine.low %v8573_v37, %v8577_v25  ;;  %v8406_v25 = vld [vmem:[#allocation14 + $0x188] sm:$0xff] }
 0x592   :  { %11523 = vmatpush1.bf16.msra.mxu1 %v14075_v46  ;;  %v8681_v16 = vld [vmem:[#allocation14 + $0xa20] sm:$0xff]  ;;  %v14259_v46 = vcombine.low %v8685_v54, %v8689_v43 }
 0x593   :  { %11524 = vmatprep.subr.bf16.mxu1 %v14068_v24  ;;  %11570 = vmatpush2.bf16.msra.mxu0 %v14307_v3  ;;  %v8565_v24 = vld [vmem:[#allocation14 + $0x680] sm:$0xff]  ;;  %v14252_v6 = vcombine.high %v8677_v21, %v8681_v16 }
 0x594   :  { %11571 = vmatprep.subr.bf16.mxu0 %v14300_v28  ;;  %v8569_v3 = vld [vmem:[#allocation14 + $0x6a0] sm:$0xff]  ;;  %v15393_v28 = vld [vmem:[#allocation14 + $0x1e8] sm:$0xff] }
 0x595   :  { %v14140_v36 = vcombine.high %v8565_v24, %v8569_v3  ;;  %v13990_v9 = vcombine.high %v15391_v41, %v15393_v28  ;;  %v14139_v60 = vcombine.low %v8565_v24, %v8569_v3  ;;  %v8549_v22 = vld [vmem:[#allocation14 + $0x600] sm:$0xff]  ;;  %v15413_v3 = vld [vmem:[#allocation14 + $0x5e8] sm:$0xff] }
 0x596   :  { %11525 = vmatpush1.bf16.msra.mxu1 %v14067_v14  ;;  %v14251_v14 = vcombine.low %v8677_v21, %v8681_v16  ;;  %v8553_v31 = vld [vmem:[#allocation14 + $0x620] sm:$0xff] }
 0x597   :  { %11526 = vmatprep.subr.bf16.mxu1 %v14060_v8  ;;  %11572 = vmatpush2.bf16.msra.mxu0 %v14299_v5  ;;  %v8557_v8 = vld [vmem:[#allocation14 + $0x640] sm:$0xff]  ;;  %v14123_v30 = vcombine.low %v8549_v22, %v8553_v31 }
 0x598   :  { %11573 = vmatprep.subr.bf16.mxu0 %v14292_v13  ;;  %v8561_v5 = vld [vmem:[#allocation14 + $0x660] sm:$0xff] }
 0x599   :  { %v14132_v13 = vcombine.high %v8557_v8, %v8561_v5  ;;  %v8797_v55 = vld [vmem:[#allocation14 + $0xdc0] sm:$0xff] }
 0x59a   :  { %11527 = vmatpush1.bf16.msra.mxu1 %v14059_v51  ;;  %v8789_v10 = vld [vmem:[#allocation14 + $0xd80] sm:$0xff] }
 0x59b   :  { %11528 = vmatprep.subr.bf16.mxu1 %v14180_v44  ;;  %11574 = vmatpush2.bf16.msra.mxu0 %v14291_v62  ;;  %v14131_v44 = vcombine.low %v8557_v8, %v8561_v5  ;;  %v14124_v62 = vcombine.high %v8549_v22, %v8553_v31  ;;  %v8793_v53 = vld [vmem:[#allocation14 + $0xda0] sm:$0xff]  ;;  %v8390_v22 = vld [vmem:[#allocation14 + $0x108] sm:$0xff] }
 0x59c   :  { %11575 = vmatprep.subr.bf16.mxu0 %v14284_v38  ;;  %v8801_v38 = vld [vmem:[#allocation14 + $0xde0] sm:$0xff]  ;;  %v14364_v49 = vcombine.high %v8789_v10, %v8793_v53  ;;  %v8394_v31 = vld [vmem:[#allocation14 + $0x128] sm:$0xff] }
 0x59d   :  { %v8773_v43 = vld [vmem:[#allocation14 + $0xd00] sm:$0xff] }
 0x59e   :  { %11529 = vmatpush2.bf16.msra.mxu1 %v14179_v39  ;;  %v8343_v39 = vmax.f32 %v15363_v20, 0.0  ;;  %v14363_v20 = vcombine.low %v8789_v10, %v8793_v53  ;;  %v8769_v24 = vld [vmem:[#allocation14 + $0xce0] sm:$0xff]  ;;  %v13965_v53 = vcombine.low %v8390_v22, %v8394_v31 }
 0x59f   :  { %11530 = vmatprep.subr.bf16.mxu1 %v14172_v33  ;;  %11576 = vmatpush2.bf16.msra.mxu0 %v14283_v11  ;;  %v14372_v33 = vcombine.high %v8797_v55, %v8801_v38 }
 0x5a0   :  { %11577 = vmatprep.subr.bf16.mxu0 %v14276_v0  ;;  %v14371_v0 = vcombine.low %v8797_v55, %v8801_v38  ;;  %v15402_v7 = vpack.c.bf16 %v8343_v39, %v8343_v39  ;;  %v8749_v38 = vld [vmem:[#allocation14 + $0xc40] sm:$0xff]  ;;  %v8382_v39 = vld [vmem:[#allocation14 + $0xc8] sm:$0xff] }
 0x5a2   :  { %11531 = vmatpush2.bf16.msra.mxu1 %v14171_v12  ;;  %v8781_v12 = vld [vmem:[#allocation14 + $0xd40] sm:$0xff] }
 0x5a3   :  { %11532 = vmatprep.subr.bf16.mxu1 %v14164_v23  ;;  %11578 = vmatpush2.bf16.msra.mxu0 %v14275_v47  ;;  %v8785_v23 = vld [vmem:[#allocation14 + $0xd60] sm:$0xff] }
 0x5a4   :  { %11579 = vmatprep.subr.bf16.mxu0 %v14268_v59  ;;  %v14356_v59 = vcombine.high %v8781_v12, %v8785_v23  ;;  %v14355_v21 = vcombine.low %v8781_v12, %v8785_v23  ;;  %v8374_v23 = vld [vmem:[#allocation14 + $0x88] sm:$0xff] }
 0x5a6   :  { %11533 = vmatpush2.bf16.msra.mxu1 %v14163_v2  ;;  %v8777_v2 = vld [vmem:[#allocation14 + $0xd20] sm:$0xff] }
 0x5a7   :  { %11534 = vmatprep.subr.bf16.mxu1 %v14156_v57  ;;  %11580 = vmatpush2.bf16.msra.mxu0 %v14267_v34  ;;  %v14347_v8 = vcombine.low %v8773_v43, %v8777_v2 }
 0x5a8   :  { %11581 = vmatprep.subr.bf16.mxu0 %v14260_v4  ;;  %v8410_v4 = vld [vmem:[#allocation14 + $0x1a8] sm:$0xff] }
 0x5aa   :  { %11535 = vmatpush2.bf16.msra.mxu1 %v14155_v48  ;;  %v14348_v48 = vcombine.high %v8773_v43, %v8777_v2  ;;  %v8366_v2 = vld [vmem:[#allocation14 + $0x48] sm:$0xff] }
 0x5ab   :  { %11536 = vmatprep.subr.bf16.mxu1 %v14148_v40  ;;  %11582 = vmatpush2.bf16.msra.mxu0 %v14259_v46  ;;  %v13989_v46 = vcombine.low %v15391_v41, %v15393_v28  ;;  %v13981_v28 = vcombine.low %v8406_v25, %v8410_v4 }
 0x5ac   :  { %11583 = vmatprep.subr.bf16.mxu0 %v14252_v6 }
 0x5ae   :  { %11537 = vmatpush2.bf16.msra.mxu1 %v14147_v50  ;;  %v13982_v50 = vcombine.high %v8406_v25, %v8410_v4  ;;  %v8853_v4 = vld [vmem:[#allocation14 + $0xf80] sm:$0xff] }
 0x5af   :  { %11538 = vmatprep.subr.bf16.mxu1 %v14140_v36  ;;  %11584 = vmatpush2.bf16.msra.mxu0 %v14251_v14  ;;  %v8398_v36 = vld [vmem:[#allocation14 + $0x148] sm:$0xff] }
 0x5b0   :  { %11635 = vmatprep.subr.bf16.mxu0 %v13990_v9  ;;  %v8402_v14 = vld [vmem:[#allocation14 + $0x168] sm:$0xff]  ;;  %v8757_v9 = vld [vmem:[#allocation14 + $0xc80] sm:$0xff] }
 0x5b1   :  { %v13973_v55 = vcombine.low %v8398_v36, %v8402_v14 }
 0x5b2   :  { %v15397_v51 = vpop.f32.mrf.mxu0  ;;  %11539 = vmatpush2.bf16.msra.mxu1 %v14139_v60  ;;  %v8761_v60 = vld [vmem:[#allocation14 + $0xca0] sm:$0xff] }
 0x5b3   :  { %11540 = vmatprep.subr.bf16.mxu1 %v14132_v13  ;;  %v13974_v13 = vcombine.high %v8398_v36, %v8402_v14  ;;  %v8845_v36 = vld [vmem:[#allocation14 + $0xf40] sm:$0xff] }
 0x5b4   :  { %v15399_v45 = vpop.f32.mrf.mxu0  ;;  %v8849_v14 = vld [vmem:[#allocation14 + $0xf60] sm:$0xff] }
 0x5b6   :  { %v8215_v35 = vpop.f32.mrf.mxu0  ;;  %11541 = vmatpush2.bf16.msra.mxu1 %v14131_v44 }
 0x5b7   :  { %11542 = vmatprep.subr.bf16.mxu1 %v14124_v62  ;;  %v14332_v62 = vcombine.high %v8757_v9, %v8761_v60  ;;  %v8753_v35 = vld [vmem:[#allocation14 + $0xc60] sm:$0xff] }
 0x5b8   :  { %v8216_v11 = vpop.f32.mrf.mxu0  ;;  %v14324_v10 = vcombine.high %v8749_v38, %v8753_v35 }
 0x5b9   :  { %v14331_v11 = vcombine.low %v8757_v9, %v8761_v60  ;;  %v14420_v60 = vcombine.high %v8845_v36, %v8849_v14 }
 0x5ba   :  { %11543 = vmatpush2.bf16.msra.mxu1 %v14123_v30  ;;  %v13966_v30 = vcombine.high %v8390_v22, %v8394_v31  ;;  %v8837_v22 = vld [vmem:[#allocation14 + $0xf00] sm:$0xff] }
 0x5bb   :  { %11594 = vmatprep.subr.bf16.mxu1 %v14372_v33  ;;  %v8386_v33 = vld [vmem:[#allocation14 + $0xe8] sm:$0xff]  ;;  %v8841_v31 = vld [vmem:[#allocation14 + $0xf20] sm:$0xff] }
 0x5bc   :  { %v13958_v12 = vcombine.high %v8382_v39, %v8386_v33 }
 0x5bd   :  { %v8170_v47 = vpop.f32.mrf.mxu1  ;;  %11545 = vmatmul.mubr.bf16.vlgmr.msra.gmra.mxu1 %v15402_v7 }
 0x5be   :  { %v8171_v56 = vadd.f32 %v8170_v47, %v15387_v27  ;;  %11595 = vmatpush1.bf16.msra.mxu1 %v14371_v0  ;;  %v8765_v27 = vld [vmem:[#allocation14 + $0xcc0] sm:$0xff]  ;;  %v8378_v47 = vld [vmem:[#allocation14 + $0xa8] sm:$0xff] }
 0x5bf   :  { %v8172_v58 = vpop.f32.mrf.mxu1  ;;  %11596 = vmatprep.subr.bf16.mxu1 %v14364_v49  ;;  %v14340_v41 = vcombine.high %v8765_v27, %v8769_v24  ;;  %v14339_v44 = vcombine.low %v8765_v27, %v8769_v24  ;;  %v8741_v0 = vld [vmem:[#allocation14 + $0xc00] sm:$0xff]  ;;  %v13950_v43 = vcombine.high %v8374_v23, %v8378_v47  ;;  %v13949_v25 = vcombine.low %v8374_v23, %v8378_v47  ;;  %v8362_v27 = vld [vmem:[#allocation14 + $0x28] sm:$0xff] }
 0x5c0   :  { %v8173_v54 = vadd.f32 %v8172_v58, %v15389_v26  ;;  %v8345_v57 = vmax.f32 %v8171_v56, 0.0  ;;  %v15411_v26 = vld [vmem:[#allocation14 + $0x5c8] sm:$0xff]  ;;  %v8745_v49 = vld [vmem:[#allocation14 + $0xc20] sm:$0xff]  ;;  %v14323_v56 = vcombine.low %v8749_v38, %v8753_v35  ;;  %v13957_v58 = vcombine.low %v8382_v39, %v8386_v33 }
 0x5c1   :  { %v8174_v34 = vpop.f32.mrf.mxu1  ;;  %v14117_v5 = vcombine.low %v15411_v26, %v15413_v3  ;;  %v14419_v38 = vcombine.low %v8845_v36, %v8849_v14  ;;  %v14412_v35 = vcombine.high %v8837_v22, %v8841_v31  ;;  %v8829_v39 = vld [vmem:[#allocation14 + $0xec0] sm:$0xff]  ;;  %v8442_v36 = vld [vmem:[#allocation14 + $0x2a8] sm:$0xff] }
 0x5c2   :  { %v8346_v37 = vmax.f32 %v8173_v54, 0.0  ;;  %11597 = vmatpush1.bf16.msra.mxu1 %v14363_v20  ;;  %v15415_v6 = vpack.c.bf16 %v8345_v57, %v8345_v57  ;;  %v14316_v20 = vcombine.high %v8741_v0, %v8745_v49  ;;  %v8865_v54 = vld [vmem:[#allocation14 + $0xfe0] sm:$0xff]  ;;  %v8370_v57 = vld [vmem:[#allocation14 + $0x68] sm:$0xff]  ;;  %v14315_v34 = vcombine.low %v8741_v0, %v8745_v49 }
 0x5c3   :  { %v8175_v16 = vpop.f32.mrf.mxu1  ;;  %11598 = vmatprep.subr.bf16.mxu1 %v14356_v59  ;;  %v8861_v59 = vld [vmem:[#allocation14 + $0xfc0] sm:$0xff]  ;;  %v14411_v0 = vcombine.low %v8837_v22, %v8841_v31  ;;  %v8434_v22 = vld [vmem:[#allocation14 + $0x268] sm:$0xff] }
 0x5c4   :  { %v15407_v40 = vpack.c.bf16 %v8346_v37, %v8346_v37  ;;  %v14436_v37 = vcombine.high %v8861_v59, %v8865_v54  ;;  %v13942_v16 = vcombine.high %v8366_v2, %v8370_v57  ;;  %v8833_v33 = vld [vmem:[#allocation14 + $0xee0] sm:$0xff] }
 0x5c5   :  { %v14404_v49 = vcombine.high %v8829_v39, %v8833_v33  ;;  %v8821_v23 = vld [vmem:[#allocation14 + $0xe80] sm:$0xff] }
 0x5c6   :  { %11585 = vmatprep.mubr.bf16.mxu0 %v15407_v40  ;;  %11599 = vmatpush1.bf16.msra.mxu1 %v14355_v21  ;;  %v8857_v21 = vld [vmem:[#allocation14 + $0xfa0] sm:$0xff] }
 0x5c7   :  { %11586 = vmatmul.mubr.bf16.vlgmr.msra.gmra.mxu0 %v15415_v6  ;;  %11600 = vmatprep.subr.bf16.mxu1 %v14348_v48  ;;  %v8358_v48 = vld [vmem:[#allocation14 + $0x8] sm:$0xff]  ;;  %v14428_v24 = vcombine.high %v8853_v4, %v8857_v21  ;;  %v14427_v9 = vcombine.low %v8853_v4, %v8857_v21  ;;  %v8825_v47 = vld [vmem:[#allocation14 + $0xea0] sm:$0xff] }
 0x5c8   :  { %11636 = vmatpush1.bf16.msra.mxu0 %v13989_v46  ;;  %11667 = vmatprep.mubr.bf16.mxu0 %v15353_v52  ;;  %v14435_v46 = vcombine.low %v8861_v59, %v8865_v54  ;;  %v14403_v59 = vcombine.low %v8829_v39, %v8833_v33  ;;  %v14396_v54 = vcombine.high %v8821_v23, %v8825_v47  ;;  %v8422_v33 = vld [vmem:[#allocation14 + $0x208] sm:$0xff] }
 0x5c9   :  { %11637 = vmatprep.subr.bf16.mxu0 %v13982_v50  ;;  %v13941_v50 = vcombine.low %v8366_v2, %v8370_v57  ;;  %v8813_v2 = vld [vmem:[#allocation14 + $0xe40] sm:$0xff]  ;;  %v14395_v4 = vcombine.low %v8821_v23, %v8825_v47  ;;  %v8670_v47 = vld [vmem:[#allocation14 + $0x9c8] sm:$0xff] }
 0x5ca   :  { %11601 = vmatpush1.bf16.msra.mxu1 %v14347_v8  ;;  %v13934_v8 = vcombine.high %v8358_v48, %v8362_v27  ;;  %v8817_v57 = vld [vmem:[#allocation14 + $0xe60] sm:$0xff] }
 0x5cb   :  { %11602 = vmatprep.subr.bf16.mxu1 %v14340_v41  ;;  %v8478_v41 = vld [vmem:[#allocation14 + $0x3c8] sm:$0xff]  ;;  %v14388_v21 = vcombine.high %v8813_v2, %v8817_v57  ;;  %v14387_v14 = vcombine.low %v8813_v2, %v8817_v57 }
 0x5cc   :  { %11638 = vmatpush1.bf16.msra.mxu0 %v13981_v28  ;;  %v8482_v28 = vld [vmem:[#allocation14 + $0x3e8] sm:$0xff] }
 0x5cd   :  { %11639 = vmatprep.subr.bf16.mxu0 %v13974_v13  ;;  %v13933_v13 = vcombine.low %v8358_v48, %v8362_v27  ;;  %v8805_v48 = vld [vmem:[#allocation14 + $0xe00] sm:$0xff]  ;;  %v8666_v57 = vld [vmem:[#allocation14 + $0x9a8] sm:$0xff] }
 0x5ce   :  { %11603 = vmatpush1.bf16.msra.mxu1 %v14339_v44  ;;  %v14054_v44 = vcombine.high %v8478_v41, %v8482_v28  ;;  %v8809_v27 = vld [vmem:[#allocation14 + $0xe20] sm:$0xff] }
 0x5cf   :  { %11604 = vmatprep.subr.bf16.mxu1 %v14332_v62  ;;  %v8470_v62 = vld [vmem:[#allocation14 + $0x388] sm:$0xff]  ;;  %v14379_v31 = vcombine.low %v8805_v48, %v8809_v27 }
 0x5d0   :  { %11640 = vmatpush1.bf16.msra.mxu0 %v13973_v55  ;;  %v8474_v55 = vld [vmem:[#allocation14 + $0x3a8] sm:$0xff] }
 0x5d1   :  { %11641 = vmatprep.subr.bf16.mxu0 %v13966_v30  ;;  %v14053_v30 = vcombine.low %v8478_v41, %v8482_v28 }
 0x5d2   :  { %11605 = vmatpush1.bf16.msra.mxu1 %v14331_v11  ;;  %v14046_v11 = vcombine.high %v8470_v62, %v8474_v55 }
 0x5d3   :  { %11606 = vmatprep.subr.bf16.mxu1 %v14324_v10  ;;  %v8462_v10 = vld [vmem:[#allocation14 + $0x348] sm:$0xff] }
 0x5d4   :  { %11642 = vmatpush1.bf16.msra.mxu0 %v13965_v53  ;;  %v8466_v53 = vld [vmem:[#allocation14 + $0x368] sm:$0xff] }
 0x5d5   :  { %11643 = vmatprep.subr.bf16.mxu0 %v13958_v12  ;;  %v14045_v12 = vcombine.low %v8470_v62, %v8474_v55  ;;  %v14680_v62 = vld [vmem:[#allocation13] sm:$0xff] }
 0x5d6   :  { %11607 = vmatpush1.bf16.msra.mxu1 %v14323_v56  ;;  %v14038_v56 = vcombine.high %v8462_v10, %v8466_v53  ;;  %v5112_v55 = vrot.slane %v14680_v62, %v15147_v61  ;;  %v5116_v39 = vrot.slane %v14680_v62, %v15130_v32 }
 0x5d7   :  { %11608 = vmatprep.subr.bf16.mxu1 %v14316_v20  ;;  %v8454_v20 = vld [vmem:[#allocation14 + $0x308] sm:$0xff] }
 0x5d8   :  { %11644 = vmatpush1.bf16.msra.mxu0 %v13957_v58  ;;  %v8458_v58 = vld [vmem:[#allocation14 + $0x328] sm:$0xff] }
 0x5d9   :  { %11645 = vmatprep.subr.bf16.mxu0 %v13950_v43  ;;  %v14037_v43 = vcombine.low %v8462_v10, %v8466_v53  ;;  %v8212_v10 = vadd.f32 %v15397_v51, %v5112_v55  ;;  %v8662_v51 = vld [vmem:[#allocation14 + $0x988] sm:$0xff] }
 0x5da   :  { %11609 = vmatpush1.bf16.msra.mxu1 %v14315_v34  ;;  %v14030_v34 = vcombine.high %v8454_v20, %v8458_v58  ;;  %v8614_v55 = vld [vmem:[#allocation14 + $0x808] sm:$0xff] }
 0x5db   :  { %11610 = vmatprep.subr.bf16.mxu1 %v14436_v37  ;;  %v8446_v37 = vld [vmem:[#allocation14 + $0x2c8] sm:$0xff] }
 0x5dc   :  { %11646 = vmatpush1.bf16.msra.mxu0 %v13949_v25  ;;  %v8450_v25 = vld [vmem:[#allocation14 + $0x2e8] sm:$0xff] }
 0x5dd   :  { %11647 = vmatprep.subr.bf16.mxu0 %v13942_v16  ;;  %v14029_v16 = vcombine.low %v8454_v20, %v8458_v58  ;;  %v14021_v28 = vcombine.low %v8446_v37, %v8450_v25 }
 0x5de   :  { %11611 = vmatpush2.bf16.msra.mxu1 %v14435_v46  ;;  %v14022_v46 = vcombine.high %v8446_v37, %v8450_v25 }
 0x5df   :  { %11612 = vmatprep.subr.bf16.mxu1 %v14428_v24 }
 0x5e0   :  { %11648 = vmatpush1.bf16.msra.mxu0 %v13941_v50  ;;  %v8438_v50 = vld [vmem:[#allocation14 + $0x288] sm:$0xff] }
 0x5e1   :  { %11649 = vmatprep.subr.bf16.mxu0 %v13934_v8  ;;  %v14380_v8 = vcombine.high %v8805_v48, %v8809_v27  ;;  %v8646_v27 = vld [vmem:[#allocation14 + $0x908] sm:$0xff] }
 0x5e2   :  { %11613 = vmatpush2.bf16.msra.mxu1 %v14427_v9  ;;  %v14014_v9 = vcombine.high %v8438_v50, %v8442_v36 }
 0x5e3   :  { %11614 = vmatprep.subr.bf16.mxu1 %v14420_v60 }
 0x5e4   :  { %11650 = vmatpush1.bf16.msra.mxu0 %v13933_v13  ;;  %v8430_v13 = vld [vmem:[#allocation14 + $0x248] sm:$0xff] }
 0x5e5   :  { %11651 = vmatprep.subr.bf16.mxu0 %v14054_v44  ;;  %v14118_v44 = vcombine.high %v15411_v26, %v15413_v3  ;;  %v14005_v53 = vcombine.low %v8430_v13, %v8434_v22 }
 0x5e6   :  { %11615 = vmatpush2.bf16.msra.mxu1 %v14419_v38 }
 0x5e7   :  { %11616 = vmatprep.subr.bf16.mxu1 %v14412_v35  ;;  %v14013_v35 = vcombine.low %v8438_v50, %v8442_v36  ;;  %v8638_v36 = vld [vmem:[#allocation14 + $0x8c8] sm:$0xff] }
 0x5e8   :  { %11652 = vmatpush2.bf16.msra.mxu0 %v14053_v30  ;;  %v14006_v30 = vcombine.high %v8430_v13, %v8434_v22  ;;  %v8622_v22 = vld [vmem:[#allocation14 + $0x848] sm:$0xff] }
 0x5e9   :  { %11653 = vmatprep.subr.bf16.mxu0 %v14046_v11  ;;  %v8426_v11 = vld [vmem:[#allocation14 + $0x228] sm:$0xff] }
 0x5ea   :  { %11617 = vmatpush2.bf16.msra.mxu1 %v14411_v0 }
 0x5eb   :  { %11618 = vmatprep.subr.bf16.mxu1 %v14404_v49  ;;  %v13998_v49 = vcombine.high %v8422_v33, %v8426_v11 }
 0x5ec   :  { %11654 = vmatpush2.bf16.msra.mxu0 %v14045_v12  ;;  %v8214_v12 = vadd.f32 %v15399_v45, %v5116_v39  ;;  %v14238_v45 = vcombine.high %v8662_v51, %v8666_v57  ;;  %v8734_v39 = vld [vmem:[#allocation14 + $0xbc8] sm:$0xff] }
 0x5ed   :  { %11655 = vmatprep.subr.bf16.mxu0 %v14038_v56  ;;  %v8674_v56 = vld [vmem:[#allocation14 + $0x9e8] sm:$0xff] }
 0x5ee   :  { %11619 = vmatpush2.bf16.msra.mxu1 %v14403_v59  ;;  %v13997_v59 = vcombine.low %v8422_v33, %v8426_v11  ;;  %v14246_v2 = vcombine.high %v8670_v47, %v8674_v56  ;;  %v14245_v25 = vcombine.low %v8670_v47, %v8674_v56  ;;  %v8738_v33 = vld [vmem:[#allocation14 + $0xbe8] sm:$0xff] }
 0x5ef   :  { %11620 = vmatprep.subr.bf16.mxu1 %v14396_v54  ;;  %v8722_v47 = vld [vmem:[#allocation14 + $0xb68] sm:$0xff] }
 0x5f0   :  { %11656 = vmatpush2.bf16.msra.mxu0 %v14037_v43 }
 0x5f1   :  { %11657 = vmatprep.subr.bf16.mxu0 %v14030_v34 }
 0x5f2   :  { %v8293_v24 = vpop.f32.mrf.mxu0  ;;  %11621 = vmatpush2.bf16.msra.mxu1 %v14395_v4  ;;  %v8654_v4 = vld [vmem:[#allocation14 + $0x948] sm:$0xff] }
 0x5f3   :  { %11622 = vmatprep.subr.bf16.mxu1 %v14388_v21  ;;  %v8658_v21 = vld [vmem:[#allocation14 + $0x968] sm:$0xff] }
 0x5f4   :  { %11658 = vmatpush2.bf16.msra.mxu0 %v14029_v16  ;;  %v8295_v41 = vpop.f32.mrf.mxu0  ;;  %v14237_v16 = vcombine.low %v8662_v51, %v8666_v57  ;;  %v14230_v48 = vcombine.high %v8654_v4, %v8658_v21  ;;  %v8702_v51 = vld [vmem:[#allocation14 + $0xac8] sm:$0xff] }
 0x5f5   :  { %11659 = vmatprep.subr.bf16.mxu0 %v14022_v46  ;;  %v8650_v46 = vld [vmem:[#allocation14 + $0x928] sm:$0xff] }
 0x5f6   :  { %v8297_v60 = vpop.f32.mrf.mxu0  ;;  %11623 = vmatpush2.bf16.msra.mxu1 %v14387_v14  ;;  %v14222_v50 = vcombine.high %v8646_v27, %v8650_v46  ;;  %v8642_v14 = vld [vmem:[#allocation14 + $0x8e8] sm:$0xff] }
 0x5f7   :  { %11624 = vmatprep.subr.bf16.mxu1 %v14380_v8  ;;  %v14221_v8 = vcombine.low %v8646_v27, %v8650_v46  ;;  %v14213_v60 = vcombine.low %v8638_v36, %v8642_v14  ;;  %v8706_v57 = vld [vmem:[#allocation14 + $0xae8] sm:$0xff] }
 0x5f8   :  { %11660 = vmatpush2.bf16.msra.mxu0 %v14021_v28  ;;  %v8298_v38 = vpop.f32.mrf.mxu0  ;;  %v8630_v28 = vld [vmem:[#allocation14 + $0x888] sm:$0xff] }
 0x5f9   :  { %11661 = vmatprep.subr.bf16.mxu0 %v14014_v9  ;;  %v8634_v9 = vld [vmem:[#allocation14 + $0x8a8] sm:$0xff] }
 0x5fa   :  { %11625 = vmatpush2.bf16.msra.mxu1 %v14379_v31  ;;  %v14206_v13 = vcombine.high %v8630_v28, %v8634_v9  ;;  %v8626_v31 = vld [vmem:[#allocation14 + $0x868] sm:$0xff] }
 0x5fb   :  { %11676 = vmatprep.subr.bf16.mxu1 %v14118_v44  ;;  %v14205_v44 = vcombine.low %v8630_v28, %v8634_v9  ;;  %v14198_v62 = vcombine.high %v8622_v22, %v8626_v31  ;;  %v8618_v38 = vld [vmem:[#allocation14 + $0x828] sm:$0xff] }
 0x5fc   :  { %11662 = vmatpush2.bf16.msra.mxu0 %v14013_v35  ;;  %v14197_v35 = vcombine.low %v8622_v22, %v8626_v31  ;;  %v14189_v11 = vcombine.low %v8614_v55, %v8618_v38  ;;  %v8682_v28 = vld [vmem:[#allocation14 + $0xa28] sm:$0xff]  ;;  %v8415_v31 = vld [vmem:[#allocation14 + $0x1d0] sm:$0xff] }
 0x5fd   :  { %v8252_v0 = vpop.f32.mrf.mxu1  ;;  %11663 = vmatprep.subr.bf16.mxu0 %v14006_v30  ;;  %v14190_v30 = vcombine.high %v8614_v55, %v8618_v38 }
 0x5fe   :  { %v8253_v23 = vadd.f32 %v8252_v0, %v8212_v10  ;;  %v14310_v10 = vcombine.high %v8734_v39, %v8738_v33  ;;  %v8730_v0 = vld [vmem:[#allocation14 + $0xba8] sm:$0xff] }
 0x5ff   :  { %v8254_v20 = vpop.f32.mrf.mxu1 }
 0x600   :  { %v8255_v58 = vadd.f32 %v8254_v20, %v8214_v12  ;;  %11664 = vmatpush2.bf16.msra.mxu0 %v14005_v53  ;;  %v15428_v54 = vadd.f32 %v8293_v24, %v8253_v23  ;;  %v14229_v24 = vcombine.low %v8654_v4, %v8658_v21  ;;  %v8726_v53 = vld [vmem:[#allocation14 + $0xb88] sm:$0xff] }
 0x601   :  { %v8256_v43 = vpop.f32.mrf.mxu1  ;;  %11665 = vmatprep.subr.bf16.mxu0 %v13998_v49  ;;  %v14309_v49 = vcombine.low %v8734_v39, %v8738_v33  ;;  %v14302_v12 = vcombine.high %v8726_v53, %v8730_v0  ;;  %v8718_v23 = vld [vmem:[#allocation14 + $0xb48] sm:$0xff]  ;;  %v14301_v56 = vcombine.low %v8726_v53, %v8730_v0  ;;  %v8407_v0 = vld [vmem:[#allocation14 + $0x190] sm:$0xff] }
 0x602   :  { %v15430_v34 = vadd.f32 %v8295_v41, %v8255_v58  ;;  %v14214_v41 = vcombine.high %v8638_v36, %v8642_v14  ;;  %v14294_v20 = vcombine.high %v8718_v23, %v8722_v47  ;;  %v8710_v58 = vld [vmem:[#allocation14 + $0xb08] sm:$0xff]  ;;  %v14293_v43 = vcombine.low %v8718_v23, %v8722_v47 }
 0x603   :  { %v8257_v37 = vpop.f32.mrf.mxu1  ;;  %v8694_v4 = vld [vmem:[#allocation14 + $0xa88] sm:$0xff] }
 0x604   :  { %11666 = vmatpush2.bf16.msra.mxu0 %v13997_v59  ;;  %v8714_v59 = vld [vmem:[#allocation14 + $0xb28] sm:$0xff] }
 0x605   :  { %11717 = vmatprep.subr.bf16.mxu0 %v14246_v2  ;;  %v14286_v2 = vcombine.high %v8710_v58, %v8714_v59  ;;  %v14285_v37 = vcombine.low %v8710_v58, %v8714_v59  ;;  %v8698_v21 = vld [vmem:[#allocation14 + $0xaa8] sm:$0xff]  ;;  %v8399_v58 = vld [vmem:[#allocation14 + $0x150] sm:$0xff] }
 0x606   :  { %v14270_v27 = vcombine.high %v8694_v4, %v8698_v21  ;;  %v14269_v14 = vcombine.low %v8694_v4, %v8698_v21  ;;  %v8538_v53 = vld [vmem:[#allocation14 + $0x5a8] sm:$0xff]  ;;  %v8403_v59 = vld [vmem:[#allocation14 + $0x170] sm:$0xff] }
 0x607   :  { %11668 = vmatmul.mubr.bf16.vlgmr.msra.gmra.mxu0 %v15369_v1  ;;  %v8391_v4 = vld [vmem:[#allocation14 + $0x110] sm:$0xff]  ;;  %v13975_v26 = vcombine.low %v8399_v58, %v8403_v59 }
 0x608   :  { %11718 = vmatpush1.bf16.msra.mxu0 %v14245_v25  ;;  %11749 = vmatprep.mubr.bf16.mxu0 %v15407_v40  ;;  %v14278_v25 = vcombine.high %v8702_v51, %v8706_v57  ;;  %v8395_v21 = vld [vmem:[#allocation14 + $0x130] sm:$0xff] }
 0x609   :  { %11719 = vmatprep.subr.bf16.mxu0 %v14238_v45 }
 0x60c   :  { %11720 = vmatpush1.bf16.msra.mxu0 %v14237_v16 }
 0x60d   :  { %11721 = vmatprep.subr.bf16.mxu0 %v14230_v48  ;;  %v14277_v48 = vcombine.low %v8702_v51, %v8706_v57  ;;  %v13976_v57 = vcombine.high %v8399_v58, %v8403_v59  ;;  %v8606_v58 = vld [vmem:[#allocation14 + $0x7c8] sm:$0xff] }
 0x60e   :  { %v8610_v59 = vld [vmem:[#allocation14 + $0x7e8] sm:$0xff] }
 0x610   :  { %11722 = vmatpush1.bf16.msra.mxu0 %v14229_v24  ;;  %v8686_v24 = vld [vmem:[#allocation14 + $0xa48] sm:$0xff] }
 0x611   :  { %11723 = vmatprep.subr.bf16.mxu0 %v14222_v50  ;;  %v8690_v50 = vld [vmem:[#allocation14 + $0xa68] sm:$0xff] }
 0x612   :  { %v14261_v9 = vcombine.low %v8686_v24, %v8690_v50 }
 0x614   :  { %11724 = vmatpush1.bf16.msra.mxu0 %v14221_v8  ;;  %v14262_v8 = vcombine.high %v8686_v24, %v8690_v50  ;;  %v8383_v24 = vld [vmem:[#allocation14 + $0xd0] sm:$0xff] }
 0x615   :  { %11725 = vmatprep.subr.bf16.mxu0 %v14214_v41  ;;  %v8678_v41 = vld [vmem:[#allocation14 + $0xa08] sm:$0xff]  ;;  %v8387_v50 = vld [vmem:[#allocation14 + $0xf0] sm:$0xff] }
 0x616   :  { %v14253_v38 = vcombine.low %v8678_v41, %v8682_v28 }
 0x618   :  { %11726 = vmatpush1.bf16.msra.mxu0 %v14213_v60 }
 0x619   :  { %11727 = vmatprep.subr.bf16.mxu0 %v14206_v13  ;;  %v14254_v13 = vcombine.high %v8678_v41, %v8682_v28  ;;  %v13960_v41 = vcombine.high %v8383_v24, %v8387_v50  ;;  %v8502_v28 = vld [vmem:[#allocation14 + $0x488] sm:$0xff] }
 0x61c   :  { %11728 = vmatpush1.bf16.msra.mxu0 %v14205_v44  ;;  %v8419_v44 = vld [vmem:[#allocation14 + $0x1f0] sm:$0xff] }
 0x61d   :  { %11729 = vmatprep.subr.bf16.mxu0 %v14198_v62  ;;  %v13992_v39 = vcombine.high %v8415_v31, %v8419_v44 }
 0x620   :  { %11730 = vmatpush1.bf16.msra.mxu0 %v14197_v35 }
 0x621   :  { %11731 = vmatprep.subr.bf16.mxu0 %v14190_v30 }
 0x624   :  { %11732 = vmatpush1.bf16.msra.mxu0 %v14189_v11  ;;  %v8534_v11 = vld [vmem:[#allocation14 + $0x588] sm:$0xff] }
 0x625   :  { %11733 = vmatprep.subr.bf16.mxu0 %v14310_v10  ;;  %v14110_v47 = vcombine.high %v8534_v11, %v8538_v53 }
 0x628   :  { %11734 = vmatpush2.bf16.msra.mxu0 %v14309_v49  ;;  %v8411_v49 = vld [vmem:[#allocation14 + $0x1b0] sm:$0xff] }
 0x629   :  { %11735 = vmatprep.subr.bf16.mxu0 %v14302_v12 }
 0x62c   :  { %11736 = vmatpush2.bf16.msra.mxu0 %v14301_v56  ;;  %v13984_v56 = vcombine.high %v8407_v0, %v8411_v49 }
 0x62d   :  { %11737 = vmatprep.subr.bf16.mxu0 %v14294_v20  ;;  %v8530_v20 = vld [vmem:[#allocation14 + $0x568] sm:$0xff] }
 0x630   :  { %11738 = vmatpush2.bf16.msra.mxu0 %v14293_v43  ;;  %v14109_v43 = vcombine.low %v8534_v11, %v8538_v53  ;;  %v8486_v53 = vld [vmem:[#allocation14 + $0x408] sm:$0xff] }
 0x631   :  { %11739 = vmatprep.subr.bf16.mxu0 %v14286_v2  ;;  %v13983_v2 = vcombine.low %v8407_v0, %v8411_v49  ;;  %v8490_v0 = vld [vmem:[#allocation14 + $0x428] sm:$0xff]  ;;  %v8359_v49 = vld [vmem:[#allocation14 + $0x10] sm:$0xff] }
 0x632   :  { %v15434_v45 = vpop.f32.mrf.mxu0 }
 0x634   :  { %11740 = vmatpush2.bf16.msra.mxu0 %v14285_v37  ;;  %v15436_v16 = vpop.f32.mrf.mxu0  ;;  %v8518_v37 = vld [vmem:[#allocation14 + $0x508] sm:$0xff] }
 0x635   :  { %11741 = vmatprep.subr.bf16.mxu0 %v14278_v25  ;;  %v8522_v25 = vld [vmem:[#allocation14 + $0x528] sm:$0xff] }
 0x636   :  { %v11509_v46 = vpop.f32.mrf.mxu0  ;;  %v14094_v3 = vcombine.high %v8518_v37, %v8522_v25 }
 0x637   :  { %v8514_v46 = vld [vmem:[#allocation14 + $0x4e8] sm:$0xff] }
 0x638   :  { %11742 = vmatpush2.bf16.msra.mxu0 %v14277_v48  ;;  %v11510_v36 = vpop.f32.mrf.mxu0 }
 0x639   :  { %11743 = vmatprep.subr.bf16.mxu0 %v14270_v27  ;;  %v8510_v27 = vld [vmem:[#allocation14 + $0x4c8] sm:$0xff]  ;;  %v14093_v36 = vcombine.low %v8518_v37, %v8522_v25  ;;  %v14182_v37 = vcombine.high %v8606_v58, %v8610_v59 }
 0x63c   :  { %11744 = vmatpush2.bf16.msra.mxu0 %v14269_v14  ;;  %v13967_v14 = vcombine.low %v8391_v4, %v8395_v21 }
 0x63d   :  { %v8334_v60 = vpop.f32.mrf.mxu1  ;;  %11745 = vmatprep.subr.bf16.mxu0 %v14262_v8  ;;  %v14086_v8 = vcombine.high %v8510_v27, %v8514_v46 }
 0x63e   :  { %v8335_v22 = vadd.f32 %v8334_v60, %v15428_v54  ;;  %v13991_v54 = vcombine.low %v8415_v31, %v8419_v44  ;;  %v8375_v60 = vld [vmem:[#allocation14 + $0x90] sm:$0xff]  ;;  %v13959_v31 = vcombine.low %v8383_v24, %v8387_v50  ;;  %v8590_v24 = vld [vmem:[#allocation14 + $0x748] sm:$0xff] }
 0x63f   :  { %v8336_v62 = vpop.f32.mrf.mxu1  ;;  %v8594_v50 = vld [vmem:[#allocation14 + $0x768] sm:$0xff] }
 0x640   :  { %v8337_v55 = vadd.f32 %v8336_v62, %v15430_v34  ;;  %11746 = vmatpush2.bf16.msra.mxu0 %v14261_v9  ;;  %v8347_v35 = vmax.f32 %v8335_v22, 0.0  ;;  %v8526_v34 = vld [vmem:[#allocation14 + $0x548] sm:$0xff]  ;;  %v14085_v22 = vcombine.low %v8510_v27, %v8514_v46 }
 0x641   :  { %v8338_v30 = vpop.f32.mrf.mxu1  ;;  %11747 = vmatprep.subr.bf16.mxu0 %v14254_v13  ;;  %v14102_v51 = vcombine.high %v8526_v34, %v8530_v20  ;;  %v14101_v48 = vcombine.low %v8526_v34, %v8530_v20  ;;  %v8506_v9 = vld [vmem:[#allocation14 + $0x4a8] sm:$0xff]  ;;  %v8379_v13 = vld [vmem:[#allocation14 + $0xb0] sm:$0xff] }
 0x642   :  { %v8348_v33 = vmax.f32 %v8337_v55, 0.0  ;;  %v15442_v23 = vpack.c.bf16 %v8347_v35, %v8347_v35  ;;  %v14078_v44 = vcombine.high %v8502_v28, %v8506_v9  ;;  %v13952_v62 = vcombine.high %v8375_v60, %v8379_v13  ;;  %v8494_v55 = vld [vmem:[#allocation14 + $0x448] sm:$0xff]  ;;  %v8367_v35 = vld [vmem:[#allocation14 + $0x50] sm:$0xff] }
 0x643   :  { %v8339_v10 = vpop.f32.mrf.mxu1  ;;  %v8371_v30 = vld [vmem:[#allocation14 + $0x70] sm:$0xff] }
 0x644   :  { %v15440_v12 = vpack.c.bf16 %v8348_v33, %v8348_v33  ;;  %11748 = vmatpush2.bf16.msra.mxu0 %v14253_v38  ;;  %v8498_v38 = vld [vmem:[#allocation14 + $0x468] sm:$0xff]  ;;  %v13951_v33 = vcombine.low %v8375_v60, %v8379_v13  ;;  %v13944_v10 = vcombine.high %v8367_v35, %v8371_v30 }
 0x645   :  { %11799 = vmatprep.subr.bf16.mxu0 %v13992_v39  ;;  %v14077_v39 = vcombine.low %v8502_v28, %v8506_v9  ;;  %v14070_v11 = vcombine.high %v8494_v55, %v8498_v38  ;;  %v14069_v34 = vcombine.low %v8494_v55, %v8498_v38  ;;  %v14166_v28 = vcombine.high %v8590_v24, %v8594_v50  ;;  %v8582_v60 = vld [vmem:[#allocation14 + $0x708] sm:$0xff] }
 0x646   :  { %11626 = vmatprep.mubr.bf16.mxu1 %v15440_v12  ;;  %v8586_v13 = vld [vmem:[#allocation14 + $0x728] sm:$0xff] }
 0x647   :  { %11750 = vmatmul.mubr.bf16.vlgmr.msra.gmra.mxu0 %v15415_v6  ;;  %11627 = vmatmul.mubr.bf16.vlgmr.msra.gmra.mxu1 %v15442_v23  ;;  %v14158_v55 = vcombine.high %v8582_v60, %v8586_v13 }
 0x648   :  { %11677 = vmatpush1.bf16.msra.mxu1 %v14117_v5  ;;  %11800 = vmatpush1.bf16.msra.mxu0 %v13991_v54  ;;  %v13968_v5 = vcombine.high %v8391_v4, %v8395_v21  ;;  %v8363_v54 = vld [vmem:[#allocation14 + $0x30] sm:$0xff]  ;;  %v8598_v4 = vld [vmem:[#allocation14 + $0x788] sm:$0xff] }
 0x649   :  { %11831 = vmatprep.mubr.bf16.mxu0 %v15353_v52  ;;  %11708 = vmatprep.mubr.bf16.mxu1 %v15381_v42  ;;  %v13936_v20 = vcombine.high %v8359_v49, %v8363_v54  ;;  %v8602_v21 = vld [vmem:[#allocation14 + $0x7a8] sm:$0xff] }
 0x64a   :  { %11678 = vmatprep.subr.bf16.mxu1 %v14110_v47  ;;  %11801 = vmatprep.subr.bf16.mxu0 %v13984_v56  ;;  %v13943_v47 = vcombine.low %v8367_v35, %v8371_v30  ;;  %v14062_v56 = vcombine.high %v8486_v53, %v8490_v0  ;;  %v14174_v27 = vcombine.high %v8598_v4, %v8602_v21  ;;  %v8574_v35 = vld [vmem:[#allocation14 + $0x6c8] sm:$0xff] }
 0x64b   :  { %v8578_v30 = vld [vmem:[#allocation14 + $0x6e8] sm:$0xff] }
 0x64c   :  { %11679 = vmatpush1.bf16.msra.mxu1 %v14109_v43  ;;  %11802 = vmatpush1.bf16.msra.mxu0 %v13983_v2  ;;  %v8479_v43 = vld [vmem:[#allocation14 + $0x3d0] sm:$0xff] }
 0x64d   :  { %11680 = vmatprep.subr.bf16.mxu1 %v14102_v51  ;;  %11803 = vmatprep.subr.bf16.mxu0 %v13976_v57  ;;  %v8483_v2 = vld [vmem:[#allocation14 + $0x3f0] sm:$0xff]  ;;  %v14061_v51 = vcombine.low %v8486_v53, %v8490_v0  ;;  %v13935_v57 = vcombine.low %v8359_v49, %v8363_v54  ;;  %v14150_v53 = vcombine.high %v8574_v35, %v8578_v30  ;;  %v8566_v49 = vld [vmem:[#allocation14 + $0x688] sm:$0xff] }
 0x64e   :  { %v14056_v25 = vcombine.high %v8479_v43, %v8483_v2  ;;  %v8570_v54 = vld [vmem:[#allocation14 + $0x6a8] sm:$0xff] }
 0x650   :  { %11681 = vmatpush1.bf16.msra.mxu1 %v14101_v48  ;;  %11804 = vmatpush1.bf16.msra.mxu0 %v13975_v26  ;;  %v8471_v48 = vld [vmem:[#allocation14 + $0x390] sm:$0xff] }
 0x651   :  { %11682 = vmatprep.subr.bf16.mxu1 %v14094_v3  ;;  %11805 = vmatprep.subr.bf16.mxu0 %v13968_v5  ;;  %v8475_v26 = vld [vmem:[#allocation14 + $0x3b0] sm:$0xff]  ;;  %v14181_v3 = vcombine.low %v8606_v58, %v8610_v59  ;;  %v14055_v5 = vcombine.low %v8479_v43, %v8483_v2  ;;  %v8869_v58 = vld [vmem:[#allocation16] sm:$0xff]  ;;  %v14142_v59 = vcombine.high %v8566_v49, %v8570_v54  ;;  %v8558_v2 = vld [vmem:[#allocation14 + $0x648] sm:$0xff] }
 0x652   :  { %v14048_v46 = vcombine.high %v8471_v48, %v8475_v26 }
 0x654   :  { %11683 = vmatpush1.bf16.msra.mxu1 %v14093_v36  ;;  %11806 = vmatpush1.bf16.msra.mxu0 %v13967_v14  ;;  %v8463_v36 = vld [vmem:[#allocation14 + $0x350] sm:$0xff] }
 0x655   :  { %11684 = vmatprep.subr.bf16.mxu1 %v14086_v8  ;;  %11807 = vmatprep.subr.bf16.mxu0 %v13960_v41  ;;  %v8467_v14 = vld [vmem:[#allocation14 + $0x370] sm:$0xff]  ;;  %v14173_v8 = vcombine.low %v8598_v4, %v8602_v21  ;;  %v14047_v41 = vcombine.low %v8471_v48, %v8475_v26  ;;  %v14141_v4 = vcombine.low %v8566_v49, %v8570_v54  ;;  %v8782_v54 = vld [vmem:[#allocation14 + $0xd48] sm:$0xff] }
 0x656   :  { %v14040_v9 = vcombine.high %v8463_v36, %v8467_v14 }
 0x658   :  { %11685 = vmatpush1.bf16.msra.mxu1 %v14085_v22  ;;  %11808 = vmatpush1.bf16.msra.mxu0 %v13959_v31  ;;  %v8455_v22 = vld [vmem:[#allocation14 + $0x310] sm:$0xff] }
 0x659   :  { %11686 = vmatprep.subr.bf16.mxu1 %v14078_v44  ;;  %11809 = vmatprep.subr.bf16.mxu0 %v13952_v62  ;;  %v8459_v31 = vld [vmem:[#allocation14 + $0x330] sm:$0xff]  ;;  %v14165_v44 = vcombine.low %v8590_v24, %v8594_v50  ;;  %v14039_v62 = vcombine.low %v8463_v36, %v8467_v14 }
 0x65a   :  { %v14032_v38 = vcombine.high %v8455_v22, %v8459_v31  ;;  %v8427_v24 = vld [vmem:[#allocation14 + $0x230] sm:$0xff] }
 0x65c   :  { %11687 = vmatpush1.bf16.msra.mxu1 %v14077_v39  ;;  %11810 = vmatpush1.bf16.msra.mxu0 %v13951_v33  ;;  %v8447_v39 = vld [vmem:[#allocation14 + $0x2d0] sm:$0xff] }
 0x65d   :  { %11688 = vmatprep.subr.bf16.mxu1 %v14070_v11  ;;  %11811 = vmatprep.subr.bf16.mxu0 %v13944_v10  ;;  %v8451_v33 = vld [vmem:[#allocation14 + $0x2f0] sm:$0xff]  ;;  %v14157_v11 = vcombine.low %v8582_v60, %v8586_v13  ;;  %v14031_v10 = vcombine.low %v8455_v22, %v8459_v31  ;;  %v8802_v13 = vld [vmem:[#allocation14 + $0xde8] sm:$0xff] }
 0x65e   :  { %v14024_v0 = vcombine.high %v8447_v39, %v8451_v33  ;;  %v8675_v22 = vld [vmem:[#allocation14 + $0x9f0] sm:$0xff] }
 0x660   :  { %11689 = vmatpush1.bf16.msra.mxu1 %v14069_v34  ;;  %11812 = vmatpush1.bf16.msra.mxu0 %v13943_v47  ;;  %v8439_v34 = vld [vmem:[#allocation14 + $0x290] sm:$0xff] }
 0x661   :  { %11690 = vmatprep.subr.bf16.mxu1 %v14062_v56  ;;  %11813 = vmatprep.subr.bf16.mxu0 %v13936_v20  ;;  %v8443_v47 = vld [vmem:[#allocation14 + $0x2b0] sm:$0xff]  ;;  %v14149_v56 = vcombine.low %v8574_v35, %v8578_v30  ;;  %v14023_v20 = vcombine.low %v8447_v39, %v8451_v33  ;;  %v8790_v30 = vld [vmem:[#allocation14 + $0xd88] sm:$0xff] }
 0x662   :  { %v14016_v43 = vcombine.high %v8439_v34, %v8443_v47  ;;  %v14015_v21 = vcombine.low %v8439_v34, %v8443_v47  ;;  %v8794_v33 = vld [vmem:[#allocation14 + $0xda8] sm:$0xff] }
 0x663   :  { %v8786_v34 = vld [vmem:[#allocation14 + $0xd68] sm:$0xff] }
 0x664   :  { %11691 = vmatpush1.bf16.msra.mxu1 %v14061_v51  ;;  %11814 = vmatpush1.bf16.msra.mxu0 %v13935_v57  ;;  %v8562_v51 = vld [vmem:[#allocation14 + $0x668] sm:$0xff]  ;;  %v8431_v57 = vld [vmem:[#allocation14 + $0x250] sm:$0xff] }
 0x665   :  { %11692 = vmatprep.subr.bf16.mxu1 %v14182_v37  ;;  %11815 = vmatprep.subr.bf16.mxu0 %v14056_v25  ;;  %v8435_v37 = vld [vmem:[#allocation14 + $0x270] sm:$0xff]  ;;  %v8874_v25 = vrot.slane %v8869_v58, %v15087_v15  ;;  %v14134_v48 = vcombine.high %v8558_v2, %v8562_v51  ;;  %v14133_v36 = vcombine.low %v8558_v2, %v8562_v51 }
 0x666   :  { %v14008_v26 = vcombine.high %v8431_v57, %v8435_v37  ;;  %v14007_v15 = vcombine.low %v8431_v57, %v8435_v37  ;;  %v14358_v51 = vcombine.high %v8782_v54, %v8786_v34 }
 0x667   :  { %v11506_v50 = vadd.f32 %v15434_v45, %v8874_v25  ;;  %v8774_v25 = vld [vmem:[#allocation14 + $0xd08] sm:$0xff] }
 0x668   :  { %11693 = vmatpush2.bf16.msra.mxu1 %v14181_v3  ;;  %11816 = vmatpush2.bf16.msra.mxu0 %v14055_v5  ;;  %v8550_v3 = vld [vmem:[#allocation14 + $0x608] sm:$0xff]  ;;  %v8878_v5 = vrot.slane %v8869_v58, %v15095_v18  ;;  %v8671_v18 = vld [vmem:[#allocation14 + $0x9d0] sm:$0xff] }
 0x669   :  { %11694 = vmatprep.subr.bf16.mxu1 %v14174_v27  ;;  %11817 = vmatprep.subr.bf16.mxu0 %v14048_v46  ;;  %v8554_v27 = vld [vmem:[#allocation14 + $0x628] sm:$0xff]  ;;  %v8423_v46 = vld [vmem:[#allocation14 + $0x210] sm:$0xff]  ;;  %v14248_v35 = vcombine.high %v8671_v18, %v8675_v22 }
 0x66a   :  { %v14125_v45 = vcombine.low %v8550_v3, %v8554_v27 }
 0x66c   :  { %11695 = vmatpush2.bf16.msra.mxu1 %v14173_v8  ;;  %11818 = vmatpush2.bf16.msra.mxu0 %v14047_v41  ;;  %v14126_v8 = vcombine.high %v8550_v3, %v8554_v27  ;;  %v14000_v41 = vcombine.high %v8423_v46, %v8427_v24  ;;  %v14357_v3 = vcombine.low %v8782_v54, %v8786_v34 }
 0x66d   :  { %11696 = vmatprep.subr.bf16.mxu1 %v14166_v28  ;;  %11819 = vmatprep.subr.bf16.mxu0 %v14040_v9  ;;  %v8798_v28 = vld [vmem:[#allocation14 + $0xdc8] sm:$0xff]  ;;  %v11508_v9 = vadd.f32 %v15436_v16, %v8878_v5  ;;  %v8667_v16 = vld [vmem:[#allocation14 + $0x9b0] sm:$0xff] }
 0x670   :  { %11697 = vmatpush2.bf16.msra.mxu1 %v14165_v44  ;;  %11820 = vmatpush2.bf16.msra.mxu0 %v14039_v62  ;;  %v13999_v62 = vcombine.low %v8423_v46, %v8427_v24 }
 0x671   :  { %11698 = vmatprep.subr.bf16.mxu1 %v14158_v55  ;;  %11821 = vmatprep.subr.bf16.mxu0 %v14032_v38  ;;  %v14374_v38 = vcombine.high %v8798_v28, %v8802_v13 }
 0x674   :  { %11699 = vmatpush2.bf16.msra.mxu1 %v14157_v11  ;;  %11822 = vmatpush2.bf16.msra.mxu0 %v14031_v10  ;;  %v8663_v11 = vld [vmem:[#allocation14 + $0x990] sm:$0xff]  ;;  %v14373_v10 = vcombine.low %v8798_v28, %v8802_v13  ;;  %v8762_v13 = vld [vmem:[#allocation14 + $0xca8] sm:$0xff] }
 0x675   :  { %11700 = vmatprep.subr.bf16.mxu1 %v14150_v53  ;;  %11823 = vmatprep.subr.bf16.mxu0 %v14024_v0  ;;  %v14247_v53 = vcombine.low %v8671_v18, %v8675_v22  ;;  %v14366_v0 = vcombine.high %v8790_v30, %v8794_v33  ;;  %v14240_v49 = vcombine.high %v8663_v11, %v8667_v16  ;;  %v8631_v18 = vld [vmem:[#allocation14 + $0x890] sm:$0xff] }
 0x676   :  { %v14239_v2 = vcombine.low %v8663_v11, %v8667_v16  ;;  %v8635_v22 = vld [vmem:[#allocation14 + $0x8b0] sm:$0xff] }
 0x678   :  { %11701 = vmatpush2.bf16.msra.mxu1 %v14149_v56  ;;  %11824 = vmatpush2.bf16.msra.mxu0 %v14023_v20  ;;  %v8655_v56 = vld [vmem:[#allocation14 + $0x950] sm:$0xff] }
 0x679   :  { %11702 = vmatprep.subr.bf16.mxu1 %v14142_v59  ;;  %11825 = vmatprep.subr.bf16.mxu0 %v14016_v43  ;;  %v8659_v20 = vld [vmem:[#allocation14 + $0x970] sm:$0xff]  ;;  %v14365_v59 = vcombine.low %v8790_v30, %v8794_v33  ;;  %v14207_v33 = vcombine.low %v8631_v18, %v8635_v22 }
 0x67a   :  { %v14232_v37 = vcombine.high %v8655_v56, %v8659_v20  ;;  %v14231_v27 = vcombine.low %v8655_v56, %v8659_v20  ;;  %v8627_v30 = vld [vmem:[#allocation14 + $0x870] sm:$0xff]  ;;  %v8862_v20 = vld [vmem:[#allocation14 + $0xfc8] sm:$0xff] }
 0x67c   :  { %11703 = vmatpush2.bf16.msra.mxu1 %v14141_v4  ;;  %11826 = vmatpush2.bf16.msra.mxu0 %v14015_v21  ;;  %v8778_v4 = vld [vmem:[#allocation14 + $0xd28] sm:$0xff] }
 0x67d   :  { %v11546_v14 = vpop.f32.mrf.mxu1  ;;  %11704 = vmatprep.subr.bf16.mxu1 %v14134_v48  ;;  %11827 = vmatprep.subr.bf16.mxu0 %v14008_v26  ;;  %v8647_v48 = vld [vmem:[#allocation14 + $0x910] sm:$0xff]  ;;  %v14350_v46 = vcombine.high %v8774_v25, %v8778_v4 }
 0x67e   :  { %v11547_v60 = vadd.f32 %v11546_v14, %v11506_v50  ;;  %v8651_v26 = vld [vmem:[#allocation14 + $0x930] sm:$0xff]  ;;  %v8766_v50 = vld [vmem:[#allocation14 + $0xcc8] sm:$0xff] }
 0x67f   :  { %v11548_v31 = vpop.f32.mrf.mxu1  ;;  %v14224_v24 = vcombine.high %v8647_v48, %v8651_v26  ;;  %v8643_v14 = vld [vmem:[#allocation14 + $0x8f0] sm:$0xff] }
 0x680   :  { %v11549_v44 = vadd.f32 %v11548_v31, %v11508_v9  ;;  %11705 = vmatpush2.bf16.msra.mxu1 %v14133_v36  ;;  %11828 = vmatpush2.bf16.msra.mxu0 %v14007_v15  ;;  %v8770_v36 = vld [vmem:[#allocation14 + $0xce8] sm:$0xff]  ;;  %v8639_v15 = vld [vmem:[#allocation14 + $0x8d0] sm:$0xff] }
 0x681   :  { %v11550_v55 = vpop.f32.mrf.mxu1  ;;  %11706 = vmatprep.subr.bf16.mxu1 %v14126_v8  ;;  %11829 = vmatprep.subr.bf16.mxu0 %v14000_v41  ;;  %v14349_v8 = vcombine.low %v8774_v25, %v8778_v4  ;;  %v14223_v41 = vcombine.low %v8647_v48, %v8651_v26  ;;  %v14342_v28 = vcombine.high %v8766_v50, %v8770_v36  ;;  %v8858_v48 = vld [vmem:[#allocation14 + $0xfa8] sm:$0xff]  ;;  %v8727_v26 = vld [vmem:[#allocation14 + $0xb90] sm:$0xff] }
 0x682   :  { %v14216_v9 = vcombine.high %v8639_v15, %v8643_v14  ;;  %v14341_v31 = vcombine.low %v8766_v50, %v8770_v36  ;;  %v8750_v55 = vld [vmem:[#allocation14 + $0xc48] sm:$0xff] }
 0x683   :  { %v11551_v39 = vpop.f32.mrf.mxu1  ;;  %v8846_v50 = vld [vmem:[#allocation14 + $0xf48] sm:$0xff] }
 0x684   :  { %11707 = vmatpush2.bf16.msra.mxu1 %v14125_v45  ;;  %11830 = vmatpush2.bf16.msra.mxu0 %v13999_v62  ;;  %v14208_v62 = vcombine.high %v8631_v18, %v8635_v22  ;;  %v8850_v36 = vld [vmem:[#allocation14 + $0xf68] sm:$0xff]  ;;  %v8711_v18 = vld [vmem:[#allocation14 + $0xb10] sm:$0xff] }
 0x685   :  { %11758 = vmatprep.subr.bf16.mxu1 %v14374_v38  ;;  %11881 = vmatprep.subr.bf16.mxu0 %v14248_v35  ;;  %v8754_v38 = vld [vmem:[#allocation14 + $0xc68] sm:$0xff]  ;;  %v8623_v35 = vld [vmem:[#allocation14 + $0x850] sm:$0xff] }
 0x686   :  { %v14326_v11 = vcombine.high %v8750_v55, %v8754_v38  ;;  %v14200_v16 = vcombine.high %v8623_v35, %v8627_v30  ;;  %v14325_v54 = vcombine.low %v8750_v55, %v8754_v38  ;;  %v14199_v34 = vcombine.low %v8623_v35, %v8627_v30  ;;  %v8715_v22 = vld [vmem:[#allocation14 + $0xb30] sm:$0xff]  ;;  %v8830_v55 = vld [vmem:[#allocation14 + $0xec8] sm:$0xff] }
 0x687   :  { %11709 = vmatmul.mubr.bf16.vlgmr.msra.gmra.mxu1 %v15402_v7  ;;  %11832 = vmatmul.mubr.bf16.vlgmr.msra.gmra.mxu0 %v15369_v1  ;;  %v11587_v47 = vpop.f32.mrf.mxu0  ;;  %v8834_v38 = vld [vmem:[#allocation14 + $0xee8] sm:$0xff]  ;;  %v8703_v35 = vld [vmem:[#allocation14 + $0xad0] sm:$0xff] }
 0x688   :  { %v15458_v58 = vadd.f32 %v11587_v47, %v11547_v60  ;;  %11759 = vmatpush1.bf16.msra.mxu1 %v14373_v10  ;;  %11790 = vmatprep.mubr.bf16.mxu1 %v15440_v12  ;;  %v8758_v60 = vld [vmem:[#allocation14 + $0xc88] sm:$0xff]  ;;  %v8707_v30 = vld [vmem:[#allocation14 + $0xaf0] sm:$0xff] }
 0x689   :  { %11882 = vmatpush1.bf16.msra.mxu0 %v14247_v53  ;;  %11913 = vmatprep.mubr.bf16.mxu0 %v15407_v40  ;;  %v11589_v43 = vpop.f32.mrf.mxu0  ;;  %v14334_v45 = vcombine.high %v8758_v60, %v8762_v13  ;;  %v14333_v39 = vcombine.low %v8758_v60, %v8762_v13  ;;  %v8742_v10 = vld [vmem:[#allocation14 + $0xc08] sm:$0xff] }
 0x68a   :  { %v15462_v57 = vadd.f32 %v11589_v43, %v11549_v44  ;;  %11760 = vmatprep.subr.bf16.mxu1 %v14366_v0  ;;  %11883 = vmatprep.subr.bf16.mxu0 %v14240_v49  ;;  %v14215_v44 = vcombine.low %v8639_v15, %v8643_v14  ;;  %v8746_v53 = vld [vmem:[#allocation14 + $0xc28] sm:$0xff]  ;;  %v8615_v0 = vld [vmem:[#allocation14 + $0x810] sm:$0xff] }
 0x68b   :  { %v11591_v21 = vpop.f32.mrf.mxu0  ;;  %v8619_v49 = vld [vmem:[#allocation14 + $0x830] sm:$0xff]  ;;  %v14318_v47 = vcombine.high %v8742_v10, %v8746_v53  ;;  %v8838_v60 = vld [vmem:[#allocation14 + $0xf08] sm:$0xff] }
 0x68c   :  { %11761 = vmatpush1.bf16.msra.mxu1 %v14365_v59  ;;  %v14192_v56 = vcombine.high %v8615_v0, %v8619_v49  ;;  %v8866_v59 = vld [vmem:[#allocation14 + $0xfe8] sm:$0xff]  ;;  %v8735_v43 = vld [vmem:[#allocation14 + $0xbd0] sm:$0xff] }
 0x68d   :  { %11884 = vmatpush1.bf16.msra.mxu0 %v14239_v2  ;;  %v11592_v5 = vpop.f32.mrf.mxu0  ;;  %11762 = vmatprep.subr.bf16.mxu1 %v14358_v51  ;;  %v8739_v2 = vld [vmem:[#allocation14 + $0xbf0] sm:$0xff]  ;;  %v14317_v51 = vcombine.low %v8742_v10, %v8746_v53  ;;  %v14438_v25 = vcombine.high %v8862_v20, %v8866_v59  ;;  %v8854_v21 = vld [vmem:[#allocation14 + $0xf88] sm:$0xff] }
 0x68e   :  { %11885 = vmatprep.subr.bf16.mxu0 %v14232_v37  ;;  %v14191_v37 = vcombine.low %v8615_v0, %v8619_v49  ;;  %v14312_v4 = vcombine.high %v8735_v43, %v8739_v2  ;;  %v14437_v5 = vcombine.low %v8862_v20, %v8866_v59  ;;  %v8719_v15 = vld [vmem:[#allocation14 + $0xb50] sm:$0xff]  ;;  %v8842_v13 = vld [vmem:[#allocation14 + $0xf28] sm:$0xff] }
 0x68f   :  { %v8723_v14 = vld [vmem:[#allocation14 + $0xb70] sm:$0xff]  ;;  %v8822_v10 = vld [vmem:[#allocation14 + $0xe88] sm:$0xff] }
 0x690   :  { %11763 = vmatpush1.bf16.msra.mxu1 %v14357_v3  ;;  %v8731_v3 = vld [vmem:[#allocation14 + $0xbb0] sm:$0xff]  ;;  %v8826_v53 = vld [vmem:[#allocation14 + $0xea8] sm:$0xff] }
 0x691   :  { %11886 = vmatpush1.bf16.msra.mxu0 %v14231_v27  ;;  %11764 = vmatprep.subr.bf16.mxu1 %v14350_v46  ;;  %v14311_v27 = vcombine.low %v8735_v43, %v8739_v2  ;;  %v14430_v46 = vcombine.high %v8854_v21, %v8858_v48  ;;  %v8695_v0 = vld [vmem:[#allocation14 + $0xa90] sm:$0xff]  ;;  %v8814_v20 = vld [vmem:[#allocation14 + $0xe48] sm:$0xff] }
 0x692   :  { %11887 = vmatprep.subr.bf16.mxu0 %v14224_v24  ;;  %v14304_v24 = vcombine.high %v8727_v26, %v8731_v3  ;;  %v8699_v49 = vld [vmem:[#allocation14 + $0xab0] sm:$0xff]  ;;  %v8818_v59 = vld [vmem:[#allocation14 + $0xe68] sm:$0xff] }
 0x693   :  { %v8687_v43 = vld [vmem:[#allocation14 + $0xa50] sm:$0xff] }
 0x694   :  { %11765 = vmatpush1.bf16.msra.mxu1 %v14349_v8  ;;  %v14429_v8 = vcombine.low %v8854_v21, %v8858_v48  ;;  %v8691_v2 = vld [vmem:[#allocation14 + $0xa70] sm:$0xff]  ;;  %v8806_v21 = vld [vmem:[#allocation14 + $0xe08] sm:$0xff] }
 0x695   :  { %11888 = vmatpush1.bf16.msra.mxu0 %v14223_v41  ;;  %11766 = vmatprep.subr.bf16.mxu1 %v14342_v28  ;;  %v14303_v41 = vcombine.low %v8727_v26, %v8731_v3  ;;  %v14422_v28 = vcombine.high %v8846_v50, %v8850_v36  ;;  %v8810_v48 = vld [vmem:[#allocation14 + $0xe28] sm:$0xff]  ;;  %v8679_v26 = vld [vmem:[#allocation14 + $0xa10] sm:$0xff] }
 0x696   :  { %11889 = vmatprep.subr.bf16.mxu0 %v14216_v9  ;;  %v14296_v9 = vcombine.high %v8719_v15, %v8723_v14  ;;  %v8683_v3 = vld [vmem:[#allocation14 + $0xa30] sm:$0xff] }
 0x698   :  { %11767 = vmatpush1.bf16.msra.mxu1 %v14341_v31  ;;  %v14421_v31 = vcombine.low %v8846_v50, %v8850_v36  ;;  %v8543_v50 = vld [vmem:[#allocation14 + $0x5d0] sm:$0xff] }
 0x699   :  { %11890 = vmatpush1.bf16.msra.mxu0 %v14215_v44  ;;  %11768 = vmatprep.subr.bf16.mxu1 %v14334_v45  ;;  %v14295_v44 = vcombine.low %v8719_v15, %v8723_v14  ;;  %v14414_v45 = vcombine.high %v8838_v60, %v8842_v13  ;;  %v8547_v36 = vld [vmem:[#allocation14 + $0x5f0] sm:$0xff]  ;;  %v8416_v15 = vld [vmem:[#allocation14 + $0x1d8] sm:$0xff] }
 0x69a   :  { %11891 = vmatprep.subr.bf16.mxu0 %v14208_v62  ;;  %v14288_v62 = vcombine.high %v8711_v18, %v8715_v22  ;;  %v8420_v14 = vld [vmem:[#allocation14 + $0x1f8] sm:$0xff] }
 0x69c   :  { %11769 = vmatpush1.bf16.msra.mxu1 %v14333_v39  ;;  %v14413_v39 = vcombine.low %v8838_v60, %v8842_v13  ;;  %v8535_v60 = vld [vmem:[#allocation14 + $0x590] sm:$0xff] }
 0x69d   :  { %11892 = vmatpush1.bf16.msra.mxu0 %v14207_v33  ;;  %11770 = vmatprep.subr.bf16.mxu1 %v14326_v11  ;;  %v14287_v33 = vcombine.low %v8711_v18, %v8715_v22  ;;  %v14406_v11 = vcombine.high %v8830_v55, %v8834_v38  ;;  %v8539_v13 = vld [vmem:[#allocation14 + $0x5b0] sm:$0xff]  ;;  %v14119_v18 = vcombine.low %v8543_v50, %v8547_v36  ;;  %v8408_v22 = vld [vmem:[#allocation14 + $0x198] sm:$0xff] }
 0x69e   :  { %11893 = vmatprep.subr.bf16.mxu0 %v14200_v16  ;;  %v14280_v16 = vcombine.high %v8703_v35, %v8707_v30 }
 0x6a0   :  { %11771 = vmatpush1.bf16.msra.mxu1 %v14325_v54  ;;  %v14405_v54 = vcombine.low %v8830_v55, %v8834_v38  ;;  %v8531_v55 = vld [vmem:[#allocation14 + $0x570] sm:$0xff] }
 0x6a1   :  { %11894 = vmatpush1.bf16.msra.mxu0 %v14199_v34  ;;  %11772 = vmatprep.subr.bf16.mxu1 %v14318_v47  ;;  %v14279_v34 = vcombine.low %v8703_v35, %v8707_v30  ;;  %v14398_v47 = vcombine.high %v8822_v10, %v8826_v53  ;;  %v8400_v30 = vld [vmem:[#allocation14 + $0x158] sm:$0xff] }
 0x6a2   :  { %11895 = vmatprep.subr.bf16.mxu0 %v14192_v56  ;;  %v14272_v56 = vcombine.high %v8695_v0, %v8699_v49 }
 0x6a4   :  { %11773 = vmatpush1.bf16.msra.mxu1 %v14317_v51  ;;  %v14397_v51 = vcombine.low %v8822_v10, %v8826_v53 }
 0x6a5   :  { %11896 = vmatpush1.bf16.msra.mxu0 %v14191_v37  ;;  %11774 = vmatprep.subr.bf16.mxu1 %v14438_v25  ;;  %v14271_v37 = vcombine.low %v8695_v0, %v8699_v49  ;;  %v14390_v25 = vcombine.high %v8814_v20, %v8818_v59  ;;  %v8519_v0 = vld [vmem:[#allocation14 + $0x510] sm:$0xff] }
 0x6a6   :  { %11897 = vmatprep.subr.bf16.mxu0 %v14312_v4  ;;  %v14264_v4 = vcombine.high %v8687_v43, %v8691_v2  ;;  %v8523_v49 = vld [vmem:[#allocation14 + $0x530] sm:$0xff] }
 0x6a8   :  { %11775 = vmatpush2.bf16.msra.mxu1 %v14437_v5  ;;  %v14389_v5 = vcombine.low %v8814_v20, %v8818_v59 }
 0x6a9   :  { %11898 = vmatpush2.bf16.msra.mxu0 %v14311_v27  ;;  %11776 = vmatprep.subr.bf16.mxu1 %v14430_v46  ;;  %v14263_v27 = vcombine.low %v8687_v43, %v8691_v2  ;;  %v14382_v46 = vcombine.high %v8806_v21, %v8810_v48  ;;  %v14096_v43 = vcombine.high %v8519_v0, %v8523_v49 }
 0x6aa   :  { %11899 = vmatprep.subr.bf16.mxu0 %v14304_v24  ;;  %v14256_v24 = vcombine.high %v8679_v26, %v8683_v3 }
 0x6ac   :  { %11777 = vmatpush2.bf16.msra.mxu1 %v14429_v8  ;;  %v14381_v8 = vcombine.low %v8806_v21, %v8810_v48 }
 0x6ad   :  { %11900 = vmatpush2.bf16.msra.mxu0 %v14303_v41  ;;  %11778 = vmatprep.subr.bf16.mxu1 %v14422_v28  ;;  %v14255_v41 = vcombine.low %v8679_v26, %v8683_v3  ;;  %v14120_v28 = vcombine.high %v8543_v50, %v8547_v36  ;;  %v8503_v3 = vld [vmem:[#allocation14 + $0x490] sm:$0xff] }
 0x6ae   :  { %11901 = vmatprep.subr.bf16.mxu0 %v14296_v9  ;;  %v13994_v9 = vcombine.high %v8416_v15, %v8420_v14 }
 0x6b0   :  { %11779 = vmatpush2.bf16.msra.mxu1 %v14421_v31  ;;  %v8412_v31 = vld [vmem:[#allocation14 + $0x1b8] sm:$0xff] }
 0x6b1   :  { %11902 = vmatpush2.bf16.msra.mxu0 %v14295_v44  ;;  %11780 = vmatprep.subr.bf16.mxu1 %v14414_v45  ;;  %v13993_v44 = vcombine.low %v8416_v15, %v8420_v14  ;;  %v14112_v45 = vcombine.high %v8535_v60, %v8539_v13  ;;  %v13986_v35 = vcombine.high %v8408_v22, %v8412_v31  ;;  %v8495_v14 = vld [vmem:[#allocation14 + $0x450] sm:$0xff] }
 0x6b2   :  { %11903 = vmatprep.subr.bf16.mxu0 %v14288_v62  ;;  %v8527_v62 = vld [vmem:[#allocation14 + $0x550] sm:$0xff] }
 0x6b3   :  { %v14104_v10 = vcombine.high %v8527_v62, %v8531_v55 }
 0x6b4   :  { %11781 = vmatpush2.bf16.msra.mxu1 %v14413_v39  ;;  %v8404_v39 = vld [vmem:[#allocation14 + $0x178] sm:$0xff] }
 0x6b5   :  { %11904 = vmatpush2.bf16.msra.mxu0 %v14287_v33  ;;  %11782 = vmatprep.subr.bf16.mxu1 %v14406_v11  ;;  %v14111_v33 = vcombine.low %v8535_v60, %v8539_v13  ;;  %v13978_v53 = vcombine.high %v8400_v30, %v8404_v39  ;;  %v13977_v59 = vcombine.low %v8400_v30, %v8404_v39  ;;  %v8607_v39 = vld [vmem:[#allocation14 + $0x7d0] sm:$0xff] }
 0x6b6   :  { %11905 = vmatprep.subr.bf16.mxu0 %v14280_v16  ;;  %v13985_v16 = vcombine.low %v8408_v22, %v8412_v31  ;;  %v8487_v22 = vld [vmem:[#allocation14 + $0x410] sm:$0xff] }
 0x6b7   :  { %v8491_v31 = vld [vmem:[#allocation14 + $0x430] sm:$0xff] }
 0x6b8   :  { %11783 = vmatpush2.bf16.msra.mxu1 %v14405_v54 }
 0x6b9   :  { %11906 = vmatpush2.bf16.msra.mxu0 %v14279_v34  ;;  %11784 = vmatprep.subr.bf16.mxu1 %v14398_v47  ;;  %v8392_v34 = vld [vmem:[#allocation14 + $0x118] sm:$0xff] }
 0x6ba   :  { %11907 = vmatprep.subr.bf16.mxu0 %v14272_v56  ;;  %v8396_v47 = vld [vmem:[#allocation14 + $0x138] sm:$0xff]  ;;  %v14103_v56 = vcombine.low %v8527_v62, %v8531_v55 }
 0x6bb   :  { %v13970_v2 = vcombine.high %v8392_v34, %v8396_v47  ;;  %v13969_v21 = vcombine.low %v8392_v34, %v8396_v47  ;;  %v8599_v34 = vld [vmem:[#allocation14 + $0x790] sm:$0xff] }
 0x6bc   :  { %11785 = vmatpush2.bf16.msra.mxu1 %v14397_v51  ;;  %v8511_v51 = vld [vmem:[#allocation14 + $0x4d0] sm:$0xff] }
 0x6bd   :  { %11908 = vmatpush2.bf16.msra.mxu0 %v14271_v37  ;;  %11786 = vmatprep.subr.bf16.mxu1 %v14390_v25  ;;  %v8515_v37 = vld [vmem:[#allocation14 + $0x4f0] sm:$0xff]  ;;  %v8388_v25 = vld [vmem:[#allocation14 + $0xf8] sm:$0xff] }
 0x6be   :  { %11909 = vmatprep.subr.bf16.mxu0 %v14264_v4  ;;  %v14095_v4 = vcombine.low %v8519_v0, %v8523_v49  ;;  %v14088_v48 = vcombine.high %v8511_v51, %v8515_v37  ;;  %v8603_v47 = vld [vmem:[#allocation14 + $0x7b0] sm:$0xff] }
 0x6c0   :  { %11787 = vmatpush2.bf16.msra.mxu1 %v14389_v5  ;;  %v8507_v5 = vld [vmem:[#allocation14 + $0x4b0] sm:$0xff] }
 0x6c1   :  { %11910 = vmatpush2.bf16.msra.mxu0 %v14263_v27  ;;  %11788 = vmatprep.subr.bf16.mxu1 %v14382_v46  ;;  %v8376_v27 = vld [vmem:[#allocation14 + $0x98] sm:$0xff]  ;;  %v14080_v36 = vcombine.high %v8503_v3, %v8507_v5 }
 0x6c2   :  { %11911 = vmatprep.subr.bf16.mxu0 %v14256_v24  ;;  %v8380_v46 = vld [vmem:[#allocation14 + $0xb8] sm:$0xff]  ;;  %v14087_v24 = vcombine.low %v8511_v51, %v8515_v37  ;;  %v8591_v37 = vld [vmem:[#allocation14 + $0x750] sm:$0xff] }
 0x6c3   :  { %v13954_v15 = vcombine.high %v8376_v27, %v8380_v46  ;;  %v13953_v60 = vcombine.low %v8376_v27, %v8380_v46  ;;  %v8587_v27 = vld [vmem:[#allocation14 + $0x730] sm:$0xff]  ;;  %v8456_v46 = vld [vmem:[#allocation14 + $0x318] sm:$0xff] }
 0x6c4   :  { %11789 = vmatpush2.bf16.msra.mxu1 %v14381_v8  ;;  %v8499_v8 = vld [vmem:[#allocation14 + $0x470] sm:$0xff] }
 0x6c5   :  { %11912 = vmatpush2.bf16.msra.mxu0 %v14255_v41  ;;  %11840 = vmatprep.subr.bf16.mxu1 %v14120_v28  ;;  %v8368_v41 = vld [vmem:[#allocation14 + $0x58] sm:$0xff]  ;;  %v14072_v13 = vcombine.high %v8495_v14, %v8499_v8  ;;  %v14071_v62 = vcombine.low %v8495_v14, %v8499_v8  ;;  %v8575_v8 = vld [vmem:[#allocation14 + $0x6d0] sm:$0xff] }
 0x6c6   :  { %11963 = vmatprep.subr.bf16.mxu0 %v13994_v9  ;;  %v8372_v28 = vld [vmem:[#allocation14 + $0x78] sm:$0xff]  ;;  %v14079_v9 = vcombine.low %v8503_v3, %v8507_v5  ;;  %v8583_v5 = vld [vmem:[#allocation14 + $0x710] sm:$0xff] }
 0x6c7   :  { %v15464_v38 = vpop.f32.mrf.mxu0  ;;  %11791 = vmatmul.mubr.bf16.vlgmr.msra.gmra.mxu1 %v15442_v23  ;;  %v13945_v55 = vcombine.low %v8368_v41, %v8372_v28 }
 0x6c8   :  { %11914 = vmatmul.mubr.bf16.vlgmr.msra.gmra.mxu0 %v15415_v6  ;;  %11841 = vmatpush1.bf16.msra.mxu1 %v14119_v18  ;;  %v13946_v18 = vcombine.high %v8368_v41, %v8372_v28  ;;  %v8579_v41 = vld [vmem:[#allocation14 + $0x6f0] sm:$0xff]  ;;  %v8448_v28 = vld [vmem:[#allocation14 + $0x2d8] sm:$0xff] }
 0x6c9   :  { %11872 = vmatprep.mubr.bf16.mxu1 %v15381_v42  ;;  %11964 = vmatpush1.bf16.msra.mxu0 %v13993_v44  ;;  %v15469_v11 = vpop.f32.mrf.mxu0  ;;  %v8360_v44 = vld [vmem:[#allocation14 + $0x18] sm:$0xff] }
 0x6ca   :  { %11995 = vmatprep.mubr.bf16.mxu0 %v15353_v52  ;;  %11842 = vmatprep.subr.bf16.mxu1 %v14112_v45  ;;  %v8384_v52 = vld [vmem:[#allocation14 + $0xd8] sm:$0xff] }
 0x6cb   :  { %v11673_v54 = vpop.f32.mrf.mxu0  ;;  %11965 = vmatprep.subr.bf16.mxu0 %v13986_v35  ;;  %v13962_v26 = vcombine.high %v8384_v52, %v8388_v25  ;;  %v13961_v50 = vcombine.low %v8384_v52, %v8388_v25  ;;  %v8364_v45 = vld [vmem:[#allocation14 + $0x38] sm:$0xff]  ;;  %v14064_v35 = vcombine.high %v8487_v22, %v8491_v31  ;;  %v8595_v52 = vld [vmem:[#allocation14 + $0x770] sm:$0xff] }
 0x6cc   :  { %11843 = vmatpush1.bf16.msra.mxu1 %v14111_v33  ;;  %v13938_v30 = vcombine.high %v8360_v44, %v8364_v45  ;;  %v8611_v33 = vld [vmem:[#allocation14 + $0x7f0] sm:$0xff]  ;;  %v13937_v0 = vcombine.low %v8360_v44, %v8364_v45  ;;  %v8464_v25 = vld [vmem:[#allocation14 + $0x358] sm:$0xff] }
 0x6cd   :  { %11966 = vmatpush1.bf16.msra.mxu0 %v13985_v16  ;;  %v11674_v20 = vpop.f32.mrf.mxu0  ;;  %11844 = vmatprep.subr.bf16.mxu1 %v14104_v10  ;;  %v8480_v16 = vld [vmem:[#allocation14 + $0x3d8] sm:$0xff]  ;;  %v14184_v49 = vcombine.high %v8607_v39, %v8611_v33  ;;  %v8571_v44 = vld [vmem:[#allocation14 + $0x6b0] sm:$0xff] }
 0x6ce   :  { %11967 = vmatprep.subr.bf16.mxu0 %v13978_v53  ;;  %v8484_v10 = vld [vmem:[#allocation14 + $0x3f8] sm:$0xff]  ;;  %v14063_v53 = vcombine.low %v8487_v22, %v8491_v31  ;;  %v8567_v31 = vld [vmem:[#allocation14 + $0x690] sm:$0xff] }
 0x6cf   :  { %v14058_v54 = vcombine.high %v8480_v16, %v8484_v10  ;;  %v8476_v20 = vld [vmem:[#allocation14 + $0x3b8] sm:$0xff] }
 0x6d0   :  { %11845 = vmatpush1.bf16.msra.mxu1 %v14103_v56  ;;  %v8472_v56 = vld [vmem:[#allocation14 + $0x398] sm:$0xff] }
 0x6d1   :  { %11968 = vmatpush1.bf16.msra.mxu0 %v13977_v59  ;;  %11846 = vmatprep.subr.bf16.mxu1 %v14096_v43  ;;  %v14183_v59 = vcombine.low %v8607_v39, %v8611_v33  ;;  %v14057_v43 = vcombine.low %v8480_v16, %v8484_v10  ;;  %v14050_v51 = vcombine.high %v8472_v56, %v8476_v20  ;;  %v8440_v45 = vld [vmem:[#allocation14 + $0x298] sm:$0xff]  ;;  %v8559_v33 = vld [vmem:[#allocation14 + $0x650] sm:$0xff] }
 0x6d2   :  { %11969 = vmatprep.subr.bf16.mxu0 %v13970_v2  ;;  %v14176_v2 = vcombine.high %v8599_v34, %v8603_v47  ;;  %v8563_v16 = vld [vmem:[#allocation14 + $0x670] sm:$0xff]  ;;  %v8432_v10 = vld [vmem:[#allocation14 + $0x258] sm:$0xff] }
 0x6d4   :  { %11847 = vmatpush1.bf16.msra.mxu1 %v14095_v4  ;;  %v8468_v4 = vld [vmem:[#allocation14 + $0x378] sm:$0xff] }
 0x6d5   :  { %11970 = vmatpush1.bf16.msra.mxu0 %v13969_v21  ;;  %11848 = vmatprep.subr.bf16.mxu1 %v14088_v48  ;;  %v14175_v21 = vcombine.low %v8599_v34, %v8603_v47  ;;  %v14049_v48 = vcombine.low %v8472_v56, %v8476_v20  ;;  %v14042_v3 = vcombine.high %v8464_v25, %v8468_v4  ;;  %v8551_v47 = vld [vmem:[#allocation14 + $0x610] sm:$0xff]  ;;  %v8424_v20 = vld [vmem:[#allocation14 + $0x218] sm:$0xff] }
 0x6d6   :  { %11971 = vmatprep.subr.bf16.mxu0 %v13962_v26  ;;  %v14168_v26 = vcombine.high %v8591_v37, %v8595_v52  ;;  %v8555_v56 = vld [vmem:[#allocation14 + $0x630] sm:$0xff] }
 0x6d8   :  { %11849 = vmatpush1.bf16.msra.mxu1 %v14087_v24  ;;  %v8460_v24 = vld [vmem:[#allocation14 + $0x338] sm:$0xff] }
 0x6d9   :  { %11972 = vmatpush1.bf16.msra.mxu0 %v13961_v50  ;;  %11850 = vmatprep.subr.bf16.mxu1 %v14080_v36  ;;  %v14167_v50 = vcombine.low %v8591_v37, %v8595_v52  ;;  %v14041_v36 = vcombine.low %v8464_v25, %v8468_v4  ;;  %v14034_v14 = vcombine.high %v8456_v46, %v8460_v24  ;;  %v8799_v52 = vld [vmem:[#allocation14 + $0xdd0] sm:$0xff]  ;;  %v8672_v4 = vld [vmem:[#allocation14 + $0x9d8] sm:$0xff] }
 0x6da   :  { %11973 = vmatprep.subr.bf16.mxu0 %v13954_v15  ;;  %v14160_v15 = vcombine.high %v8583_v5, %v8587_v27  ;;  %v8803_v25 = vld [vmem:[#allocation14 + $0xdf0] sm:$0xff] }
 0x6dc   :  { %11851 = vmatpush1.bf16.msra.mxu1 %v14079_v9  ;;  %v8452_v9 = vld [vmem:[#allocation14 + $0x2f8] sm:$0xff] }
 0x6dd   :  { %11974 = vmatpush1.bf16.msra.mxu0 %v13953_v60  ;;  %11852 = vmatprep.subr.bf16.mxu1 %v14072_v13  ;;  %v14159_v60 = vcombine.low %v8583_v5, %v8587_v27  ;;  %v14033_v13 = vcombine.low %v8456_v46, %v8460_v24  ;;  %v14026_v22 = vcombine.high %v8448_v28, %v8452_v9  ;;  %v8791_v27 = vld [vmem:[#allocation14 + $0xd90] sm:$0xff] }
 0x6de   :  { %11975 = vmatprep.subr.bf16.mxu0 %v13946_v18  ;;  %v14152_v18 = vcombine.high %v8575_v8, %v8579_v41  ;;  %v8795_v46 = vld [vmem:[#allocation14 + $0xdb0] sm:$0xff]  ;;  %v14375_v24 = vcombine.low %v8799_v52, %v8803_v25 }
 0x6e0   :  { %11853 = vmatpush1.bf16.msra.mxu1 %v14071_v62  ;;  %v8444_v62 = vld [vmem:[#allocation14 + $0x2b8] sm:$0xff] }
 0x6e1   :  { %11976 = vmatpush1.bf16.msra.mxu0 %v13945_v55  ;;  %11854 = vmatprep.subr.bf16.mxu1 %v14064_v35  ;;  %v14151_v55 = vcombine.low %v8575_v8, %v8579_v41  ;;  %v14025_v35 = vcombine.low %v8448_v28, %v8452_v9  ;;  %v14018_v39 = vcombine.high %v8440_v45, %v8444_v62  ;;  %v8783_v8 = vld [vmem:[#allocation14 + $0xd50] sm:$0xff] }
 0x6e2   :  { %11977 = vmatprep.subr.bf16.mxu0 %v13938_v30  ;;  %v14144_v30 = vcombine.high %v8567_v31, %v8571_v44  ;;  %v8787_v41 = vld [vmem:[#allocation14 + $0xd70] sm:$0xff] }
 0x6e4   :  { %11855 = vmatpush1.bf16.msra.mxu1 %v14063_v53  ;;  %v8436_v53 = vld [vmem:[#allocation14 + $0x278] sm:$0xff] }
 0x6e5   :  { %11978 = vmatpush1.bf16.msra.mxu0 %v13937_v0  ;;  %11856 = vmatprep.subr.bf16.mxu1 %v14184_v49  ;;  %v14143_v0 = vcombine.low %v8567_v31, %v8571_v44  ;;  %v14017_v49 = vcombine.low %v8440_v45, %v8444_v62  ;;  %v14010_v34 = vcombine.high %v8432_v10, %v8436_v53 }
 0x6e6   :  { %11979 = vmatprep.subr.bf16.mxu0 %v14058_v54  ;;  %v14136_v54 = vcombine.high %v8559_v33, %v8563_v16  ;;  %v14367_v31 = vcombine.low %v8791_v27, %v8795_v46 }
 0x6e8   :  { %11857 = vmatpush2.bf16.msra.mxu1 %v14183_v59  ;;  %v8428_v59 = vld [vmem:[#allocation14 + $0x238] sm:$0xff] }
 0x6e9   :  { %11980 = vmatpush2.bf16.msra.mxu0 %v14057_v43  ;;  %11858 = vmatprep.subr.bf16.mxu1 %v14176_v2  ;;  %v14135_v43 = vcombine.low %v8559_v33, %v8563_v16  ;;  %v14009_v2 = vcombine.low %v8432_v10, %v8436_v53  ;;  %v14002_v37 = vcombine.high %v8424_v20, %v8428_v59  ;;  %v8648_v33 = vld [vmem:[#allocation14 + $0x918] sm:$0xff] }
 0x6ea   :  { %11981 = vmatprep.subr.bf16.mxu0 %v14050_v51  ;;  %v14128_v51 = vcombine.high %v8551_v47, %v8555_v56  ;;  %v8652_v16 = vld [vmem:[#allocation14 + $0x938] sm:$0xff]  ;;  %v14359_v10 = vcombine.low %v8783_v8, %v8787_v41 }
 0x6ec   :  { %11859 = vmatpush2.bf16.msra.mxu1 %v14175_v21  ;;  %v8676_v21 = vld [vmem:[#allocation14 + $0x9f8] sm:$0xff] }
 0x6ed   :  { %11982 = vmatpush2.bf16.msra.mxu0 %v14049_v48  ;;  %11860 = vmatprep.subr.bf16.mxu1 %v14168_v26  ;;  %v14127_v48 = vcombine.low %v8551_v47, %v8555_v56  ;;  %v14001_v26 = vcombine.low %v8424_v20, %v8428_v59  ;;  %v14250_v5 = vcombine.high %v8672_v4, %v8676_v21  ;;  %v8771_v47 = vld [vmem:[#allocation14 + $0xcf0] sm:$0xff]  ;;  %v8640_v56 = vld [vmem:[#allocation14 + $0x8d8] sm:$0xff] }
 0x6ee   :  { %11983 = vmatprep.subr.bf16.mxu0 %v14042_v3  ;;  %v14376_v3 = vcombine.high %v8799_v52, %v8803_v25  ;;  %v8644_v20 = vld [vmem:[#allocation14 + $0x8f8] sm:$0xff]  ;;  %v8763_v52 = vld [vmem:[#allocation14 + $0xcb0] sm:$0xff] }
 0x6ef   :  { %v8632_v25 = vld [vmem:[#allocation14 + $0x898] sm:$0xff] }
 0x6f0   :  { %11861 = vmatpush2.bf16.msra.mxu1 %v14167_v50  ;;  %v8664_v50 = vld [vmem:[#allocation14 + $0x998] sm:$0xff] }
 0x6f1   :  { %11984 = vmatpush2.bf16.msra.mxu0 %v14041_v36  ;;  %11862 = vmatprep.subr.bf16.mxu1 %v14160_v15  ;;  %v8668_v36 = vld [vmem:[#allocation14 + $0x9b8] sm:$0xff]  ;;  %v14249_v15 = vcombine.low %v8672_v4, %v8676_v21 }
 0x6f2   :  { %11985 = vmatprep.subr.bf16.mxu0 %v14034_v14  ;;  %v14368_v14 = vcombine.high %v8791_v27, %v8795_v46  ;;  %v14241_v62 = vcombine.low %v8664_v50, %v8668_v36  ;;  %v8636_v4 = vld [vmem:[#allocation14 + $0x8b8] sm:$0xff]  ;;  %v8755_v27 = vld [vmem:[#allocation14 + $0xc70] sm:$0xff] }
 0x6f3   :  { %v8624_v46 = vld [vmem:[#allocation14 + $0x858] sm:$0xff] }
 0x6f4   :  { %11863 = vmatpush2.bf16.msra.mxu1 %v14159_v60  ;;  %v14242_v60 = vcombine.high %v8664_v50, %v8668_v36  ;;  %v14209_v36 = vcombine.low %v8632_v25, %v8636_v4 }
 0x6f5   :  { %11986 = vmatpush2.bf16.msra.mxu0 %v14033_v13  ;;  %11864 = vmatprep.subr.bf16.mxu1 %v14152_v18  ;;  %v8656_v13 = vld [vmem:[#allocation14 + $0x958] sm:$0xff] }
 0x6f6   :  { %11987 = vmatprep.subr.bf16.mxu0 %v14026_v22  ;;  %v8660_v18 = vld [vmem:[#allocation14 + $0x978] sm:$0xff] }
 0x6f8   :  { %11865 = vmatpush2.bf16.msra.mxu1 %v14151_v55  ;;  %v14360_v55 = vcombine.high %v8783_v8, %v8787_v41  ;;  %v8743_v8 = vld [vmem:[#allocation14 + $0xc10] sm:$0xff] }
 0x6f9   :  { %11988 = vmatpush2.bf16.msra.mxu0 %v14025_v35  ;;  %11866 = vmatprep.subr.bf16.mxu1 %v14144_v30  ;;  %v14234_v35 = vcombine.high %v8656_v13, %v8660_v18  ;;  %v8775_v30 = vld [vmem:[#allocation14 + $0xd10] sm:$0xff] }
 0x6fa   :  { %11989 = vmatprep.subr.bf16.mxu0 %v14018_v39  ;;  %v8747_v41 = vld [vmem:[#allocation14 + $0xc30] sm:$0xff] }
 0x6fc   :  { %11867 = vmatpush2.bf16.msra.mxu1 %v14143_v0 }
 0x6fd   :  { %11990 = vmatpush2.bf16.msra.mxu0 %v14017_v49  ;;  %11868 = vmatprep.subr.bf16.mxu1 %v14136_v54  ;;  %v14233_v49 = vcombine.low %v8656_v13, %v8660_v18 }
 0x6fe   :  { %11991 = vmatprep.subr.bf16.mxu0 %v14010_v34  ;;  %v14226_v34 = vcombine.high %v8648_v33, %v8652_v16 }
 0x700   :  { %11869 = vmatpush2.bf16.msra.mxu1 %v14135_v43  ;;  %v14225_v43 = vcombine.low %v8648_v33, %v8652_v16 }
 0x701   :  { %11992 = vmatpush2.bf16.msra.mxu0 %v14009_v2  ;;  %11870 = vmatprep.subr.bf16.mxu1 %v14128_v51  ;;  %v14218_v51 = vcombine.high %v8640_v56, %v8644_v20 }
 0x702   :  { %11993 = vmatprep.subr.bf16.mxu0 %v14002_v37  ;;  %v8759_v37 = vld [vmem:[#allocation14 + $0xc90] sm:$0xff] }
 0x703   :  { %v14335_v50 = vcombine.low %v8759_v37, %v8763_v52 }
 0x704   :  { %11871 = vmatpush2.bf16.msra.mxu1 %v14127_v48  ;;  %v14217_v48 = vcombine.low %v8640_v56, %v8644_v20  ;;  %v8847_v56 = vld [vmem:[#allocation14 + $0xf50] sm:$0xff] }
 0x705   :  { %11994 = vmatpush2.bf16.msra.mxu0 %v14001_v26  ;;  %11922 = vmatprep.subr.bf16.mxu1 %v14376_v3  ;;  %v14336_v26 = vcombine.high %v8759_v37, %v8763_v52  ;;  %v14210_v3 = vcombine.high %v8632_v25, %v8636_v4  ;;  %v8851_v20 = vld [vmem:[#allocation14 + $0xf70] sm:$0xff] }
 0x706   :  { %12045 = vmatprep.subr.bf16.mxu0 %v14250_v5  ;;  %v8751_v5 = vld [vmem:[#allocation14 + $0xc50] sm:$0xff]  ;;  %v14424_v37 = vcombine.high %v8847_v56, %v8851_v20 }
 0x707   :  { %v15472_v28 = vpop.f32.mrf.mxu0  ;;  %11873 = vmatmul.mubr.bf16.vlgmr.msra.gmra.mxu1 %v15402_v7  ;;  %v11628_v9 = vpop.f32.mrf.mxu1  ;;  %v14327_v13 = vcombine.low %v8751_v5, %v8755_v27  ;;  %v8839_v25 = vld [vmem:[#allocation14 + $0xf10] sm:$0xff] }
 0x708   :  { %11996 = vmatmul.mubr.bf16.vlgmr.msra.gmra.mxu0 %v15369_v1  ;;  %v15477_v22 = vadd.f32 %v11628_v9, %v15458_v58  ;;  %11923 = vmatpush1.bf16.msra.mxu1 %v14375_v24  ;;  %v8779_v1 = vld [vmem:[#allocation14 + $0xd30] sm:$0xff]  ;;  %v8628_v24 = vld [vmem:[#allocation14 + $0x878] sm:$0xff] }
 0x709   :  { %11954 = vmatprep.mubr.bf16.mxu1 %v15440_v12  ;;  %12046 = vmatpush1.bf16.msra.mxu0 %v14249_v15  ;;  %v15480_v44 = vpop.f32.mrf.mxu0  ;;  %v15482_v45 = vpop.f32.mrf.mxu1  ;;  %v14352_v54 = vcombine.high %v8775_v30, %v8779_v1  ;;  %v14351_v59 = vcombine.low %v8775_v30, %v8779_v1  ;;  %v14328_v15 = vcombine.high %v8751_v5, %v8755_v27  ;;  %v8616_v9 = vld [vmem:[#allocation14 + $0x818] sm:$0xff]  ;;  %v8843_v4 = vld [vmem:[#allocation14 + $0xf30] sm:$0xff] }
 0x70a   :  { %12077 = vmatprep.mubr.bf16.mxu0 %v15407_v40  ;;  %11924 = vmatprep.subr.bf16.mxu1 %v14368_v14  ;;  %v8767_v40 = vld [vmem:[#allocation14 + $0xcd0] sm:$0xff]  ;;  %v14202_v14 = vcombine.high %v8624_v46, %v8628_v24  ;;  %v14201_v18 = vcombine.low %v8624_v46, %v8628_v24  ;;  %v8736_v30 = vld [vmem:[#allocation14 + $0xbd8] sm:$0xff]  ;;  %v14416_v5 = vcombine.high %v8839_v25, %v8843_v4 }
 0x70b   :  { %v11755_v39 = vpop.f32.mrf.mxu0  ;;  %12047 = vmatprep.subr.bf16.mxu0 %v14242_v60  ;;  %v11632_v58 = vpop.f32.mrf.mxu1  ;;  %v14344_v2 = vcombine.high %v8767_v40, %v8771_v47  ;;  %v14343_v21 = vcombine.low %v8767_v40, %v8771_v47  ;;  %v8620_v60 = vld [vmem:[#allocation14 + $0x838] sm:$0xff]  ;;  %v8831_v46 = vld [vmem:[#allocation14 + $0xed0] sm:$0xff] }
 0x70c   :  { %11925 = vmatpush1.bf16.msra.mxu1 %v14367_v31  ;;  %v14320_v31 = vcombine.high %v8743_v8, %v8747_v41  ;;  %v8740_v1 = vld [vmem:[#allocation14 + $0xbf8] sm:$0xff]  ;;  %v14319_v39 = vcombine.low %v8743_v8, %v8747_v41  ;;  %v14193_v58 = vcombine.low %v8616_v9, %v8620_v60  ;;  %v8835_v24 = vld [vmem:[#allocation14 + $0xef0] sm:$0xff] }
 0x70d   :  { %12048 = vmatpush1.bf16.msra.mxu0 %v14241_v62  ;;  %v11756_v53 = vpop.f32.mrf.mxu0  ;;  %v11633_v0 = vpop.f32.mrf.mxu1  ;;  %11926 = vmatprep.subr.bf16.mxu1 %v14360_v55  ;;  %v14194_v62 = vcombine.high %v8616_v9, %v8620_v60  ;;  %v8863_v55 = vld [vmem:[#allocation14 + $0xfd0] sm:$0xff]  ;;  %v14314_v16 = vcombine.high %v8736_v30, %v8740_v1  ;;  %v14408_v8 = vcombine.high %v8831_v46, %v8835_v24 }
 0x70e   :  { %12049 = vmatprep.subr.bf16.mxu0 %v14234_v35  ;;  %v8867_v35 = vld [vmem:[#allocation14 + $0xff0] sm:$0xff]  ;;  %v8728_v0 = vld [vmem:[#allocation14 + $0xb98] sm:$0xff] }
 0x70f   :  { %v14440_v33 = vcombine.high %v8863_v55, %v8867_v35  ;;  %v8859_v53 = vld [vmem:[#allocation14 + $0xfb0] sm:$0xff] }
 0x710   :  { %11927 = vmatpush1.bf16.msra.mxu1 %v14359_v10  ;;  %v8855_v10 = vld [vmem:[#allocation14 + $0xf90] sm:$0xff] }
 0x711   :  { %12050 = vmatpush1.bf16.msra.mxu0 %v14233_v49  ;;  %11928 = vmatprep.subr.bf16.mxu1 %v14352_v54  ;;  %v8732_v49 = vld [vmem:[#allocation14 + $0xbb8] sm:$0xff]  ;;  %v14439_v54 = vcombine.low %v8863_v55, %v8867_v35  ;;  %v14432_v40 = vcombine.high %v8855_v10, %v8859_v53  ;;  %v8823_v9 = vld [vmem:[#allocation14 + $0xe90] sm:$0xff] }
 0x712   :  { %12051 = vmatprep.subr.bf16.mxu0 %v14226_v34  ;;  %v14313_v34 = vcombine.low %v8736_v30, %v8740_v1  ;;  %v14306_v47 = vcombine.high %v8728_v0, %v8732_v49  ;;  %v8827_v60 = vld [vmem:[#allocation14 + $0xeb0] sm:$0xff] }
 0x713   :  { %v14400_v55 = vcombine.high %v8823_v9, %v8827_v60  ;;  %v8815_v30 = vld [vmem:[#allocation14 + $0xe50] sm:$0xff] }
 0x714   :  { %11929 = vmatpush1.bf16.msra.mxu1 %v14351_v59  ;;  %v8720_v59 = vld [vmem:[#allocation14 + $0xb58] sm:$0xff]  ;;  %v8819_v1 = vld [vmem:[#allocation14 + $0xe70] sm:$0xff] }
 0x715   :  { %12052 = vmatpush1.bf16.msra.mxu0 %v14225_v43  ;;  %11930 = vmatprep.subr.bf16.mxu1 %v14344_v2  ;;  %v8724_v43 = vld [vmem:[#allocation14 + $0xb78] sm:$0xff]  ;;  %v14431_v2 = vcombine.low %v8855_v10, %v8859_v53  ;;  %v14392_v10 = vcombine.high %v8815_v30, %v8819_v1 }
 0x716   :  { %12053 = vmatprep.subr.bf16.mxu0 %v14218_v51  ;;  %v14305_v51 = vcombine.low %v8728_v0, %v8732_v49  ;;  %v14298_v52 = vcombine.high %v8720_v59, %v8724_v43  ;;  %v8807_v0 = vld [vmem:[#allocation14 + $0xe10] sm:$0xff] }
 0x717   :  { %v8811_v49 = vld [vmem:[#allocation14 + $0xe30] sm:$0xff] }
 0x718   :  { %11931 = vmatpush1.bf16.msra.mxu1 %v14343_v21  ;;  %v8712_v21 = vld [vmem:[#allocation14 + $0xb18] sm:$0xff] }
 0x719   :  { %12054 = vmatpush1.bf16.msra.mxu0 %v14217_v48  ;;  %11932 = vmatprep.subr.bf16.mxu1 %v14336_v26  ;;  %v8716_v48 = vld [vmem:[#allocation14 + $0xb38] sm:$0xff]  ;;  %v14423_v26 = vcombine.low %v8847_v56, %v8851_v20  ;;  %v14384_v56 = vcombine.high %v8807_v0, %v8811_v49 }
 0x71a   :  { %12055 = vmatprep.subr.bf16.mxu0 %v14210_v3  ;;  %v14297_v3 = vcombine.low %v8720_v59, %v8724_v43  ;;  %v14290_v27 = vcombine.high %v8712_v21, %v8716_v48  ;;  %v8544_v59 = vld [vmem:[#allocation14 + $0x5d8] sm:$0xff] }
 0x71b   :  { %v8548_v43 = vld [vmem:[#allocation14 + $0x5f8] sm:$0xff] }
 0x71c   :  { %11933 = vmatpush1.bf16.msra.mxu1 %v14335_v50  ;;  %v8704_v50 = vld [vmem:[#allocation14 + $0xad8] sm:$0xff] }
 0x71d   :  { %12056 = vmatpush1.bf16.msra.mxu0 %v14209_v36  ;;  %11934 = vmatprep.subr.bf16.mxu1 %v14328_v15  ;;  %v8708_v36 = vld [vmem:[#allocation14 + $0xaf8] sm:$0xff]  ;;  %v14415_v15 = vcombine.low %v8839_v25, %v8843_v4  ;;  %v15487_v25 = vld [vmem:[#allocation16] sm:$0xff] }
 0x71e   :  { %12057 = vmatprep.subr.bf16.mxu0 %v14202_v14  ;;  %v14289_v14 = vcombine.low %v8712_v21, %v8716_v48  ;;  %v14282_v41 = vcombine.high %v8704_v50, %v8708_v36  ;;  %v8882_v4 = vrot.slane %v15487_v25, %v15092_v17  ;;  %v14613_v21 = vld [vmem:[#allocation17 + $0x78] sm:$0xff]   ;;  %v8886_v48 = vrot.slane %v15487_v25, %v15098_v19  ;;  %v14615_v19 = vld [vmem:[#allocation17 + $0x70] sm:$0xff]  }
 0x720   :  { %11935 = vmatpush1.bf16.msra.mxu1 %v14327_v13  ;;  %v8696_v13 = vld [vmem:[#allocation14 + $0xa98] sm:$0xff]  ;;  %v11672_v17 = vadd.f32 %v15469_v11, %v8886_v48 }
 0x721   :  { %12058 = vmatpush1.bf16.msra.mxu0 %v14201_v18  ;;  %11936 = vmatprep.subr.bf16.mxu1 %v14320_v31  ;;  %v8700_v18 = vld [vmem:[#allocation14 + $0xab8] sm:$0xff]  ;;  %v14407_v31 = vcombine.low %v8831_v46, %v8835_v24 }
 0x722   :  { %12059 = vmatprep.subr.bf16.mxu0 %v14194_v62  ;;  %v14281_v62 = vcombine.low %v8704_v50, %v8708_v36  ;;  %v14274_v35 = vcombine.high %v8696_v13, %v8700_v18  ;;  %v8528_v24 = vld [vmem:[#allocation14 + $0x558] sm:$0xff] }
 0x723   :  { %v8532_v50 = vld [vmem:[#allocation14 + $0x578] sm:$0xff] }
 0x724   :  { %11937 = vmatpush1.bf16.msra.mxu1 %v14319_v39  ;;  %v8688_v39 = vld [vmem:[#allocation14 + $0xa58] sm:$0xff] }
 0x725   :  { %12060 = vmatpush1.bf16.msra.mxu0 %v14193_v58  ;;  %11938 = vmatprep.subr.bf16.mxu1 %v14440_v33  ;;  %v8692_v58 = vld [vmem:[#allocation14 + $0xa78] sm:$0xff]  ;;  %v14399_v33 = vcombine.low %v8823_v9, %v8827_v60  ;;  %v14106_v60 = vcombine.high %v8528_v24, %v8532_v50 }
 0x726   :  { %12061 = vmatprep.subr.bf16.mxu0 %v14314_v16  ;;  %v14273_v16 = vcombine.low %v8696_v13, %v8700_v18  ;;  %v14266_v53 = vcombine.high %v8688_v39, %v8692_v58  ;;  %v14616_v11 = vld [vmem:[#allocation17 + $0x30] sm:$0xff]   ;;  %v14617_v18 = vld [vmem:[#allocation17 + $0x68] sm:$0xff]  }
 0x728   :  { %11939 = vmatpush2.bf16.msra.mxu1 %v14439_v54  ;;  %v8680_v54 = vld [vmem:[#allocation14 + $0xa18] sm:$0xff] }
 0x729   :  { %12062 = vmatpush2.bf16.msra.mxu0 %v14313_v34  ;;  %11940 = vmatprep.subr.bf16.mxu1 %v14432_v40  ;;  %v8684_v34 = vld [vmem:[#allocation14 + $0xa38] sm:$0xff]  ;;  %v14391_v40 = vcombine.low %v8815_v30, %v8819_v1  ;;  %v14618_v1 = vld [vmem:[#allocation17 + $0x28] sm:$0xff]  }
 0x72a   :  { %12063 = vmatprep.subr.bf16.mxu0 %v14306_v47  ;;  %v14265_v47 = vcombine.low %v8688_v39, %v8692_v58  ;;  %v14258_v20 = vcombine.high %v8680_v54, %v8684_v34  ;;  %v14619_v58 = vld [vmem:[#allocation17 + $0x60] sm:$0xff]  }
 0x72c   :  { %11941 = vmatpush2.bf16.msra.mxu1 %v14431_v2  ;;  %v11631_v2 = vadd.f32 %v15482_v45, %v15462_v57  ;;  %v14121_v57 = vcombine.low %v8544_v59, %v8548_v43  ;;  %v14614_v45 = vld [vmem:[#allocation17 + $0x38] sm:$0xff]  }
 0x72d   :  { %12064 = vmatpush2.bf16.msra.mxu0 %v14305_v51  ;;  %11942 = vmatprep.subr.bf16.mxu1 %v14424_v37  ;;  %v14383_v51 = vcombine.low %v8807_v0, %v8811_v49  ;;  %v14257_v37 = vcombine.low %v8680_v54, %v8684_v34  ;;  %v14621_v49 = vld [vmem:[#allocation17 + $0x58] sm:$0xff]   ;;  %v8504_v54 = vld [vmem:[#allocation14 + $0x498] sm:$0xff] }
 0x72e   :  { %12065 = vmatprep.subr.bf16.mxu0 %v14298_v52  ;;  %v14122_v52 = vcombine.high %v8544_v59, %v8548_v43  ;;  %v8508_v34 = vld [vmem:[#allocation14 + $0x4b8] sm:$0xff] }
 0x72f   :  { %v8496_v59 = vld [vmem:[#allocation14 + $0x458] sm:$0xff] }
 0x730   :  { %11943 = vmatpush2.bf16.msra.mxu1 %v14423_v26  ;;  %v8536_v26 = vld [vmem:[#allocation14 + $0x598] sm:$0xff] }
 0x731   :  { %12066 = vmatpush2.bf16.msra.mxu0 %v14297_v3  ;;  %11944 = vmatprep.subr.bf16.mxu1 %v14416_v5  ;;  %v8540_v3 = vld [vmem:[#allocation14 + $0x5b8] sm:$0xff]  ;;  %v12128_v5 = vmax.f32 %v11631_v2, 0.0  ;;  %v14081_v2 = vcombine.low %v8504_v54, %v8508_v34 }
 0x732   :  { %12067 = vmatprep.subr.bf16.mxu0 %v14290_v27  ;;  %v11670_v27 = vadd.f32 %v15464_v38, %v8882_v4  ;;  %v14114_v46 = vcombine.high %v8536_v26, %v8540_v3  ;;  %v8500_v43 = vld [vmem:[#allocation14 + $0x478] sm:$0xff] }
 0x733   :  { %v8488_v4 = vld [vmem:[#allocation14 + $0x418] sm:$0xff]  ;;  %v14073_v48 = vcombine.low %v8496_v59, %v8500_v43 }
 0x734   :  { %11945 = vmatpush2.bf16.msra.mxu1 %v14415_v15 }
 0x735   :  { %12068 = vmatpush2.bf16.msra.mxu0 %v14289_v14  ;;  %11946 = vmatprep.subr.bf16.mxu1 %v14408_v8  ;;  %v12136_v14 = vpack.c.bf16 %v12128_v5, %v12128_v5  ;;  %v14627_v5 = vld [vmem:[#allocation17 + $0x40] sm:$0xff]  }
 0x736   :  { %12069 = vmatprep.subr.bf16.mxu0 %v14282_v41  ;;  %v14113_v41 = vcombine.low %v8536_v26, %v8540_v3  ;;  %v14626_v26 = vld [vmem:[#allocation17 + $0x8] sm:$0xff]  }
 0x738   :  { %11947 = vmatpush2.bf16.msra.mxu1 %v14407_v31  ;;  %v8520_v31 = vld [vmem:[#allocation14 + $0x518] sm:$0xff] }
 0x739   :  { %12070 = vmatpush2.bf16.msra.mxu0 %v14281_v62  ;;  %11948 = vmatprep.subr.bf16.mxu1 %v14400_v55  ;;  %v8524_v62 = vld [vmem:[#allocation14 + $0x538] sm:$0xff] }
 0x73a   :  { %12071 = vmatprep.subr.bf16.mxu0 %v14274_v35  ;;  %v14098_v39 = vcombine.high %v8520_v31, %v8524_v62 }
 0x73c   :  { %11949 = vmatpush2.bf16.msra.mxu1 %v14399_v33  ;;  %v8512_v33 = vld [vmem:[#allocation14 + $0x4d8] sm:$0xff] }
 0x73d   :  { %12072 = vmatpush2.bf16.msra.mxu0 %v14273_v16  ;;  %11950 = vmatprep.subr.bf16.mxu1 %v14392_v10  ;;  %v8516_v16 = vld [vmem:[#allocation14 + $0x4f8] sm:$0xff]  ;;  %v14097_v10 = vcombine.low %v8520_v31, %v8524_v62 }
 0x73e   :  { %12073 = vmatprep.subr.bf16.mxu0 %v14266_v53  ;;  %v14620_v53 = vld [vmem:[#allocation17 + $0x20] sm:$0xff]   ;;  %v14090_v0 = vcombine.high %v8512_v33, %v8516_v16  ;;  %v14647_v31 = vld [vmem:[#allocation17 + $0x170] sm:$0xff]  }
 0x740   :  { %11951 = vmatpush2.bf16.msra.mxu1 %v14391_v40  ;;  %v14089_v40 = vcombine.low %v8512_v33, %v8516_v16  ;;  %v14650_v33 = vld [vmem:[#allocation17 + $0x128] sm:$0xff]   ;;  %v14651_v16 = vld [vmem:[#allocation17 + $0x160] sm:$0xff]  }
 0x741   :  { %12074 = vmatpush2.bf16.msra.mxu0 %v14265_v47  ;;  %11952 = vmatprep.subr.bf16.mxu1 %v14384_v56  ;;  %v14622_v47 = vld [vmem:[#allocation17 + $0x18] sm:$0xff]   ;;  %v14082_v56 = vcombine.high %v8504_v54, %v8508_v34  ;;  %v14652_v54 = vld [vmem:[#allocation17 + $0x120] sm:$0xff]  }
 0x742   :  { %12075 = vmatprep.subr.bf16.mxu0 %v14258_v20  ;;  %v14623_v20 = vld [vmem:[#allocation17 + $0x50] sm:$0xff]   ;;  %v14653_v34 = vld [vmem:[#allocation17 + $0x158] sm:$0xff]  }
 0x744   :  { %11953 = vmatpush2.bf16.msra.mxu1 %v14383_v51  ;;  %v14624_v51 = vld [vmem:[#allocation17 + $0x10] sm:$0xff]  }
 0x745   :  { %12076 = vmatpush2.bf16.msra.mxu0 %v14257_v37  ;;  %12004 = vmatprep.subr.bf16.mxu1 %v14122_v52  ;;  %v14074_v37 = vcombine.high %v8496_v59, %v8500_v43  ;;  %v14625_v52 = vld [vmem:[#allocation17 + $0x48] sm:$0xff]   ;;  %v14654_v59 = vld [vmem:[#allocation17 + $0x118] sm:$0xff]   ;;  %v14655_v43 = vld [vmem:[#allocation17 + $0x150] sm:$0xff]  }
 0x746   :  { %14508 = vmatprep.subr.bf16.mxu0 %v14613_v21  ;;  %v8492_v21 = vld [vmem:[#allocation14 + $0x438] sm:$0xff] }
 0x747   :  { %v11710_v36 = vpop.f32.mrf.mxu1  ;;  %v15495_v15 = vpop.f32.mrf.mxu0  ;;  %11955 = vmatmul.mubr.bf16.vlgmr.msra.gmra.mxu1 %v15442_v23  ;;  %v14066_v3 = vcombine.high %v8488_v4, %v8492_v21 }
 0x748   :  { %v15498_v8 = vadd.f32 %v11710_v36, %v11670_v27  ;;  %12078 = vmatmul.mubr.bf16.vlgmr.msra.gmra.mxu0 %v15415_v6  ;;  %12005 = vmatpush1.bf16.msra.mxu1 %v14121_v57  ;;  %v14105_v6 = vcombine.low %v8528_v24, %v8532_v50  ;;  %v8608_v57 = vld [vmem:[#allocation14 + $0x7d8] sm:$0xff]  ;;  %v14065_v27 = vcombine.low %v8488_v4, %v8492_v21  ;;  %v12127_v50 = vmax.f32 %v15477_v22, 0.0 }
 0x749   :  { %12036 = vmatprep.mubr.bf16.mxu1 %v15381_v42  ;;  %14509 = vmatpush3.bf16.msra.mxu0 %v14614_v45  ;;  %v11712_v38 = vpop.f32.mrf.mxu1  ;;  %v15502_v9 = vpop.f32.mrf.mxu0  ;;  %v8612_v45 = vld [vmem:[#allocation14 + $0x7f8] sm:$0xff] }
 0x74a   :  { %12694 = vmatprep.mubr.bf16.mxu0 %v12136_v14  ;;  %v15504_v13 = vadd.f32 %v11712_v38, %v11672_v17  ;;  %12006 = vmatprep.subr.bf16.mxu1 %v14114_v46  ;;  %v14628_v46 = vld [vmem:[#allocation17] sm:$0xff]   ;;  %v14186_v24 = vcombine.high %v8608_v57, %v8612_v45  ;;  %v8600_v17 = vld [vmem:[#allocation14 + $0x798] sm:$0xff] }
 0x74b   :  { %v11714_v55 = vpop.f32.mrf.mxu1  ;;  %v11837_v35 = vpop.f32.mrf.mxu0  ;;  %14510 = vmatprep.subr.bf16.mxu0 %v14615_v19  ;;  %v8604_v36 = vld [vmem:[#allocation14 + $0x7b8] sm:$0xff]  ;;  %v14185_v19 = vcombine.low %v8608_v57, %v8612_v45 }
 0x74c   :  { %12007 = vmatpush1.bf16.msra.mxu1 %v14113_v41  ;;  %v14178_v14 = vcombine.high %v8600_v17, %v8604_v36  ;;  %v12135_v41 = vpack.c.bf16 %v12127_v50, %v12127_v50  ;;  %v8592_v38 = vld [vmem:[#allocation14 + $0x758] sm:$0xff]  ;;  %v14177_v62 = vcombine.low %v8600_v17, %v8604_v36  ;;  %v11752_v50 = vadd.f32 %v15472_v28, %v15498_v8 }
 0x74d   :  { %14511 = vmatpush3.bf16.msra.mxu0 %v14616_v11  ;;  %v11715_v42 = vpop.f32.mrf.mxu1  ;;  %v11838_v30 = vpop.f32.mrf.mxu0  ;;  %12008 = vmatprep.subr.bf16.mxu1 %v14106_v60  ;;  %v8596_v11 = vld [vmem:[#allocation14 + $0x778] sm:$0xff]  ;;  %v14645_v60 = vld [vmem:[#allocation17 + $0x178] sm:$0xff]  }
 0x74e   :  { %14512 = vmatprep.subr.bf16.mxu0 %v14617_v18  ;;  %v14646_v18 = vld [vmem:[#allocation17 + $0x138] sm:$0xff]   ;;  %v14170_v55 = vcombine.high %v8592_v38, %v8596_v11  ;;  %v8584_v22 = vld [vmem:[#allocation14 + $0x718] sm:$0xff]  ;;  %v14649_v42 = vld [vmem:[#allocation17 + $0x168] sm:$0xff]   ;;  %v14169_v30 = vcombine.low %v8592_v38, %v8596_v11 }
 0x74f   :  { %v8588_v35 = vld [vmem:[#allocation14 + $0x738] sm:$0xff] }
 0x750   :  { %12009 = vmatpush1.bf16.msra.mxu1 %v14105_v6  ;;  %v14648_v6 = vld [vmem:[#allocation17 + $0x130] sm:$0xff]  }
 0x751   :  { %14513 = vmatpush3.bf16.msra.mxu0 %v14618_v1  ;;  %12010 = vmatprep.subr.bf16.mxu1 %v14098_v39  ;;  %v14162_v1 = vcombine.high %v8584_v22, %v8588_v35  ;;  %v8576_v39 = vld [vmem:[#allocation14 + $0x6d8] sm:$0xff] }
 0x752   :  { %14514 = vmatprep.subr.bf16.mxu0 %v14619_v58  ;;  %v8580_v58 = vld [vmem:[#allocation14 + $0x6f8] sm:$0xff] }
 0x753   :  { %v14656_v4 = vld [vmem:[#allocation17 + $0x110] sm:$0xff]  }
 0x754   :  { %12011 = vmatpush1.bf16.msra.mxu1 %v14097_v10  ;;  %v14161_v10 = vcombine.low %v8584_v22, %v8588_v35  ;;  %v8792_v45 = vld [vmem:[#allocation14 + $0xd98] sm:$0xff] }
 0x755   :  { %14515 = vmatpush3.bf16.msra.mxu0 %v14620_v53  ;;  %12012 = vmatprep.subr.bf16.mxu1 %v14090_v0  ;;  %v14154_v53 = vcombine.high %v8576_v39, %v8580_v58  ;;  %v8568_v0 = vld [vmem:[#allocation14 + $0x698] sm:$0xff] }
 0x756   :  { %14516 = vmatprep.subr.bf16.mxu0 %v14621_v49  ;;  %v8572_v49 = vld [vmem:[#allocation14 + $0x6b8] sm:$0xff] }
 0x757   :  { %v8784_v17 = vld [vmem:[#allocation14 + $0xd58] sm:$0xff] }
 0x758   :  { %12013 = vmatpush1.bf16.msra.mxu1 %v14089_v40  ;;  %v14153_v40 = vcombine.low %v8576_v39, %v8580_v58  ;;  %v8788_v36 = vld [vmem:[#allocation14 + $0xd78] sm:$0xff]  ;;  %v14660_v39 = vld [vmem:[#allocation17 + $0x100] sm:$0xff]  }
 0x759   :  { %14517 = vmatpush3.bf16.msra.mxu0 %v14622_v47  ;;  %12014 = vmatprep.subr.bf16.mxu1 %v14082_v56  ;;  %v14146_v47 = vcombine.high %v8568_v0, %v8572_v49  ;;  %v8560_v56 = vld [vmem:[#allocation14 + $0x658] sm:$0xff]  ;;  %v14361_v22 = vcombine.low %v8784_v17, %v8788_v36 }
 0x75a   :  { %14518 = vmatprep.subr.bf16.mxu0 %v14623_v20  ;;  %v8564_v20 = vld [vmem:[#allocation14 + $0x678] sm:$0xff] }
 0x75b   :  { %v14137_v21 = vcombine.low %v8560_v56, %v8564_v20  ;;  %v8776_v28 = vld [vmem:[#allocation14 + $0xd18] sm:$0xff] }
 0x75c   :  { %12015 = vmatpush1.bf16.msra.mxu1 %v14081_v2  ;;  %v14145_v2 = vcombine.low %v8568_v0, %v8572_v49  ;;  %v8780_v8 = vld [vmem:[#allocation14 + $0xd38] sm:$0xff] }
 0x75d   :  { %14519 = vmatpush3.bf16.msra.mxu0 %v14624_v51  ;;  %12016 = vmatprep.subr.bf16.mxu1 %v14074_v37  ;;  %v14138_v51 = vcombine.high %v8560_v56, %v8564_v20  ;;  %v8552_v37 = vld [vmem:[#allocation14 + $0x618] sm:$0xff]  ;;  %v14353_v58 = vcombine.low %v8776_v28, %v8780_v8 }
 0x75e   :  { %14520 = vmatprep.subr.bf16.mxu0 %v14625_v52  ;;  %v8556_v52 = vld [vmem:[#allocation14 + $0x638] sm:$0xff] }
 0x75f   :  { %v8752_v49 = vld [vmem:[#allocation14 + $0xc58] sm:$0xff] }
 0x760   :  { %12017 = vmatpush1.bf16.msra.mxu1 %v14073_v48  ;;  %v14130_v48 = vcombine.high %v8552_v37, %v8556_v52  ;;  %v8748_v56 = vld [vmem:[#allocation14 + $0xc38] sm:$0xff] }
 0x761   :  { %14521 = vmatpush3.bf16.msra.mxu0 %v14626_v26  ;;  %12018 = vmatprep.subr.bf16.mxu1 %v14066_v3  ;;  %v8800_v26 = vld [vmem:[#allocation14 + $0xdd8] sm:$0xff] }
 0x762   :  { %14522 = vmatprep.subr.bf16.mxu0 %v14627_v5  ;;  %v8804_v3 = vld [vmem:[#allocation14 + $0xdf8] sm:$0xff]  ;;  %v14129_v5 = vcombine.low %v8552_v37, %v8556_v52 }
 0x763   :  { %v14378_v57 = vcombine.high %v8800_v26, %v8804_v3  ;;  %v8856_v52 = vld [vmem:[#allocation14 + $0xf98] sm:$0xff] }
 0x764   :  { %12019 = vmatpush1.bf16.msra.mxu1 %v14065_v27  ;;  %v8796_v27 = vld [vmem:[#allocation14 + $0xdb8] sm:$0xff] }
 0x765   :  { %14523 = vmatpush3.bf16.msra.mxu0 %v14628_v46  ;;  %12020 = vmatprep.subr.bf16.mxu1 %v14186_v24  ;;  %v14377_v46 = vcombine.low %v8800_v26, %v8804_v3  ;;  %v14370_v24 = vcombine.high %v8792_v45, %v8796_v27  ;;  %v14369_v38 = vcombine.low %v8792_v45, %v8796_v27  ;;  %v8848_v26 = vld [vmem:[#allocation14 + $0xf58] sm:$0xff] }
 0x766   :  { %14552 = vmatprep.subr.bf16.mxu0 %v14645_v60  ;;  %v14362_v60 = vcombine.high %v8784_v17, %v8788_v36  ;;  %v8852_v3 = vld [vmem:[#allocation14 + $0xf78] sm:$0xff] }
 0x767   :  { %v8840_v45 = vld [vmem:[#allocation14 + $0xf18] sm:$0xff] }
 0x768   :  { %12695 = vmatmul.mubr.bf16.vlgmr.msra.gmra.mxu0 %v12135_v41  ;;  %12021 = vmatpush2.bf16.msra.mxu1 %v14185_v19  ;;  %v8844_v27 = vld [vmem:[#allocation14 + $0xf38] sm:$0xff] }
 0x769   :  { %12022 = vmatprep.subr.bf16.mxu1 %v14178_v14  ;;  %14553 = vmatpush3.bf16.msra.mxu0 %v14646_v18  ;;  %v14657_v18 = vld [vmem:[#allocation17 + $0x148] sm:$0xff]   ;;  %v8836_v17 = vld [vmem:[#allocation14 + $0xef8] sm:$0xff]  ;;  %v14417_v36 = vcombine.low %v8840_v45, %v8844_v27 }
 0x76a   :  { %14554 = vmatprep.subr.bf16.mxu0 %v14647_v31 }
 0x76c   :  { %12023 = vmatpush2.bf16.msra.mxu1 %v14177_v62  ;;  %v14658_v62 = vld [vmem:[#allocation17 + $0x108] sm:$0xff]  }
 0x76d   :  { %12024 = vmatprep.subr.bf16.mxu1 %v14170_v55  ;;  %14555 = vmatpush3.bf16.msra.mxu0 %v14648_v6  ;;  %v14659_v6 = vld [vmem:[#allocation17 + $0x140] sm:$0xff]  }
 0x76e   :  { %14556 = vmatprep.subr.bf16.mxu0 %v14649_v42 }
 0x770   :  { %12025 = vmatpush2.bf16.msra.mxu1 %v14169_v30  ;;  %v8768_v30 = vld [vmem:[#allocation14 + $0xcd8] sm:$0xff] }
 0x771   :  { %12026 = vmatprep.subr.bf16.mxu1 %v14162_v1  ;;  %14557 = vmatpush3.bf16.msra.mxu0 %v14650_v33  ;;  %v8772_v1 = vld [vmem:[#allocation14 + $0xcf8] sm:$0xff] }
 0x772   :  { %14558 = vmatprep.subr.bf16.mxu0 %v14651_v16  ;;  %v14346_v33 = vcombine.high %v8768_v30, %v8772_v1  ;;  %v8760_v16 = vld [vmem:[#allocation14 + $0xc98] sm:$0xff] }
 0x774   :  { %12027 = vmatpush2.bf16.msra.mxu1 %v14161_v10  ;;  %v8764_v10 = vld [vmem:[#allocation14 + $0xcb8] sm:$0xff] }
 0x775   :  { %12028 = vmatprep.subr.bf16.mxu1 %v14154_v53  ;;  %14559 = vmatpush3.bf16.msra.mxu0 %v14652_v54  ;;  %v14345_v53 = vcombine.low %v8768_v30, %v8772_v1  ;;  %v14338_v0 = vcombine.high %v8760_v16, %v8764_v10  ;;  %v8756_v54 = vld [vmem:[#allocation14 + $0xc78] sm:$0xff] }
 0x776   :  { %14560 = vmatprep.subr.bf16.mxu0 %v14653_v34  ;;  %v14337_v34 = vcombine.low %v8760_v16, %v8764_v10  ;;  %v14329_v20 = vcombine.low %v8752_v49, %v8756_v54  ;;  %v8894_v16 = vrot.slane %v15487_v25, %v15127_v29  ;;  %v14630_v10 = vld [vmem:[#allocation17 + $0xb8] sm:$0xff]   ;;  %v14633_v29 = vld [vmem:[#allocation17 + $0xe8] sm:$0xff]  }
 0x778   :  { %12029 = vmatpush2.bf16.msra.mxu1 %v14153_v40  ;;  %v14330_v40 = vcombine.high %v8752_v49, %v8756_v54 }
 0x779   :  { %12030 = vmatprep.subr.bf16.mxu1 %v14146_v47  ;;  %14561 = vmatpush3.bf16.msra.mxu0 %v14654_v59  ;;  %v8744_v47 = vld [vmem:[#allocation14 + $0xc18] sm:$0xff] }
 0x77a   :  { %14562 = vmatprep.subr.bf16.mxu0 %v14655_v43  ;;  %v14322_v59 = vcombine.high %v8744_v47, %v8748_v56  ;;  %v8864_v43 = vld [vmem:[#allocation14 + $0xfd8] sm:$0xff] }
 0x77c   :  { %12031 = vmatpush2.bf16.msra.mxu1 %v14145_v2  ;;  %v8868_v2 = vld [vmem:[#allocation14 + $0xff8] sm:$0xff] }
 0x77d   :  { %12032 = vmatprep.subr.bf16.mxu1 %v14138_v51  ;;  %14563 = vmatpush3.bf16.msra.mxu0 %v14656_v4  ;;  %v14321_v51 = vcombine.low %v8744_v47, %v8748_v56  ;;  %v14442_v37 = vcombine.high %v8864_v43, %v8868_v2  ;;  %v8860_v4 = vld [vmem:[#allocation14 + $0xfb8] sm:$0xff] }
 0x77e   :  { %14564 = vmatprep.subr.bf16.mxu0 %v14657_v18 }
 0x780   :  { %12033 = vmatpush2.bf16.msra.mxu1 %v14137_v21  ;;  %v14441_v21 = vcombine.low %v8864_v43, %v8868_v2  ;;  %v14635_v43 = vld [vmem:[#allocation17 + $0xe0] sm:$0xff]  }
 0x781   :  { %12034 = vmatprep.subr.bf16.mxu1 %v14130_v48  ;;  %14565 = vmatpush3.bf16.msra.mxu0 %v14658_v62  ;;  %v14434_v48 = vcombine.high %v8856_v52, %v8860_v4  ;;  %v8820_v62 = vld [vmem:[#allocation14 + $0xe78] sm:$0xff] }
 0x782   :  { %14566 = vmatprep.subr.bf16.mxu0 %v14659_v6 }
 0x784   :  { %12035 = vmatpush2.bf16.msra.mxu1 %v14129_v5  ;;  %v14433_v5 = vcombine.low %v8856_v52, %v8860_v4  ;;  %v14638_v52 = vld [vmem:[#allocation17 + $0x98] sm:$0xff]   ;;  %v14639_v4 = vld [vmem:[#allocation17 + $0xd0] sm:$0xff]  }
 0x785   :  { %12086 = vmatprep.subr.bf16.mxu1 %v14378_v57  ;;  %14567 = vmatpush3.bf16.msra.mxu0 %v14660_v39  ;;  %v14426_v57 = vcombine.high %v8848_v26, %v8852_v3  ;;  %v14629_v39 = vld [vmem:[#allocation17 + $0xf8] sm:$0xff]  }
 0x787   :  { %v11792_v19 = vpop.f32.mrf.mxu1  ;;  %12037 = vmatmul.mubr.bf16.vlgmr.msra.gmra.mxu1 %v15402_v7 }
 0x788   :  { %v15510_v14 = vadd.f32 %v11792_v19, %v11752_v50  ;;  %v15512_v41 = vpop.f32.mrf.mxu0  ;;  %12087 = vmatpush1.bf16.msra.mxu1 %v14377_v46  ;;  %12118 = vmatprep.mubr.bf16.mxu1 %v15440_v12  ;;  %v14354_v12 = vcombine.high %v8776_v28, %v8780_v8  ;;  %v14425_v46 = vcombine.low %v8848_v26, %v8852_v3  ;;  %v8832_v50 = vld [vmem:[#allocation14 + $0xed8] sm:$0xff]  ;;  %v14644_v26 = vld [vmem:[#allocation17 + $0x80] sm:$0xff]  }
 0x789   :  { %v15515_v11 = vpop.f32.mrf.mxu1  ;;  %12088 = vmatprep.subr.bf16.mxu1 %v14370_v24  ;;  %v14418_v24 = vcombine.high %v8840_v45, %v8844_v27  ;;  %v14410_v19 = vcombine.high %v8832_v50, %v8836_v17  ;;  %v14409_v18 = vcombine.low %v8832_v50, %v8836_v17  ;;  %v8816_v8 = vld [vmem:[#allocation14 + $0xe58] sm:$0xff]  ;;  %v14666_v50 = vld [vmem:[#allocation17 + $0x1a8] sm:$0xff]   ;;  %v14667_v17 = vld [vmem:[#allocation17 + $0x1e0] sm:$0xff]  }
 0x78a   :  { %v15517_v31 = vpop.f32.mrf.mxu0  ;;  %v14393_v6 = vcombine.low %v8816_v8, %v8820_v62  ;;  %v12129_v3 = vmax.f32 %v15510_v14, 0.0  ;;  %v14663_v27 = vld [vmem:[#allocation17 + $0x1f0] sm:$0xff]   ;;  %v14669_v14 = vld [vmem:[#allocation17 + $0x1d8] sm:$0xff]  }
 0x78b   :  { %v11796_v55 = vpop.f32.mrf.mxu1 }
 0x78c   :  { %v11919_v7 = vpop.f32.mrf.mxu0  ;;  %12089 = vmatpush1.bf16.msra.mxu1 %v14369_v38  ;;  %v8824_v38 = vld [vmem:[#allocation14 + $0xe98] sm:$0xff]  ;;  %v12137_v45 = vpack.c.bf16 %v12129_v3, %v12129_v3 }
 0x78d   :  { %v11797_v35 = vpop.f32.mrf.mxu1  ;;  %12090 = vmatprep.subr.bf16.mxu1 %v14362_v60  ;;  %v8828_v60 = vld [vmem:[#allocation14 + $0xeb8] sm:$0xff]  ;;  %v14394_v7 = vcombine.high %v8816_v8, %v8820_v62 }
 0x78e   :  { %v11920_v42 = vpop.f32.mrf.mxu0  ;;  %v14402_v28 = vcombine.high %v8824_v38, %v8828_v60  ;;  %v14401_v55 = vcombine.low %v8824_v38, %v8828_v60  ;;  %v8812_v35 = vld [vmem:[#allocation14 + $0xe38] sm:$0xff] }
 0x78f   :  { %v14671_v38 = vld [vmem:[#allocation17 + $0x1d0] sm:$0xff]  }
 0x790   :  { %12091 = vmatpush1.bf16.msra.mxu1 %v14361_v22  ;;  %v8808_v22 = vld [vmem:[#allocation14 + $0xe18] sm:$0xff] }
 0x791   :  { %12092 = vmatprep.subr.bf16.mxu1 %v14354_v12  ;;  %v11754_v12 = vadd.f32 %v15480_v44, %v15504_v13  ;;  %v14386_v42 = vcombine.high %v8808_v22, %v8812_v35  ;;  %v14385_v1 = vcombine.low %v8808_v22, %v8812_v35  ;;  %v14631_v44 = vld [vmem:[#allocation17 + $0xf0] sm:$0xff]   ;;  %v14674_v35 = vld [vmem:[#allocation17 + $0x188] sm:$0xff]  }
 0x792   :  { %v14672_v60 = vld [vmem:[#allocation17 + $0x190] sm:$0xff]  }
 0x793   :  { %v11795_v30 = vadd.f32 %v15515_v11, %v11754_v12  ;;  %v11836_v11 = vadd.f32 %v15502_v9, %v8894_v16  ;;  %v14676_v16 = vld [vmem:[#allocation17 + $0x180] sm:$0xff]  }
 0x794   :  { %12093 = vmatpush1.bf16.msra.mxu1 %v14353_v58  ;;  %v8890_v58 = vrot.slane %v15487_v25, %v15150_v63  ;;  %v14632_v63 = vld [vmem:[#allocation17 + $0xb0] sm:$0xff]  }
 0x795   :  { %12094 = vmatprep.subr.bf16.mxu1 %v14346_v33  ;;  %v12130_v33 = vmax.f32 %v11795_v30, 0.0 }
 0x796   :  { %v11834_v13 = vadd.f32 %v15495_v15, %v8890_v58 }
 0x798   :  { %12095 = vmatpush1.bf16.msra.mxu1 %v14345_v53  ;;  %v12138_v53 = vpack.c.bf16 %v12130_v33, %v12130_v33 }
 0x799   :  { %12096 = vmatprep.subr.bf16.mxu1 %v14338_v0 }
 0x79c   :  { %12097 = vmatpush1.bf16.msra.mxu1 %v14337_v34 }
 0x79d   :  { %12098 = vmatprep.subr.bf16.mxu1 %v14330_v40 }
 0x7a0   :  { %12099 = vmatpush1.bf16.msra.mxu1 %v14329_v20 }
 0x7a1   :  { %12100 = vmatprep.subr.bf16.mxu1 %v14322_v59 }
 0x7a4   :  { %12101 = vmatpush1.bf16.msra.mxu1 %v14321_v51  ;;  %v14636_v51 = vld [vmem:[#allocation17 + $0xa0] sm:$0xff]  }
 0x7a5   :  { %12102 = vmatprep.subr.bf16.mxu1 %v14442_v37  ;;  %v14637_v37 = vld [vmem:[#allocation17 + $0xd8] sm:$0xff]  }
 0x7a8   :  { %12103 = vmatpush2.bf16.msra.mxu1 %v14441_v21  ;;  %v14641_v21 = vld [vmem:[#allocation17 + $0xc8] sm:$0xff]  }
 0x7a9   :  { %12104 = vmatprep.subr.bf16.mxu1 %v14434_v48  ;;  %v14642_v48 = vld [vmem:[#allocation17 + $0x88] sm:$0xff]  }
 0x7ac   :  { %12105 = vmatpush2.bf16.msra.mxu1 %v14433_v5  ;;  %v14661_v5 = vld [vmem:[#allocation17 + $0x1f8] sm:$0xff]  }
 0x7ad   :  { %12106 = vmatprep.subr.bf16.mxu1 %v14426_v57  ;;  %v14662_v57 = vld [vmem:[#allocation17 + $0x1b8] sm:$0xff]  }
 0x7b0   :  { %12107 = vmatpush2.bf16.msra.mxu1 %v14425_v46  ;;  %v14664_v46 = vld [vmem:[#allocation17 + $0x1b0] sm:$0xff]  }
 0x7b1   :  { %12108 = vmatprep.subr.bf16.mxu1 %v14418_v24  ;;  %v14665_v24 = vld [vmem:[#allocation17 + $0x1e8] sm:$0xff]  }
 0x7b4   :  { %12109 = vmatpush2.bf16.msra.mxu1 %v14417_v36  ;;  %v14668_v36 = vld [vmem:[#allocation17 + $0x1a0] sm:$0xff]  }
 0x7b5   :  { %12110 = vmatprep.subr.bf16.mxu1 %v14410_v19  ;;  %v14670_v19 = vld [vmem:[#allocation17 + $0x198] sm:$0xff]  }
 0x7b8   :  { %12111 = vmatpush2.bf16.msra.mxu1 %v14409_v18 }
 0x7b9   :  { %12112 = vmatprep.subr.bf16.mxu1 %v14402_v28 }
 0x7bc   :  { %12113 = vmatpush2.bf16.msra.mxu1 %v14401_v55  ;;  %v14673_v55 = vld [vmem:[#allocation17 + $0x1c8] sm:$0xff]  }
 0x7bd   :  { %12114 = vmatprep.subr.bf16.mxu1 %v14394_v7 }
 0x7c0   :  { %12115 = vmatpush2.bf16.msra.mxu1 %v14393_v6 }
 0x7c1   :  { %12116 = vmatprep.subr.bf16.mxu1 %v14386_v42 }
 0x7c4   :  { %12117 = vmatpush2.bf16.msra.mxu1 %v14385_v1 }
 0x7c5   :  { %14530 = vmatprep.subr.bf16.mxu1 %v14629_v39  ;;  %v14675_v39 = vld [vmem:[#allocation17 + $0x1c0] sm:$0xff]  }
 0x7c7   :  { %v11874_v0 = vpop.f32.mrf.mxu1  ;;  %12119 = vmatmul.mubr.bf16.vlgmr.msra.gmra.mxu1 %v15442_v23  ;;  %v14634_v23 = vld [vmem:[#allocation17 + $0xa8] sm:$0xff]  }
 0x7c8   :  { %v11875_v49 = vadd.f32 %v11874_v0, %v11834_v13  ;;  %v15529_v54 = vpop.f32.mrf.mxu0  ;;  %14531 = vmatpush3.bf16.msra.mxu1 %v14630_v10  ;;  %12734 = vmatprep.mubr.bf16.mxu1 %v12138_v53 }
 0x7c9   :  { %v11876_v34 = vpop.f32.mrf.mxu1  ;;  %14532 = vmatprep.subr.bf16.mxu1 %v14631_v44 }
 0x7ca   :  { %v11877_v40 = vadd.f32 %v11876_v34, %v11836_v11  ;;  %v15531_v47 = vpop.f32.mrf.mxu0  ;;  %v11916_v15 = vadd.f32 %v15512_v41, %v11875_v49  ;;  %v14640_v41 = vld [vmem:[#allocation17 + $0x90] sm:$0xff]   ;;  %v8898_v49 = vrot.slane %v15487_v25, %v15147_v61 }
 0x7cb   :  { %v11878_v56 = vpop.f32.mrf.mxu1 }
 0x7cc   :  { %v12001_v20 = vpop.f32.mrf.mxu0  ;;  %14533 = vmatpush3.bf16.msra.mxu1 %v14632_v63  ;;  %v11918_v9 = vadd.f32 %v15517_v31, %v11877_v40  ;;  %v14643_v31 = vld [vmem:[#allocation17 + $0xc0] sm:$0xff]   ;;  %v8902_v63 = vrot.slane %v15487_v25, %v15130_v32  ;;  %v11998_v34 = vadd.f32 %v15529_v54, %v8898_v49 }
 0x7cd   :  { %v11879_v59 = vpop.f32.mrf.mxu1  ;;  %14534 = vmatprep.subr.bf16.mxu1 %v14633_v29 }
 0x7ce   :  { %v12002_v2 = vpop.f32.mrf.mxu0  ;;  %v12000_v40 = vadd.f32 %v15531_v47, %v8902_v63  ;;  %v14443_v47 = vld [vmem:[#allocation19] ss:$0 sm:$0xff] }
 0x7d0   :  { %14535 = vmatpush3.bf16.msra.mxu1 %v14634_v23 }
 0x7d1   :  { %14536 = vmatprep.subr.bf16.mxu1 %v14635_v43 }
 0x7d4   :  { %14537 = vmatpush3.bf16.msra.mxu1 %v14636_v51 }
 0x7d5   :  { %14538 = vmatprep.subr.bf16.mxu1 %v14637_v37 }
 0x7d8   :  { %14539 = vmatpush3.bf16.msra.mxu1 %v14638_v52 }
 0x7d9   :  { %14540 = vmatprep.subr.bf16.mxu1 %v14639_v4 }
 0x7dc   :  { %14541 = vmatpush3.bf16.msra.mxu1 %v14640_v41 }
 0x7dd   :  { %14542 = vmatprep.subr.bf16.mxu1 %v14641_v21 }
 0x7e0   :  { %14543 = vmatpush3.bf16.msra.mxu1 %v14642_v48 }
 0x7e1   :  { %14544 = vmatprep.subr.bf16.mxu1 %v14643_v31 }
 0x7e4   :  { %14545 = vmatpush3.bf16.msra.mxu1 %v14644_v26 }
 0x7e5   :  { %14574 = vmatprep.subr.bf16.mxu1 %v14661_v5 }
 0x7e7   :  { %12735 = vmatmul.mubr.bf16.vlgmr.msra.gmra.mxu1 %v12137_v45 }
 0x7e8   :  { %14575 = vmatpush3.bf16.msra.mxu1 %v14662_v57 }
 0x7e9   :  { %14576 = vmatprep.subr.bf16.mxu1 %v14663_v27 }
 0x7ec   :  { %14577 = vmatpush3.bf16.msra.mxu1 %v14664_v46 }
 0x7ed   :  { %14578 = vmatprep.subr.bf16.mxu1 %v14665_v24 }
 0x7f0   :  { %14579 = vmatpush3.bf16.msra.mxu1 %v14666_v50 }
 0x7f1   :  { %14580 = vmatprep.subr.bf16.mxu1 %v14667_v17 }
 0x7f4   :  { %14581 = vmatpush3.bf16.msra.mxu1 %v14668_v36 }
 0x7f5   :  { %14582 = vmatprep.subr.bf16.mxu1 %v14669_v14 }
 0x7f8   :  { %14583 = vmatpush3.bf16.msra.mxu1 %v14670_v19 }
 0x7f9   :  { %14584 = vmatprep.subr.bf16.mxu1 %v14671_v38 }
 0x7fc   :  { %14585 = vmatpush3.bf16.msra.mxu1 %v14672_v60 }
 0x7fd   :  { %14586 = vmatprep.subr.bf16.mxu1 %v14673_v55 }
 0x800   :  { %14587 = vmatpush3.bf16.msra.mxu1 %v14674_v35 }
 0x801   :  { %14588 = vmatprep.subr.bf16.mxu1 %v14675_v39 }
 0x804   :  { %14589 = vmatpush3.bf16.msra.mxu1 %v14676_v16 }
 0x807   :  { %v11956_v18 = vpop.f32.mrf.mxu1 }
 0x808   :  { %v11957_v28 = vadd.f32 %v11956_v18, %v11916_v15  ;;  %v12079_v8 = vpop.f32.mrf.mxu0 }
 0x809   :  { %v11958_v62 = vpop.f32.mrf.mxu1 }
 0x80a   :  { %v11959_v7 = vadd.f32 %v11958_v62, %v11918_v9  ;;  %v12081_v22 = vpop.f32.mrf.mxu0  ;;  %v12131_v12 = vmax.f32 %v11957_v28, 0.0 }
 0x80b   :  { %v11960_v6 = vpop.f32.mrf.mxu1 }
 0x80c   :  { %v12132_v42 = vmax.f32 %v11959_v7, 0.0  ;;  %v12083_v30 = vpop.f32.mrf.mxu0  ;;  %v12139_v10 = vpack.c.bf16 %v12131_v12, %v12131_v12 }
 0x80d   :  { %v11961_v1 = vpop.f32.mrf.mxu1 }
 0x80e   :  { %v12140_v58 = vpack.c.bf16 %v12132_v42, %v12132_v42  ;;  %v12084_v33 = vpop.f32.mrf.mxu0 }
 0x810   :  { %12774 = vmatprep.mubr.bf16.mxu0 %v12140_v58 }
 0x811   :  { %12775 = vmatmul.mubr.bf16.vlgmr.msra.gmra.mxu0 %v12139_v10 }
 0x828   :  { %v14524_v44 = vpop.f32.mrf.mxu0 }
 0x82a   :  { %v14525_v13 = vpop.f32.mrf.mxu0 }
 0x82b   :  { %v14526_v53 = vadd.f32 %v14525_v13, %v14524_v44 }
 0x82c   :  { %v14527_v0 = vpop.f32.mrf.mxu0 }
 0x82d   :  { %v12697_v31 = vadd.f32 %v14526_v53, %v14443_v47 }
 0x82e   :  { %v14528_v11 = vpop.f32.mrf.mxu0 }
 0x847   :  { %v12038_v29 = vpop.f32.mrf.mxu1 }
 0x848   :  { %v12039_v15 = vadd.f32 %v12038_v29, %v11998_v34 }
 0x849   :  { %v12040_v56 = vpop.f32.mrf.mxu1 }
 0x84a   :  { %v12041_v20 = vadd.f32 %v12040_v56, %v12000_v40  ;;  %v12080_v23 = vadd.f32 %v12079_v8, %v12039_v15 }
 0x84b   :  { %v12042_v9 = vpop.f32.mrf.mxu1 }
 0x84c   :  { %v12082_v59 = vadd.f32 %v12081_v22, %v12041_v20 }
 0x84d   :  { %v12043_v43 = vpop.f32.mrf.mxu1 }
 0x887   :  { %v12120_v2 = vpop.f32.mrf.mxu1 }
 0x888   :  { %v12121_v51 = vadd.f32 %v12120_v2, %v12080_v23 }
 0x889   :  { %v12122_v37 = vpop.f32.mrf.mxu1 }
 0x88a   :  { %v12123_v52 = vadd.f32 %v12122_v37, %v12082_v59  ;;  %v12133_v61 = vmax.f32 %v12121_v51, 0.0 }
 0x88b   :  { %v12124_v4 = vpop.f32.mrf.mxu1 }
 0x88c   :  { %v12134_v41 = vmax.f32 %v12123_v52, 0.0  ;;  %v12141_v54 = vpack.c.bf16 %v12133_v61, %v12133_v61 }
 0x88d   :  { %v12125_v32 = vpop.f32.mrf.mxu1 }
 0x88e   :  { %v12142_v25 = vpack.c.bf16 %v12134_v41, %v12134_v41 }
 0x890   :  { %12814 = vmatprep.mubr.bf16.mxu1 %v12142_v25 }
 0x891   :  { %12815 = vmatmul.mubr.bf16.vlgmr.msra.gmra.mxu1 %v12141_v54 }
 0x8a7   :  { %v14546_v21 = vpop.f32.mrf.mxu1 }
 0x8a9   :  { %v14547_v48 = vpop.f32.mrf.mxu1 }
 0x8aa   :  { %v14548_v26 = vadd.f32 %v14547_v48, %v14546_v21 }
 0x8ab   :  { %v14549_v3 = vpop.f32.mrf.mxu1 }
 0x8ac   :  { %v12737_v5 = vadd.f32 %v14548_v26, %v12697_v31 }
 0x8ad   :  { %v14550_v57 = vpop.f32.mrf.mxu1 }
 0x8d1   :  { %v14568_v45 = vpop.f32.mrf.mxu0 }
 0x8d3   :  { %v14569_v27 = vpop.f32.mrf.mxu0 }
 0x8d4   :  { %v14570_v46 = vadd.f32 %v14569_v27, %v14568_v45 }
 0x8d5   :  { %v14571_v24 = vpop.f32.mrf.mxu0 }
 0x8d6   :  { %v12777_v50 = vadd.f32 %v14570_v46, %v12737_v5 }
 0x8d7   :  { %v14572_v17 = vpop.f32.mrf.mxu0 }
 0x951   :  { %v14590_v36 = vpop.f32.mrf.mxu1 }
 0x953   :  { %v14591_v14 = vpop.f32.mrf.mxu1 }
 0x954   :  { %v14592_v19 = vadd.f32 %v14591_v14, %v14590_v36 }
 0x955   :  { %v14593_v38 = vpop.f32.mrf.mxu1 }
 0x956   :  { %v12817_v60 = vadd.f32 %v14592_v19, %v12777_v50 }
 0x957   :  { %v14594_v18 = vpop.f32.mrf.mxu1 }
 0x958   :  { %12822 = vst [vmem:[#allocation20] sm:$0xff] %v12817_v60 }
 0x959   :  { %14913 = shalt.err (!%p14910_p3)
}
 0x95a   :  { %12832 = dma.vmem_to_hbm [thread:$0]  %s12830_s10, 128, %s15556_s11, [#allocation4]  }
 0x95b   :  { %14934 = dma.done.wait [#allocation4], 128  }
 0x95c   :  { %14935 = vsyncadd [#allocation4], 4294967168 }
 0x95d   :  { %12836 = vsyncpa [#allocation3], 1 }
 0x95e   :  { %12837 = vsyncpa [#allocation6], 1 }
 0x95f   :  { %12838 = vsyncpa [#allocation9], 1 }
 0x960   :  { %12839 = vsyncpa [#allocation12], 1 }
 0x961   :  { %12840 = vsyncpa [#allocation15], 1 }
 0x962   :  { %12841 = vsyncpa [#allocation18], 1 }
 0x963   :  { %12842 = vsyncpa [#allocation4], 1 }

</bundles_post_ra>
